<compile_context>
chip_gen: v5e
topology: v5e:2x2
jax: 0.10.0
libtpu: 0.0.40
codegen_flags: <defaults>
</compile_context>

<pallas_src>
import math
import functools

import jax
import jax.numpy as jnp
from jax import lax
from jax.experimental import pallas as pl
from jax.experimental.pallas import tpu as pltpu  # noqa: F401  (TPU backend assumed)


# ----------------------------------------------------------------------------
# In-kernel helpers
# ----------------------------------------------------------------------------
def _layer_norm(v, w2d, b2d, eps=1e-5):
    mu = jnp.mean(v, axis=-1, keepdims=True)
    var = jnp.mean((v - mu) ** 2, axis=-1, keepdims=True)
    return (v - mu) * lax.rsqrt(var + eps) * w2d + b2d


def _gelu_exact(v):
    return 0.5 * v * (1.0 + lax.erf(v * (1.0 / math.sqrt(2.0))))


# ----------------------------------------------------------------------------
# Branch parameter ordering (flat ref tuple per branch)
# ----------------------------------------------------------------------------
_BRANCH_KEYS = (
    "fin_wT", "fin_b", "pe",                     # 0..2   input fc + pos-enc
    "ipwT", "ipb", "owT", "ob",                  # 3..6   attention projections
    "l1wT", "l1b", "l2wT", "l2b",                # 7..10  FFN
    "ln1w", "ln1b", "ln2w", "ln2b",              # 11..14 layer norms
    "hmask", "vmask", "segB",                    # 15..17 precomputed attn masks
    "fco_a", "fco_b",                            # 18..19 output fc (branch-specific layout)
)
_NBR = len(_BRANCH_KEYS)  # 20


# ----------------------------------------------------------------------------
# Fully fused kernel: spatial stack -> relayout -> temporal stack
# ----------------------------------------------------------------------------
def _fused_kernel(*refs, seq_sp, seq_tm, batch, d_model, num_heads, num_layers):
    f32 = jnp.float32
    d, H = d_model, num_heads
    hd = d // H
    scale = 1.0 / math.sqrt(hd)

    x_ref, e_sp_ref, e_tm_ref = refs[0], refs[1], refs[2]
    sp = refs[3:3 + _NBR]
    tm = refs[3 + _NBR:3 + 2 * _NBR]
    o_ref = refs[3 + 2 * _NBR]

    def encoder_stack(h, br):
        (ipwT, ipb, owT, ob, l1wT, l1b, l2wT, l2b,
         ln1w, ln1b, ln2w, ln2b, hmask_r, vmask_r, segB_r) = br[3:18]
        hmask = hmask_r[...]     # [H*B*S, d]   head-column selector
        vmask = vmask_r[...]     # [B*S, H*B*S] 1 iff same batch element
        segB = segB_r[...]       # [H*B*S, H*B*S] per-(head,batch) segment sum
        for l in range(num_layers):                       # NL=2 -> unrolled
            # fused QKV projection: one [B*S, d] x [d, 3d] matmul
            qkv = jnp.dot(h, ipwT[l], preferred_element_type=f32) + ipb[l]
            q = qkv[:, 0:d]
            k = qkv[:, d:2 * d]
            v = qkv[:, 2 * d:3 * d]

            # batch+head folded block-diagonal attention (128-lane wide)
            kblk = jnp.concatenate([k] * H, axis=0) * hmask   # [H*B*S, d]
            vblk = jnp.concatenate([v] * H, axis=0) * hmask   # [H*B*S, d]
            # s[r, (h,b2,j)] = <q_h[r], k_h[b2,j]>  (trans_b matmul)
            s = lax.dot_general(q, kblk, (((1,), (1,)), ((), ())),
                                preferred_element_type=f32) * scale  # [B*S, H*B*S]
            m = jnp.max(s, axis=-1, keepdims=True)
            p = jnp.exp(s - m) * vmask                  # zero cross-batch cols
            denom = jnp.dot(p, segB, preferred_element_type=f32) + 1e-20
            p = p * pl.reciprocal(denom, approx=True)
            ctx = jnp.dot(p, vblk, preferred_element_type=f32)        # [B*S, d]

            attn = jnp.dot(ctx, owT[l], preferred_element_type=f32) + ob[l]
            y = _layer_norm(h + attn, ln1w[l], ln1b[l])               # post-LN 1

            ff = _gelu_exact(jnp.dot(y, l1wT[l], preferred_element_type=f32) + l1b[l])
            ff = jnp.dot(ff, l2wT[l], preferred_element_type=f32) + l2b[l]
            h = _layer_norm(y + ff, ln2w[l], ln2b[l])                 # post-LN 2
        return h

    # ---- spatial branch (sequence axis = input_dim) ----
    h = jnp.dot(x_ref[...], sp[0][...], preferred_element_type=f32) + sp[1][...]
    h = h + e_sp_ref[...] + sp[2][...]
    h = encoder_stack(h, sp)

    # ---- spatial out_fc fused with (b, i, t) -> (b, t, i) relayout ----
    # x_tm_b[t, i] = sum_c fout_w[t, c] * h[b*D + i, c] + fout_b[t]
    out_w_sp = sp[18][...]                  # [L, d]  (non-transposed torch weight)
    out_b_sp = sp[19][...]                  # [L, 1]
    parts = []
    for b in range(batch):                  # batch is tiny & static
        hb = h[b * seq_sp:(b + 1) * seq_sp, :]                         # [D, d]
        xb = lax.dot_general(out_w_sp, hb, (((1,), (1,)), ((), ())),
                             preferred_element_type=f32) + out_b_sp    # [L, D]
        parts.append(xb)
    x_tm = jnp.concatenate(parts, axis=0)                              # [B*L, D]

    # ---- temporal branch (sequence axis = window length) ----
    h2 = jnp.dot(x_tm, tm[0][...], preferred_element_type=f32) + tm[1][...]
    h2 = h2 + e_tm_ref[...] + tm[2][...]
    h2 = encoder_stack(h2, tm)

    out = jnp.dot(h2, tm[18][...], preferred_element_type=f32) + tm[19][...]
    o_ref[...] = out.astype(o_ref.dtype)


def pallas_forward(x_sp, e_sp, e_tm, sp, tm, *, seq_sp, seq_tm, batch,
                   num_heads, num_layers):
    """Single fused pallas_call for the whole Series_Denoiser forward."""
    d = sp["fin_wT"].shape[1]
    out_dim = tm["fco_a"].shape[1]
    kernel = functools.partial(
        _fused_kernel, seq_sp=seq_sp, seq_tm=seq_tm, batch=batch,
        d_model=d, num_heads=num_heads, num_layers=num_layers)
    args = ((x_sp, e_sp, e_tm)
            + tuple(sp[k] for k in _BRANCH_KEYS)
            + tuple(tm[k] for k in _BRANCH_KEYS))
    return pl.pallas_call(
        kernel,
        out_shape=jax.ShapeDtypeStruct((batch * seq_tm, out_dim), jnp.float32),
    )(*args)


# ----------------------------------------------------------------------------
# Buffers / parameter construction (PyTorch layout)
# ----------------------------------------------------------------------------
def build_diffusion_table(num_steps, embedding_dim):
    dim = embedding_dim // 2
    steps = jnp.arange(num_steps, dtype=jnp.float32)[:, None]
    freqs = (10.0 ** (jnp.arange(dim, dtype=jnp.float32) / (dim - 1) * 4.0))[None, :]
    table = steps * freqs
    return jnp.concatenate([jnp.sin(table), jnp.cos(table)], axis=1)  # [num_steps, emb]


def build_positional_encoding(d_model, max_len=5000):
    position = jnp.arange(max_len, dtype=jnp.float32)[:, None]
    div_term = jnp.exp(
        jnp.arange(0, d_model, 2, dtype=jnp.float32) * (-math.log(10000.0) / d_model))
    angles = position * div_term
    pe = jnp.zeros((max_len, 1, d_model), jnp.float32)
    pe = pe.at[:, 0, 0::2].set(jnp.sin(angles))
    pe = pe.at[:, 0, 1::2].set(jnp.cos(angles))
    return pe


def _normal(key, shape, scale=0.05):
    return scale * jax.random.normal(key, shape, jnp.float32)


def init_encoder_layer(key, d, dff):
    ks = jax.random.split(key, 8)
    return dict(
        in_proj_w=_normal(ks[0], (3 * d, d)),
        in_proj_b=_normal(ks[1], (3 * d,)),
        out_w=_normal(ks[2], (d, d)),
        out_b=_normal(ks[3], (d,)),
        lin1_w=_normal(ks[4], (dff, d)),
        lin1_b=_normal(ks[5], (dff,)),
        lin2_w=_normal(ks[6], (d, dff)),
        lin2_b=_normal(ks[7], (d,)),
        ln1_w=jnp.ones((d,), jnp.float32),
        ln1_b=jnp.zeros((d,), jnp.float32),
        ln2_w=jnp.ones((d,), jnp.float32),
        ln2_b=jnp.zeros((d,), jnp.float32),
    )


def init_params(key, input_dim, qkv_dim, num_layers, num_heads,
                prefix_len, pred_len, diff_steps):
    L = prefix_len + pred_len
    ks = iter(jax.random.split(key, 32))
    return {
        "spatial_inp_fc": {"w": _normal(next(ks), (qkv_dim, L)), "b": _normal(next(ks), (qkv_dim,))},
        "spatial_out_fc": {"w": _normal(next(ks), (L, qkv_dim)), "b": _normal(next(ks), (L,))},
        "temporal_inp_fc": {"w": _normal(next(ks), (qkv_dim, input_dim)), "b": _normal(next(ks), (qkv_dim,))},
        "temporal_out_fc": {"w": _normal(next(ks), (input_dim, qkv_dim)), "b": _normal(next(ks), (input_dim,))},
        "spatial_layers": [init_encoder_layer(next(ks), qkv_dim, qkv_dim) for _ in range(num_layers)],
        "temporal_layers": [init_encoder_layer(next(ks), qkv_dim, qkv_dim) for _ in range(num_layers)],
        "step_spatial": {
            "table": build_diffusion_table(diff_steps, qkv_dim),
            "p1_w": _normal(next(ks), (qkv_dim, qkv_dim)), "p1_b": _normal(next(ks), (qkv_dim,)),
            "p2_w": _normal(next(ks), (qkv_dim, qkv_dim)), "p2_b": _normal(next(ks), (qkv_dim,)),
        },
        "step_temporal": {
            "table": build_diffusion_table(diff_steps, qkv_dim),
            "p1_w": _normal(next(ks), (qkv_dim, qkv_dim)), "p1_b": _normal(next(ks), (qkv_dim,)),
            "p2_w": _normal(next(ks), (qkv_dim, qkv_dim)), "p2_b": _normal(next(ks), (qkv_dim,)),
        },
        "pe": build_positional_encoding(qkv_dim),
    }


# ----------------------------------------------------------------------------
# One-time parameter preparation (transpose / stack / broadcast / masks)
# ----------------------------------------------------------------------------
def _build_attention_masks(batch, seq, d_model, num_heads):
    """Constants for batch+head folded block-diagonal attention.

    Row ordering of the folded K/V block is (head, batch, position):
        row = head * (B*S) + b * S + j
    """
    B, S, H, d = batch, seq, num_heads, d_model
    hd = d // H
    n = H * B * S
    col_head = jnp.arange(d) // hd                       # which head owns feature c
    row_head = jnp.arange(n) // (B * S)
    hmask = (row_head[:, None] == col_head[None, :]).astype(jnp.float32)     # [n, d]

    q_batch = jnp.arange(B * S) // S
    kv_batch = (jnp.arange(n) % (B * S)) // S
    vmask = (q_batch[:, None] == kv_batch[None, :]).astype(jnp.float32)      # [B*S, n]

    grp = jnp.arange(n) // S                             # (head, batch) group id
    segB = (grp[:, None] == grp[None, :]).astype(jnp.float32)                # [n, n]
    return hmask, vmask, segB


def _prepare_branch(layers, inp_fc, out_fc, step_enc, pe, masks, *,
                    seq, batch, spatial_out):
    f32 = jnp.float32
    d = inp_fc["w"].shape[0]

    def stackT(key):
        return jnp.stack([lp[key].T for lp in layers]).astype(f32)

    def stackB(key):
        return jnp.stack([lp[key].reshape(1, -1) for lp in layers]).astype(f32)

    pe_b = jnp.broadcast_to(pe[:seq, 0, :], (batch, seq, d)).reshape(batch * seq, d)
    hmask, vmask, segB = masks

    # Diffusion-step MLP depends only on t -> precompute the whole table.
    e = jax.nn.silu(step_enc["table"] @ step_enc["p1_w"].T + step_enc["p1_b"])
    e = jax.nn.silu(e @ step_enc["p2_w"].T + step_enc["p2_b"])

    if spatial_out:
        # non-transposed weight + column bias: used for fused out_fc + relayout
        fco_a = out_fc["w"].astype(f32)                  # [L, d]
        fco_b = out_fc["b"].reshape(-1, 1).astype(f32)   # [L, 1]
    else:
        fco_a = out_fc["w"].T.astype(f32)                # [d, D]
        fco_b = out_fc["b"].reshape(1, -1).astype(f32)   # [1, D]

    return {
        "fin_wT": inp_fc["w"].T.astype(f32), "fin_b": inp_fc["b"].reshape(1, -1).astype(f32),
        "pe": pe_b.astype(f32),
        "ipwT": stackT("in_proj_w"), "ipb": stackB("in_proj_b"),
        "owT": stackT("out_w"), "ob": stackB("out_b"),
        "l1wT": stackT("lin1_w"), "l1b": stackB("lin1_b"),
        "l2wT": stackT("lin2_w"), "l2b": stackB("lin2_b"),
        "ln1w": stackB("ln1_w"), "ln1b": stackB("ln1_b"),
        "ln2w": stackB("ln2_w"), "ln2b": stackB("ln2_b"),
        "hmask": hmask, "vmask": vmask, "segB": segB,
        "fco_a": fco_a, "fco_b": fco_b,
        "emb": e.astype(f32),                            # [diff_steps, d]
    }


def prepare_params(params, *, input_dim, prefix_len, pred_len, batch, num_heads):
    L = prefix_len + pred_len
    D = input_dim
    d = params["spatial_inp_fc"]["w"].shape[0]
    masks_sp = _build_attention_masks(batch, D, d, num_heads)
    masks_tm = _build_attention_masks(batch, L, d, num_heads)
    return {
        "spatial": _prepare_branch(params["spatial_layers"], params["spatial_inp_fc"],
                                   params["spatial_out_fc"], params["step_spatial"],
                                   params["pe"], masks_sp, seq=D, batch=batch,
                                   spatial_out=True),
        "temporal": _prepare_branch(params["temporal_layers"], params["temporal_inp_fc"],
                                    params["temporal_out_fc"], params["step_temporal"],
                                    params["pe"], masks_tm, seq=L, batch=batch,
                                    spatial_out=False),
    }


# ----------------------------------------------------------------------------
# Series_Denoiser forward: ONE fused pallas_call + tiny XLA layout glue
# ----------------------------------------------------------------------------
def series_denoiser_forward(prep, noise, x, t, *, num_heads, num_layers, prefix_len):
    # noise: [pred_len, B, D], x: [prefix_len, B, D], t: scalar int step index
    window = jnp.concatenate([x, noise], axis=0)                  # [L, B, D]
    L, B, D = window.shape

    x_sp = jnp.transpose(window, (1, 2, 0)).reshape(B * D, L)     # rows (b, i), feat = L
    e_sp = prep["spatial"]["emb"][t][None, :]                     # precomputed step MLP
    e_tm = prep["temporal"]["emb"][t][None, :]

    tm = pallas_forward(x_sp, e_sp, e_tm, prep["spatial"], prep["temporal"],
                        seq_sp=D, seq_tm=L, batch=B,
                        num_heads=num_heads, num_layers=num_layers)  # [B*L, D]

    out = jnp.transpose(tm.reshape(B, L, D), (1, 0, 2))           # [L, B, D]
    return out[prefix_len:]                                       # [pred_len, B, D]


# ----------------------------------------------------------------------------
if __name__ == "__main__":
    input_dim, qkv_dim = 16, 32
    num_layers, num_heads = 2, 4
    prefix_len, pred_len = 8, 8
    diff_steps = 50
    batch = 2

    key = jax.random.PRNGKey(0)
    kp, kx, kn = jax.random.split(key, 3)
    params = init_params(kp, input_dim, qkv_dim, num_layers, num_heads,
                         prefix_len, pred_len, diff_steps)
    prep = prepare_params(params, input_dim=input_dim, prefix_len=prefix_len,
                          pred_len=pred_len, batch=batch, num_heads=num_heads)

    x = jax.random.normal(kx, (prefix_len, batch, input_dim), jnp.float32)
    noise = jax.random.normal(kn, (pred_len, batch, input_dim), jnp.float32)
    t = jnp.array(7, dtype=jnp.int32)

    fwd = jax.jit(functools.partial(series_denoiser_forward,
                                    num_heads=num_heads,
                                    num_layers=num_layers,
                                    prefix_len=prefix_len))
    out = jax.block_until_ready(fwd(prep, noise, x, t))
    assert out.shape == (pred_len, batch, input_dim), out.shape
    assert bool(jnp.all(jnp.isfinite(out)))
    print("KERNEL_OK")
</pallas_src>

<mosaic_0001>
module attributes {stable_mosaic.version = 11 : i64} {
  func.func @_fused_kernel(%arg0: memref<32x16xf32, #tpu.memory_space<vmem>>, %arg1: memref<1x32xf32, #tpu.memory_space<vmem>>, %arg2: memref<1x32xf32, #tpu.memory_space<vmem>>, %arg3: memref<16x32xf32, #tpu.memory_space<vmem>>, %arg4: memref<1x32xf32, #tpu.memory_space<vmem>>, %arg5: memref<32x32xf32, #tpu.memory_space<vmem>>, %arg6: memref<2x32x96xf32, #tpu.memory_space<vmem>>, %arg7: memref<2x1x96xf32, #tpu.memory_space<vmem>>, %arg8: memref<2x32x32xf32, #tpu.memory_space<vmem>>, %arg9: memref<2x1x32xf32, #tpu.memory_space<vmem>>, %arg10: memref<2x32x32xf32, #tpu.memory_space<vmem>>, %arg11: memref<2x1x32xf32, #tpu.memory_space<vmem>>, %arg12: memref<2x32x32xf32, #tpu.memory_space<vmem>>, %arg13: memref<2x1x32xf32, #tpu.memory_space<vmem>>, %arg14: memref<2x1x32xf32, #tpu.memory_space<vmem>>, %arg15: memref<2x1x32xf32, #tpu.memory_space<vmem>>, %arg16: memref<2x1x32xf32, #tpu.memory_space<vmem>>, %arg17: memref<2x1x32xf32, #tpu.memory_space<vmem>>, %arg18: memref<128x32xf32, #tpu.memory_space<vmem>>, %arg19: memref<32x128xf32, #tpu.memory_space<vmem>>, %arg20: memref<128x128xf32, #tpu.memory_space<vmem>>, %arg21: memref<16x32xf32, #tpu.memory_space<vmem>>, %arg22: memref<16x1xf32, #tpu.memory_space<vmem>>, %arg23: memref<16x32xf32, #tpu.memory_space<vmem>>, %arg24: memref<1x32xf32, #tpu.memory_space<vmem>>, %arg25: memref<32x32xf32, #tpu.memory_space<vmem>>, %arg26: memref<2x32x96xf32, #tpu.memory_space<vmem>>, %arg27: memref<2x1x96xf32, #tpu.memory_space<vmem>>, %arg28: memref<2x32x32xf32, #tpu.memory_space<vmem>>, %arg29: memref<2x1x32xf32, #tpu.memory_space<vmem>>, %arg30: memref<2x32x32xf32, #tpu.memory_space<vmem>>, %arg31: memref<2x1x32xf32, #tpu.memory_space<vmem>>, %arg32: memref<2x32x32xf32, #tpu.memory_space<vmem>>, %arg33: memref<2x1x32xf32, #tpu.memory_space<vmem>>, %arg34: memref<2x1x32xf32, #tpu.memory_space<vmem>>, %arg35: memref<2x1x32xf32, #tpu.memory_space<vmem>>, %arg36: memref<2x1x32xf32, #tpu.memory_space<vmem>>, %arg37: memref<2x1x32xf32, #tpu.memory_space<vmem>>, %arg38: memref<128x32xf32, #tpu.memory_space<vmem>>, %arg39: memref<32x128xf32, #tpu.memory_space<vmem>>, %arg40: memref<128x128xf32, #tpu.memory_space<vmem>>, %arg41: memref<32x16xf32, #tpu.memory_space<vmem>>, %arg42: memref<1x16xf32, #tpu.memory_space<vmem>>, %arg43: memref<32x16xf32, #tpu.memory_space<vmem>>) attributes {dimension_semantics = [], scalar_prefetch = 0 : i64, scratch_operands = 0 : i64, tpu.core_type = #tpu.core_type<tc>} {
    %c0 = arith.constant 0 : index
    %c0_0 = arith.constant 0 : index
    %0 = vector.load %arg0[%c0, %c0_0] : memref<32x16xf32, #tpu.memory_space<vmem>>, vector<32x16xf32>
    %c0_1 = arith.constant 0 : index
    %c0_2 = arith.constant 0 : index
    %1 = vector.load %arg3[%c0_1, %c0_2] : memref<16x32xf32, #tpu.memory_space<vmem>>, vector<16x32xf32>
    %cst = arith.constant dense<0.000000e+00> : vector<32x32xf32>
    %2 = tpu.matmul %0, %1, %cst {dimension_numbers = #tpu.dot_dimension_numbers<[1], [0], [0], [1], [0, 0, 1, 1], [], []>} : vector<32x16xf32>, vector<16x32xf32>, vector<32x32xf32> -> vector<32x32xf32>
    %c0_3 = arith.constant 0 : index
    %c0_4 = arith.constant 0 : index
    %3 = vector.load %arg4[%c0_3, %c0_4] : memref<1x32xf32, #tpu.memory_space<vmem>>, vector<1x32xf32>
    %4 = vector.broadcast %3 : vector<1x32xf32> to vector<32x32xf32>
    %5 = arith.addf %2, %4 : vector<32x32xf32>
    %c0_5 = arith.constant 0 : index
    %c0_6 = arith.constant 0 : index
    %6 = vector.load %arg1[%c0_5, %c0_6] : memref<1x32xf32, #tpu.memory_space<vmem>>, vector<1x32xf32>
    %7 = vector.broadcast %6 : vector<1x32xf32> to vector<32x32xf32>
    %8 = arith.addf %5, %7 : vector<32x32xf32>
    %c0_7 = arith.constant 0 : index
    %c0_8 = arith.constant 0 : index
    %9 = vector.load %arg5[%c0_7, %c0_8] : memref<32x32xf32, #tpu.memory_space<vmem>>, vector<32x32xf32>
    %10 = arith.addf %8, %9 : vector<32x32xf32>
    %c0_9 = arith.constant 0 : index
    %c0_10 = arith.constant 0 : index
    %11 = vector.load %arg18[%c0_9, %c0_10] : memref<128x32xf32, #tpu.memory_space<vmem>>, vector<128x32xf32>
    %c0_11 = arith.constant 0 : index
    %c0_12 = arith.constant 0 : index
    %12 = vector.load %arg19[%c0_11, %c0_12] : memref<32x128xf32, #tpu.memory_space<vmem>>, vector<32x128xf32>
    %c0_13 = arith.constant 0 : index
    %c0_14 = arith.constant 0 : index
    %13 = vector.load %arg20[%c0_13, %c0_14] : memref<128x128xf32, #tpu.memory_space<vmem>>, vector<128x128xf32>
    %c0_15 = arith.constant 0 : index
    %c0_16 = arith.constant 0 : index
    %c0_17 = arith.constant 0 : index
    %14 = vector.load %arg6[%c0_15, %c0_16, %c0_17] : memref<2x32x96xf32, #tpu.memory_space<vmem>>, vector<1x32x96xf32>
    %15 = vector.shape_cast %14 : vector<1x32x96xf32> to vector<32x96xf32>
    %cst_18 = arith.constant dense<0.000000e+00> : vector<32x96xf32>
    %16 = tpu.matmul %10, %15, %cst_18 {dimension_numbers = #tpu.dot_dimension_numbers<[1], [0], [0], [1], [0, 0, 1, 1], [], []>} : vector<32x32xf32>, vector<32x96xf32>, vector<32x96xf32> -> vector<32x96xf32>
    %c0_19 = arith.constant 0 : index
    %c0_20 = arith.constant 0 : index
    %c0_21 = arith.constant 0 : index
    %17 = vector.load %arg7[%c0_19, %c0_20, %c0_21] : memref<2x1x96xf32, #tpu.memory_space<vmem>>, vector<1x1x96xf32>
    %18 = vector.shape_cast %17 : vector<1x1x96xf32> to vector<1x96xf32>
    %19 = vector.broadcast %18 : vector<1x96xf32> to vector<32x96xf32>
    %20 = arith.addf %16, %19 : vector<32x96xf32>
    %21 = vector.extract_strided_slice %20 {offsets = [0, 0], sizes = [32, 32], strides = [1, 1]} : vector<32x96xf32> to vector<32x32xf32>
    %22 = vector.extract_strided_slice %20 {offsets = [0, 32], sizes = [32, 32], strides = [1, 1]} : vector<32x96xf32> to vector<32x32xf32>
    %23 = vector.extract_strided_slice %20 {offsets = [0, 64], sizes = [32, 32], strides = [1, 1]} : vector<32x96xf32> to vector<32x32xf32>
    %24 = tpu.concatenate %22, %22, %22, %22 in 0 : vector<32x32xf32>, vector<32x32xf32>, vector<32x32xf32>, vector<32x32xf32> -> vector<128x32xf32>
    %25 = arith.mulf %24, %11 : vector<128x32xf32>
    %26 = tpu.concatenate %23, %23, %23, %23 in 0 : vector<32x32xf32>, vector<32x32xf32>, vector<32x32xf32>, vector<32x32xf32> -> vector<128x32xf32>
    %27 = arith.mulf %26, %11 : vector<128x32xf32>
    %cst_22 = arith.constant dense<0.000000e+00> : vector<32x128xf32>
    %28 = tpu.matmul %21, %25, %cst_22 {dimension_numbers = #tpu.dot_dimension_numbers<[1], [1], [0], [0], [0, 0, 1, 0], [], []>} : vector<32x32xf32>, vector<128x32xf32>, vector<32x128xf32> -> vector<32x128xf32>
    %cst_23 = arith.constant 0.353553385 : f32
    %29 = vector.broadcast %cst_23 : f32 to vector<32x128xf32>
    %30 = arith.mulf %28, %29 : vector<32x128xf32>
    %cst_24 = arith.constant dense<0xFF800000> : vector<32xf32>
    %31 = vector.multi_reduction <maximumf>, %30, %cst_24 [1] : vector<32x128xf32> to vector<32xf32>
    %32 = vector.shape_cast %31 : vector<32xf32> to vector<32x1xf32>
    %33 = vector.broadcast %32 : vector<32x1xf32> to vector<32x128xf32>
    %34 = arith.subf %30, %33 : vector<32x128xf32>
    %35 = math.exp %34 : vector<32x128xf32>
    %36 = arith.mulf %35, %12 : vector<32x128xf32>
    %cst_25 = arith.constant dense<0.000000e+00> : vector<32x128xf32>
    %37 = tpu.matmul %36, %13, %cst_25 {dimension_numbers = #tpu.dot_dimension_numbers<[1], [0], [0], [1], [0, 0, 1, 1], [], []>} : vector<32x128xf32>, vector<128x128xf32>, vector<32x128xf32> -> vector<32x128xf32>
    %cst_26 = arith.constant 9.99999968E-21 : f32
    %38 = vector.broadcast %cst_26 : f32 to vector<32x128xf32>
    %39 = arith.addf %37, %38 : vector<32x128xf32>
    %40 = tpu.reciprocal %39 {approx = true} : vector<32x128xf32> -> vector<32x128xf32>
    %41 = arith.mulf %36, %40 : vector<32x128xf32>
    %cst_27 = arith.constant dense<0.000000e+00> : vector<32x32xf32>
    %42 = tpu.matmul %41, %27, %cst_27 {dimension_numbers = #tpu.dot_dimension_numbers<[1], [0], [0], [1], [0, 0, 1, 1], [], []>} : vector<32x128xf32>, vector<128x32xf32>, vector<32x32xf32> -> vector<32x32xf32>
    %c0_28 = arith.constant 0 : index
    %c0_29 = arith.constant 0 : index
    %c0_30 = arith.constant 0 : index
    %43 = vector.load %arg8[%c0_28, %c0_29, %c0_30] : memref<2x32x32xf32, #tpu.memory_space<vmem>>, vector<1x32x32xf32>
    %44 = vector.shape_cast %43 : vector<1x32x32xf32> to vector<32x32xf32>
    %cst_31 = arith.constant dense<0.000000e+00> : vector<32x32xf32>
    %45 = tpu.matmul %42, %44, %cst_31 {dimension_numbers = #tpu.dot_dimension_numbers<[1], [0], [0], [1], [0, 0, 1, 1], [], []>} : vector<32x32xf32>, vector<32x32xf32>, vector<32x32xf32> -> vector<32x32xf32>
    %c0_32 = arith.constant 0 : index
    %c0_33 = arith.constant 0 : index
    %c0_34 = arith.constant 0 : index
    %46 = vector.load %arg9[%c0_32, %c0_33, %c0_34] : memref<2x1x32xf32, #tpu.memory_space<vmem>>, vector<1x1x32xf32>
    %47 = vector.shape_cast %46 : vector<1x1x32xf32> to vector<1x32xf32>
    %48 = vector.broadcast %47 : vector<1x32xf32> to vector<32x32xf32>
    %49 = arith.addf %45, %48 : vector<32x32xf32>
    %50 = arith.addf %10, %49 : vector<32x32xf32>
    %c0_35 = arith.constant 0 : index
    %c0_36 = arith.constant 0 : index
    %c0_37 = arith.constant 0 : index
    %51 = vector.load %arg14[%c0_35, %c0_36, %c0_37] : memref<2x1x32xf32, #tpu.memory_space<vmem>>, vector<1x1x32xf32>
    %52 = vector.shape_cast %51 : vector<1x1x32xf32> to vector<1x32xf32>
    %c0_38 = arith.constant 0 : index
    %c0_39 = arith.constant 0 : index
    %c0_40 = arith.constant 0 : index
    %53 = vector.load %arg15[%c0_38, %c0_39, %c0_40] : memref<2x1x32xf32, #tpu.memory_space<vmem>>, vector<1x1x32xf32>
    %54 = vector.shape_cast %53 : vector<1x1x32xf32> to vector<1x32xf32>
    %cst_41 = arith.constant dense<0.000000e+00> : vector<32xf32>
    %55 = vector.multi_reduction <add>, %50, %cst_41 [1] : vector<32x32xf32> to vector<32xf32>
    %56 = vector.shape_cast %55 : vector<32xf32> to vector<32x1xf32>
    %cst_42 = arith.constant 3.200000e+01 : f32
    %57 = vector.broadcast %cst_42 : f32 to vector<32x1xf32>
    %58 = arith.divf %56, %57 : vector<32x1xf32>
    %59 = vector.broadcast %58 : vector<32x1xf32> to vector<32x32xf32>
    %60 = arith.subf %50, %59 : vector<32x32xf32>
    %61 = arith.mulf %60, %60 : vector<32x32xf32>
    %cst_43 = arith.constant dense<0.000000e+00> : vector<32xf32>
    %62 = vector.multi_reduction <add>, %61, %cst_43 [1] : vector<32x32xf32> to vector<32xf32>
    %63 = vector.shape_cast %62 : vector<32xf32> to vector<32x1xf32>
    %cst_44 = arith.constant 3.200000e+01 : f32
    %64 = vector.broadcast %cst_44 : f32 to vector<32x1xf32>
    %65 = arith.divf %63, %64 : vector<32x1xf32>
    %66 = vector.broadcast %58 : vector<32x1xf32> to vector<32x32xf32>
    %67 = arith.subf %50, %66 : vector<32x32xf32>
    %cst_45 = arith.constant 9.99999974E-6 : f32
    %68 = vector.broadcast %cst_45 : f32 to vector<32x1xf32>
    %69 = arith.addf %65, %68 : vector<32x1xf32>
    %70 = math.rsqrt %69 : vector<32x1xf32>
    %71 = vector.broadcast %70 : vector<32x1xf32> to vector<32x32xf32>
    %72 = arith.mulf %67, %71 : vector<32x32xf32>
    %73 = vector.broadcast %52 : vector<1x32xf32> to vector<32x32xf32>
    %74 = arith.mulf %72, %73 : vector<32x32xf32>
    %75 = vector.broadcast %54 : vector<1x32xf32> to vector<32x32xf32>
    %76 = arith.addf %74, %75 : vector<32x32xf32>
    %c0_46 = arith.constant 0 : index
    %c0_47 = arith.constant 0 : index
    %c0_48 = arith.constant 0 : index
    %77 = vector.load %arg10[%c0_46, %c0_47, %c0_48] : memref<2x32x32xf32, #tpu.memory_space<vmem>>, vector<1x32x32xf32>
    %78 = vector.shape_cast %77 : vector<1x32x32xf32> to vector<32x32xf32>
    %cst_49 = arith.constant dense<0.000000e+00> : vector<32x32xf32>
    %79 = tpu.matmul %76, %78, %cst_49 {dimension_numbers = #tpu.dot_dimension_numbers<[1], [0], [0], [1], [0, 0, 1, 1], [], []>} : vector<32x32xf32>, vector<32x32xf32>, vector<32x32xf32> -> vector<32x32xf32>
    %c0_50 = arith.constant 0 : index
    %c0_51 = arith.constant 0 : index
    %c0_52 = arith.constant 0 : index
    %80 = vector.load %arg11[%c0_50, %c0_51, %c0_52] : memref<2x1x32xf32, #tpu.memory_space<vmem>>, vector<1x1x32xf32>
    %81 = vector.shape_cast %80 : vector<1x1x32xf32> to vector<1x32xf32>
    %82 = vector.broadcast %81 : vector<1x32xf32> to vector<32x32xf32>
    %83 = arith.addf %79, %82 : vector<32x32xf32>
    %cst_53 = arith.constant 5.000000e-01 : f32
    %84 = vector.broadcast %cst_53 : f32 to vector<32x32xf32>
    %85 = arith.mulf %84, %83 : vector<32x32xf32>
    %cst_54 = arith.constant 0.707106769 : f32
    %86 = vector.broadcast %cst_54 : f32 to vector<32x32xf32>
    %87 = arith.mulf %83, %86 : vector<32x32xf32>
    %88 = math.erf %87 : vector<32x32xf32>
    %cst_55 = arith.constant 1.000000e+00 : f32
    %89 = vector.broadcast %cst_55 : f32 to vector<32x32xf32>
    %90 = arith.addf %89, %88 : vector<32x32xf32>
    %91 = arith.mulf %85, %90 : vector<32x32xf32>
    %c0_56 = arith.constant 0 : index
    %c0_57 = arith.constant 0 : index
    %c0_58 = arith.constant 0 : index
    %92 = vector.load %arg12[%c0_56, %c0_57, %c0_58] : memref<2x32x32xf32, #tpu.memory_space<vmem>>, vector<1x32x32xf32>
    %93 = vector.shape_cast %92 : vector<1x32x32xf32> to vector<32x32xf32>
    %cst_59 = arith.constant dense<0.000000e+00> : vector<32x32xf32>
    %94 = tpu.matmul %91, %93, %cst_59 {dimension_numbers = #tpu.dot_dimension_numbers<[1], [0], [0], [1], [0, 0, 1, 1], [], []>} : vector<32x32xf32>, vector<32x32xf32>, vector<32x32xf32> -> vector<32x32xf32>
    %c0_60 = arith.constant 0 : index
    %c0_61 = arith.constant 0 : index
    %c0_62 = arith.constant 0 : index
    %95 = vector.load %arg13[%c0_60, %c0_61, %c0_62] : memref<2x1x32xf32, #tpu.memory_space<vmem>>, vector<1x1x32xf32>
    %96 = vector.shape_cast %95 : vector<1x1x32xf32> to vector<1x32xf32>
    %97 = vector.broadcast %96 : vector<1x32xf32> to vector<32x32xf32>
    %98 = arith.addf %94, %97 : vector<32x32xf32>
    %99 = arith.addf %76, %98 : vector<32x32xf32>
    %c0_63 = arith.constant 0 : index
    %c0_64 = arith.constant 0 : index
    %c0_65 = arith.constant 0 : index
    %100 = vector.load %arg16[%c0_63, %c0_64, %c0_65] : memref<2x1x32xf32, #tpu.memory_space<vmem>>, vector<1x1x32xf32>
    %101 = vector.shape_cast %100 : vector<1x1x32xf32> to vector<1x32xf32>
    %c0_66 = arith.constant 0 : index
    %c0_67 = arith.constant 0 : index
    %c0_68 = arith.constant 0 : index
    %102 = vector.load %arg17[%c0_66, %c0_67, %c0_68] : memref<2x1x32xf32, #tpu.memory_space<vmem>>, vector<1x1x32xf32>
    %103 = vector.shape_cast %102 : vector<1x1x32xf32> to vector<1x32xf32>
    %cst_69 = arith.constant dense<0.000000e+00> : vector<32xf32>
    %104 = vector.multi_reduction <add>, %99, %cst_69 [1] : vector<32x32xf32> to vector<32xf32>
    %105 = vector.shape_cast %104 : vector<32xf32> to vector<32x1xf32>
    %cst_70 = arith.constant 3.200000e+01 : f32
    %106 = vector.broadcast %cst_70 : f32 to vector<32x1xf32>
    %107 = arith.divf %105, %106 : vector<32x1xf32>
    %108 = vector.broadcast %107 : vector<32x1xf32> to vector<32x32xf32>
    %109 = arith.subf %99, %108 : vector<32x32xf32>
    %110 = arith.mulf %109, %109 : vector<32x32xf32>
    %cst_71 = arith.constant dense<0.000000e+00> : vector<32xf32>
    %111 = vector.multi_reduction <add>, %110, %cst_71 [1] : vector<32x32xf32> to vector<32xf32>
    %112 = vector.shape_cast %111 : vector<32xf32> to vector<32x1xf32>
    %cst_72 = arith.constant 3.200000e+01 : f32
    %113 = vector.broadcast %cst_72 : f32 to vector<32x1xf32>
    %114 = arith.divf %112, %113 : vector<32x1xf32>
    %115 = vector.broadcast %107 : vector<32x1xf32> to vector<32x32xf32>
    %116 = arith.subf %99, %115 : vector<32x32xf32>
    %cst_73 = arith.constant 9.99999974E-6 : f32
    %117 = vector.broadcast %cst_73 : f32 to vector<32x1xf32>
    %118 = arith.addf %114, %117 : vector<32x1xf32>
    %119 = math.rsqrt %118 : vector<32x1xf32>
    %120 = vector.broadcast %119 : vector<32x1xf32> to vector<32x32xf32>
    %121 = arith.mulf %116, %120 : vector<32x32xf32>
    %122 = vector.broadcast %101 : vector<1x32xf32> to vector<32x32xf32>
    %123 = arith.mulf %121, %122 : vector<32x32xf32>
    %124 = vector.broadcast %103 : vector<1x32xf32> to vector<32x32xf32>
    %125 = arith.addf %123, %124 : vector<32x32xf32>
    %c1 = arith.constant 1 : index
    %c0_74 = arith.constant 0 : index
    %c0_75 = arith.constant 0 : index
    %126 = vector.load %arg6[%c1, %c0_74, %c0_75] : memref<2x32x96xf32, #tpu.memory_space<vmem>>, vector<1x32x96xf32>
    %127 = vector.shape_cast %126 : vector<1x32x96xf32> to vector<32x96xf32>
    %cst_76 = arith.constant dense<0.000000e+00> : vector<32x96xf32>
    %128 = tpu.matmul %125, %127, %cst_76 {dimension_numbers = #tpu.dot_dimension_numbers<[1], [0], [0], [1], [0, 0, 1, 1], [], []>} : vector<32x32xf32>, vector<32x96xf32>, vector<32x96xf32> -> vector<32x96xf32>
    %c1_77 = arith.constant 1 : index
    %c0_78 = arith.constant 0 : index
    %c0_79 = arith.constant 0 : index
    %129 = vector.load %arg7[%c1_77, %c0_78, %c0_79] : memref<2x1x96xf32, #tpu.memory_space<vmem>>, vector<1x1x96xf32>
    %130 = vector.shape_cast %129 : vector<1x1x96xf32> to vector<1x96xf32>
    %131 = vector.broadcast %130 : vector<1x96xf32> to vector<32x96xf32>
    %132 = arith.addf %128, %131 : vector<32x96xf32>
    %133 = vector.extract_strided_slice %132 {offsets = [0, 0], sizes = [32, 32], strides = [1, 1]} : vector<32x96xf32> to vector<32x32xf32>
    %134 = vector.extract_strided_slice %132 {offsets = [0, 32], sizes = [32, 32], strides = [1, 1]} : vector<32x96xf32> to vector<32x32xf32>
    %135 = vector.extract_strided_slice %132 {offsets = [0, 64], sizes = [32, 32], strides = [1, 1]} : vector<32x96xf32> to vector<32x32xf32>
    %136 = tpu.concatenate %134, %134, %134, %134 in 0 : vector<32x32xf32>, vector<32x32xf32>, vector<32x32xf32>, vector<32x32xf32> -> vector<128x32xf32>
    %137 = arith.mulf %136, %11 : vector<128x32xf32>
    %138 = tpu.concatenate %135, %135, %135, %135 in 0 : vector<32x32xf32>, vector<32x32xf32>, vector<32x32xf32>, vector<32x32xf32> -> vector<128x32xf32>
    %139 = arith.mulf %138, %11 : vector<128x32xf32>
    %cst_80 = arith.constant dense<0.000000e+00> : vector<32x128xf32>
    %140 = tpu.matmul %133, %137, %cst_80 {dimension_numbers = #tpu.dot_dimension_numbers<[1], [1], [0], [0], [0, 0, 1, 0], [], []>} : vector<32x32xf32>, vector<128x32xf32>, vector<32x128xf32> -> vector<32x128xf32>
    %cst_81 = arith.constant 0.353553385 : f32
    %141 = vector.broadcast %cst_81 : f32 to vector<32x128xf32>
    %142 = arith.mulf %140, %141 : vector<32x128xf32>
    %cst_82 = arith.constant dense<0xFF800000> : vector<32xf32>
    %143 = vector.multi_reduction <maximumf>, %142, %cst_82 [1] : vector<32x128xf32> to vector<32xf32>
    %144 = vector.shape_cast %143 : vector<32xf32> to vector<32x1xf32>
    %145 = vector.broadcast %144 : vector<32x1xf32> to vector<32x128xf32>
    %146 = arith.subf %142, %145 : vector<32x128xf32>
    %147 = math.exp %146 : vector<32x128xf32>
    %148 = arith.mulf %147, %12 : vector<32x128xf32>
    %cst_83 = arith.constant dense<0.000000e+00> : vector<32x128xf32>
    %149 = tpu.matmul %148, %13, %cst_83 {dimension_numbers = #tpu.dot_dimension_numbers<[1], [0], [0], [1], [0, 0, 1, 1], [], []>} : vector<32x128xf32>, vector<128x128xf32>, vector<32x128xf32> -> vector<32x128xf32>
    %cst_84 = arith.constant 9.99999968E-21 : f32
    %150 = vector.broadcast %cst_84 : f32 to vector<32x128xf32>
    %151 = arith.addf %149, %150 : vector<32x128xf32>
    %152 = tpu.reciprocal %151 {approx = true} : vector<32x128xf32> -> vector<32x128xf32>
    %153 = arith.mulf %148, %152 : vector<32x128xf32>
    %cst_85 = arith.constant dense<0.000000e+00> : vector<32x32xf32>
    %154 = tpu.matmul %153, %139, %cst_85 {dimension_numbers = #tpu.dot_dimension_numbers<[1], [0], [0], [1], [0, 0, 1, 1], [], []>} : vector<32x128xf32>, vector<128x32xf32>, vector<32x32xf32> -> vector<32x32xf32>
    %c1_86 = arith.constant 1 : index
    %c0_87 = arith.constant 0 : index
    %c0_88 = arith.constant 0 : index
    %155 = vector.load %arg8[%c1_86, %c0_87, %c0_88] : memref<2x32x32xf32, #tpu.memory_space<vmem>>, vector<1x32x32xf32>
    %156 = vector.shape_cast %155 : vector<1x32x32xf32> to vector<32x32xf32>
    %cst_89 = arith.constant dense<0.000000e+00> : vector<32x32xf32>
    %157 = tpu.matmul %154, %156, %cst_89 {dimension_numbers = #tpu.dot_dimension_numbers<[1], [0], [0], [1], [0, 0, 1, 1], [], []>} : vector<32x32xf32>, vector<32x32xf32>, vector<32x32xf32> -> vector<32x32xf32>
    %c1_90 = arith.constant 1 : index
    %c0_91 = arith.constant 0 : index
    %c0_92 = arith.constant 0 : index
    %158 = vector.load %arg9[%c1_90, %c0_91, %c0_92] : memref<2x1x32xf32, #tpu.memory_space<vmem>>, vector<1x1x32xf32>
    %159 = vector.shape_cast %158 : vector<1x1x32xf32> to vector<1x32xf32>
    %160 = vector.broadcast %159 : vector<1x32xf32> to vector<32x32xf32>
    %161 = arith.addf %157, %160 : vector<32x32xf32>
    %162 = arith.addf %125, %161 : vector<32x32xf32>
    %c1_93 = arith.constant 1 : index
    %c0_94 = arith.constant 0 : index
    %c0_95 = arith.constant 0 : index
    %163 = vector.load %arg14[%c1_93, %c0_94, %c0_95] : memref<2x1x32xf32, #tpu.memory_space<vmem>>, vector<1x1x32xf32>
    %164 = vector.shape_cast %163 : vector<1x1x32xf32> to vector<1x32xf32>
    %c1_96 = arith.constant 1 : index
    %c0_97 = arith.constant 0 : index
    %c0_98 = arith.constant 0 : index
    %165 = vector.load %arg15[%c1_96, %c0_97, %c0_98] : memref<2x1x32xf32, #tpu.memory_space<vmem>>, vector<1x1x32xf32>
    %166 = vector.shape_cast %165 : vector<1x1x32xf32> to vector<1x32xf32>
    %cst_99 = arith.constant dense<0.000000e+00> : vector<32xf32>
    %167 = vector.multi_reduction <add>, %162, %cst_99 [1] : vector<32x32xf32> to vector<32xf32>
    %168 = vector.shape_cast %167 : vector<32xf32> to vector<32x1xf32>
    %cst_100 = arith.constant 3.200000e+01 : f32
    %169 = vector.broadcast %cst_100 : f32 to vector<32x1xf32>
    %170 = arith.divf %168, %169 : vector<32x1xf32>
    %171 = vector.broadcast %170 : vector<32x1xf32> to vector<32x32xf32>
    %172 = arith.subf %162, %171 : vector<32x32xf32>
    %173 = arith.mulf %172, %172 : vector<32x32xf32>
    %cst_101 = arith.constant dense<0.000000e+00> : vector<32xf32>
    %174 = vector.multi_reduction <add>, %173, %cst_101 [1] : vector<32x32xf32> to vector<32xf32>
    %175 = vector.shape_cast %174 : vector<32xf32> to vector<32x1xf32>
    %cst_102 = arith.constant 3.200000e+01 : f32
    %176 = vector.broadcast %cst_102 : f32 to vector<32x1xf32>
    %177 = arith.divf %175, %176 : vector<32x1xf32>
    %178 = vector.broadcast %170 : vector<32x1xf32> to vector<32x32xf32>
    %179 = arith.subf %162, %178 : vector<32x32xf32>
    %cst_103 = arith.constant 9.99999974E-6 : f32
    %180 = vector.broadcast %cst_103 : f32 to vector<32x1xf32>
    %181 = arith.addf %177, %180 : vector<32x1xf32>
    %182 = math.rsqrt %181 : vector<32x1xf32>
    %183 = vector.broadcast %182 : vector<32x1xf32> to vector<32x32xf32>
    %184 = arith.mulf %179, %183 : vector<32x32xf32>
    %185 = vector.broadcast %164 : vector<1x32xf32> to vector<32x32xf32>
    %186 = arith.mulf %184, %185 : vector<32x32xf32>
    %187 = vector.broadcast %166 : vector<1x32xf32> to vector<32x32xf32>
    %188 = arith.addf %186, %187 : vector<32x32xf32>
    %c1_104 = arith.constant 1 : index
    %c0_105 = arith.constant 0 : index
    %c0_106 = arith.constant 0 : index
    %189 = vector.load %arg10[%c1_104, %c0_105, %c0_106] : memref<2x32x32xf32, #tpu.memory_space<vmem>>, vector<1x32x32xf32>
    %190 = vector.shape_cast %189 : vector<1x32x32xf32> to vector<32x32xf32>
    %cst_107 = arith.constant dense<0.000000e+00> : vector<32x32xf32>
    %191 = tpu.matmul %188, %190, %cst_107 {dimension_numbers = #tpu.dot_dimension_numbers<[1], [0], [0], [1], [0, 0, 1, 1], [], []>} : vector<32x32xf32>, vector<32x32xf32>, vector<32x32xf32> -> vector<32x32xf32>
    %c1_108 = arith.constant 1 : index
    %c0_109 = arith.constant 0 : index
    %c0_110 = arith.constant 0 : index
    %192 = vector.load %arg11[%c1_108, %c0_109, %c0_110] : memref<2x1x32xf32, #tpu.memory_space<vmem>>, vector<1x1x32xf32>
    %193 = vector.shape_cast %192 : vector<1x1x32xf32> to vector<1x32xf32>
    %194 = vector.broadcast %193 : vector<1x32xf32> to vector<32x32xf32>
    %195 = arith.addf %191, %194 : vector<32x32xf32>
    %cst_111 = arith.constant 5.000000e-01 : f32
    %196 = vector.broadcast %cst_111 : f32 to vector<32x32xf32>
    %197 = arith.mulf %196, %195 : vector<32x32xf32>
    %cst_112 = arith.constant 0.707106769 : f32
    %198 = vector.broadcast %cst_112 : f32 to vector<32x32xf32>
    %199 = arith.mulf %195, %198 : vector<32x32xf32>
    %200 = math.erf %199 : vector<32x32xf32>
    %cst_113 = arith.constant 1.000000e+00 : f32
    %201 = vector.broadcast %cst_113 : f32 to vector<32x32xf32>
    %202 = arith.addf %201, %200 : vector<32x32xf32>
    %203 = arith.mulf %197, %202 : vector<32x32xf32>
    %c1_114 = arith.constant 1 : index
    %c0_115 = arith.constant 0 : index
    %c0_116 = arith.constant 0 : index
    %204 = vector.load %arg12[%c1_114, %c0_115, %c0_116] : memref<2x32x32xf32, #tpu.memory_space<vmem>>, vector<1x32x32xf32>
    %205 = vector.shape_cast %204 : vector<1x32x32xf32> to vector<32x32xf32>
    %cst_117 = arith.constant dense<0.000000e+00> : vector<32x32xf32>
    %206 = tpu.matmul %203, %205, %cst_117 {dimension_numbers = #tpu.dot_dimension_numbers<[1], [0], [0], [1], [0, 0, 1, 1], [], []>} : vector<32x32xf32>, vector<32x32xf32>, vector<32x32xf32> -> vector<32x32xf32>
    %c1_118 = arith.constant 1 : index
    %c0_119 = arith.constant 0 : index
    %c0_120 = arith.constant 0 : index
    %207 = vector.load %arg13[%c1_118, %c0_119, %c0_120] : memref<2x1x32xf32, #tpu.memory_space<vmem>>, vector<1x1x32xf32>
    %208 = vector.shape_cast %207 : vector<1x1x32xf32> to vector<1x32xf32>
    %209 = vector.broadcast %208 : vector<1x32xf32> to vector<32x32xf32>
    %210 = arith.addf %206, %209 : vector<32x32xf32>
    %211 = arith.addf %188, %210 : vector<32x32xf32>
    %c1_121 = arith.constant 1 : index
    %c0_122 = arith.constant 0 : index
    %c0_123 = arith.constant 0 : index
    %212 = vector.load %arg16[%c1_121, %c0_122, %c0_123] : memref<2x1x32xf32, #tpu.memory_space<vmem>>, vector<1x1x32xf32>
    %213 = vector.shape_cast %212 : vector<1x1x32xf32> to vector<1x32xf32>
    %c1_124 = arith.constant 1 : index
    %c0_125 = arith.constant 0 : index
    %c0_126 = arith.constant 0 : index
    %214 = vector.load %arg17[%c1_124, %c0_125, %c0_126] : memref<2x1x32xf32, #tpu.memory_space<vmem>>, vector<1x1x32xf32>
    %215 = vector.shape_cast %214 : vector<1x1x32xf32> to vector<1x32xf32>
    %cst_127 = arith.constant dense<0.000000e+00> : vector<32xf32>
    %216 = vector.multi_reduction <add>, %211, %cst_127 [1] : vector<32x32xf32> to vector<32xf32>
    %217 = vector.shape_cast %216 : vector<32xf32> to vector<32x1xf32>
    %cst_128 = arith.constant 3.200000e+01 : f32
    %218 = vector.broadcast %cst_128 : f32 to vector<32x1xf32>
    %219 = arith.divf %217, %218 : vector<32x1xf32>
    %220 = vector.broadcast %219 : vector<32x1xf32> to vector<32x32xf32>
    %221 = arith.subf %211, %220 : vector<32x32xf32>
    %222 = arith.mulf %221, %221 : vector<32x32xf32>
    %cst_129 = arith.constant dense<0.000000e+00> : vector<32xf32>
    %223 = vector.multi_reduction <add>, %222, %cst_129 [1] : vector<32x32xf32> to vector<32xf32>
    %224 = vector.shape_cast %223 : vector<32xf32> to vector<32x1xf32>
    %cst_130 = arith.constant 3.200000e+01 : f32
    %225 = vector.broadcast %cst_130 : f32 to vector<32x1xf32>
    %226 = arith.divf %224, %225 : vector<32x1xf32>
    %227 = vector.broadcast %219 : vector<32x1xf32> to vector<32x32xf32>
    %228 = arith.subf %211, %227 : vector<32x32xf32>
    %cst_131 = arith.constant 9.99999974E-6 : f32
    %229 = vector.broadcast %cst_131 : f32 to vector<32x1xf32>
    %230 = arith.addf %226, %229 : vector<32x1xf32>
    %231 = math.rsqrt %230 : vector<32x1xf32>
    %232 = vector.broadcast %231 : vector<32x1xf32> to vector<32x32xf32>
    %233 = arith.mulf %228, %232 : vector<32x32xf32>
    %234 = vector.broadcast %213 : vector<1x32xf32> to vector<32x32xf32>
    %235 = arith.mulf %233, %234 : vector<32x32xf32>
    %236 = vector.broadcast %215 : vector<1x32xf32> to vector<32x32xf32>
    %237 = arith.addf %235, %236 : vector<32x32xf32>
    %c0_132 = arith.constant 0 : index
    %c0_133 = arith.constant 0 : index
    %238 = vector.load %arg21[%c0_132, %c0_133] : memref<16x32xf32, #tpu.memory_space<vmem>>, vector<16x32xf32>
    %c0_134 = arith.constant 0 : index
    %c0_135 = arith.constant 0 : index
    %239 = vector.load %arg22[%c0_134, %c0_135] : memref<16x1xf32, #tpu.memory_space<vmem>>, vector<16x1xf32>
    %240 = vector.extract_strided_slice %237 {offsets = [0, 0], sizes = [16, 32], strides = [1, 1]} : vector<32x32xf32> to vector<16x32xf32>
    %cst_136 = arith.constant dense<0.000000e+00> : vector<16x16xf32>
    %241 = tpu.matmul %238, %240, %cst_136 {dimension_numbers = #tpu.dot_dimension_numbers<[1], [1], [0], [0], [0, 0, 1, 0], [], []>} : vector<16x32xf32>, vector<16x32xf32>, vector<16x16xf32> -> vector<16x16xf32>
    %242 = vector.broadcast %239 : vector<16x1xf32> to vector<16x16xf32>
    %243 = arith.addf %241, %242 : vector<16x16xf32>
    %244 = vector.extract_strided_slice %237 {offsets = [16, 0], sizes = [16, 32], strides = [1, 1]} : vector<32x32xf32> to vector<16x32xf32>
    %cst_137 = arith.constant dense<0.000000e+00> : vector<16x16xf32>
    %245 = tpu.matmul %238, %244, %cst_137 {dimension_numbers = #tpu.dot_dimension_numbers<[1], [1], [0], [0], [0, 0, 1, 0], [], []>} : vector<16x32xf32>, vector<16x32xf32>, vector<16x16xf32> -> vector<16x16xf32>
    %246 = vector.broadcast %239 : vector<16x1xf32> to vector<16x16xf32>
    %247 = arith.addf %245, %246 : vector<16x16xf32>
    %248 = tpu.concatenate %243, %247 in 0 : vector<16x16xf32>, vector<16x16xf32> -> vector<32x16xf32>
    %c0_138 = arith.constant 0 : index
    %c0_139 = arith.constant 0 : index
    %249 = vector.load %arg23[%c0_138, %c0_139] : memref<16x32xf32, #tpu.memory_space<vmem>>, vector<16x32xf32>
    %cst_140 = arith.constant dense<0.000000e+00> : vector<32x32xf32>
    %250 = tpu.matmul %248, %249, %cst_140 {dimension_numbers = #tpu.dot_dimension_numbers<[1], [0], [0], [1], [0, 0, 1, 1], [], []>} : vector<32x16xf32>, vector<16x32xf32>, vector<32x32xf32> -> vector<32x32xf32>
    %c0_141 = arith.constant 0 : index
    %c0_142 = arith.constant 0 : index
    %251 = vector.load %arg24[%c0_141, %c0_142] : memref<1x32xf32, #tpu.memory_space<vmem>>, vector<1x32xf32>
    %252 = vector.broadcast %251 : vector<1x32xf32> to vector<32x32xf32>
    %253 = arith.addf %250, %252 : vector<32x32xf32>
    %c0_143 = arith.constant 0 : index
    %c0_144 = arith.constant 0 : index
    %254 = vector.load %arg2[%c0_143, %c0_144] : memref<1x32xf32, #tpu.memory_space<vmem>>, vector<1x32xf32>
    %255 = vector.broadcast %254 : vector<1x32xf32> to vector<32x32xf32>
    %256 = arith.addf %253, %255 : vector<32x32xf32>
    %c0_145 = arith.constant 0 : index
    %c0_146 = arith.constant 0 : index
    %257 = vector.load %arg25[%c0_145, %c0_146] : memref<32x32xf32, #tpu.memory_space<vmem>>, vector<32x32xf32>
    %258 = arith.addf %256, %257 : vector<32x32xf32>
    %c0_147 = arith.constant 0 : index
    %c0_148 = arith.constant 0 : index
    %259 = vector.load %arg38[%c0_147, %c0_148] : memref<128x32xf32, #tpu.memory_space<vmem>>, vector<128x32xf32>
    %c0_149 = arith.constant 0 : index
    %c0_150 = arith.constant 0 : index
    %260 = vector.load %arg39[%c0_149, %c0_150] : memref<32x128xf32, #tpu.memory_space<vmem>>, vector<32x128xf32>
    %c0_151 = arith.constant 0 : index
    %c0_152 = arith.constant 0 : index
    %261 = vector.load %arg40[%c0_151, %c0_152] : memref<128x128xf32, #tpu.memory_space<vmem>>, vector<128x128xf32>
    %c0_153 = arith.constant 0 : index
    %c0_154 = arith.constant 0 : index
    %c0_155 = arith.constant 0 : index
    %262 = vector.load %arg26[%c0_153, %c0_154, %c0_155] : memref<2x32x96xf32, #tpu.memory_space<vmem>>, vector<1x32x96xf32>
    %263 = vector.shape_cast %262 : vector<1x32x96xf32> to vector<32x96xf32>
    %cst_156 = arith.constant dense<0.000000e+00> : vector<32x96xf32>
    %264 = tpu.matmul %258, %263, %cst_156 {dimension_numbers = #tpu.dot_dimension_numbers<[1], [0], [0], [1], [0, 0, 1, 1], [], []>} : vector<32x32xf32>, vector<32x96xf32>, vector<32x96xf32> -> vector<32x96xf32>
    %c0_157 = arith.constant 0 : index
    %c0_158 = arith.constant 0 : index
    %c0_159 = arith.constant 0 : index
    %265 = vector.load %arg27[%c0_157, %c0_158, %c0_159] : memref<2x1x96xf32, #tpu.memory_space<vmem>>, vector<1x1x96xf32>
    %266 = vector.shape_cast %265 : vector<1x1x96xf32> to vector<1x96xf32>
    %267 = vector.broadcast %266 : vector<1x96xf32> to vector<32x96xf32>
    %268 = arith.addf %264, %267 : vector<32x96xf32>
    %269 = vector.extract_strided_slice %268 {offsets = [0, 0], sizes = [32, 32], strides = [1, 1]} : vector<32x96xf32> to vector<32x32xf32>
    %270 = vector.extract_strided_slice %268 {offsets = [0, 32], sizes = [32, 32], strides = [1, 1]} : vector<32x96xf32> to vector<32x32xf32>
    %271 = vector.extract_strided_slice %268 {offsets = [0, 64], sizes = [32, 32], strides = [1, 1]} : vector<32x96xf32> to vector<32x32xf32>
    %272 = tpu.concatenate %270, %270, %270, %270 in 0 : vector<32x32xf32>, vector<32x32xf32>, vector<32x32xf32>, vector<32x32xf32> -> vector<128x32xf32>
    %273 = arith.mulf %272, %259 : vector<128x32xf32>
    %274 = tpu.concatenate %271, %271, %271, %271 in 0 : vector<32x32xf32>, vector<32x32xf32>, vector<32x32xf32>, vector<32x32xf32> -> vector<128x32xf32>
    %275 = arith.mulf %274, %259 : vector<128x32xf32>
    %cst_160 = arith.constant dense<0.000000e+00> : vector<32x128xf32>
    %276 = tpu.matmul %269, %273, %cst_160 {dimension_numbers = #tpu.dot_dimension_numbers<[1], [1], [0], [0], [0, 0, 1, 0], [], []>} : vector<32x32xf32>, vector<128x32xf32>, vector<32x128xf32> -> vector<32x128xf32>
    %cst_161 = arith.constant 0.353553385 : f32
    %277 = vector.broadcast %cst_161 : f32 to vector<32x128xf32>
    %278 = arith.mulf %276, %277 : vector<32x128xf32>
    %cst_162 = arith.constant dense<0xFF800000> : vector<32xf32>
    %279 = vector.multi_reduction <maximumf>, %278, %cst_162 [1] : vector<32x128xf32> to vector<32xf32>
    %280 = vector.shape_cast %279 : vector<32xf32> to vector<32x1xf32>
    %281 = vector.broadcast %280 : vector<32x1xf32> to vector<32x128xf32>
    %282 = arith.subf %278, %281 : vector<32x128xf32>
    %283 = math.exp %282 : vector<32x128xf32>
    %284 = arith.mulf %283, %260 : vector<32x128xf32>
    %cst_163 = arith.constant dense<0.000000e+00> : vector<32x128xf32>
    %285 = tpu.matmul %284, %261, %cst_163 {dimension_numbers = #tpu.dot_dimension_numbers<[1], [0], [0], [1], [0, 0, 1, 1], [], []>} : vector<32x128xf32>, vector<128x128xf32>, vector<32x128xf32> -> vector<32x128xf32>
    %cst_164 = arith.constant 9.99999968E-21 : f32
    %286 = vector.broadcast %cst_164 : f32 to vector<32x128xf32>
    %287 = arith.addf %285, %286 : vector<32x128xf32>
    %288 = tpu.reciprocal %287 {approx = true} : vector<32x128xf32> -> vector<32x128xf32>
    %289 = arith.mulf %284, %288 : vector<32x128xf32>
    %cst_165 = arith.constant dense<0.000000e+00> : vector<32x32xf32>
    %290 = tpu.matmul %289, %275, %cst_165 {dimension_numbers = #tpu.dot_dimension_numbers<[1], [0], [0], [1], [0, 0, 1, 1], [], []>} : vector<32x128xf32>, vector<128x32xf32>, vector<32x32xf32> -> vector<32x32xf32>
    %c0_166 = arith.constant 0 : index
    %c0_167 = arith.constant 0 : index
    %c0_168 = arith.constant 0 : index
    %291 = vector.load %arg28[%c0_166, %c0_167, %c0_168] : memref<2x32x32xf32, #tpu.memory_space<vmem>>, vector<1x32x32xf32>
    %292 = vector.shape_cast %291 : vector<1x32x32xf32> to vector<32x32xf32>
    %cst_169 = arith.constant dense<0.000000e+00> : vector<32x32xf32>
    %293 = tpu.matmul %290, %292, %cst_169 {dimension_numbers = #tpu.dot_dimension_numbers<[1], [0], [0], [1], [0, 0, 1, 1], [], []>} : vector<32x32xf32>, vector<32x32xf32>, vector<32x32xf32> -> vector<32x32xf32>
    %c0_170 = arith.constant 0 : index
    %c0_171 = arith.constant 0 : index
    %c0_172 = arith.constant 0 : index
    %294 = vector.load %arg29[%c0_170, %c0_171, %c0_172] : memref<2x1x32xf32, #tpu.memory_space<vmem>>, vector<1x1x32xf32>
    %295 = vector.shape_cast %294 : vector<1x1x32xf32> to vector<1x32xf32>
    %296 = vector.broadcast %295 : vector<1x32xf32> to vector<32x32xf32>
    %297 = arith.addf %293, %296 : vector<32x32xf32>
    %298 = arith.addf %258, %297 : vector<32x32xf32>
    %c0_173 = arith.constant 0 : index
    %c0_174 = arith.constant 0 : index
    %c0_175 = arith.constant 0 : index
    %299 = vector.load %arg34[%c0_173, %c0_174, %c0_175] : memref<2x1x32xf32, #tpu.memory_space<vmem>>, vector<1x1x32xf32>
    %300 = vector.shape_cast %299 : vector<1x1x32xf32> to vector<1x32xf32>
    %c0_176 = arith.constant 0 : index
    %c0_177 = arith.constant 0 : index
    %c0_178 = arith.constant 0 : index
    %301 = vector.load %arg35[%c0_176, %c0_177, %c0_178] : memref<2x1x32xf32, #tpu.memory_space<vmem>>, vector<1x1x32xf32>
    %302 = vector.shape_cast %301 : vector<1x1x32xf32> to vector<1x32xf32>
    %cst_179 = arith.constant dense<0.000000e+00> : vector<32xf32>
    %303 = vector.multi_reduction <add>, %298, %cst_179 [1] : vector<32x32xf32> to vector<32xf32>
    %304 = vector.shape_cast %303 : vector<32xf32> to vector<32x1xf32>
    %cst_180 = arith.constant 3.200000e+01 : f32
    %305 = vector.broadcast %cst_180 : f32 to vector<32x1xf32>
    %306 = arith.divf %304, %305 : vector<32x1xf32>
    %307 = vector.broadcast %306 : vector<32x1xf32> to vector<32x32xf32>
    %308 = arith.subf %298, %307 : vector<32x32xf32>
    %309 = arith.mulf %308, %308 : vector<32x32xf32>
    %cst_181 = arith.constant dense<0.000000e+00> : vector<32xf32>
    %310 = vector.multi_reduction <add>, %309, %cst_181 [1] : vector<32x32xf32> to vector<32xf32>
    %311 = vector.shape_cast %310 : vector<32xf32> to vector<32x1xf32>
    %cst_182 = arith.constant 3.200000e+01 : f32
    %312 = vector.broadcast %cst_182 : f32 to vector<32x1xf32>
    %313 = arith.divf %311, %312 : vector<32x1xf32>
    %314 = vector.broadcast %306 : vector<32x1xf32> to vector<32x32xf32>
    %315 = arith.subf %298, %314 : vector<32x32xf32>
    %cst_183 = arith.constant 9.99999974E-6 : f32
    %316 = vector.broadcast %cst_183 : f32 to vector<32x1xf32>
    %317 = arith.addf %313, %316 : vector<32x1xf32>
    %318 = math.rsqrt %317 : vector<32x1xf32>
    %319 = vector.broadcast %318 : vector<32x1xf32> to vector<32x32xf32>
    %320 = arith.mulf %315, %319 : vector<32x32xf32>
    %321 = vector.broadcast %300 : vector<1x32xf32> to vector<32x32xf32>
    %322 = arith.mulf %320, %321 : vector<32x32xf32>
    %323 = vector.broadcast %302 : vector<1x32xf32> to vector<32x32xf32>
    %324 = arith.addf %322, %323 : vector<32x32xf32>
    %c0_184 = arith.constant 0 : index
    %c0_185 = arith.constant 0 : index
    %c0_186 = arith.constant 0 : index
    %325 = vector.load %arg30[%c0_184, %c0_185, %c0_186] : memref<2x32x32xf32, #tpu.memory_space<vmem>>, vector<1x32x32xf32>
    %326 = vector.shape_cast %325 : vector<1x32x32xf32> to vector<32x32xf32>
    %cst_187 = arith.constant dense<0.000000e+00> : vector<32x32xf32>
    %327 = tpu.matmul %324, %326, %cst_187 {dimension_numbers = #tpu.dot_dimension_numbers<[1], [0], [0], [1], [0, 0, 1, 1], [], []>} : vector<32x32xf32>, vector<32x32xf32>, vector<32x32xf32> -> vector<32x32xf32>
    %c0_188 = arith.constant 0 : index
    %c0_189 = arith.constant 0 : index
    %c0_190 = arith.constant 0 : index
    %328 = vector.load %arg31[%c0_188, %c0_189, %c0_190] : memref<2x1x32xf32, #tpu.memory_space<vmem>>, vector<1x1x32xf32>
    %329 = vector.shape_cast %328 : vector<1x1x32xf32> to vector<1x32xf32>
    %330 = vector.broadcast %329 : vector<1x32xf32> to vector<32x32xf32>
    %331 = arith.addf %327, %330 : vector<32x32xf32>
    %cst_191 = arith.constant 5.000000e-01 : f32
    %332 = vector.broadcast %cst_191 : f32 to vector<32x32xf32>
    %333 = arith.mulf %332, %331 : vector<32x32xf32>
    %cst_192 = arith.constant 0.707106769 : f32
    %334 = vector.broadcast %cst_192 : f32 to vector<32x32xf32>
    %335 = arith.mulf %331, %334 : vector<32x32xf32>
    %336 = math.erf %335 : vector<32x32xf32>
    %cst_193 = arith.constant 1.000000e+00 : f32
    %337 = vector.broadcast %cst_193 : f32 to vector<32x32xf32>
    %338 = arith.addf %337, %336 : vector<32x32xf32>
    %339 = arith.mulf %333, %338 : vector<32x32xf32>
    %c0_194 = arith.constant 0 : index
    %c0_195 = arith.constant 0 : index
    %c0_196 = arith.constant 0 : index
    %340 = vector.load %arg32[%c0_194, %c0_195, %c0_196] : memref<2x32x32xf32, #tpu.memory_space<vmem>>, vector<1x32x32xf32>
    %341 = vector.shape_cast %340 : vector<1x32x32xf32> to vector<32x32xf32>
    %cst_197 = arith.constant dense<0.000000e+00> : vector<32x32xf32>
    %342 = tpu.matmul %339, %341, %cst_197 {dimension_numbers = #tpu.dot_dimension_numbers<[1], [0], [0], [1], [0, 0, 1, 1], [], []>} : vector<32x32xf32>, vector<32x32xf32>, vector<32x32xf32> -> vector<32x32xf32>
    %c0_198 = arith.constant 0 : index
    %c0_199 = arith.constant 0 : index
    %c0_200 = arith.constant 0 : index
    %343 = vector.load %arg33[%c0_198, %c0_199, %c0_200] : memref<2x1x32xf32, #tpu.memory_space<vmem>>, vector<1x1x32xf32>
    %344 = vector.shape_cast %343 : vector<1x1x32xf32> to vector<1x32xf32>
    %345 = vector.broadcast %344 : vector<1x32xf32> to vector<32x32xf32>
    %346 = arith.addf %342, %345 : vector<32x32xf32>
    %347 = arith.addf %324, %346 : vector<32x32xf32>
    %c0_201 = arith.constant 0 : index
    %c0_202 = arith.constant 0 : index
    %c0_203 = arith.constant 0 : index
    %348 = vector.load %arg36[%c0_201, %c0_202, %c0_203] : memref<2x1x32xf32, #tpu.memory_space<vmem>>, vector<1x1x32xf32>
    %349 = vector.shape_cast %348 : vector<1x1x32xf32> to vector<1x32xf32>
    %c0_204 = arith.constant 0 : index
    %c0_205 = arith.constant 0 : index
    %c0_206 = arith.constant 0 : index
    %350 = vector.load %arg37[%c0_204, %c0_205, %c0_206] : memref<2x1x32xf32, #tpu.memory_space<vmem>>, vector<1x1x32xf32>
    %351 = vector.shape_cast %350 : vector<1x1x32xf32> to vector<1x32xf32>
    %cst_207 = arith.constant dense<0.000000e+00> : vector<32xf32>
    %352 = vector.multi_reduction <add>, %347, %cst_207 [1] : vector<32x32xf32> to vector<32xf32>
    %353 = vector.shape_cast %352 : vector<32xf32> to vector<32x1xf32>
    %cst_208 = arith.constant 3.200000e+01 : f32
    %354 = vector.broadcast %cst_208 : f32 to vector<32x1xf32>
    %355 = arith.divf %353, %354 : vector<32x1xf32>
    %356 = vector.broadcast %355 : vector<32x1xf32> to vector<32x32xf32>
    %357 = arith.subf %347, %356 : vector<32x32xf32>
    %358 = arith.mulf %357, %357 : vector<32x32xf32>
    %cst_209 = arith.constant dense<0.000000e+00> : vector<32xf32>
    %359 = vector.multi_reduction <add>, %358, %cst_209 [1] : vector<32x32xf32> to vector<32xf32>
    %360 = vector.shape_cast %359 : vector<32xf32> to vector<32x1xf32>
    %cst_210 = arith.constant 3.200000e+01 : f32
    %361 = vector.broadcast %cst_210 : f32 to vector<32x1xf32>
    %362 = arith.divf %360, %361 : vector<32x1xf32>
    %363 = vector.broadcast %355 : vector<32x1xf32> to vector<32x32xf32>
    %364 = arith.subf %347, %363 : vector<32x32xf32>
    %cst_211 = arith.constant 9.99999974E-6 : f32
    %365 = vector.broadcast %cst_211 : f32 to vector<32x1xf32>
    %366 = arith.addf %362, %365 : vector<32x1xf32>
    %367 = math.rsqrt %366 : vector<32x1xf32>
    %368 = vector.broadcast %367 : vector<32x1xf32> to vector<32x32xf32>
    %369 = arith.mulf %364, %368 : vector<32x32xf32>
    %370 = vector.broadcast %349 : vector<1x32xf32> to vector<32x32xf32>
    %371 = arith.mulf %369, %370 : vector<32x32xf32>
    %372 = vector.broadcast %351 : vector<1x32xf32> to vector<32x32xf32>
    %373 = arith.addf %371, %372 : vector<32x32xf32>
    %c1_212 = arith.constant 1 : index
    %c0_213 = arith.constant 0 : index
    %c0_214 = arith.constant 0 : index
    %374 = vector.load %arg26[%c1_212, %c0_213, %c0_214] : memref<2x32x96xf32, #tpu.memory_space<vmem>>, vector<1x32x96xf32>
    %375 = vector.shape_cast %374 : vector<1x32x96xf32> to vector<32x96xf32>
    %cst_215 = arith.constant dense<0.000000e+00> : vector<32x96xf32>
    %376 = tpu.matmul %373, %375, %cst_215 {dimension_numbers = #tpu.dot_dimension_numbers<[1], [0], [0], [1], [0, 0, 1, 1], [], []>} : vector<32x32xf32>, vector<32x96xf32>, vector<32x96xf32> -> vector<32x96xf32>
    %c1_216 = arith.constant 1 : index
    %c0_217 = arith.constant 0 : index
    %c0_218 = arith.constant 0 : index
    %377 = vector.load %arg27[%c1_216, %c0_217, %c0_218] : memref<2x1x96xf32, #tpu.memory_space<vmem>>, vector<1x1x96xf32>
    %378 = vector.shape_cast %377 : vector<1x1x96xf32> to vector<1x96xf32>
    %379 = vector.broadcast %378 : vector<1x96xf32> to vector<32x96xf32>
    %380 = arith.addf %376, %379 : vector<32x96xf32>
    %381 = vector.extract_strided_slice %380 {offsets = [0, 0], sizes = [32, 32], strides = [1, 1]} : vector<32x96xf32> to vector<32x32xf32>
    %382 = vector.extract_strided_slice %380 {offsets = [0, 32], sizes = [32, 32], strides = [1, 1]} : vector<32x96xf32> to vector<32x32xf32>
    %383 = vector.extract_strided_slice %380 {offsets = [0, 64], sizes = [32, 32], strides = [1, 1]} : vector<32x96xf32> to vector<32x32xf32>
    %384 = tpu.concatenate %382, %382, %382, %382 in 0 : vector<32x32xf32>, vector<32x32xf32>, vector<32x32xf32>, vector<32x32xf32> -> vector<128x32xf32>
    %385 = arith.mulf %384, %259 : vector<128x32xf32>
    %386 = tpu.concatenate %383, %383, %383, %383 in 0 : vector<32x32xf32>, vector<32x32xf32>, vector<32x32xf32>, vector<32x32xf32> -> vector<128x32xf32>
    %387 = arith.mulf %386, %259 : vector<128x32xf32>
    %cst_219 = arith.constant dense<0.000000e+00> : vector<32x128xf32>
    %388 = tpu.matmul %381, %385, %cst_219 {dimension_numbers = #tpu.dot_dimension_numbers<[1], [1], [0], [0], [0, 0, 1, 0], [], []>} : vector<32x32xf32>, vector<128x32xf32>, vector<32x128xf32> -> vector<32x128xf32>
    %cst_220 = arith.constant 0.353553385 : f32
    %389 = vector.broadcast %cst_220 : f32 to vector<32x128xf32>
    %390 = arith.mulf %388, %389 : vector<32x128xf32>
    %cst_221 = arith.constant dense<0xFF800000> : vector<32xf32>
    %391 = vector.multi_reduction <maximumf>, %390, %cst_221 [1] : vector<32x128xf32> to vector<32xf32>
    %392 = vector.shape_cast %391 : vector<32xf32> to vector<32x1xf32>
    %393 = vector.broadcast %392 : vector<32x1xf32> to vector<32x128xf32>
    %394 = arith.subf %390, %393 : vector<32x128xf32>
    %395 = math.exp %394 : vector<32x128xf32>
    %396 = arith.mulf %395, %260 : vector<32x128xf32>
    %cst_222 = arith.constant dense<0.000000e+00> : vector<32x128xf32>
    %397 = tpu.matmul %396, %261, %cst_222 {dimension_numbers = #tpu.dot_dimension_numbers<[1], [0], [0], [1], [0, 0, 1, 1], [], []>} : vector<32x128xf32>, vector<128x128xf32>, vector<32x128xf32> -> vector<32x128xf32>
    %cst_223 = arith.constant 9.99999968E-21 : f32
    %398 = vector.broadcast %cst_223 : f32 to vector<32x128xf32>
    %399 = arith.addf %397, %398 : vector<32x128xf32>
    %400 = tpu.reciprocal %399 {approx = true} : vector<32x128xf32> -> vector<32x128xf32>
    %401 = arith.mulf %396, %400 : vector<32x128xf32>
    %cst_224 = arith.constant dense<0.000000e+00> : vector<32x32xf32>
    %402 = tpu.matmul %401, %387, %cst_224 {dimension_numbers = #tpu.dot_dimension_numbers<[1], [0], [0], [1], [0, 0, 1, 1], [], []>} : vector<32x128xf32>, vector<128x32xf32>, vector<32x32xf32> -> vector<32x32xf32>
    %c1_225 = arith.constant 1 : index
    %c0_226 = arith.constant 0 : index
    %c0_227 = arith.constant 0 : index
    %403 = vector.load %arg28[%c1_225, %c0_226, %c0_227] : memref<2x32x32xf32, #tpu.memory_space<vmem>>, vector<1x32x32xf32>
    %404 = vector.shape_cast %403 : vector<1x32x32xf32> to vector<32x32xf32>
    %cst_228 = arith.constant dense<0.000000e+00> : vector<32x32xf32>
    %405 = tpu.matmul %402, %404, %cst_228 {dimension_numbers = #tpu.dot_dimension_numbers<[1], [0], [0], [1], [0, 0, 1, 1], [], []>} : vector<32x32xf32>, vector<32x32xf32>, vector<32x32xf32> -> vector<32x32xf32>
    %c1_229 = arith.constant 1 : index
    %c0_230 = arith.constant 0 : index
    %c0_231 = arith.constant 0 : index
    %406 = vector.load %arg29[%c1_229, %c0_230, %c0_231] : memref<2x1x32xf32, #tpu.memory_space<vmem>>, vector<1x1x32xf32>
    %407 = vector.shape_cast %406 : vector<1x1x32xf32> to vector<1x32xf32>
    %408 = vector.broadcast %407 : vector<1x32xf32> to vector<32x32xf32>
    %409 = arith.addf %405, %408 : vector<32x32xf32>
    %410 = arith.addf %373, %409 : vector<32x32xf32>
    %c1_232 = arith.constant 1 : index
    %c0_233 = arith.constant 0 : index
    %c0_234 = arith.constant 0 : index
    %411 = vector.load %arg34[%c1_232, %c0_233, %c0_234] : memref<2x1x32xf32, #tpu.memory_space<vmem>>, vector<1x1x32xf32>
    %412 = vector.shape_cast %411 : vector<1x1x32xf32> to vector<1x32xf32>
    %c1_235 = arith.constant 1 : index
    %c0_236 = arith.constant 0 : index
    %c0_237 = arith.constant 0 : index
    %413 = vector.load %arg35[%c1_235, %c0_236, %c0_237] : memref<2x1x32xf32, #tpu.memory_space<vmem>>, vector<1x1x32xf32>
    %414 = vector.shape_cast %413 : vector<1x1x32xf32> to vector<1x32xf32>
    %cst_238 = arith.constant dense<0.000000e+00> : vector<32xf32>
    %415 = vector.multi_reduction <add>, %410, %cst_238 [1] : vector<32x32xf32> to vector<32xf32>
    %416 = vector.shape_cast %415 : vector<32xf32> to vector<32x1xf32>
    %cst_239 = arith.constant 3.200000e+01 : f32
    %417 = vector.broadcast %cst_239 : f32 to vector<32x1xf32>
    %418 = arith.divf %416, %417 : vector<32x1xf32>
    %419 = vector.broadcast %418 : vector<32x1xf32> to vector<32x32xf32>
    %420 = arith.subf %410, %419 : vector<32x32xf32>
    %421 = arith.mulf %420, %420 : vector<32x32xf32>
    %cst_240 = arith.constant dense<0.000000e+00> : vector<32xf32>
    %422 = vector.multi_reduction <add>, %421, %cst_240 [1] : vector<32x32xf32> to vector<32xf32>
    %423 = vector.shape_cast %422 : vector<32xf32> to vector<32x1xf32>
    %cst_241 = arith.constant 3.200000e+01 : f32
    %424 = vector.broadcast %cst_241 : f32 to vector<32x1xf32>
    %425 = arith.divf %423, %424 : vector<32x1xf32>
    %426 = vector.broadcast %418 : vector<32x1xf32> to vector<32x32xf32>
    %427 = arith.subf %410, %426 : vector<32x32xf32>
    %cst_242 = arith.constant 9.99999974E-6 : f32
    %428 = vector.broadcast %cst_242 : f32 to vector<32x1xf32>
    %429 = arith.addf %425, %428 : vector<32x1xf32>
    %430 = math.rsqrt %429 : vector<32x1xf32>
    %431 = vector.broadcast %430 : vector<32x1xf32> to vector<32x32xf32>
    %432 = arith.mulf %427, %431 : vector<32x32xf32>
    %433 = vector.broadcast %412 : vector<1x32xf32> to vector<32x32xf32>
    %434 = arith.mulf %432, %433 : vector<32x32xf32>
    %435 = vector.broadcast %414 : vector<1x32xf32> to vector<32x32xf32>
    %436 = arith.addf %434, %435 : vector<32x32xf32>
    %c1_243 = arith.constant 1 : index
    %c0_244 = arith.constant 0 : index
    %c0_245 = arith.constant 0 : index
    %437 = vector.load %arg30[%c1_243, %c0_244, %c0_245] : memref<2x32x32xf32, #tpu.memory_space<vmem>>, vector<1x32x32xf32>
    %438 = vector.shape_cast %437 : vector<1x32x32xf32> to vector<32x32xf32>
    %cst_246 = arith.constant dense<0.000000e+00> : vector<32x32xf32>
    %439 = tpu.matmul %436, %438, %cst_246 {dimension_numbers = #tpu.dot_dimension_numbers<[1], [0], [0], [1], [0, 0, 1, 1], [], []>} : vector<32x32xf32>, vector<32x32xf32>, vector<32x32xf32> -> vector<32x32xf32>
    %c1_247 = arith.constant 1 : index
    %c0_248 = arith.constant 0 : index
    %c0_249 = arith.constant 0 : index
    %440 = vector.load %arg31[%c1_247, %c0_248, %c0_249] : memref<2x1x32xf32, #tpu.memory_space<vmem>>, vector<1x1x32xf32>
    %441 = vector.shape_cast %440 : vector<1x1x32xf32> to vector<1x32xf32>
    %442 = vector.broadcast %441 : vector<1x32xf32> to vector<32x32xf32>
    %443 = arith.addf %439, %442 : vector<32x32xf32>
    %cst_250 = arith.constant 5.000000e-01 : f32
    %444 = vector.broadcast %cst_250 : f32 to vector<32x32xf32>
    %445 = arith.mulf %444, %443 : vector<32x32xf32>
    %cst_251 = arith.constant 0.707106769 : f32
    %446 = vector.broadcast %cst_251 : f32 to vector<32x32xf32>
    %447 = arith.mulf %443, %446 : vector<32x32xf32>
    %448 = math.erf %447 : vector<32x32xf32>
    %cst_252 = arith.constant 1.000000e+00 : f32
    %449 = vector.broadcast %cst_252 : f32 to vector<32x32xf32>
    %450 = arith.addf %449, %448 : vector<32x32xf32>
    %451 = arith.mulf %445, %450 : vector<32x32xf32>
    %c1_253 = arith.constant 1 : index
    %c0_254 = arith.constant 0 : index
    %c0_255 = arith.constant 0 : index
    %452 = vector.load %arg32[%c1_253, %c0_254, %c0_255] : memref<2x32x32xf32, #tpu.memory_space<vmem>>, vector<1x32x32xf32>
    %453 = vector.shape_cast %452 : vector<1x32x32xf32> to vector<32x32xf32>
    %cst_256 = arith.constant dense<0.000000e+00> : vector<32x32xf32>
    %454 = tpu.matmul %451, %453, %cst_256 {dimension_numbers = #tpu.dot_dimension_numbers<[1], [0], [0], [1], [0, 0, 1, 1], [], []>} : vector<32x32xf32>, vector<32x32xf32>, vector<32x32xf32> -> vector<32x32xf32>
    %c1_257 = arith.constant 1 : index
    %c0_258 = arith.constant 0 : index
    %c0_259 = arith.constant 0 : index
    %455 = vector.load %arg33[%c1_257, %c0_258, %c0_259] : memref<2x1x32xf32, #tpu.memory_space<vmem>>, vector<1x1x32xf32>
    %456 = vector.shape_cast %455 : vector<1x1x32xf32> to vector<1x32xf32>
    %457 = vector.broadcast %456 : vector<1x32xf32> to vector<32x32xf32>
    %458 = arith.addf %454, %457 : vector<32x32xf32>
    %459 = arith.addf %436, %458 : vector<32x32xf32>
    %c1_260 = arith.constant 1 : index
    %c0_261 = arith.constant 0 : index
    %c0_262 = arith.constant 0 : index
    %460 = vector.load %arg36[%c1_260, %c0_261, %c0_262] : memref<2x1x32xf32, #tpu.memory_space<vmem>>, vector<1x1x32xf32>
    %461 = vector.shape_cast %460 : vector<1x1x32xf32> to vector<1x32xf32>
    %c1_263 = arith.constant 1 : index
    %c0_264 = arith.constant 0 : index
    %c0_265 = arith.constant 0 : index
    %462 = vector.load %arg37[%c1_263, %c0_264, %c0_265] : memref<2x1x32xf32, #tpu.memory_space<vmem>>, vector<1x1x32xf32>
    %463 = vector.shape_cast %462 : vector<1x1x32xf32> to vector<1x32xf32>
    %cst_266 = arith.constant dense<0.000000e+00> : vector<32xf32>
    %464 = vector.multi_reduction <add>, %459, %cst_266 [1] : vector<32x32xf32> to vector<32xf32>
    %465 = vector.shape_cast %464 : vector<32xf32> to vector<32x1xf32>
    %cst_267 = arith.constant 3.200000e+01 : f32
    %466 = vector.broadcast %cst_267 : f32 to vector<32x1xf32>
    %467 = arith.divf %465, %466 : vector<32x1xf32>
    %468 = vector.broadcast %467 : vector<32x1xf32> to vector<32x32xf32>
    %469 = arith.subf %459, %468 : vector<32x32xf32>
    %470 = arith.mulf %469, %469 : vector<32x32xf32>
    %cst_268 = arith.constant dense<0.000000e+00> : vector<32xf32>
    %471 = vector.multi_reduction <add>, %470, %cst_268 [1] : vector<32x32xf32> to vector<32xf32>
    %472 = vector.shape_cast %471 : vector<32xf32> to vector<32x1xf32>
    %cst_269 = arith.constant 3.200000e+01 : f32
    %473 = vector.broadcast %cst_269 : f32 to vector<32x1xf32>
    %474 = arith.divf %472, %473 : vector<32x1xf32>
    %475 = vector.broadcast %467 : vector<32x1xf32> to vector<32x32xf32>
    %476 = arith.subf %459, %475 : vector<32x32xf32>
    %cst_270 = arith.constant 9.99999974E-6 : f32
    %477 = vector.broadcast %cst_270 : f32 to vector<32x1xf32>
    %478 = arith.addf %474, %477 : vector<32x1xf32>
    %479 = math.rsqrt %478 : vector<32x1xf32>
    %480 = vector.broadcast %479 : vector<32x1xf32> to vector<32x32xf32>
    %481 = arith.mulf %476, %480 : vector<32x32xf32>
    %482 = vector.broadcast %461 : vector<1x32xf32> to vector<32x32xf32>
    %483 = arith.mulf %481, %482 : vector<32x32xf32>
    %484 = vector.broadcast %463 : vector<1x32xf32> to vector<32x32xf32>
    %485 = arith.addf %483, %484 : vector<32x32xf32>
    %c0_271 = arith.constant 0 : index
    %c0_272 = arith.constant 0 : index
    %486 = vector.load %arg41[%c0_271, %c0_272] : memref<32x16xf32, #tpu.memory_space<vmem>>, vector<32x16xf32>
    %cst_273 = arith.constant dense<0.000000e+00> : vector<32x16xf32>
    %487 = tpu.matmul %485, %486, %cst_273 {dimension_numbers = #tpu.dot_dimension_numbers<[1], [0], [0], [1], [0, 0, 1, 1], [], []>} : vector<32x32xf32>, vector<32x16xf32>, vector<32x16xf32> -> vector<32x16xf32>
    %c0_274 = arith.constant 0 : index
    %c0_275 = arith.constant 0 : index
    %488 = vector.load %arg42[%c0_274, %c0_275] : memref<1x16xf32, #tpu.memory_space<vmem>>, vector<1x16xf32>
    %489 = vector.broadcast %488 : vector<1x16xf32> to vector<32x16xf32>
    %490 = arith.addf %487, %489 : vector<32x16xf32>
    %c0_276 = arith.constant 0 : index
    %c0_277 = arith.constant 0 : index
    %491 = vector.load %arg43[%c0_276, %c0_277] : memref<32x16xf32, #tpu.memory_space<vmem>>, vector<32x16xf32>
    tpu.vector_store %arg43[%c0_276, %c0_277], %490 {strides = array<i32>} : memref<32x16xf32, #tpu.memory_space<vmem>>, vector<32x16xf32>,
    return
  }
}

</mosaic_0001>

<bundles_post_ra>
// kernel: series_denoiser_forward.1
= control target key start
LH: loop header
LB: loop body
LE: loop exit
PB: predicated region body
PF: predicated region fallthrough
CT: control target
= control target key end

     0   :  { %s5933_s6 = smov 1   ;;  %s5934_s10 = smov 2   ;;  %s8360_s0 = inlined_call_operand.smem [shape: u32[44], index: -1, kind: input, shape index: {}] }
   0x1   :  { %s6014_s5 = sld [smem:[%s8360_s0]]   ;;  %s5935_s14 = smov 3  }
   0x2   :  { %s6019_s9 = sld [smem:[%s8360_s0 + %s5933_s6]]   ;;  %s5936_s18 = smov 4  }
   0x3   :  { %s6024_s13 = sld [smem:[%s8360_s0 + %s5934_s10]]   ;;  %s5937_s22 = smov 5  }
   0x4   :  { %s6029_s17 = sld [smem:[%s8360_s0 + %s5935_s14]]   ;;  %s5938_s26 = smov 6  }
   0x5   :  { %s6034_s21 = sld [smem:[%s8360_s0 + %s5936_s18]]   ;;  %s5939_s30 = smov 7  }
   0x6   :  { %s6039_s25 = sld [smem:[%s8360_s0 + %s5937_s22]]   ;;  %s5940_s4 = smov 8  }
   0x7   :  { %8404 = sst [smem:[#allocation45_spill]] %s6014_s5  ;;  %s5941_s10 = smov 9  }
   0x8   :  { %8405 = sst [smem:[#allocation46_spill]] %s6019_s9  ;;  %s5942_s15 = smov 10  }
   0x9   :  { %8406 = sst [smem:[#allocation47_spill]] %s6024_s13  ;;  %s5943_s20 = smov 11  }
   0xa   :  { %8407 = sst [smem:[#allocation48_spill]] %s6029_s17  ;;  %s5945_s1 = smov 13  }
   0xb   :  { %8408 = sst [smem:[#allocation49_spill]] %s6034_s21  ;;  %s5946_s7 = smov 14  }
   0xc   :  { %8409 = sst [smem:[#allocation50_spill]] %s6039_s25  ;;  %s5948_s22 = smov 16  }
   0xd   :  { %s6044_s29 = sld [smem:[%s8360_s0 + %s5938_s26]]   ;;  %s5944_s26 = smov 12  }
   0xe   :  { %s6049_s3 = sld [smem:[%s8360_s0 + %s5939_s30]]   ;;  %s5949_s28 = smov 17  }
   0xf   :  { %s6054_s8 = sld [smem:[%s8360_s0 + %s5940_s4]]  }
  0x10   :  { %s6059_s14 = sld [smem:[%s8360_s0 + %s5941_s10]]  }
  0x11   :  { %s6064_s19 = sld [smem:[%s8360_s0 + %s5942_s15]]   ;;  %s5947_s15 = smov 15  }
  0x12   :  { %s6069_s24 = sld [smem:[%s8360_s0 + %s5943_s20]]  }
  0x13   :  { %8410 = sst [smem:[#allocation51_spill]] %s6044_s29 }
  0x14   :  { %8411 = sst [smem:[#allocation52_spill]] %s6049_s3 }
  0x15   :  { %8412 = sst [smem:[#allocation53_spill]] %s6054_s8 }
  0x16   :  { %8413 = sst [smem:[#allocation54_spill]] %s6059_s14 }
  0x17   :  { %8414 = sst [smem:[#allocation55_spill]] %s6064_s19 }
  0x18   :  { %s6074_s30 = sld [smem:[%s8360_s0 + %s5944_s26]]  }
  0x19   :  { %s6079_s6 = sld [smem:[%s8360_s0 + %s5945_s1]]  }
  0x1a   :  { %s6084_s12 = sld [smem:[%s8360_s0 + %s5946_s7]]   ;;  %s5950_s7 = smov 18  }
  0x1b   :  { %s6089_s20 = sld [smem:[%s8360_s0 + %s5947_s15]]   ;;  %s5951_s15 = smov 19  }
  0x1c   :  { %s6094_s27 = sld [smem:[%s8360_s0 + %s5948_s22]]   ;;  %s5952_s22 = smov 20  }
  0x1d   :  { %s6099_s4 = sld [smem:[%s8360_s0 + %s5949_s28]]   ;;  %s5953_s28 = smov 21  }
  0x1e   :  { %8415 = sst [smem:[#allocation56_spill]] %s6074_s30 }
  0x1f   :  { %s6104_s13 = sld [smem:[%s8360_s0 + %s5950_s7]]   ;;  %s5954_s7 = smov 22  }
  0x20   :  { %s6109_s30 = sld [smem:[%s8360_s0 + %s5951_s15]]   ;;  %s5955_s15 = smov 23  }
  0x21   :  { %s6114_s19 = sld [smem:[%s8360_s0 + %s5952_s22]]   ;;  %s5956_s22 = smov 24  }
  0x22   :  { %s6119_s14 = sld [smem:[%s8360_s0 + %s5953_s28]]   ;;  %s5957_s28 = smov 25  }
  0x23   :  { %s6124_s8 = sld [smem:[%s8360_s0 + %s5954_s7]]   ;;  %s5958_s7 = smov 26  }
  0x24   :  { %s6129_s3 = sld [smem:[%s8360_s0 + %s5955_s15]]   ;;  %s5959_s15 = smov 27  }
  0x25   :  { %8416 = sst [smem:[#allocation57_spill]] %s6104_s13 }
  0x26   :  { %s6139_s25 = sld [smem:[%s8360_s0 + %s5957_s28]]   ;;  %s5961_s28 = smov 29  }
  0x27   :  { %8417 = sst [smem:[#allocation58_spill]] %s6114_s19 }
  0x28   :  { %s6134_s19 = sld [smem:[%s8360_s0 + %s5956_s22]]   ;;  %s5960_s22 = smov 28  }
  0x29   :  { %8418 = sst [smem:[#allocation59_spill]] %s6124_s8 }
  0x2a   :  { %8419 = sst [smem:[#allocation60_spill]] %s6129_s3 }
  0x2b   :  { %s6144_s8 = sld [smem:[%s8360_s0 + %s5958_s7]]   ;;  %s5962_s7 = smov 30  }
  0x2c   :  { %8420 = sst [smem:[#allocation61_spill]] %s6139_s25 }
  0x2d   :  { %s6149_s9 = sld [smem:[%s8360_s0 + %s5959_s15]]   ;;  %s5963_s15 = smov 31  }
  0x2e   :  { %s6154_s21 = sld [smem:[%s8360_s0 + %s5960_s22]]   ;;  %s5964_s22 = smov 32  }
  0x2f   :  { %s6159_s25 = sld [smem:[%s8360_s0 + %s5961_s28]]   ;;  %s5965_s28 = smov 33  }
  0x30   :  { %s6164_s29 = sld [smem:[%s8360_s0 + %s5962_s7]]   ;;  %s5966_s7 = smov 34  }
  0x31   :  { %8421 = sst [smem:[#allocation62_spill]] %s6144_s8 }
  0x32   :  { %s6169_s13 = sld [smem:[%s8360_s0 + %s5963_s15]]   ;;  %s5967_s15 = smov 35  }
  0x33   :  { %s6174_s5 = sld [smem:[%s8360_s0 + %s5964_s22]]   ;;  %s5968_s22 = smov 36  }
  0x34   :  { %8422 = sst [smem:[#allocation63_spill]] %s6154_s21 }
  0x35   :  { %8423 = sst [smem:[#allocation64_spill]] %s6159_s25 }
  0x36   :  { %s6179_s25 = sld [smem:[%s8360_s0 + %s5965_s28]]   ;;  %s5969_s28 = smov 37  }
  0x37   :  { %s6184_s17 = sld [smem:[%s8360_s0 + %s5966_s7]]   ;;  %s5970_s7 = smov 38  }
  0x38   :  { %8424 = sst [smem:[#allocation65_spill]] %s6169_s13 }
  0x39   :  { %s6189_s13 = sld [smem:[%s8360_s0 + %s5967_s15]]   ;;  %s5971_s15 = smov 39  }
  0x3a   :  { %s6194_s21 = sld [smem:[%s8360_s0 + %s5968_s22]]   ;;  %s5972_s22 = smov 40  }
  0x3b   :  { %s6214_s8 = sld [smem:[%s8360_s0 + %s5972_s22]]  }
  0x3c   :  { %8425 = sst [smem:[#allocation66_spill]] %s6179_s25 }
  0x3d   :  { %8426 = sst [smem:[#allocation67_spill]] %s6184_s17 }
  0x3e   :  { %s6199_s25 = sld [smem:[%s8360_s0 + %s5969_s28]]   ;;  %s5973_s28 = smov 41  }
  0x3f   :  { %8427 = sst [smem:[#allocation68_spill]] %s6189_s13 }
  0x40   :  { %s6204_s17 = sld [smem:[%s8360_s0 + %s5970_s7]]   ;;  %s5974_s7 = smov 42  }
  0x41   :  { %s6209_s13 = sld [smem:[%s8360_s0 + %s5971_s15]]   ;;  %s5975_s15 = smov 43  }
  0x42   :  { %s6229_s3 = sld [smem:[%s8360_s0 + %s5975_s15]]  }
  0x44   :  { %8428 = sst [smem:[#allocation69_spill]] %s6199_s25 }
  0x45   :  { %s6219_s25 = sld [smem:[%s8360_s0 + %s5973_s28]]  }
  0x46   :  { %8429 = sst [smem:[#allocation70_spill]] %s6204_s17 }
  0x47   :  { %s6224_s17 = sld [smem:[%s8360_s0 + %s5974_s7]]  }
  0x48   :  { %92 = vsyncpa [#allocation3], 0 }
  0x49   :  { %93 = vsyncpa [#allocation5], 0 }
  0x4a   :  { %94 = vsyncpa [#allocation8], 0 }
  0x4b   :  { %95 = vsyncpa [#allocation11], 0 }
  0x4c   :  { %96 = vsyncpa [#allocation14], 0 }
  0x4d   :  { %97 = vsyncpa [#allocation17], 0 }
  0x4e   :  { %98 = vsyncpa [#allocation20], 0 }
  0x4f   :  { %99 = vsyncpa [#allocation23], 0 }
  0x50   :  { %100 = vsyncpa [#allocation26], 0 }
  0x51   :  { %101 = vsyncpa [#allocation29], 0 }
  0x52   :  { %102 = vsyncpa [#allocation32], 0  ;;  %s144_s22 = sshll.u32 %s6079_s6, 4  ;;  %s5976_s23 = smov [#allocation4]   ;;  %s145_s22 = int_to_ptr.hbm [resolvable:$true] %s144_s22 }
  0x53   :  { %s146_s0 = sshll.u32 %s5976_s23, 4  ;;  %s170_s26 = sshll.u32 %s6089_s20, 4  ;;  %s147_s0 = int_to_ptr.vmem [resolvable:$true] %s146_s0  ;;  %s171_s26 = int_to_ptr.hbm [resolvable:$true] %s170_s26 }
  0x54   :  { %s5407_s28 = sshra.s32 %s145_s22, 4  ;;  %s5411_s2 = scalar_lea.hbm %s6079_s6, 2  ;;  %s5408_s28 = int_to_ptr.hbm [resolvable:$true] %s5407_s28 }
  0x55   :  { %s5409_s1 = scalar_lea.hbm %s5408_s28, 2  ;;  %p5412_p1 = scmp.lt.s32.totalorder %s5408_s28, %s6079_s6 }
  0x56   :  { %p5410_p0 = scmp.ne.s32.totalorder %s5408_s28, %s5409_s1  ;;  %p5413_p2 = scmp.lt.s32.totalorder %s5411_s2, %s5409_s1 }
  0x58   :  { %p5414_p3 = por %p5413_p2, %p5412_p1 }
  0x5a   :  { %p5415_p4 = pnand %p5414_p3, %p5410_p0 }
  0x5c   :  { %5418 = shalt.err (!%p5415_p4)
}
  0x5d   :  { %s5977_s7 = smov 16   ;;  %s5978_s10 = smov 1  }
  0x5e   :  { %152 = dma.hbm_to_vmem [thread:$0]  %s145_s22, 32, %s147_s0, [#allocation5], %s5977_s7, %s5977_s7, %s5978_s10  }
  0x5f   :  { %s5979_s11 = smov [#allocation7]   ;;  %s196_s16 = sshll.u32 %s6099_s4, 4  ;;  %s6239_s16 = int_to_ptr.hbm [resolvable:$true] %s196_s16 }
  0x60   :  { %s172_s15 = sshll.u32 %s5979_s11, 4  ;;  %s5431_s6 = sshra.s32 %s171_s26, 4  ;;  %s173_s15 = int_to_ptr.vmem [resolvable:$true] %s172_s15  ;;  %s5432_s6 = int_to_ptr.hbm [resolvable:$true] %s5431_s6 }
  0x61   :  { %s5433_s18 = scalar_lea.hbm %s5432_s6, 2  ;;  %s5435_s23 = scalar_lea.hbm %s6089_s20, 2 }
  0x62   :  { %p5434_p5 = scmp.ne.s32.totalorder %s5432_s6, %s5433_s18  ;;  %p5436_p6 = scmp.lt.s32.totalorder %s5432_s6, %s6089_s20 }
  0x63   :  { %p5437_p7 = scmp.lt.s32.totalorder %s5435_s23, %s5433_s18 }
  0x65   :  { %p5438_p8 = por %p5437_p7, %p5436_p6 }
  0x67   :  { %p5439_p9 = pnand %p5438_p8, %p5434_p5 }
  0x69   :  { %5442 = shalt.err (!%p5439_p9)
}
  0x6a   :  { %178 = dma.hbm_to_vmem [thread:$0]  %s171_s26, 32, %s173_s15, [#allocation8], %s5977_s7, %s5977_s7, %s5978_s10  }
  0x6b   :  { %s5980_s22 = smov [#allocation10]   ;;  %s226_s28 = sshll.u32 %s6119_s14, 4  ;;  %s227_s28 = int_to_ptr.hbm [resolvable:$true] %s226_s28 }
  0x6c   :  { %s198_s0 = sshll.u32 %s5980_s22, 4  ;;  %s5455_s1 = sshra.s32 %s6239_s16, 4  ;;  %s199_s0 = int_to_ptr.vmem [resolvable:$true] %s198_s0  ;;  %s5456_s1 = int_to_ptr.hbm [resolvable:$true] %s5455_s1 }
  0x6d   :  { %s5457_s2 = scalar_lea.hbm %s5456_s1, 2  ;;  %s5459_s20 = scalar_lea.hbm %s6099_s4, 2 }
  0x6e   :  { %p5458_p10 = scmp.ne.s32.totalorder %s5456_s1, %s5457_s2  ;;  %p5460_p11 = scmp.lt.s32.totalorder %s5456_s1, %s6099_s4 }
  0x6f   :  { %p5461_p12 = scmp.lt.s32.totalorder %s5459_s20, %s5457_s2 }
  0x71   :  { %p5462_p13 = por %p5461_p12, %p5460_p11 }
  0x73   :  { %p5463_p0 = pnand %p5462_p13, %p5458_p10 }
  0x75   :  { %5466 = shalt.err (!%p5463_p0)
}
  0x76   :  { %204 = dma.hbm_to_vmem [thread:$0]  %s6239_s16, 32, %s199_s0, [#allocation11], %s5977_s7, %s5977_s7, %s5978_s10  }
  0x77   :  { %s5981_s26 = smov [#allocation13]   ;;  %s255_s15 = sshll.u32 %s6134_s19, 4  ;;  %s6255_s15 = int_to_ptr.hbm [resolvable:$true] %s255_s15 }
  0x78   :  { %s228_s11 = sshll.u32 %s5981_s26, 4  ;;  %s5479_s4 = sshra.s32 %s227_s28, 4  ;;  %s229_s11 = int_to_ptr.vmem [resolvable:$true] %s228_s11  ;;  %s5480_s4 = int_to_ptr.hbm [resolvable:$true] %s5479_s4 }
  0x79   :  { %s5481_s6 = scalar_lea.hbm %s5480_s4, 16  ;;  %s5483_s18 = scalar_lea.hbm %s6119_s14, 16 }
  0x7a   :  { %p5482_p1 = scmp.ne.s32.totalorder %s5480_s4, %s5481_s6  ;;  %p5484_p2 = scmp.lt.s32.totalorder %s5480_s4, %s6119_s14 }
  0x7b   :  { %p5485_p3 = scmp.lt.s32.totalorder %s5483_s18, %s5481_s6 }
  0x7d   :  { %p5486_p4 = por %p5485_p3, %p5484_p2 }
  0x7f   :  { %p5487_p5 = pnand %p5486_p4, %p5482_p1 }
  0x81   :  { %5490 = shalt.err (!%p5487_p5)
}
  0x82   :  { %s5982_s23 = smov 128   ;;  %s5983_s16 = smov 8  }
  0x83   :  { %234 = dma.hbm_to_vmem [thread:$0]  %s227_s28, 256, %s229_s11, [#allocation14], %s5982_s23, %s5982_s23, %s5983_s16  }
  0x84   :  { %s280_s22 = sshll.u32 %s6149_s9, 4  ;;  %s5984_s0 = smov [#allocation16]   ;;  %s6263_s22 = int_to_ptr.hbm [resolvable:$true] %s280_s22 }
  0x85   :  { %s257_s1 = sshll.u32 %s5984_s0, 4  ;;  %s5503_s14 = sshra.s32 %s6255_s15, 4  ;;  %s258_s1 = int_to_ptr.vmem [resolvable:$true] %s257_s1  ;;  %s5504_s14 = int_to_ptr.hbm [resolvable:$true] %s5503_s14 }
  0x86   :  { %s5505_s2 = scalar_lea.hbm %s5504_s14, 1  ;;  %s5507_s20 = scalar_lea.hbm %s6134_s19, 1 }
  0x87   :  { %p5506_p6 = scmp.ne.s32.totalorder %s5504_s14, %s5505_s2  ;;  %p5508_p7 = scmp.lt.s32.totalorder %s5504_s14, %s6134_s19 }
  0x88   :  { %p5509_p8 = scmp.lt.s32.totalorder %s5507_s20, %s5505_s2 }
  0x8a   :  { %p5510_p9 = por %p5509_p8, %p5508_p7 }
  0x8c   :  { %p5511_p10 = pnand %p5510_p9, %p5506_p6 }
  0x8e   :  { %5514 = shalt.err (!%p5511_p10)
}
  0x8f   :  { %260 = dma.hbm_to_vmem [thread:$0]  %s6255_s15, 16, %s258_s1, [#allocation17]  }
  0x90   :  { %s5985_s28 = smov [#allocation19]   ;;  %s308_s11 = sshll.u32 %s6164_s29, 4  ;;  %s6270_s11 = int_to_ptr.hbm [resolvable:$true] %s308_s11 }
  0x91   :  { %s282_s26 = sshll.u32 %s5985_s28, 4  ;;  %s5527_s4 = sshra.s32 %s6263_s22, 4  ;;  %s283_s26 = int_to_ptr.vmem [resolvable:$true] %s282_s26  ;;  %s5528_s4 = int_to_ptr.hbm [resolvable:$true] %s5527_s4 }
  0x92   :  { %s5529_s6 = scalar_lea.hbm %s5528_s4, 2  ;;  %s5531_s19 = scalar_lea.hbm %s6149_s9, 2 }
  0x93   :  { %p5530_p11 = scmp.ne.s32.totalorder %s5528_s4, %s5529_s6  ;;  %p5532_p12 = scmp.lt.s32.totalorder %s5528_s4, %s6149_s9 }
  0x94   :  { %p5533_p13 = scmp.lt.s32.totalorder %s5531_s19, %s5529_s6 }
  0x96   :  { %p5534_p0 = por %p5533_p13, %p5532_p12 }
  0x98   :  { %p5535_p1 = pnand %p5534_p0, %p5530_p11 }
  0x9a   :  { %5538 = shalt.err (!%p5535_p1)
}
  0x9b   :  { %288 = dma.hbm_to_vmem [thread:$0]  %s6263_s22, 32, %s283_s26, [#allocation20], %s5977_s7, %s5977_s7, %s5978_s10  }
  0x9c   :  { %s334_s15 = sshll.u32 %s6174_s5, 4  ;;  %s5986_s18 = smov [#allocation22]   ;;  %s6280_s15 = int_to_ptr.hbm [resolvable:$true] %s334_s15 }
  0x9d   :  { %s310_s0 = sshll.u32 %s5986_s18, 4  ;;  %s5551_s9 = sshra.s32 %s6270_s11, 4  ;;  %s311_s0 = int_to_ptr.vmem [resolvable:$true] %s310_s0  ;;  %s5552_s9 = int_to_ptr.hbm [resolvable:$true] %s5551_s9 }
  0x9e   :  { %s5553_s1 = scalar_lea.hbm %s5552_s9, 64  ;;  %s5555_s14 = scalar_lea.hbm %s6164_s29, 64 }
  0x9f   :  { %p5554_p2 = scmp.ne.s32.totalorder %s5552_s9, %s5553_s1  ;;  %p5556_p3 = scmp.lt.s32.totalorder %s5552_s9, %s6164_s29 }
  0xa0   :  { %p5557_p4 = scmp.lt.s32.totalorder %s5555_s14, %s5553_s1 }
  0xa2   :  { %p5558_p5 = por %p5557_p4, %p5556_p3 }
  0xa4   :  { %p5559_p6 = pnand %p5558_p5, %p5554_p2 }
  0xa6   :  { %5562 = shalt.err (!%p5559_p6)
}
  0xa7   :  { %316 = dma.hbm_to_vmem [thread:$0]  %s6270_s11, 1024, %s311_s0, [#allocation23], %s5982_s23, %s5982_s23, %s5983_s16  }
  0xa8   :  { %s5987_s22 = smov [#allocation25]   ;;  %s364_s20 = sshll.u32 %s6194_s21, 4  ;;  %s6290_s20 = int_to_ptr.hbm [resolvable:$true] %s364_s20 }
  0xa9   :  { %s336_s2 = sshll.u32 %s5987_s22, 4  ;;  %s5575_s29 = sshra.s32 %s6280_s15, 4  ;;  %s337_s2 = int_to_ptr.vmem [resolvable:$true] %s336_s2  ;;  %s5576_s29 = int_to_ptr.hbm [resolvable:$true] %s5575_s29 }
  0xaa   :  { %s5577_s28 = scalar_lea.hbm %s5576_s29, 64  ;;  %s5579_s26 = scalar_lea.hbm %s6174_s5, 64 }
  0xab   :  { %p5578_p7 = scmp.ne.s32.totalorder %s5576_s29, %s5577_s28  ;;  %p5580_p8 = scmp.lt.s32.totalorder %s5576_s29, %s6174_s5 }
  0xac   :  { %p5581_p9 = scmp.lt.s32.totalorder %s5579_s26, %s5577_s28 }
  0xae   :  { %p5582_p10 = por %p5581_p9, %p5580_p8 }
  0xb0   :  { %p5583_p11 = pnand %p5582_p10, %p5578_p7 }
  0xb2   :  { %5586 = shalt.err (!%p5583_p11)
}
  0xb3   :  { %342 = dma.hbm_to_vmem [thread:$0]  %s6280_s15, 1024, %s337_s2, [#allocation26], %s5982_s23, %s5982_s23, %s5983_s16  }
  0xb4   :  { %s392_s11 = sshll.u32 %s6209_s13, 4  ;;  %s5988_s4 = smov [#allocation28]   ;;  %s6300_s11 = int_to_ptr.hbm [resolvable:$true] %s392_s11 }
  0xb5   :  { %s366_s6 = sshll.u32 %s5988_s4, 4  ;;  %s5599_s5 = sshra.s32 %s6290_s20, 4  ;;  %s367_s6 = int_to_ptr.vmem [resolvable:$true] %s366_s6  ;;  %s5600_s5 = int_to_ptr.hbm [resolvable:$true] %s5599_s5 }
  0xb6   :  { %s5601_s19 = scalar_lea.hbm %s5600_s5, 2  ;;  %s5603_s18 = scalar_lea.hbm %s6194_s21, 2 }
  0xb7   :  { %p5602_p12 = scmp.ne.s32.totalorder %s5600_s5, %s5601_s19  ;;  %p5604_p13 = scmp.lt.s32.totalorder %s5600_s5, %s6194_s21 }
  0xb8   :  { %p5605_p0 = scmp.lt.s32.totalorder %s5603_s18, %s5601_s19 }
  0xba   :  { %p5606_p1 = por %p5605_p0, %p5604_p13 }
  0xbc   :  { %p5607_p2 = pnand %p5606_p1, %p5602_p12 }
  0xbe   :  { %5610 = shalt.err (!%p5607_p2)
}
  0xbf   :  { %372 = dma.hbm_to_vmem [thread:$0]  %s6290_s20, 32, %s367_s6, [#allocation29], %s5977_s7, %s5977_s7, %s5978_s10  }
  0xc0   :  { %s5989_s15 = smov [#allocation31]   ;;  %s129_s9 = sshll.u32 %s6069_s24, 4  ;;  %s6310_s9 = int_to_ptr.hbm [resolvable:$true] %s129_s9 }
  0xc1   :  { %s394_s0 = sshll.u32 %s5989_s15, 4  ;;  %s5623_s21 = sshra.s32 %s6300_s11, 4  ;;  %s395_s0 = int_to_ptr.vmem [resolvable:$true] %s394_s0  ;;  %s5624_s21 = int_to_ptr.hbm [resolvable:$true] %s5623_s21 }
  0xc2   :  { %s5625_s1 = scalar_lea.hbm %s5624_s21, 32  ;;  %s5627_s14 = scalar_lea.hbm %s6209_s13, 32 }
  0xc3   :  { %p5626_p3 = scmp.ne.s32.totalorder %s5624_s21, %s5625_s1  ;;  %p5628_p4 = scmp.lt.s32.totalorder %s5624_s21, %s6209_s13 }
  0xc4   :  { %p5629_p5 = scmp.lt.s32.totalorder %s5627_s14, %s5625_s1 }
  0xc6   :  { %p5630_p6 = por %p5629_p5, %p5628_p4 }
  0xc8   :  { %p5631_p7 = pnand %p5630_p6, %p5626_p3 }
  0xca   :  { %5634 = shalt.err (!%p5631_p7)
}
  0xcb   :  { %400 = dma.hbm_to_vmem [thread:$0]  %s6300_s11, 512, %s395_s0, [#allocation32], %s5982_s23, %s5982_s23, %s5983_s16  }
  0xcc   :  { %s157_s22 = sshll.u32 %s6084_s12, 4  ;;  %s5990_s2 = smov [#allocation2]   ;;  %s6320_s22 = int_to_ptr.hbm [resolvable:$true] %s157_s22 }
  0xcd   :  { %s131_s20 = sshll.u32 %s5990_s2, 4  ;;  %s5647_s13 = sshra.s32 %s6310_s9, 4  ;;  %s132_s20 = int_to_ptr.vmem [resolvable:$true] %s131_s20  ;;  %s5648_s13 = int_to_ptr.hbm [resolvable:$true] %s5647_s13 }
  0xce   :  { %s5649_s29 = scalar_lea.hbm %s5648_s13, 2  ;;  %s5651_s28 = scalar_lea.hbm %s6069_s24, 2 }
  0xcf   :  { %p5650_p8 = scmp.ne.s32.totalorder %s5648_s13, %s5649_s29  ;;  %p5652_p9 = scmp.lt.s32.totalorder %s5648_s13, %s6069_s24 }
  0xd0   :  { %p5653_p10 = scmp.lt.s32.totalorder %s5651_s28, %s5649_s29 }
  0xd2   :  { %p5654_p11 = por %p5653_p10, %p5652_p9 }
  0xd4   :  { %p5655_p12 = pnand %p5654_p11, %p5650_p8 }
  0xd6   :  { %5658 = shalt.err (!%p5655_p12)
}
  0xd7   :  { %137 = dma.hbm_to_vmem [thread:$0]  %s6310_s9, 32, %s132_s20, [#allocation3], %s5977_s7, %s5977_s7, %s5978_s10  }
  0xd8   :  { %s5991_s26 = smov [#allocation6]   ;;  %s183_s4 = sshll.u32 %s6094_s27, 4  ;;  %s6330_s4 = int_to_ptr.hbm [resolvable:$true] %s183_s4 }
  0xd9   :  { %s159_s11 = sshll.u32 %s5991_s26, 4  ;;  %s5671_s24 = sshra.s32 %s6320_s22, 4  ;;  %s160_s11 = int_to_ptr.vmem [resolvable:$true] %s159_s11  ;;  %s5672_s24 = int_to_ptr.hbm [resolvable:$true] %s5671_s24 }
  0xda   :  { %s5673_s6 = scalar_lea.hbm %s5672_s24, 2  ;;  %s5675_s5 = scalar_lea.hbm %s6084_s12, 2 }
  0xdb   :  { %p5674_p13 = scmp.ne.s32.totalorder %s5672_s24, %s5673_s6  ;;  %p5676_p0 = scmp.lt.s32.totalorder %s5672_s24, %s6084_s12 }
  0xdc   :  { %p5677_p1 = scmp.lt.s32.totalorder %s5675_s5, %s5673_s6 }
  0xde   :  { %p5678_p2 = por %p5677_p1, %p5676_p0 }
  0xe0   :  { %p5679_p3 = pnand %p5678_p2, %p5674_p13 }
  0xe2   :  { %5682 = shalt.err (!%p5679_p3)
}
  0xe3   :  { %165 = dma.hbm_to_vmem [thread:$0]  %s6320_s22, 32, %s160_s11, [#allocation5], %s5977_s7, %s5977_s7, %s5978_s10  }
  0xe4   :  { %s211_s19 = sshll.u32 %s6109_s30, 4  ;;  %s5992_s18 = smov [#allocation9]   ;;  %s6340_s19 = int_to_ptr.hbm [resolvable:$true] %s211_s19 }
  0xe5   :  { %s185_s15 = sshll.u32 %s5992_s18, 4  ;;  %s5695_s12 = sshra.s32 %s6330_s4, 4  ;;  %s186_s15 = int_to_ptr.vmem [resolvable:$true] %s185_s15  ;;  %s5696_s12 = int_to_ptr.hbm [resolvable:$true] %s5695_s12 }
  0xe6   :  { %s5697_s0 = scalar_lea.hbm %s5696_s12, 2  ;;  %s5699_s9 = scalar_lea.hbm %s6094_s27, 2 }
  0xe7   :  { %p5698_p4 = scmp.ne.s32.totalorder %s5696_s12, %s5697_s0  ;;  %p5700_p5 = scmp.lt.s32.totalorder %s5696_s12, %s6094_s27 }
  0xe8   :  { %p5701_p6 = scmp.lt.s32.totalorder %s5699_s9, %s5697_s0 }
  0xea   :  { %p5702_p7 = por %p5701_p6, %p5700_p5 }
  0xec   :  { %p5703_p8 = pnand %p5702_p7, %p5698_p4 }
  0xee   :  { %5706 = shalt.err (!%p5703_p8)
}
  0xef   :  { %s8430_s21 = sld [smem:[#allocation60_spill]]  ;;  %s5993_s1 = smov [#allocation12]  }
  0xf0   :  { %191 = dma.hbm_to_vmem [thread:$0]  %s6330_s4, 32, %s186_s15, [#allocation8], %s5977_s7, %s5977_s7, %s5978_s10  }
  0xf1   :  { %s213_s14 = sshll.u32 %s5993_s1, 4  ;;  %s5719_s27 = sshra.s32 %s6340_s19, 4  ;;  %s214_s14 = int_to_ptr.vmem [resolvable:$true] %s213_s14  ;;  %s5720_s27 = int_to_ptr.hbm [resolvable:$true] %s5719_s27 }
  0xf2   :  { %s5721_s2 = scalar_lea.hbm %s5720_s27, 32  ;;  %s5723_s20 = scalar_lea.hbm %s6109_s30, 32 }
  0xf3   :  { %p5722_p9 = scmp.ne.s32.totalorder %s5720_s27, %s5721_s2  ;;  %p5724_p10 = scmp.lt.s32.totalorder %s5720_s27, %s6109_s30 }
  0xf4   :  { %p5725_p11 = scmp.lt.s32.totalorder %s5723_s20, %s5721_s2 }
  0xf5   :  { %s241_s22 = sshll.u32 %s8430_s21, 4  ;;  %s6350_s22 = int_to_ptr.hbm [resolvable:$true] %s241_s22 }
  0xf6   :  { %p5726_p12 = por %p5725_p11, %p5724_p10 }
  0xf8   :  { %p5727_p13 = pnand %p5726_p12, %p5722_p9 }
  0xfa   :  { %5730 = shalt.err (!%p5727_p13)
}
  0xfb   :  { %s8431_s13 = sld [smem:[#allocation62_spill]]  ;;  %s5994_s28 = smov [#allocation15]  }
  0xfc   :  { %219 = dma.hbm_to_vmem [thread:$0]  %s6340_s19, 512, %s214_s14, [#allocation11], %s5982_s23, %s5982_s23, %s5983_s16  }
  0xfd   :  { %s243_s26 = sshll.u32 %s5994_s28, 4  ;;  %s5743_s30 = sshra.s32 %s6350_s22, 4  ;;  %s244_s26 = int_to_ptr.vmem [resolvable:$true] %s243_s26  ;;  %s5744_s30 = int_to_ptr.hbm [resolvable:$true] %s5743_s30 }
  0xfe   :  { %s5745_s11 = scalar_lea.hbm %s5744_s30, 16  ;;  %s5747_s4 = scalar_lea.hbm %s8430_s21, 16 }
  0xff   :  { %p5746_p0 = scmp.ne.s32.totalorder %s5744_s30, %s5745_s11  ;;  %p5748_p1 = scmp.lt.s32.totalorder %s5744_s30, %s8430_s21 }
 0x100   :  { %p5749_p2 = scmp.lt.s32.totalorder %s5747_s4, %s5745_s11 }
 0x101   :  { %s267_s29 = sshll.u32 %s8431_s13, 4  ;;  %s6360_s29 = int_to_ptr.hbm [resolvable:$true] %s267_s29 }
 0x102   :  { %p5750_p3 = por %p5749_p2, %p5748_p1 }
 0x104   :  { %p5751_p4 = pnand %p5750_p3, %p5746_p0 }
 0x106   :  { %5754 = shalt.err (!%p5751_p4)
}
 0x107   :  { %s8432_s24 = sld [smem:[#allocation63_spill]]  ;;  %s5995_s6 = smov [#allocation18]  }
 0x108   :  { %249 = dma.hbm_to_vmem [thread:$0]  %s6350_s22, 256, %s244_s26, [#allocation14], %s5982_s23, %s5982_s23, %s5983_s16  }
 0x109   :  { %s269_s5 = sshll.u32 %s5995_s6, 4  ;;  %s5767_s18 = sshra.s32 %s6360_s29, 4  ;;  %s270_s5 = int_to_ptr.vmem [resolvable:$true] %s269_s5  ;;  %s5768_s18 = int_to_ptr.hbm [resolvable:$true] %s5767_s18 }
 0x10a   :  { %s5769_s15 = scalar_lea.hbm %s5768_s18, 64  ;;  %s5771_s12 = scalar_lea.hbm %s8431_s13, 64 }
 0x10b   :  { %p5770_p5 = scmp.ne.s32.totalorder %s5768_s18, %s5769_s15  ;;  %p5772_p6 = scmp.lt.s32.totalorder %s5768_s18, %s8431_s13 }
 0x10c   :  { %p5773_p7 = scmp.lt.s32.totalorder %s5771_s12, %s5769_s15 }
 0x10d   :  { %s293_s19 = sshll.u32 %s8432_s24, 4  ;;  %s6370_s19 = int_to_ptr.hbm [resolvable:$true] %s293_s19 }
 0x10e   :  { %p5774_p8 = por %p5773_p7, %p5772_p6 }
 0x110   :  { %p5775_p9 = pnand %p5774_p8, %p5770_p5 }
 0x112   :  { %5778 = shalt.err (!%p5775_p9)
}
 0x113   :  { %s8433_s0 = sld [smem:[#allocation65_spill]]  ;;  %s5996_s21 = smov [#allocation21]  }
 0x114   :  { %275 = dma.hbm_to_vmem [thread:$0]  %s6360_s29, 1024, %s270_s5, [#allocation17], %s5982_s23, %s5982_s23, %s5983_s16  }
 0x115   :  { %s295_s1 = sshll.u32 %s5996_s21, 4  ;;  %s5791_s14 = sshra.s32 %s6370_s19, 4  ;;  %s296_s1 = int_to_ptr.vmem [resolvable:$true] %s295_s1  ;;  %s5792_s14 = int_to_ptr.hbm [resolvable:$true] %s5791_s14 }
 0x116   :  { %s5793_s22 = scalar_lea.hbm %s5792_s14, 64  ;;  %s5795_s27 = scalar_lea.hbm %s8432_s24, 64 }
 0x117   :  { %p5794_p10 = scmp.ne.s32.totalorder %s5792_s14, %s5793_s22  ;;  %p5796_p11 = scmp.lt.s32.totalorder %s5792_s14, %s8432_s24 }
 0x118   :  { %p5797_p12 = scmp.lt.s32.totalorder %s5795_s27, %s5793_s22 }
 0x119   :  { %s321_s9 = sshll.u32 %s8433_s0, 4  ;;  %s6380_s9 = int_to_ptr.hbm [resolvable:$true] %s321_s9 }
 0x11a   :  { %p5798_p13 = por %p5797_p12, %p5796_p11 }
 0x11c   :  { %p5799_p0 = pnand %p5798_p13, %p5794_p10 }
 0x11e   :  { %5802 = shalt.err (!%p5799_p0)
}
 0x11f   :  { %s8434_s2 = sld [smem:[#allocation68_spill]]  ;;  %s5997_s20 = smov [#allocation24]  }
 0x120   :  { %301 = dma.hbm_to_vmem [thread:$0]  %s6370_s19, 1024, %s296_s1, [#allocation20], %s5982_s23, %s5982_s23, %s5983_s16  }
 0x121   :  { %s323_s13 = sshll.u32 %s5997_s20, 4  ;;  %s5815_s28 = sshra.s32 %s6380_s9, 4  ;;  %s324_s13 = int_to_ptr.vmem [resolvable:$true] %s323_s13  ;;  %s5816_s28 = int_to_ptr.hbm [resolvable:$true] %s5815_s28 }
 0x122   :  { %s5817_s26 = scalar_lea.hbm %s5816_s28, 2  ;;  %s5819_s30 = scalar_lea.hbm %s8433_s0, 2 }
 0x123   :  { %p5818_p1 = scmp.ne.s32.totalorder %s5816_s28, %s5817_s26  ;;  %p5820_p2 = scmp.lt.s32.totalorder %s5816_s28, %s8433_s0 }
 0x124   :  { %p5821_p3 = scmp.lt.s32.totalorder %s5819_s30, %s5817_s26 }
 0x125   :  { %s351_s29 = sshll.u32 %s8434_s2, 4  ;;  %s6390_s29 = int_to_ptr.hbm [resolvable:$true] %s351_s29 }
 0x126   :  { %p5822_p4 = por %p5821_p3, %p5820_p2 }
 0x128   :  { %p5823_p5 = pnand %p5822_p4, %p5818_p1 }
 0x12a   :  { %5826 = shalt.err (!%p5823_p5)
}
 0x12b   :  { %s8435_s23 = sld [smem:[#allocation69_spill]]  ;;  %s5998_s11 = smov [#allocation27]  }
 0x12c   :  { %329 = dma.hbm_to_vmem [thread:$0]  %s6380_s9, 32, %s324_s13, [#allocation23], %s5977_s7, %s5977_s7, %s5978_s10  }
 0x12d   :  { %s353_s4 = sshll.u32 %s5998_s11, 4  ;;  %s5839_s24 = sshra.s32 %s6390_s29, 4  ;;  %s354_s4 = int_to_ptr.vmem [resolvable:$true] %s353_s4  ;;  %s5840_s24 = int_to_ptr.hbm [resolvable:$true] %s5839_s24 }
 0x12e   :  { %s5841_s6 = scalar_lea.hbm %s5840_s24, 2  ;;  %s5843_s5 = scalar_lea.hbm %s8434_s2, 2 }
 0x12f   :  { %p5842_p6 = scmp.ne.s32.totalorder %s5840_s24, %s5841_s6  ;;  %p5844_p7 = scmp.lt.s32.totalorder %s5840_s24, %s8434_s2 }
 0x130   :  { %p5845_p8 = scmp.lt.s32.totalorder %s5843_s5, %s5841_s6 }
 0x131   :  { %s377_s16 = sshll.u32 %s8435_s23, 4  ;;  %s6400_s16 = int_to_ptr.hbm [resolvable:$true] %s377_s16 }
 0x132   :  { %p5846_p9 = por %p5845_p8, %p5844_p7 }
 0x134   :  { %p5847_p10 = pnand %p5846_p9, %p5842_p6 }
 0x136   :  { %5850 = shalt.err (!%p5847_p10)
}
 0x137   :  { %359 = dma.hbm_to_vmem [thread:$0]  %s6390_s29, 32, %s354_s4, [#allocation26], %s5977_s7, %s5977_s7, %s5978_s10  }
 0x138   :  { %s5999_s19 = smov [#allocation30]   ;;  %s410_s15 = sshll.u32 %s6224_s17, 4  ;;  %s411_s15 = int_to_ptr.hbm [resolvable:$true] %s410_s15 }
 0x139   :  { %s379_s18 = sshll.u32 %s5999_s19, 4  ;;  %s5863_s12 = sshra.s32 %s6400_s16, 4  ;;  %s380_s18 = int_to_ptr.vmem [resolvable:$true] %s379_s18  ;;  %s5864_s12 = int_to_ptr.hbm [resolvable:$true] %s5863_s12 }
 0x13a   :  { %s5865_s0 = scalar_lea.hbm %s5864_s12, 2  ;;  %s5867_s9 = scalar_lea.hbm %s8435_s23, 2 }
 0x13b   :  { %p5866_p11 = scmp.ne.s32.totalorder %s5864_s12, %s5865_s0  ;;  %p5868_p12 = scmp.lt.s32.totalorder %s5864_s12, %s8435_s23 }
 0x13c   :  { %p5869_p13 = scmp.lt.s32.totalorder %s5867_s9, %s5865_s0 }
 0x13e   :  { %p5870_p0 = por %p5869_p13, %p5868_p12 }
 0x140   :  { %p5871_p1 = pnand %p5870_p0, %p5866_p11 }
 0x142   :  { %5874 = shalt.err (!%p5871_p1)
}
 0x143   :  { %385 = dma.hbm_to_vmem [thread:$0]  %s6400_s16, 32, %s380_s18, [#allocation29], %s5977_s7, %s5977_s7, %s5978_s10  }
 0x144   :  { %s6000_s21 = smov [#allocation33]   ;;  %s5887_s14 = sshra.s32 %s411_s15, 4  ;;  %s5888_s14 = int_to_ptr.hbm [resolvable:$true] %s5887_s14 }
 0x145   :  { %s412_s1 = sshll.u32 %s6000_s21, 4  ;;  %s5889_s22 = scalar_lea.hbm %s5888_s14, 1  ;;  %s413_s1 = int_to_ptr.vmem [resolvable:$true] %s412_s1 }
 0x146   :  { %p5890_p2 = scmp.ne.s32.totalorder %s5888_s14, %s5889_s22  ;;  %s5891_s27 = scalar_lea.hbm %s6224_s17, 1 }
 0x147   :  { %p5892_p3 = scmp.lt.s32.totalorder %s5888_s14, %s6224_s17  ;;  %p5893_p4 = scmp.lt.s32.totalorder %s5891_s27, %s5889_s22 }
 0x149   :  { %p5894_p5 = por %p5893_p4, %p5892_p3 }
 0x14b   :  { %p5895_p6 = pnand %p5894_p5, %p5890_p2 }
 0x14d   :  { %5898 = shalt.err (!%p5895_p6)
}
 0x14e   :  { %415 = dma.hbm_to_vmem [thread:$0]  %s411_s15, 16, %s413_s1, [#allocation32]  }
 0x14f   :  { %5911 = dma.done.wait [#allocation3], 32  }
 0x150   :  { %5912 = vsyncadd [#allocation3], 4294967264 }
 0x151   :  { %5913 = dma.done.wait [#allocation5], 64  }
 0x152   :  { %5914 = vsyncadd [#allocation5], 4294967232 }
 0x153   :  { %5915 = dma.done.wait [#allocation8], 64  }
 0x154   :  { %5916 = vsyncadd [#allocation8], 4294967232 }
 0x155   :  { %5917 = dma.done.wait [#allocation11], 544  }
 0x156   :  { %5918 = vsyncadd [#allocation11], 4294966752 }
 0x157   :  { %5919 = dma.done.wait [#allocation14], 512  }
 0x158   :  { %5920 = vsyncadd [#allocation14], 4294966784 }
 0x159   :  { %5921 = dma.done.wait [#allocation17], 1040  }
 0x15a   :  { %5922 = vsyncadd [#allocation17], 4294966256 }
 0x15b   :  { %5923 = dma.done.wait [#allocation20], 1056  }
 0x15c   :  { %5924 = vsyncadd [#allocation20], 4294966240 }
 0x15d   :  { %5925 = dma.done.wait [#allocation23], 1056  }
 0x15e   :  { %5926 = vsyncadd [#allocation23], 4294966240 }
 0x15f   :  { %5927 = dma.done.wait [#allocation26], 1056  }
 0x160   :  { %5928 = vsyncadd [#allocation26], 4294966240 }
 0x161   :  { %5929 = dma.done.wait [#allocation29], 64  }
 0x162   :  { %5930 = vsyncadd [#allocation29], 4294967232 }
 0x163   :  { %5931 = dma.done.wait [#allocation32], 528  }
 0x164   :  { %5932 = vsyncadd [#allocation32], 4294966768  ;;  %s8436_s17 = sld [smem:[#allocation48_spill]]  ;;  %vm510_vm0 = vcmask 130048   ;;  %s6001_s20 = smov 32   ;;  %vm612_vm1 = vcmask 261120  }
 0x165   :  { %s8437_s7 = sld [smem:[#allocation45_spill]]  ;;  %s6002_s30 = smov 96  }
 0x166   :  { %s8438_s10 = sld [smem:[#allocation57_spill]]  ;;  %s6003_s16 = smov 64  }
 0x167   :  { %s8439_s2 = sld [smem:[#allocation51_spill]] }
 0x168   :  { %s8440_s13 = sld [smem:[#allocation49_spill]] }
 0x169   :  { %s8441_s29 = sld [smem:[#allocation46_spill]] }
 0x16a   :  { %v505_v0 = vld [vmem:[%s8436_s17 + $0x8] sm:$0xff]  ;;  %v504_v1 = vld [vmem:[%s8436_s17] sm:$0xff]  ;;  %s8442_s28 = sld [smem:[#allocation50_spill]] }
 0x16b   :  { %537 = vmatpush.msra.mxu0 %v505_v0  ;;  %v500_v2 = vld [vmem:[%s8437_s7] sm:$0xff]  ;;  %v501_v5 = vld [vmem:[%s8437_s7 + $0x8] sm:$0xff]  ;;  %v502_v6 = vld [vmem:[%s8437_s7 + $0x10] sm:$0xff]  ;;  %s8443_s26 = sld [smem:[#allocation52_spill]] }
 0x16c   :  { %v6423_v3 = vld [vmem:[%s8438_s10 + $0x78] sm:$0xff]  ;;  %v6429_v4 = vld [vmem:[%s8438_s10 + $0x70] sm:$0xff]  ;;  %v6443_v11 = vld [vmem:[%s8438_s10 + $0x68] sm:$0xff]  ;;  %s8444_s23 = sld [smem:[#allocation58_spill]] }
 0x16d   :  { %538 = vmatpush.msra.mxu0 %v504_v1  ;;  %700 = vrot.lane.b32.xlu0 %v6423_v3, %s6001_s20  ;;  %v503_v7 = vld [vmem:[%s8437_s7 + $0x18] sm:$0xff]  ;;  %v606_v9 = vld [vmem:[%s8439_s2 + $0x10] sm:$0xff]  ;;  %v605_v10 = vld [vmem:[%s8439_s2 + $0x8] sm:$0xff]  ;;  %s8454_s11 = sld [smem:[#allocation53_spill]] }
 0x16e   :  { %4744 = vmatmul.msk.f32.vlgmr.msra.gmra.mxu0 %vm510_vm0, %v500_v2  ;;  %v607_v8 = vld [vmem:[%s8439_s2 + $0x18] sm:$0xff]  ;;  %v6446_v12 = vld [vmem:[%s8438_s10 + $0x48] sm:$0xff]  ;;  %696 = vrot.lane.b32.xlu1 %v6443_v11, %s6001_s20  ;;  %v604_v13 = vld [vmem:[%s8439_s2] sm:$0xff]  ;;  %s8455_s4 = sld [smem:[#allocation54_spill]] }
 0x16f   :  { %637 = vmatpush.msra.mxu1 %v607_v8  ;;  %v6454_v14 = vld [vmem:[%s8438_s10 + $0x60] sm:$0xff]  ;;  %v6457_v15 = vld [vmem:[%s8438_s10 + $0x30] sm:$0xff]  ;;  %v6474_v18 = vld [vmem:[%s8438_s10 + $0x28] sm:$0xff]  ;;  %s8456_s24 = sld [smem:[#allocation55_spill]] }
 0x170   :  { %v6464_v16 = vld [vmem:[%s8438_s10 + $0x40] sm:$0xff]  ;;  %v6481_v21 = vld [vmem:[%s8438_s10 + $0x58] sm:$0xff]  ;;  %v6489_v27 = vld [vmem:[%s8438_s10 + $0x50] sm:$0xff]  ;;  %s8457_s6 = sld [smem:[#allocation56_spill]] }
 0x171   :  { %638 = vmatpush.msra.mxu1 %v606_v9  ;;  %v6467_v17 = vld [vmem:[%s8438_s10 + $0x20] sm:$0xff]  ;;  %692 = vrot.lane.b32.xlu2 %v6481_v21, %s6001_s20  ;;  %v561_v30 = vld [vmem:[%s8442_s28 + $0x8] sm:$0xff]  ;;  %v6499_v33 = vld [vmem:[%s8438_s10 + $0x38] sm:$0xff]  ;;  %s8467_s5 = sld [smem:[#allocation59_spill]] }
 0x172   :  { %v5200_v19 = vld [vmem:[%s8440_s13] ss:$0 sm:$0xff]  ;;  %v562_v36 = vld [vmem:[%s8442_s28 + $0x10] sm:$0xff]  ;;  %v563_v41 = vld [vmem:[%s8442_s28 + $0x18] sm:$0xff]  ;;  %s8468_s19 = sld [smem:[#allocation70_spill]] }
 0x173   :  { %639 = vmatpush.msra.mxu1 %v605_v10  ;;  %v5201_v20 = vld [vmem:[%s8441_s29] ss:$0 sm:$0xff]  ;;  %v6532_v55 = vld [vmem:[%s8438_s10 + $0x8] sm:$0xff]  ;;  %v6546_v61 = vld [vmem:[%s8438_s10 + $0x10] sm:$0xff]  ;;  %s8469_s18 = sld [smem:[#allocation47_spill]] }
 0x174   :  { %v560_v24 = vld [vmem:[%s8442_s28] sm:$0xff]  ;;  %v6561_v2 = vld [vmem:[%s8438_s10 + $0x18] sm:$0xff]  ;;  %s8470_s15 = sld [smem:[#allocation61_spill]] }
 0x175   :  { %698 = vrot.lane.b32.xlu0 %v6429_v4, %s6001_s20  ;;  %640 = vmatpush.msra.mxu1 %v604_v13  ;;  %v5202_v46 = vld [vmem:[%s8443_s26] ss:$0 sm:$0xff]  ;;  %s8483_s12 = sld [smem:[#allocation67_spill]] }
 0x176   :  { %4745 = vmatmul.msk.f32.gmra.mxu0 %vm510_vm0, %v501_v5  ;;  %694 = vrot.lane.b32.xlu1 %v6454_v14, %s6001_s20  ;;  %s8484_s0 = sld [smem:[#allocation66_spill]] }
 0x179   :  { %690 = vrot.lane.b32.xlu2 %v6489_v27, %s6001_s20 }
 0x17d   :  { %688 = vrot.lane.b32.xlu0 %v6446_v12, %s6001_s20 }
 0x17e   :  { %4746 = vmatmul.msk.f32.gmra.mxu0 %vm510_vm0, %v502_v6  ;;  %686 = vrot.lane.b32.xlu1 %v6464_v16, %s6001_s20 }
 0x181   :  { %684 = vrot.lane.b32.xlu2 %v6499_v33, %s6001_s20 }
 0x185   :  { %682 = vrot.lane.b32.xlu0 %v6457_v15, %s6001_s20 }
 0x186   :  { %4747 = vmatmul.msk.f32.gmra.mxu0 %vm510_vm0, %v503_v7  ;;  %680 = vrot.lane.b32.xlu1 %v6474_v18, %s6001_s20 }
 0x18d   :  { %678 = vrot.lane.b32.xlu0 %v6467_v17, %s6001_s20 }
 0x1cb   :  { %v6526_v52 = vpop.permute.xlu2 %692 }
 0x1d3   :  { %v6541_v58 = vpop.permute.xlu2 %690 }
 0x1db   :  { %v6558_v1 = vpop.permute.xlu2 %684 }
 0x1df   :  { %v6515_v45 = vpop.permute.xlu0 %700 }
 0x1e0   :  { %v6520_v49 = vpop.permute.xlu1 %696 }
 0x1e7   :  { %v6522_v50 = vpop.permute.xlu0 %698 }
 0x1e8   :  { %v6575_v9 = vpop.permute.xlu1 %694 }
 0x1eb   :  { %v540_v22 = vpop.f32.mrf.mxu0 }
 0x1ec   :  { %v541_v23 = vadd.f32 %v5200_v19, %v540_v22 }
 0x1ee   :  { %v556_v25 = vadd.f32 %v5201_v20, %v541_v23 }
 0x1ef   :  { %v6536_v57 = vpop.permute.xlu0 %688 }
 0x1f0   :  { %v6486_v26 = vadd.f32 %v560_v24, %v556_v25  ;;  %v6594_v23 = vpop.permute.xlu1 %686 }
 0x1f2   :  { %4748 = vmatmul.msk.f32.vlgmr.msra.gmra.mxu1 %vm612_vm1, %v6486_v26 }
 0x1f3   :  { %v543_v28 = vpop.f32.mrf.mxu0 }
 0x1f4   :  { %v544_v29 = vadd.f32 %v5200_v19, %v543_v28 }
 0x1f6   :  { %v557_v31 = vadd.f32 %v5201_v20, %v544_v29 }
 0x1f7   :  { %v6556_v0 = vpop.permute.xlu0 %682 }
 0x1f8   :  { %v6496_v32 = vadd.f32 %v561_v30, %v557_v31  ;;  %v6599_v25 = vpop.permute.xlu1 %680 }
 0x1fa   :  { %4749 = vmatmul.msk.f32.gmra.mxu1 %vm612_vm1, %v6496_v32 }
 0x1fb   :  { %v546_v34 = vpop.f32.mrf.mxu0 }
 0x1fc   :  { %v547_v35 = vadd.f32 %v5200_v19, %v546_v34 }
 0x1fe   :  { %v558_v37 = vadd.f32 %v5201_v20, %v547_v35 }
 0x1ff   :  { %v6573_v8 = vpop.permute.xlu0 %678 }
 0x200   :  { %v6506_v38 = vadd.f32 %v562_v36, %v558_v37 }
 0x202   :  { %4750 = vmatmul.msk.f32.gmra.mxu1 %vm612_vm1, %v6506_v38 }
 0x203   :  { %v549_v39 = vpop.f32.mrf.mxu0 }
 0x204   :  { %v550_v40 = vadd.f32 %v5200_v19, %v549_v39 }
 0x206   :  { %v559_v42 = vadd.f32 %v5201_v20, %v550_v40  ;;  %v6587_v20 = vld [vmem:[%s8438_s10] sm:$0xff] }
 0x208   :  { %v6511_v43 = vadd.f32 %v563_v41, %v559_v42 }
 0x20a   :  { %4751 = vmatmul.msk.f32.gmra.mxu1 %vm612_vm1, %v6511_v43 }
 0x26f   :  { %v642_v44 = vpop.f32.mrf.mxu1 }
 0x270   :  { %v6571_v7 = vadd.f32 %v5202_v46, %v642_v44 }
 0x272   :  { %v730_v13 = vmul.f32 %v6575_v9, %v6571_v7  ;;  %v722_v19 = vmul.f32 %v6573_v8, %v6571_v7  ;;  %v726_v24 = vmul.f32 %v6594_v23, %v6571_v7 }
 0x277   :  { %v645_v47 = vpop.f32.mrf.mxu1 }
 0x278   :  { %v6518_v48 = vadd.f32 %v5202_v46, %v645_v47 }
 0x27a   :  { %v731_v51 = vmul.f32 %v6520_v49, %v6518_v48  ;;  %v727_v10 = vmul.f32 %v6536_v57, %v6518_v48  ;;  %v723_v28 = vmul.f32 %v6599_v25, %v6518_v48 }
 0x27c   :  { %840 = vrot.lane.b32.xlu0 %v731_v51, %s6002_s30 }
 0x27f   :  { %v648_v53 = vpop.f32.mrf.mxu1 }
 0x280   :  { %v6529_v54 = vadd.f32 %v5202_v46, %v648_v53 }
 0x282   :  { %v732_v56 = vmul.f32 %v6522_v50, %v6529_v54  ;;  %v728_v63 = vmul.f32 %v6541_v58, %v6529_v54  ;;  %v724_v22 = vmul.f32 %v6556_v0, %v6529_v54 }
 0x284   :  { %842 = vrot.lane.b32.xlu1 %v732_v56, %s6002_s30  ;;  %672 = vrot.lane.b32.xlu0 %v6532_v55, %s6001_s20 }
 0x287   :  { %v651_v59 = vpop.f32.mrf.mxu1 }
 0x288   :  { %v6543_v60 = vadd.f32 %v5202_v46, %v651_v59 }
 0x28a   :  { %v733_v62 = vmul.f32 %v6515_v45, %v6543_v60  ;;  %v729_v5 = vmul.f32 %v6526_v52, %v6543_v60  ;;  %v725_v6 = vmul.f32 %v6558_v1, %v6543_v60 }
 0x28c   :  { %844 = vrot.lane.b32.xlu2 %v733_v62, %s6002_s30  ;;  %674 = vrot.lane.b32.xlu1 %v6546_v61, %s6001_s20 }
 0x28d   :  { %834 = vrot.lane.b32.xlu0 %v728_v63, %s6002_s30 }
 0x294   :  { %676 = vrot.lane.b32.xlu2 %v6561_v2, %s6001_s20  ;;  %836 = vrot.lane.b32.xlu1 %v729_v5, %s6002_s30 }
 0x295   :  { %828 = vrot.lane.b32.xlu0 %v725_v6, %s6002_s30 }
 0x29c   :  { %832 = vrot.lane.b32.xlu1 %v727_v10, %s6002_s30  ;;  %838 = vrot.lane.b32.xlu2 %v730_v13, %s6002_s30 }
 0x29d   :  { %822 = vrot.lane.b32.xlu0 %v722_v19, %s6002_s30 }
 0x2a4   :  { %826 = vrot.lane.b32.xlu1 %v724_v22, %s6002_s30  ;;  %670 = vrot.lane.b32.xlu2 %v6587_v20, %s6001_s20 }
 0x2ac   :  { %830 = vrot.lane.b32.xlu2 %v726_v24, %s6002_s30 }
 0x2b4   :  { %824 = vrot.lane.b32.xlu2 %v723_v28, %s6002_s30 }
 0x2e6   :  { %v845_v29 = vpop.permute.xlu2 %844 }
 0x2e7   :  { %4752 = vmatpush.xpose.msk.msra.mxu2 %vm612_vm1, %v845_v29 }
 0x2ee   :  { %v6605_v30 = vpop.permute.xlu2 %676  ;;  %v841_v31 = vpop.permute.xlu0 %840 }
 0x2ef   :  { %v721_v34 = vmul.f32 %v6605_v30, %v6543_v60 }
 0x2f1   :  { %820 = vrot.lane.b32.xlu1 %v721_v34, %s6002_s30 }
 0x2f6   :  { %v843_v35 = vpop.permute.xlu1 %842  ;;  %v6610_v36 = vpop.permute.xlu0 %672 }
 0x2f7   :  { %v719_v37 = vmul.f32 %v6610_v36, %v6518_v48  ;;  %v839_v39 = vpop.permute.xlu2 %838  ;;  %4753 = vmatpush.xpose.msk.msra.mxu2 %vm612_vm1, %v843_v35 }
 0x2f9   :  { %816 = vrot.lane.b32.xlu0 %v719_v37, %s6002_s30  ;;  %v6668_v37 = vld [vmem:[%s8444_s23 + $0x78] sm:$0xff] }
 0x2fa   :  { %947 = vmatpush.msra.mxu3 %v6668_v37 }
 0x2fb   :  { %4754 = vmatpush.xpose.msk.msra.mxu2 %vm612_vm1, %v841_v31 }
 0x2fe   :  { %v6617_v40 = vpop.permute.xlu1 %674 }
 0x2ff   :  { %v720_v41 = vmul.f32 %v6617_v40, %v6529_v54  ;;  %v6621_v42 = vpop.permute.xlu2 %670  ;;  %4755 = vmatpush.xpose.msk.msra.mxu2 %vm612_vm1, %v839_v39  ;;  %v835_v47 = vpop.permute.xlu0 %834  ;;  %v6671_v39 = vld [vmem:[%s8444_s23 + $0x70] sm:$0xff] }
 0x300   :  { %v718_v44 = vmul.f32 %v6621_v42, %v6571_v7  ;;  %948 = vmatpush.msra.mxu3 %v6671_v39 }
 0x301   :  { %818 = vrot.lane.b32.xlu2 %v720_v41, %s6002_s30 }
 0x302   :  { %814 = vrot.lane.b32.xlu1 %v718_v44, %s6002_s30 }
 0x306   :  { %v837_v46 = vpop.permute.xlu1 %836 }
 0x307   :  { %4756 = vmatpush.xpose.msk.msra.mxu2 %vm612_vm1, %v837_v46  ;;  %v831_v53 = vpop.permute.xlu2 %830  ;;  %v829_v56 = vpop.permute.xlu0 %828 }
 0x30b   :  { %4757 = vmatpush.xpose.msk.msra.mxu2 %vm612_vm1, %v835_v47  ;;  %v584_v47 = vld [vmem:[#allocation12] sm:$0xff] }
 0x30e   :  { %v833_v51 = vpop.permute.xlu1 %832 }
 0x30f   :  { %4758 = vmatpush.xpose.msk.msra.mxu2 %vm612_vm1, %v833_v51  ;;  %v825_v62 = vpop.permute.xlu2 %824  ;;  %v823_v63 = vpop.permute.xlu0 %822 }
 0x313   :  { %4759 = vmatpush.xpose.msk.msra.mxu2 %vm612_vm1, %v831_v53 }
 0x316   :  { %v827_v59 = vpop.permute.xlu1 %826 }
 0x317   :  { %4760 = vmatpush.xpose.msk.msra.mxu2 %vm612_vm1, %v829_v56 }
 0x31b   :  { %4761 = vmatpush.xpose.msk.msra.mxu2 %vm612_vm1, %v827_v59 }
 0x31f   :  { %4762 = vmatpush.xpose.msk.msra.mxu2 %vm612_vm1, %v825_v62 }
 0x323   :  { %4763 = vmatpush.xpose.msk.msra.mxu2 %vm612_vm1, %v823_v63  ;;  %v585_v63 = vld [vmem:[#allocation12 + $0x8] sm:$0xff] }
 0x35b   :  { %v819_v6 = vpop.permute.xlu2 %818 }
 0x363   :  { %v821_v5 = vpop.permute.xlu1 %820 }
 0x364   :  { %4764 = vmatpush.xpose.msk.msra.mxu2 %vm612_vm1, %v821_v5 }
 0x368   :  { %4765 = vmatpush.xpose.msk.msra.mxu2 %vm612_vm1, %v819_v6 }
 0x36b   :  { %v817_v10 = vpop.permute.xlu0 %816 }
 0x36c   :  { %4766 = vmatpush.xpose.msk.msra.mxu2 %vm612_vm1, %v817_v10 }
 0x374   :  { %v815_v13 = vpop.permute.xlu1 %814 }
 0x375   :  { %4767 = vmatpush.xpose.msk.msra.mxu2 %vm612_vm1, %v815_v13 }
 0x378   :  { %4768 = vmatmul.msk.f32.vlgmr.msra.gmra.mxu2 %vm612_vm1, %v6571_v7 }
 0x380   :  { %4769 = vmatmul.msk.f32.gmra.mxu2 %vm612_vm1, %v6518_v48 }
 0x388   :  { %4770 = vmatmul.msk.f32.gmra.mxu2 %vm612_vm1, %v6529_v54 }
 0x390   :  { %4771 = vmatmul.msk.f32.gmra.mxu2 %vm612_vm1, %v6543_v60 }
 0x3fb   :  { %v907_v19 = vpop.f32.mrf.mxu2 }
 0x3fc   :  { %v919_v22 = vmul.f32 0.35355338, %v907_v19 }
 0x3fe   :  { %923 = vmax.xlane.f32.xlu2 %v919_v22 }
 0x403   :  { %v910_v24 = vpop.f32.mrf.mxu2 }
 0x404   :  { %v6648_v28 = vmul.f32 0.35355338, %v910_v24 }
 0x406   :  { %925 = vmax.xlane.f32.xlu0 %v6648_v28 }
 0x40b   :  { %v913_v29 = vpop.f32.mrf.mxu2 }
 0x40c   :  { %v6651_v31 = vmul.f32 0.35355338, %v913_v29 }
 0x40e   :  { %927 = vmax.xlane.f32.xlu1 %v6651_v31 }
 0x413   :  { %v916_v34 = vpop.f32.mrf.mxu2 }
 0x414   :  { %v6654_v35 = vmul.f32 0.35355338, %v916_v34 }
 0x416   :  { %929 = vmax.xlane.f32.xlu2 %v6654_v35 }
 0x41a   :  { %762 = vrot.lane.b32.xlu0 %v6429_v4, %s6003_s16  ;;  %v6677_v4 = vld [vmem:[%s8444_s23 + $0x68] sm:$0xff] }
 0x41b   :  { %949 = vmatpush.msra.mxu3 %v6677_v4 }
 0x422   :  { %758 = vrot.lane.b32.xlu0 %v6454_v14, %s6003_s16  ;;  %v6699_v14 = vld [vmem:[%s8444_s23 + $0x48] sm:$0xff] }
 0x427   :  { %760 = vrot.lane.b32.xlu1 %v6443_v11, %s6003_s16  ;;  %v6687_v11 = vld [vmem:[%s8444_s23 + $0x58] sm:$0xff] }
 0x42a   :  { %752 = vrot.lane.b32.xlu0 %v6446_v12, %s6003_s16  ;;  %v6693_v12 = vld [vmem:[%s8444_s23 + $0x50] sm:$0xff] }
 0x42e   :  { %764 = vrot.lane.b32.xlu2 %v6423_v3, %s6003_s16  ;;  %v6683_v3 = vld [vmem:[%s8444_s23 + $0x60] sm:$0xff] }
 0x42f   :  { %754 = vrot.lane.b32.xlu1 %v6489_v27, %s6003_s16  ;;  %950 = vmatpush.msra.mxu3 %v6683_v3  ;;  %v6734_v27 = vld [vmem:[%s8444_s23 + $0x20] sm:$0xff] }
 0x431   :  { %951 = vmatpush.msra.mxu3 %v6687_v11 }
 0x432   :  { %746 = vrot.lane.b32.xlu0 %v6457_v15, %s6003_s16  ;;  %v6705_v15 = vld [vmem:[%s8444_s23 + $0x40] sm:$0xff] }
 0x433   :  { %952 = vmatpush.msra.mxu3 %v6693_v12 }
 0x435   :  { %953 = vmatpush.msra.mxu3 %v6699_v14 }
 0x436   :  { %756 = vrot.lane.b32.xlu2 %v6481_v21, %s6003_s16  ;;  %v6709_v21 = vld [vmem:[%s8444_s23 + $0x38] sm:$0xff] }
 0x437   :  { %748 = vrot.lane.b32.xlu1 %v6499_v33, %s6003_s16  ;;  %954 = vmatpush.msra.mxu3 %v6705_v15  ;;  %v6738_v33 = vld [vmem:[%s8444_s23 + $0x18] sm:$0xff] }
 0x439   :  { %955 = vmatpush.msra.mxu3 %v6709_v21 }
 0x43a   :  { %740 = vrot.lane.b32.xlu0 %v6561_v2, %s6003_s16 }
 0x43e   :  { %750 = vrot.lane.b32.xlu2 %v6464_v16, %s6003_s16  ;;  %v6726_v16 = vld [vmem:[%s8444_s23 + $0x30] sm:$0xff] }
 0x43f   :  { %742 = vrot.lane.b32.xlu1 %v6467_v17, %s6003_s16  ;;  %956 = vmatpush.msra.mxu3 %v6726_v16  ;;  %v6730_v17 = vld [vmem:[%s8444_s23 + $0x28] sm:$0xff] }
 0x441   :  { %957 = vmatpush.msra.mxu3 %v6730_v17 }
 0x442   :  { %734 = vrot.lane.b32.xlu0 %v6587_v20, %s6003_s16 }
 0x443   :  { %958 = vmatpush.msra.mxu3 %v6734_v27 }
 0x445   :  { %959 = vmatpush.msra.mxu3 %v6738_v33 }
 0x446   :  { %744 = vrot.lane.b32.xlu2 %v6474_v18, %s6003_s16  ;;  %v6742_v18 = vld [vmem:[%s8444_s23 + $0x10] sm:$0xff] }
 0x447   :  { %736 = vrot.lane.b32.xlu1 %v6532_v55, %s6003_s16  ;;  %960 = vmatpush.msra.mxu3 %v6742_v18  ;;  %v6746_v55 = vld [vmem:[%s8444_s23 + $0x8] sm:$0xff] }
 0x449   :  { %961 = vmatpush.msra.mxu3 %v6746_v55 }
 0x44e   :  { %738 = vrot.lane.b32.xlu2 %v6546_v61, %s6003_s16  ;;  %v6750_v61 = vld [vmem:[%s8444_s23] sm:$0xff] }
 0x44f   :  { %962 = vmatpush.msra.mxu3 %v6750_v61 }
 0x471   :  { %v924_v2 = vpop.xlane.xlu2 %923 }
 0x472   :  { %v931_v20 = vsub.f32 %v919_v22, %v924_v2  ;;  %v586_v22 = vld [vmem:[#allocation12 + $0x10] sm:$0xff] }
 0x474   :  { %v935_v41 = vmul.f32 1.442695, %v931_v20 }
 0x476   :  { %5237 = vpow2.f32 %v935_v41  ;;  %v587_v41 = vld [vmem:[#allocation12 + $0x18] sm:$0xff] }
 0x479   :  { %v926_v44 = vpop.xlane.xlu0 %925 }
 0x47a   :  { %v932_v46 = vsub.f32 %v6648_v28, %v926_v44 }
 0x47c   :  { %v5238_v51 = vpop.eup %5237  ;;  %v937_v53 = vmul.f32 1.442695, %v932_v46 }
 0x47d   :  { %v6754_v56 = vmul.f32 %v5238_v51, %v584_v47 }
 0x47e   :  { %5239 = vpow2.f32 %v937_v53 }
 0x47f   :  { %963 = vmatmul.f32.vlgmr.msra.gmra.mxu3 %v6754_v56 }
 0x481   :  { %v928_v59 = vpop.xlane.xlu1 %927 }
 0x482   :  { %v933_v62 = vsub.f32 %v6651_v31, %v928_v59 }
 0x484   :  { %v5240_v5 = vpop.eup %5239  ;;  %v939_v6 = vmul.f32 1.442695, %v933_v62 }
 0x485   :  { %v6758_v10 = vmul.f32 %v5240_v5, %v585_v63 }
 0x486   :  { %5241 = vpow2.f32 %v939_v6 }
 0x487   :  { %966 = vmatmul.f32.gmra.mxu3 %v6758_v10 }
 0x489   :  { %v930_v13 = vpop.xlane.xlu2 %929 }
 0x48a   :  { %v934_v19 = vsub.f32 %v6654_v35, %v930_v13 }
 0x48c   :  { %v5242_v24 = vpop.eup %5241  ;;  %v941_v28 = vmul.f32 1.442695, %v934_v19  ;;  %v6762_v29 = vpop.permute.xlu0 %762 }
 0x48d   :  { %v6764_v34 = vmul.f32 %v5242_v24, %v586_v22  ;;  %v796_v2 = vmul.f32 %v6762_v29, %v6529_v54 }
 0x48e   :  { %5243 = vpow2.f32 %v941_v28 }
 0x48f   :  { %969 = vmatmul.f32.gmra.mxu3 %v6764_v34 }
 0x491   :  { %v6767_v31 = vpop.permute.xlu2 %764 }
 0x492   :  { %v797_v20 = vmul.f32 %v6767_v31, %v6543_v60 }
 0x494   :  { %v5244_v35 = vpop.eup %5243  ;;  %v6773_v44 = vpop.permute.xlu0 %758  ;;  %v5038_v46 = vpack.i.bf16 %v796_v2, %v797_v20 }
 0x495   :  { %v6775_v47 = vmul.f32 %v5244_v35, %v587_v41  ;;  %v794_v59 = vmul.f32 %v6773_v44, %v6571_v7 }
 0x496   :  { %5039 = vrot.lane.b32.xlu2 %v5038_v46, %s6003_s16 }
 0x497   :  { %972 = vmatmul.f32.gmra.mxu3 %v6775_v47 }
 0x499   :  { %v6779_v51 = vpop.permute.xlu1 %760  ;;  %v6781_v53 = vpop.permute.xlu2 %756 }
 0x49a   :  { %v795_v62 = vmul.f32 %v6779_v51, %v6518_v48  ;;  %v793_v19 = vmul.f32 %v6781_v53, %v6543_v60 }
 0x49c   :  { %v6787_v63 = vpop.permute.xlu0 %752  ;;  %v5043_v5 = vpack.i.bf16 %v794_v59, %v795_v62 }
 0x49d   :  { %v791_v22 = vmul.f32 %v6787_v63, %v6518_v48 }
 0x49e   :  { %5044 = vrot.lane.b32.xlu1 %v5043_v5, %s6003_s16 }
 0x4a1   :  { %v6790_v6 = vpop.permute.xlu1 %754  ;;  %v6792_v13 = vpop.permute.xlu2 %750 }
 0x4a2   :  { %8445 = vst [vmem:[#allocation71_spill] sm:$0xff] %v6790_v6  ;;  %v792_v24 = vmul.f32 %v6790_v6, %v6529_v54  ;;  %v790_v28 = vmul.f32 %v6792_v13, %v6571_v7 }
 0x4a4   :  { %v6802_v2 = vpop.permute.xlu0 %746  ;;  %v5048_v20 = vpack.i.bf16 %v792_v24, %v793_v19  ;;  %v5053_v41 = vpack.i.bf16 %v790_v28, %v791_v22 }
 0x4a5   :  { %8446 = vst [vmem:[#allocation72_spill] sm:$0xff] %v6802_v2  ;;  %v788_v59 = vmul.f32 %v6802_v2, %v6529_v54 }
 0x4a6   :  { %5049 = vrot.lane.b32.xlu0 %v5048_v20, %s6003_s16  ;;  %5054 = vrot.lane.b32.xlu2 %v5053_v41, %s6003_s16 }
 0x4a9   :  { %v6806_v35 = vpop.permute.xlu1 %748  ;;  %v6808_v46 = vpop.permute.xlu2 %744 }
 0x4aa   :  { %8447 = vst [vmem:[#allocation73_spill] sm:$0xff] %v6806_v35  ;;  %v789_v62 = vmul.f32 %v6806_v35, %v6543_v60  ;;  %v787_v24 = vmul.f32 %v6808_v46, %v6518_v48 }
 0x4ab   :  { %8448 = vst [vmem:[#allocation74_spill] sm:$0xff] %v6808_v46 }
 0x4ac   :  { %v5058_v5 = vpack.i.bf16 %v788_v59, %v789_v62  ;;  %v6814_v6 = vpop.permute.xlu0 %740 }
 0x4ad   :  { %8449 = vst [vmem:[#allocation75_spill] sm:$0xff] %v6814_v6  ;;  %v785_v28 = vmul.f32 %v6814_v6, %v6543_v60 }
 0x4ae   :  { %5059 = vrot.lane.b32.xlu1 %v5058_v5, %s6003_s16 }
 0x4b1   :  { %v6817_v19 = vpop.permute.xlu1 %742  ;;  %v6819_v22 = vpop.permute.xlu2 %738 }
 0x4b2   :  { %8450 = vst [vmem:[#allocation76_spill] sm:$0xff] %v6817_v19  ;;  %v786_v20 = vmul.f32 %v6817_v19, %v6571_v7  ;;  %v784_v41 = vmul.f32 %v6819_v22, %v6529_v54 }
 0x4b3   :  { %8451 = vst [vmem:[#allocation77_spill] sm:$0xff] %v6819_v22 }
 0x4b4   :  { %v5063_v59 = vpack.i.bf16 %v786_v20, %v787_v24  ;;  %v5068_v62 = vpack.i.bf16 %v784_v41, %v785_v28  ;;  %v6831_v5 = vpop.permute.xlu0 %734 }
 0x4b5   :  { %8452 = vst [vmem:[#allocation78_spill] sm:$0xff] %v6831_v5  ;;  %v782_v35 = vmul.f32 %v6831_v5, %v6571_v7 }
 0x4b6   :  { %5064 = vrot.lane.b32.xlu0 %v5063_v59, %s6003_s16  ;;  %5069 = vrot.lane.b32.xlu2 %v5068_v62, %s6003_s16 }
 0x4b9   :  { %v6833_v2 = vpop.permute.xlu1 %736 }
 0x4ba   :  { %8453 = vst [vmem:[#allocation79_spill] sm:$0xff] %v6833_v2  ;;  %v783_v60 = vmul.f32 %v6833_v2, %v6518_v48 }
 0x4bc   :  { %v5073_v19 = vpack.i.bf16 %v782_v35, %v783_v60 }
 0x4be   :  { %5074 = vrot.lane.b32.xlu1 %v5073_v19, %s6003_s16 }
 0x4f0   :  { %v5040_v54 = vpop.permute.xlu2 %5039 }
 0x4f1   :  { %v5041_v24 = vunpack.i.l.bf16 %v5040_v54  ;;  %v5042_v28 = vunpack.i.h.bf16 %v5040_v54 }
 0x4f3   :  { %1048 = vmatpush.msrb.mxu0 %v5041_v24 }
 0x4f5   :  { %1049 = vmatpush.msrb.mxu0 %v5042_v28 }
 0x500   :  { %v5055_v6 = vpop.permute.xlu2 %5054 }
 0x501   :  { %v5056_v48 = vunpack.i.l.bf16 %v5055_v6  ;;  %v5057_v19 = vunpack.i.h.bf16 %v5055_v6  ;;  %v1080_v6 = vld [vmem:[%s8454_s11 + $0x18] sm:$0xff] }
 0x502   :  { %v964_v35 = vpop.f32.mrf.mxu3  ;;  %1109 = vmatpush.msrb.mxu1 %v1080_v6 }
 0x503   :  { %v965_v28 = vadd.f32 1e-20, %v964_v35 }
 0x505   :  { %5245 = vrcp.f32 %v965_v28 }
 0x510   :  { %v5045_v20 = vpop.permute.xlu1 %5044 }
 0x511   :  { %v5046_v41 = vunpack.i.l.bf16 %v5045_v20  ;;  %v5047_v59 = vunpack.i.h.bf16 %v5045_v20  ;;  %v967_v20 = vpop.f32.mrf.mxu3 }
 0x512   :  { %v968_v5 = vadd.f32 1e-20, %v967_v20 }
 0x513   :  { %1050 = vmatpush.msrb.mxu0 %v5046_v41 }
 0x514   :  { %5247 = vrcp.f32 %v968_v5 }
 0x515   :  { %1051 = vmatpush.msrb.mxu0 %v5047_v59 }
 0x518   :  { %v5050_v62 = vpop.permute.xlu0 %5049 }
 0x519   :  { %v5051_v22 = vunpack.i.l.bf16 %v5050_v62  ;;  %v5052_v7 = vunpack.i.h.bf16 %v5050_v62  ;;  %v970_v2 = vpop.f32.mrf.mxu3 }
 0x51a   :  { %v971_v20 = vadd.f32 1e-20, %v970_v2 }
 0x51b   :  { %1052 = vmatpush.msrb.mxu0 %v5051_v22  ;;  %v5070_v22 = vpop.permute.xlu2 %5069 }
 0x51c   :  { %5249 = vrcp.f32 %v971_v20 }
 0x51d   :  { %1053 = vmatpush.msrb.mxu0 %v5052_v7  ;;  %v5071_v7 = vunpack.i.l.bf16 %v5070_v22 }
 0x51f   :  { %1054 = vmatpush.msrb.mxu0 %v5056_v48  ;;  %v1079_v48 = vld [vmem:[%s8454_s11 + $0x10] sm:$0xff] }
 0x520   :  { %v5060_v60 = vpop.permute.xlu1 %5059  ;;  %1110 = vmatpush.msrb.mxu1 %v1079_v48 }
 0x521   :  { %1055 = vmatpush.msrb.mxu0 %v5057_v19  ;;  %v5061_v54 = vunpack.i.l.bf16 %v5060_v60  ;;  %v5062_v24 = vunpack.i.h.bf16 %v5060_v60  ;;  %v5072_v19 = vunpack.i.h.bf16 %v5070_v22  ;;  %v1078_v60 = vld [vmem:[%s8454_s11 + $0x8] sm:$0xff]  ;;  %v973_v22 = vpop.f32.mrf.mxu3 }
 0x522   :  { %1111 = vmatpush.msrb.mxu1 %v1078_v60 }
 0x523   :  { %1056 = vmatpush.msrb.mxu0 %v5061_v54 }
 0x525   :  { %1057 = vmatpush.msrb.mxu0 %v5062_v24  ;;  %v5246_v24 = vpop.eup %5245 }
 0x528   :  { %v5065_v41 = vpop.permute.xlu0 %5064 }
 0x529   :  { %v5066_v59 = vunpack.i.l.bf16 %v5065_v41  ;;  %v5067_v62 = vunpack.i.h.bf16 %v5065_v41  ;;  %v980_v41 = vmul.f32 %v5246_v24, %v6754_v56 }
 0x52b   :  { %1058 = vmatpush.msrb.mxu0 %v5066_v59  ;;  %v5248_v59 = vpop.eup %5247 }
 0x52c   :  { %v5250_v6 = vpop.eup %5249 }
 0x52d   :  { %1059 = vmatpush.msrb.mxu0 %v5067_v62  ;;  %v981_v62 = vmul.f32 %v5248_v59, %v6758_v10  ;;  %v982_v5 = vmul.f32 %v5250_v6, %v6764_v34  ;;  %v5203_v34 = vld [vmem:[%s8455_s4] ss:$0 sm:$0xff] }
 0x52f   :  { %1060 = vmatpush.msrb.mxu0 %v5071_v7  ;;  %v974_v7 = vadd.f32 1e-20, %v973_v22 }
 0x530   :  { %v5075_v54 = vpop.permute.xlu1 %5074 }
 0x531   :  { %1061 = vmatpush.msrb.mxu0 %v5072_v19  ;;  %v5076_v35 = vunpack.i.l.bf16 %v5075_v54  ;;  %v5077_v28 = vunpack.i.h.bf16 %v5075_v54  ;;  %5251 = vrcp.f32 %v974_v7  ;;  %v1077_v19 = vld [vmem:[%s8454_s11] sm:$0xff] }
 0x532   :  { %1112 = vmatpush.msrb.mxu1 %v1077_v19 }
 0x533   :  { %1062 = vmatpush.msrb.mxu0 %v5076_v35 }
 0x535   :  { %1063 = vmatpush.msrb.mxu0 %v5077_v28 }
 0x536   :  { %1064 = vmatmul.f32.vlgmr.msrb.gmra.mxu0 %v980_v41 }
 0x537   :  { %v5252_v48 = vpop.eup %5251 }
 0x538   :  { %v983_v56 = vmul.f32 %v5252_v48, %v6775_v47 }
 0x53e   :  { %1067 = vmatmul.f32.gmra.mxu0 %v981_v62 }
 0x546   :  { %1070 = vmatmul.f32.gmra.mxu0 %v982_v5 }
 0x54e   :  { %1073 = vmatmul.f32.gmra.mxu0 %v983_v56 }
 0x5b3   :  { %v1065_v2 = vpop.f32.mrf.mxu0 }
 0x5b4   :  { %4772 = vmatmul.msk.f32.vlgmr.msrb.gmra.mxu1 %vm612_vm1, %v1065_v2  ;;  %v6004_v2 = vmov 32.0  }
 0x5b5   :  { %5253 = vrcp.f32 %v6004_v2 }
 0x5bb   :  { %v1068_v54 = vpop.f32.mrf.mxu0 }
 0x5bc   :  { %4773 = vmatmul.msk.f32.gmra.mxu1 %vm612_vm1, %v1068_v54 }
 0x5c3   :  { %v1071_v10 = vpop.f32.mrf.mxu0 }
 0x5c4   :  { %4774 = vmatmul.msk.f32.gmra.mxu1 %vm612_vm1, %v1071_v10 }
 0x5cb   :  { %v1074_v60 = vpop.f32.mrf.mxu0 }
 0x5cc   :  { %4775 = vmatmul.msk.f32.gmra.mxu1 %vm612_vm1, %v1074_v60 }
 0x631   :  { %v1114_v24 = vpop.f32.mrf.mxu1 }
 0x632   :  { %v1115_v35 = vadd.f32 %v5203_v34, %v1114_v24 }
 0x634   :  { %v1126_v47 = vadd.f32 %v1115_v35, %v6486_v26 }
 0x636   :  { %v1132_v28 = vsel %vm612_vm1, %v1126_v47, 0.0 }
 0x637   :  { %1133 = vadd.xlane.f32.xlu0 %v1132_v28 }
 0x639   :  { %v1117_v41 = vpop.f32.mrf.mxu1 }
 0x63a   :  { %v1118_v20 = vadd.f32 %v5203_v34, %v1117_v41 }
 0x63c   :  { %v1127_v59 = vadd.f32 %v1118_v20, %v6496_v32  ;;  %v5254_v32 = vpop.eup %5253 }
 0x63d   :  { %v1145_v54 = vmul.f32 32.0, %v5254_v32  ;;  %vm1149_vm2 = vweird.f32 %v5254_v32 }
 0x63e   :  { %v1135_v22 = vsel %vm612_vm1, %v1127_v59, 0.0 }
 0x63f   :  { %1136 = vadd.xlane.f32.xlu2 %v1135_v22  ;;  %v1146_v10 = vsub.f32 1.0, %v1145_v54 }
 0x641   :  { %v1120_v62 = vpop.f32.mrf.mxu1  ;;  %v1147_v60 = vmul.f32 %v5254_v32, %v1146_v10 }
 0x642   :  { %v1121_v7 = vadd.f32 %v5203_v34, %v1120_v62 }
 0x643   :  { %v1148_v24 = vadd.f32 %v5254_v32, %v1147_v60 }
 0x644   :  { %v1128_v6 = vadd.f32 %v1121_v7, %v6506_v38 }
 0x645   :  { %v6861_v35 = vsel %vm1149_vm2, %v5254_v32, %v1148_v24  ;;  %v1243_v24 = vld [vmem:[%s8456_s24 + $0x10] sm:$0xff] }
 0x646   :  { %v1138_v5 = vsel %vm612_vm1, %v1128_v6, 0.0 }
 0x647   :  { %1139 = vadd.xlane.f32.xlu1 %v1138_v5 }
 0x649   :  { %v1123_v48 = vpop.f32.mrf.mxu1 }
 0x64a   :  { %v1124_v56 = vadd.f32 %v5203_v34, %v1123_v48 }
 0x64c   :  { %v1129_v26 = vadd.f32 %v1124_v56, %v6511_v43 }
 0x64e   :  { %v1141_v19 = vsel %vm612_vm1, %v1129_v26, 0.0 }
 0x64f   :  { %1142 = vadd.xlane.f32.xlu0 %v1141_v19 }
 0x6aa   :  { %v1134_v38 = vpop.xlane.xlu0 %1133 }
 0x6ab   :  { %v1151_v28 = vmul.f32 %v6861_v35, %v1134_v38  ;;  %v1242_v38 = vld [vmem:[%s8456_s24 + $0x8] sm:$0xff] }
 0x6ad   :  { %v6864_v41 = vsub.f32 %v1126_v47, %v1151_v28  ;;  %v1241_v28 = vld [vmem:[%s8456_s24] sm:$0xff] }
 0x6af   :  { %v1159_v43 = vmul.f32 %v6864_v41, %v6864_v41 }
 0x6b1   :  { %v1163_v34 = vsel %vm612_vm1, %v1159_v43, 0.0 }
 0x6b2   :  { %1164 = vadd.xlane.f32.xlu2 %v1163_v34  ;;  %v1137_v20 = vpop.xlane.xlu2 %1136 }
 0x6b3   :  { %v1152_v22 = vmul.f32 %v6861_v35, %v1137_v20 }
 0x6b5   :  { %v6870_v62 = vsub.f32 %v1127_v59, %v1152_v22 }
 0x6b7   :  { %v1160_v7 = vmul.f32 %v6870_v62, %v6870_v62 }
 0x6b9   :  { %v1166_v5 = vsel %vm612_vm1, %v1160_v7, 0.0 }
 0x6ba   :  { %1167 = vadd.xlane.f32.xlu1 %v1166_v5  ;;  %v1140_v47 = vpop.xlane.xlu1 %1139 }
 0x6bb   :  { %v1153_v48 = vmul.f32 %v6861_v35, %v1140_v47 }
 0x6bd   :  { %v6876_v56 = vsub.f32 %v1128_v6, %v1153_v48  ;;  %v1244_v6 = vld [vmem:[%s8456_s24 + $0x18] sm:$0xff] }
 0x6be   :  { %1273 = vmatpush.msrb.mxu3 %v1244_v6 }
 0x6bf   :  { %v1161_v19 = vmul.f32 %v6876_v56, %v6876_v56 }
 0x6c0   :  { %1274 = vmatpush.msrb.mxu3 %v1243_v24 }
 0x6c1   :  { %v1169_v59 = vsel %vm612_vm1, %v1161_v19, 0.0 }
 0x6c2   :  { %1170 = vadd.xlane.f32.xlu0 %v1169_v59  ;;  %v1143_v2 = vpop.xlane.xlu0 %1142  ;;  %1275 = vmatpush.msrb.mxu3 %v1242_v38 }
 0x6c3   :  { %v1154_v32 = vmul.f32 %v6861_v35, %v1143_v2  ;;  %v5205_v2 = vld [vmem:[#allocation7] ss:$0 sm:$0xff] }
 0x6c4   :  { %1276 = vmatpush.msrb.mxu3 %v1241_v28 }
 0x6c5   :  { %v6882_v54 = vsub.f32 %v1129_v26, %v1154_v32 }
 0x6c6   :  { %1855 = vmatpush.msra.mxu3 %v6668_v37 }
 0x6c7   :  { %v1162_v10 = vmul.f32 %v6882_v54, %v6882_v54 }
 0x6c8   :  { %1856 = vmatpush.msra.mxu3 %v6671_v39 }
 0x6c9   :  { %v1172_v60 = vsel %vm612_vm1, %v1162_v10, 0.0 }
 0x6ca   :  { %1173 = vadd.xlane.f32.xlu2 %v1172_v60  ;;  %1857 = vmatpush.msra.mxu3 %v6677_v4 }
 0x6cc   :  { %1858 = vmatpush.msra.mxu3 %v6683_v3 }
 0x6ce   :  { %1859 = vmatpush.msra.mxu3 %v6687_v11 }
 0x6d0   :  { %1860 = vmatpush.msra.mxu3 %v6693_v12 }
 0x6d2   :  { %1861 = vmatpush.msra.mxu3 %v6699_v14 }
 0x6d4   :  { %1862 = vmatpush.msra.mxu3 %v6705_v15 }
 0x6d6   :  { %1863 = vmatpush.msra.mxu3 %v6709_v21  ;;  %v5204_v21 = vld [vmem:[#allocation6] ss:$0 sm:$0xff] }
 0x6d8   :  { %1864 = vmatpush.msra.mxu3 %v6726_v16 }
 0x6da   :  { %1865 = vmatpush.msra.mxu3 %v6730_v17 }
 0x6dc   :  { %1866 = vmatpush.msra.mxu3 %v6734_v27 }
 0x6de   :  { %1867 = vmatpush.msra.mxu3 %v6738_v33 }
 0x6e0   :  { %1868 = vmatpush.msra.mxu3 %v6742_v18 }
 0x6e2   :  { %1869 = vmatpush.msra.mxu3 %v6746_v55 }
 0x6e4   :  { %1870 = vmatpush.msra.mxu3 %v6750_v61 }
 0x725   :  { %v1165_v26 = vpop.xlane.xlu2 %1164 }
 0x726   :  { %v1175_v43 = vmul.f32 %v1165_v26, %v6861_v35 }
 0x728   :  { %v1179_v34 = vadd.f32 1e-05, %v1175_v43 }
 0x72a   :  { %5255 = vrsqrt.f32 %v1179_v34  ;;  %vm1189_vm4 = vweird.f32 %v1179_v34 }
 0x72d   :  { %v1168_v20 = vpop.xlane.xlu1 %1167 }
 0x72e   :  { %v1176_v22 = vmul.f32 %v1168_v20, %v6861_v35 }
 0x730   :  { %v5256_v37 = vpop.eup %5255  ;;  %v1180_v39 = vadd.f32 1e-05, %v1176_v22 }
 0x731   :  { %v1184_v7 = vmul.f32 %v5256_v37, %v1179_v34  ;;  %vm1190_vm3 = vweird.f32 %v5256_v37 }
 0x732   :  { %5257 = vrsqrt.f32 %v1180_v39  ;;  %vm1191_vm5 = vmor %vm1189_vm4, %vm1190_vm3  ;;  %vm1199_vm7 = vweird.f32 %v1180_v39 }
 0x733   :  { %v1185_v4 = vmul.f32 %v5256_v37, %v1184_v7 }
 0x735   :  { %v1186_v3 = vmul.f32 0.5, %v1185_v4  ;;  %v1171_v11 = vpop.xlane.xlu0 %1170 }
 0x736   :  { %v1177_v12 = vmul.f32 %v1171_v11, %v6861_v35 }
 0x737   :  { %v1187_v5 = vsub.f32 1.5, %v1186_v3 }
 0x738   :  { %v5258_v14 = vpop.eup %5257  ;;  %v1181_v47 = vadd.f32 1e-05, %v1177_v12 }
 0x739   :  { %v1188_v15 = vmul.f32 %v5256_v37, %v1187_v5  ;;  %v1194_v48 = vmul.f32 %v5258_v14, %v1180_v39  ;;  %vm1200_vm6 = vweird.f32 %v5258_v14 }
 0x73a   :  { %5259 = vrsqrt.f32 %v1181_v47  ;;  %vm1201_vm8 = vmor %vm1199_vm7, %vm1200_vm6  ;;  %vm1209_vm10 = vweird.f32 %v1181_v47 }
 0x73b   :  { %v1192_v16 = vsel %vm1191_vm5, %v5256_v37, %v1188_v15  ;;  %v1195_v19 = vmul.f32 %v5258_v14, %v1194_v48 }
 0x73c   :  { %v1223_v59 = vmul.f32 %v1192_v16, %v6864_v41 }
 0x73d   :  { %v1196_v17 = vmul.f32 0.5, %v1195_v19  ;;  %v1174_v32 = vpop.xlane.xlu2 %1173 }
 0x73e   :  { %v1178_v10 = vmul.f32 %v1174_v32, %v6861_v35  ;;  %v1230_v27 = vmul.f32 %v5204_v21, %v1223_v59 }
 0x73f   :  { %v1197_v60 = vsub.f32 1.5, %v1196_v17 }
 0x740   :  { %v5260_v6 = vpop.eup %5259  ;;  %v1182_v24 = vadd.f32 1e-05, %v1178_v10  ;;  %v6911_v38 = vadd.f32 %v5205_v2, %v1230_v27 }
 0x741   :  { %v1198_v33 = vmul.f32 %v5258_v14, %v1197_v60  ;;  %v1204_v41 = vmul.f32 %v5260_v6, %v1181_v47  ;;  %vm1210_vm9 = vweird.f32 %v5260_v6 }
 0x742   :  { %5261 = vrsqrt.f32 %v1182_v24  ;;  %4776 = vmatmul.msk.f32.vlgmr.msrb.gmra.mxu3 %vm612_vm1, %v6911_v38  ;;  %vm1211_vm11 = vmor %vm1209_vm10, %vm1210_vm9  ;;  %vm1219_vm13 = vweird.f32 %v1182_v24 }
 0x743   :  { %v1205_v18 = vmul.f32 %v5260_v6, %v1204_v41  ;;  %v1202_v28 = vsel %vm1201_vm8, %v5258_v14, %v1198_v33 }
 0x744   :  { %v1224_v55 = vmul.f32 %v1202_v28, %v6870_v62 }
 0x745   :  { %v1206_v26 = vmul.f32 0.5, %v1205_v18 }
 0x746   :  { %v1231_v43 = vmul.f32 %v5204_v21, %v1224_v55 }
 0x747   :  { %v1207_v34 = vsub.f32 1.5, %v1206_v26 }
 0x748   :  { %v5262_v20 = vpop.eup %5261  ;;  %v6917_v22 = vadd.f32 %v5205_v2, %v1231_v43  ;;  %v1469_v43 = vld [vmem:[%s8457_s6 + $0x18] sm:$0xff] }
 0x749   :  { %v1208_v61 = vmul.f32 %v5260_v6, %v1207_v34  ;;  %v1214_v37 = vmul.f32 %v5262_v20, %v1182_v24  ;;  %vm1220_vm12 = vweird.f32 %v5262_v20  ;;  %1498 = vmatpush.msra.mxu0 %v1469_v43 }
 0x74a   :  { %4777 = vmatmul.msk.f32.gmra.mxu3 %vm612_vm1, %v6917_v22  ;;  %vm1221_vm14 = vmor %vm1219_vm13, %vm1220_vm12 }
 0x74b   :  { %v1215_v39 = vmul.f32 %v5262_v20, %v1214_v37  ;;  %v1212_v7 = vsel %vm1211_vm11, %v5260_v6, %v1208_v61  ;;  %v1468_v37 = vld [vmem:[%s8457_s6 + $0x10] sm:$0xff] }
 0x74c   :  { %v1225_v4 = vmul.f32 %v1212_v7, %v6876_v56  ;;  %v5206_v56 = vld [vmem:[#allocation2] ss:$0 sm:$0xff]  ;;  %1499 = vmatpush.msra.mxu0 %v1468_v37 }
 0x74d   :  { %v1216_v3 = vmul.f32 0.5, %v1215_v39 }
 0x74e   :  { %v1232_v62 = vmul.f32 %v5204_v21, %v1225_v4 }
 0x74f   :  { %v1217_v11 = vsub.f32 1.5, %v1216_v3 }
 0x750   :  { %v6922_v12 = vadd.f32 %v5205_v2, %v1232_v62 }
 0x751   :  { %v1218_v5 = vmul.f32 %v5262_v20, %v1217_v11  ;;  %v1467_v11 = vld [vmem:[%s8457_s6 + $0x8] sm:$0xff] }
 0x752   :  { %4778 = vmatmul.msk.f32.gmra.mxu3 %vm612_vm1, %v6922_v12  ;;  %1500 = vmatpush.msra.mxu0 %v1467_v11 }
 0x753   :  { %v1222_v14 = vsel %vm1221_vm14, %v5262_v20, %v1218_v5 }
 0x754   :  { %v1226_v47 = vmul.f32 %v1222_v14, %v6882_v54 }
 0x756   :  { %v1233_v15 = vmul.f32 %v5204_v21, %v1226_v47 }
 0x758   :  { %v6927_v48 = vadd.f32 %v5205_v2, %v1233_v15 }
 0x75a   :  { %4779 = vmatmul.msk.f32.gmra.mxu3 %vm612_vm1, %v6927_v48 }
 0x7c5   :  { %v1278_v16 = vpop.f32.mrf.mxu3 }
 0x7c6   :  { %v6931_v19 = vadd.f32 %v5206_v56, %v1278_v16  ;;  %v1466_v16 = vld [vmem:[%s8457_s6] sm:$0xff] }
 0x7c7   :  { %1501 = vmatpush.msra.mxu0 %v1466_v16 }
 0x7c8   :  { %v6934_v59 = vmul.f32 0.70710677, %v6931_v19 }
 0x7ca   :  { %v1298_v17 = vmul.f32 %v6934_v59, %v6934_v59 }
 0x7cc   :  { %v6938_v32 = vmin.f32 %v1298_v17, 16.0 }
 0x7cd   :  { %v1281_v54 = vpop.f32.mrf.mxu3 }
 0x7ce   :  { %v1300_v21 = vmul.f32 2.1237322e-06, %v6938_v32  ;;  %v1311_v2 = vmul.f32 3.8918573e-05, %v6938_v32  ;;  %v6942_v10 = vadd.f32 %v5206_v56, %v1281_v54 }
 0x7d0   :  { %v1301_v27 = vadd.f32 0.00028619796, %v1300_v21  ;;  %v1312_v60 = vadd.f32 0.001143296, %v1311_v2  ;;  %v6945_v6 = vmul.f32 0.70710677, %v6942_v10 }
 0x7d2   :  { %v1302_v24 = vmul.f32 %v1301_v27, %v6938_v32  ;;  %v1313_v33 = vmul.f32 %v1312_v60, %v6938_v32  ;;  %v1338_v41 = vmul.f32 %v6945_v6, %v6945_v6 }
 0x7d4   :  { %v1303_v18 = vadd.f32 0.0036580483, %v1302_v24  ;;  %v1314_v28 = vadd.f32 0.014752088, %v1313_v33  ;;  %v6951_v55 = vmin.f32 %v1338_v41, 16.0 }
 0x7d5   :  { %v1284_v26 = vpop.f32.mrf.mxu3 }
 0x7d6   :  { %v1315_v34 = vmul.f32 %v1314_v28, %v6938_v32  ;;  %v6955_v20 = vadd.f32 %v5206_v56, %v1284_v26  ;;  %v1340_v61 = vmul.f32 2.1237322e-06, %v6951_v55  ;;  %v1351_v39 = vmul.f32 3.8918573e-05, %v6951_v55 }
 0x7d7   :  { %v1304_v7 = vmul.f32 %v1303_v18, %v6938_v32 }
 0x7d8   :  { %v1316_v4 = vadd.f32 0.112945676, %v1315_v34  ;;  %v1341_v3 = vadd.f32 0.00028619796, %v1340_v61  ;;  %v6962_v62 = vmul.f32 0.70710677, %v6955_v20 }
 0x7d9   :  { %v1352_v14 = vadd.f32 0.001143296, %v1351_v39  ;;  %v1305_v17 = vadd.f32 0.05243302, %v1304_v7 }
 0x7da   :  { %v1317_v5 = vmul.f32 %v1316_v4, %v6938_v32  ;;  %v1342_v47 = vmul.f32 %v1341_v3, %v6951_v55  ;;  %v1378_v15 = vmul.f32 %v6962_v62, %v6962_v62 }
 0x7db   :  { %v1353_v21 = vmul.f32 %v1352_v14, %v6951_v55  ;;  %v1306_v26 = vmul.f32 %v1305_v17, %v6938_v32 }
 0x7dc   :  { %v1318_v54 = vadd.f32 0.4994258, %v1317_v5  ;;  %v1343_v2 = vadd.f32 0.0036580483, %v1342_v47  ;;  %v6971_v27 = vmin.f32 %v1378_v15, 16.0 }
 0x7dd   :  { %v1287_v60 = vpop.f32.mrf.mxu3  ;;  %v1354_v41 = vadd.f32 0.014752088, %v1353_v21  ;;  %v1307_v5 = vadd.f32 0.18741608, %v1306_v26 }
 0x7de   :  { %v1319_v24 = vmul.f32 %v1318_v54, %v6938_v32  ;;  %v6974_v33 = vadd.f32 %v5206_v56, %v1287_v60  ;;  %v1380_v18 = vmul.f32 2.1237322e-06, %v6971_v27  ;;  %v1391_v28 = vmul.f32 3.8918573e-05, %v6971_v27 }
 0x7df   :  { %v1344_v61 = vmul.f32 %v1343_v2, %v6951_v55  ;;  %v1355_v39 = vmul.f32 %v1354_v41, %v6951_v55  ;;  %v1308_v41 = vmul.f32 %v1307_v5, %v6938_v32 }
 0x7e0   :  { %v1320_v43 = vadd.f32 1.0, %v1319_v24  ;;  %v6980_v34 = vmul.f32 0.70710677, %v6974_v33  ;;  %v1381_v37 = vadd.f32 0.00028619796, %v1380_v18 }
 0x7e1   :  { %v1392_v7 = vadd.f32 0.001143296, %v1391_v28  ;;  %v1356_v3 = vadd.f32 0.112945676, %v1355_v39  ;;  %v1345_v14 = vadd.f32 0.05243302, %v1344_v61 }
 0x7e2   :  { %5263 = vrcp.f32 %v1320_v43  ;;  %v1382_v56 = vmul.f32 %v1381_v37, %v6971_v27  ;;  %v1418_v4 = vmul.f32 %v6980_v34, %v6980_v34  ;;  %v1309_v32 = vadd.f32 1.1283791, %v1308_v41 }
 0x7e3   :  { %v1393_v11 = vmul.f32 %v1392_v7, %v6971_v27  ;;  %v1357_v15 = vmul.f32 %v1356_v3, %v6951_v55  ;;  %v1346_v28 = vmul.f32 %v1345_v14, %v6951_v55  ;;  %v1330_v14 = vand.u32 2147483647, %v1320_v43 }
 0x7e4   :  { %v6988_v47 = vmin.f32 %v1418_v4, 16.0  ;;  %v1383_v17 = vadd.f32 0.0036580483, %v1382_v56  ;;  %v1332_v56 = vand.u32 2147483648, %v1320_v43  ;;  %vm1326_vm2 = vweird.f32 %v1320_v43 }
 0x7e5   :  { %v1394_v16 = vadd.f32 0.014752088, %v1393_v11  ;;  %v1358_v60 = vadd.f32 0.4994258, %v1357_v15  ;;  %vm1331_vm4 = vcmp.eq.f32.partialorder %v1330_v14, 8.507059e+37 }
 0x7e6   :  { %v1420_v54 = vmul.f32 2.1237322e-06, %v6988_v47  ;;  %v1431_v21 = vmul.f32 3.8918573e-05, %v6988_v47  ;;  %v1384_v4 = vmul.f32 %v1383_v17, %v6971_v27 }
 0x7e7   :  { %v1395_v24 = vmul.f32 %v1394_v16, %v6971_v27  ;;  %v1359_v61 = vmul.f32 %v1358_v60, %v6951_v55 }
 0x7e8   :  { %v5264_v2 = vpop.eup %5263  ;;  %v1421_v26 = vadd.f32 0.00028619796, %v1420_v54  ;;  %v1432_v39 = vadd.f32 0.001143296, %v1431_v21  ;;  %v1347_v54 = vadd.f32 0.18741608, %v1346_v28 }
 0x7e9   :  { %v1322_v18 = vmul.f32 %v5264_v2, %v1320_v43  ;;  %v1396_v37 = vadd.f32 0.112945676, %v1395_v24  ;;  %v1360_v11 = vadd.f32 1.0, %v1359_v61  ;;  %vm1327_vm15 = vweird.f32 %v5264_v2 }
 0x7ea   :  { %v1422_v3 = vmul.f32 %v1421_v26, %v6988_v47  ;;  %v1433_v16 = vmul.f32 %v1432_v39, %v6988_v47  ;;  %v1385_v21 = vadd.f32 0.05243302, %v1384_v4  ;;  %vm1328_vm3 = vmor %vm1326_vm2, %vm1327_vm15  ;;  %v1310_v26 = vmul.f32 %v1309_v32, %v6934_v59 }
 0x7eb   :  { %v1323_v7 = vsub.f32 1.0, %v1322_v18  ;;  %v1397_v15 = vmul.f32 %v1396_v37, %v6971_v27  ;;  %5265 = vrcp.f32 %v1360_v11  ;;  %v1333_v18 = vor.u32 1.1754944e-38, %v1332_v56 }
 0x7ec   :  { %v1423_v17 = vadd.f32 0.0036580483, %v1422_v3  ;;  %v1434_v46 = vadd.f32 0.014752088, %v1433_v16  ;;  %v1348_v39 = vmul.f32 %v1347_v54, %v6951_v55  ;;  %v1386_v43 = vmul.f32 %v1385_v21, %v6971_v27 }
 0x7ed   :  { %v1324_v5 = vmul.f32 %v5264_v2, %v1323_v7  ;;  %v1398_v24 = vadd.f32 0.4994258, %v1397_v15  ;;  %v1290_v59 = vmul.f32 0.5, %v6931_v19  ;;  %v1370_v54 = vand.u32 2147483647, %v1360_v11 }
 0x7ee   :  { %v1435_v28 = vmul.f32 %v1434_v46, %v6988_v47  ;;  %v1424_v56 = vmul.f32 %v1423_v17, %v6988_v47  ;;  %v1387_v14 = vadd.f32 0.18741608, %v1386_v43  ;;  %vm1366_vm6 = vweird.f32 %v1360_v11 }
 0x7ef   :  { %v1325_v60 = vadd.f32 %v5264_v2, %v1324_v5  ;;  %v1399_v37 = vmul.f32 %v1398_v24, %v6971_v27  ;;  %v1372_v24 = vand.u32 2147483648, %v1360_v11  ;;  %vm1371_vm8 = vcmp.eq.f32.partialorder %v1370_v54, 8.507059e+37 }
 0x7f0   :  { %v1436_v3 = vadd.f32 0.112945676, %v1435_v28  ;;  %v1425_v46 = vadd.f32 0.05243302, %v1424_v56 }
 0x7f1   :  { %v1329_v61 = vsel %vm1328_vm3, %v5264_v2, %v1325_v60  ;;  %v1400_v4 = vadd.f32 1.0, %v1399_v37  ;;  %v5266_v15 = vpop.eup %5265  ;;  %v1349_v2 = vadd.f32 1.1283791, %v1348_v39  ;;  %v1373_v39 = vor.u32 1.1754944e-38, %v1372_v24 }
 0x7f2   :  { %v1334_v41 = vsel %vm1331_vm4, %v1333_v18, %v1329_v61  ;;  %v1362_v5 = vmul.f32 %v5266_v15, %v1360_v11  ;;  %v1437_v55 = vmul.f32 %v1436_v3, %v6988_v47  ;;  %vm1367_vm5 = vweird.f32 %v5266_v15 }
 0x7f3   :  { %v1335_v7 = vmul.f32 %v1334_v41, %v1310_v26  ;;  %5267 = vrcp.f32 %v1400_v4  ;;  %v1350_v37 = vmul.f32 %v1349_v2, %v6945_v6  ;;  %v1388_v41 = vmul.f32 %v1387_v14, %v6971_v27  ;;  %vm1368_vm7 = vmor %vm1366_vm6, %vm1367_vm5 }
 0x7f4   :  { %v1363_v60 = vsub.f32 1.0, %v1362_v5  ;;  %v1438_v26 = vadd.f32 0.4994258, %v1437_v55  ;;  %vm1406_vm10 = vweird.f32 %v1400_v4  ;;  %v1291_v14 = vmul.f32 0.5, %v6942_v10 }
 0x7f5   :  { %v4780_v16 = vclamps-f32 %v1335_v7, 1.0  ;;  %v1426_v7 = vmul.f32 %v1425_v46, %v6988_v47  ;;  %v1389_v11 = vadd.f32 1.1283791, %v1388_v41  ;;  %v1292_v10 = vmul.f32 0.5, %v6955_v20 }
 0x7f6   :  { %v1364_v18 = vmul.f32 %v5266_v15, %v1363_v60  ;;  %v1439_v19 = vmul.f32 %v1438_v26, %v6988_v47  ;;  %v1410_v60 = vand.u32 2147483647, %v1400_v4 }
 0x7f7   :  { %v1458_v32 = vadd.f32 1.0, %v4780_v16  ;;  %v1427_v6 = vadd.f32 0.18741608, %v1426_v7  ;;  %v1390_v46 = vmul.f32 %v1389_v11, %v6962_v62  ;;  %v1293_v11 = vmul.f32 0.5, %v6974_v33 }
 0x7f8   :  { %v1365_v61 = vadd.f32 %v5266_v15, %v1364_v18  ;;  %v1440_v56 = vadd.f32 1.0, %v1439_v19  ;;  %vm1411_vm12 = vcmp.eq.f32.partialorder %v1410_v60, 8.507059e+37 }
 0x7f9   :  { %v1462_v21 = vmul.f32 %v1458_v32, %v1290_v59  ;;  %v5268_v17 = vpop.eup %5267  ;;  %v1412_v59 = vand.u32 2147483648, %v1400_v4 }
 0x7fa   :  { %v1402_v28 = vmul.f32 %v5268_v17, %v1400_v4  ;;  %v1369_v43 = vsel %vm1368_vm7, %v5266_v15, %v1365_v61  ;;  %5269 = vrcp.f32 %v1440_v56  ;;  %vm1407_vm9 = vweird.f32 %v5268_v17 }
 0x7fb   :  { %4784 = vmatmul.msk.f32.vlgmr.msra.gmra.mxu0 %vm612_vm1, %v1462_v21  ;;  %v1374_v3 = vsel %vm1371_vm8, %v1373_v39, %v1369_v43  ;;  %vm1408_vm11 = vmor %vm1406_vm10, %vm1407_vm9  ;;  %v1413_v15 = vor.u32 1.1754944e-38, %v1412_v59  ;;  %v1428_v21 = vmul.f32 %v1427_v6, %v6988_v47  ;;  %v1452_v39 = vand.u32 2147483648, %v1440_v56  ;;  %v5207_v6 = vld [vmem:[#allocation4] ss:$0 sm:$0xff] }
 0x7fc   :  { %v1403_v16 = vsub.f32 1.0, %v1402_v28  ;;  %v1375_v5 = vmul.f32 %v1374_v3, %v1350_v37  ;;  %v1450_v62 = vand.u32 2147483647, %v1440_v56  ;;  %vm1446_vm14 = vweird.f32 %v1440_v56 }
 0x7fd   :  { %v1429_v41 = vadd.f32 1.1283791, %v1428_v21  ;;  %v1453_v47 = vor.u32 1.1754944e-38, %v1452_v39 }
 0x7fe   :  { %v1404_v32 = vmul.f32 %v5268_v17, %v1403_v16  ;;  %v4781_v2 = vclamps-f32 %v1375_v5, 1.0  ;;  %vm1451_vm2 = vcmp.eq.f32.partialorder %v1450_v62, 8.507059e+37 }
 0x7ff   :  { %v1430_v3 = vmul.f32 %v1429_v41, %v6980_v34 }
 0x800   :  { %v1405_v27 = vadd.f32 %v5268_v17, %v1404_v32  ;;  %v1459_v55 = vadd.f32 1.0, %v4781_v2  ;;  %v5270_v24 = vpop.eup %5269 }
 0x801   :  { %v1442_v19 = vmul.f32 %v5270_v24, %v1440_v56  ;;  %vm1447_vm13 = vweird.f32 %v5270_v24 }
 0x802   :  { %v1409_v54 = vsel %vm1408_vm11, %v5268_v17, %v1405_v27  ;;  %v1463_v18 = vmul.f32 %v1459_v55, %v1291_v14  ;;  %vm1448_vm15 = vmor %vm1446_vm14, %vm1447_vm13 }
 0x803   :  { %v1414_v26 = vsel %vm1411_vm12, %v1413_v15, %v1409_v54  ;;  %v1443_v4 = vsub.f32 1.0, %v1442_v19 }
 0x804   :  { %v1415_v61 = vmul.f32 %v1414_v26, %v1390_v46  ;;  %4785 = vmatmul.msk.f32.gmra.mxu0 %vm612_vm1, %v1463_v18 }
 0x805   :  { %v1444_v7 = vmul.f32 %v5270_v24, %v1443_v4 }
 0x806   :  { %v4782_v37 = vclamps-f32 %v1415_v61, 1.0 }
 0x807   :  { %v1445_v43 = vadd.f32 %v5270_v24, %v1444_v7 }
 0x808   :  { %v1460_v28 = vadd.f32 1.0, %v4782_v37 }
 0x809   :  { %v1449_v16 = vsel %vm1448_vm15, %v5270_v24, %v1445_v43 }
 0x80a   :  { %v1464_v17 = vmul.f32 %v1460_v28, %v1292_v10  ;;  %v1454_v5 = vsel %vm1451_vm2, %v1453_v47, %v1449_v16 }
 0x80b   :  { %v1455_v59 = vmul.f32 %v1454_v5, %v1430_v3 }
 0x80c   :  { %4786 = vmatmul.msk.f32.gmra.mxu0 %vm612_vm1, %v1464_v17 }
 0x80d   :  { %v4783_v20 = vclamps-f32 %v1455_v59, 1.0 }
 0x80f   :  { %v1461_v32 = vadd.f32 1.0, %v4783_v20 }
 0x811   :  { %v1465_v60 = vmul.f32 %v1461_v32, %v1293_v11  ;;  %v4791_v11 = vld [vmem:[%s8439_s2 + $0x38] sm:$0xff]  ;;  %v4790_v32 = vld [vmem:[%s8439_s2 + $0x30] sm:$0xff] }
 0x812   :  { %1657 = vmatpush.msra.mxu1 %v4791_v11 }
 0x814   :  { %4787 = vmatmul.msk.f32.gmra.mxu0 %vm612_vm1, %v1465_v60  ;;  %1658 = vmatpush.msra.mxu1 %v4790_v32  ;;  %v4789_v60 = vld [vmem:[%s8439_s2 + $0x28] sm:$0xff] }
 0x816   :  { %1659 = vmatpush.msra.mxu1 %v4789_v60 }
 0x878   :  { %v1503_v2 = vpop.f32.mrf.mxu0 }
 0x879   :  { %v1504_v56 = vadd.f32 %v5207_v6, %v1503_v2 }
 0x87b   :  { %v1515_v27 = vadd.f32 %v1504_v56, %v6911_v38  ;;  %v4788_v56 = vld [vmem:[%s8439_s2 + $0x20] sm:$0xff] }
 0x87c   :  { %1660 = vmatpush.msra.mxu1 %v4788_v56 }
 0x87d   :  { %v1521_v34 = vsel %vm612_vm1, %v1515_v27, 0.0 }
 0x87e   :  { %1522 = vadd.xlane.f32.xlu1 %v1521_v34 }
 0x881   :  { %v1506_v14 = vpop.f32.mrf.mxu0 }
 0x882   :  { %v1507_v55 = vadd.f32 %v5207_v6, %v1506_v14 }
 0x884   :  { %v1516_v15 = vadd.f32 %v1507_v55, %v6917_v22 }
 0x886   :  { %v1524_v46 = vsel %vm612_vm1, %v1516_v15, 0.0 }
 0x887   :  { %1525 = vadd.xlane.f32.xlu0 %v1524_v46 }
 0x889   :  { %v1509_v33 = vpop.f32.mrf.mxu0 }
 0x88a   :  { %v1510_v54 = vadd.f32 %v5207_v6, %v1509_v33 }
 0x88c   :  { %v1517_v24 = vadd.f32 %v1510_v54, %v6922_v12 }
 0x88e   :  { %v1527_v21 = vsel %vm612_vm1, %v1517_v24, 0.0 }
 0x88f   :  { %1528 = vadd.xlane.f32.xlu2 %v1527_v21 }
 0x891   :  { %v1512_v18 = vpop.f32.mrf.mxu0 }
 0x892   :  { %v1513_v26 = vadd.f32 %v5207_v6, %v1512_v18 }
 0x894   :  { %v1518_v38 = vadd.f32 %v1513_v26, %v6927_v48  ;;  %v5208_v26 = vld [vmem:[#allocation9] ss:$0 sm:$0xff] }
 0x896   :  { %v1530_v61 = vsel %vm612_vm1, %v1518_v38, 0.0 }
 0x897   :  { %1531 = vadd.xlane.f32.xlu1 %v1530_v61 }
 0x8f1   :  { %v1523_v19 = vpop.xlane.xlu1 %1522 }
 0x8f2   :  { %v1533_v22 = vmul.f32 %v1523_v19, %v6861_v35 }
 0x8f4   :  { %v1537_v37 = vsub.f32 %v1515_v27, %v1533_v22 }
 0x8f6   :  { %v1541_v4 = vmul.f32 %v1537_v37, %v1537_v37 }
 0x8f8   :  { %v1545_v10 = vsel %vm612_vm1, %v1541_v4, 0.0 }
 0x8f9   :  { %1546 = vadd.xlane.f32.xlu0 %v1545_v10  ;;  %v5209_v10 = vld [vmem:[#allocation10] ss:$0 sm:$0xff] }
 0x8fa   :  { %v1526_v41 = vpop.xlane.xlu0 %1525 }
 0x8fb   :  { %v1534_v12 = vmul.f32 %v1526_v41, %v6861_v35 }
 0x8fd   :  { %v7034_v39 = vsub.f32 %v1516_v15, %v1534_v12 }
 0x8ff   :  { %v1542_v48 = vmul.f32 %v7034_v39, %v7034_v39 }
 0x901   :  { %v1548_v28 = vsel %vm612_vm1, %v1542_v48, 0.0 }
 0x902   :  { %v1529_v7 = vpop.xlane.xlu2 %1528  ;;  %1549 = vadd.xlane.f32.xlu2 %v1548_v28 }
 0x903   :  { %v1535_v62 = vmul.f32 %v1529_v7, %v6861_v35 }
 0x905   :  { %v7040_v17 = vsub.f32 %v1517_v24, %v1535_v62 }
 0x907   :  { %v1543_v43 = vmul.f32 %v7040_v17, %v7040_v17 }
 0x909   :  { %v1551_v47 = vsel %vm612_vm1, %v1543_v43, 0.0 }
 0x90a   :  { %1552 = vadd.xlane.f32.xlu1 %v1551_v47  ;;  %v1532_v3 = vpop.xlane.xlu1 %1531 }
 0x90b   :  { %v1536_v16 = vmul.f32 %v1532_v3, %v6861_v35 }
 0x90d   :  { %v7046_v5 = vsub.f32 %v1518_v38, %v1536_v16 }
 0x90f   :  { %v1544_v59 = vmul.f32 %v7046_v5, %v7046_v5 }
 0x911   :  { %v1554_v20 = vsel %vm612_vm1, %v1544_v59, 0.0 }
 0x912   :  { %1555 = vadd.xlane.f32.xlu0 %v1554_v20 }
 0x96c   :  { %v1547_v6 = vpop.xlane.xlu0 %1546 }
 0x96d   :  { %v1557_v2 = vmul.f32 %v1547_v6, %v6861_v35 }
 0x96f   :  { %v1561_v27 = vadd.f32 1e-05, %v1557_v2 }
 0x971   :  { %5271 = vrsqrt.f32 %v1561_v27  ;;  %vm1571_vm4 = vweird.f32 %v1561_v27 }
 0x975   :  { %v1550_v55 = vpop.xlane.xlu2 %1549 }
 0x976   :  { %v1558_v15 = vmul.f32 %v1550_v55, %v6861_v35 }
 0x977   :  { %v5272_v34 = vpop.eup %5271 }
 0x978   :  { %v1566_v14 = vmul.f32 %v5272_v34, %v1561_v27  ;;  %v1562_v33 = vadd.f32 1e-05, %v1558_v15  ;;  %vm1572_vm3 = vweird.f32 %v5272_v34 }
 0x979   :  { %vm1573_vm5 = vmor %vm1571_vm4, %vm1572_vm3 }
 0x97a   :  { %v1567_v46 = vmul.f32 %v5272_v34, %v1566_v14  ;;  %5273 = vrsqrt.f32 %v1562_v33  ;;  %vm1581_vm7 = vweird.f32 %v1562_v33 }
 0x97c   :  { %v1568_v54 = vmul.f32 0.5, %v1567_v46 }
 0x97d   :  { %v1553_v18 = vpop.xlane.xlu1 %1552 }
 0x97e   :  { %v1569_v24 = vsub.f32 1.5, %v1568_v54  ;;  %v1559_v38 = vmul.f32 %v1553_v18, %v6861_v35 }
 0x980   :  { %v1570_v21 = vmul.f32 %v5272_v34, %v1569_v24  ;;  %v5274_v19 = vpop.eup %5273  ;;  %v1563_v4 = vadd.f32 1e-05, %v1559_v38 }
 0x981   :  { %v1576_v41 = vmul.f32 %v5274_v19, %v1562_v33  ;;  %vm1582_vm6 = vweird.f32 %v5274_v19 }
 0x982   :  { %v1574_v61 = vsel %vm1573_vm5, %v5272_v34, %v1570_v21  ;;  %5275 = vrsqrt.f32 %v1563_v4  ;;  %vm1583_vm8 = vmor %vm1581_vm7, %vm1582_vm6  ;;  %vm1591_vm10 = vweird.f32 %v1563_v4 }
 0x983   :  { %v1605_v22 = vmul.f32 %v1574_v61, %v1537_v37  ;;  %v1577_v48 = vmul.f32 %v5274_v19, %v1576_v41 }
 0x985   :  { %v1612_v12 = vmul.f32 %v5208_v26, %v1605_v22  ;;  %v1578_v7 = vmul.f32 0.5, %v1577_v48  ;;  %v1556_v62 = vpop.xlane.xlu0 %1555  ;;  %v5210_v22 = vld [vmem:[%s8443_s26 + $0x1] ss:$0 sm:$0xff] }
 0x986   :  { %v1560_v47 = vmul.f32 %v1556_v62, %v6861_v35 }
 0x987   :  { %v7058_v28 = vadd.f32 %v5209_v10, %v1612_v12  ;;  %v1579_v43 = vsub.f32 1.5, %v1578_v7 }
 0x988   :  { %v5276_v3 = vpop.eup %5275  ;;  %v1564_v59 = vadd.f32 1e-05, %v1560_v47 }
 0x989   :  { %4793 = vmatmul.msk.f32.vlgmr.msra.gmra.mxu1 %vm612_vm1, %v7058_v28  ;;  %v1580_v16 = vmul.f32 %v5274_v19, %v1579_v43  ;;  %v1586_v37 = vmul.f32 %v5276_v3, %v1563_v4  ;;  %vm1592_vm9 = vweird.f32 %v5276_v3 }
 0x98a   :  { %5277 = vrsqrt.f32 %v1564_v59  ;;  %vm1593_vm11 = vmor %vm1591_vm10, %vm1592_vm9  ;;  %vm1601_vm13 = vweird.f32 %v1564_v59 }
 0x98b   :  { %v1587_v20 = vmul.f32 %v5276_v3, %v1586_v37  ;;  %v1584_v11 = vsel %vm1583_vm8, %v5274_v19, %v1580_v16 }
 0x98c   :  { %v1606_v32 = vmul.f32 %v1584_v11, %v7034_v39 }
 0x98d   :  { %v1588_v60 = vmul.f32 0.5, %v1587_v20 }
 0x98e   :  { %v1613_v6 = vmul.f32 %v5208_v26, %v1606_v32 }
 0x98f   :  { %v1589_v2 = vsub.f32 1.5, %v1588_v60 }
 0x990   :  { %v7064_v56 = vadd.f32 %v5209_v10, %v1613_v6  ;;  %v5278_v27 = vpop.eup %5277 }
 0x991   :  { %v1590_v34 = vmul.f32 %v5276_v3, %v1589_v2  ;;  %v1596_v14 = vmul.f32 %v5278_v27, %v1564_v59  ;;  %vm1602_vm12 = vweird.f32 %v5278_v27 }
 0x992   :  { %4794 = vmatmul.msk.f32.gmra.mxu1 %vm612_vm1, %v7064_v56  ;;  %vm1603_vm14 = vmor %vm1601_vm13, %vm1602_vm12 }
 0x993   :  { %v1594_v55 = vsel %vm1593_vm11, %v5276_v3, %v1590_v34  ;;  %v1597_v15 = vmul.f32 %v5278_v27, %v1596_v14 }
 0x994   :  { %v1607_v46 = vmul.f32 %v1594_v55, %v7040_v17 }
 0x995   :  { %v1598_v39 = vmul.f32 0.5, %v1597_v15 }
 0x996   :  { %v1614_v33 = vmul.f32 %v5208_v26, %v1607_v46 }
 0x997   :  { %v1599_v54 = vsub.f32 1.5, %v1598_v39 }
 0x998   :  { %v7069_v24 = vadd.f32 %v5209_v10, %v1614_v33 }
 0x999   :  { %v1600_v21 = vmul.f32 %v5278_v27, %v1599_v54 }
 0x99a   :  { %4795 = vmatmul.msk.f32.gmra.mxu1 %vm612_vm1, %v7069_v24 }
 0x99b   :  { %v1604_v18 = vsel %vm1603_vm14, %v5278_v27, %v1600_v21 }
 0x99c   :  { %v1608_v38 = vmul.f32 %v1604_v18, %v7046_v5 }
 0x99e   :  { %v1615_v61 = vmul.f32 %v5208_v26, %v1608_v38 }
 0x9a0   :  { %v7074_v19 = vadd.f32 %v5209_v10, %v1615_v61 }
 0x9a2   :  { %4796 = vmatmul.msk.f32.gmra.mxu1 %vm612_vm1, %v7074_v19 }
 0xa06   :  { %v1662_v17 = vpop.f32.mrf.mxu1 }
 0xa0f   :  { %v1665_v4 = vpop.f32.mrf.mxu1 }
 0xa10   :  { %v7079_v41 = vadd.f32 %v5210_v22, %v1665_v4 }
 0xa12   :  { %v1687_v12 = vmul.f32 %v7079_v41, %v6520_v49  ;;  %v1683_v3 = vmul.f32 %v7079_v41, %v6536_v57 }
 0xa14   :  { %1748 = vrot.lane.b32.xlu0 %v1687_v12, %s6002_s30 }
 0xa17   :  { %v1668_v48 = vpop.f32.mrf.mxu1 }
 0xa18   :  { %v7084_v7 = vadd.f32 %v5210_v22, %v1668_v48 }
 0xa1a   :  { %v1688_v5 = vmul.f32 %v7084_v7, %v6522_v50  ;;  %v1684_v62 = vmul.f32 %v7084_v7, %v6541_v58  ;;  %v7100_v50 = vadd.f32 %v5210_v22, %v1662_v17  ;;  %v1704_v38 = vmul.f32 %v7084_v7, %v6762_v29 }
 0xa1b   :  { %v1703_v17 = vmul.f32 %v7079_v41, %v6779_v51 }
 0xa1c   :  { %1750 = vrot.lane.b32.xlu1 %v1688_v5, %s6002_s30  ;;  %v1686_v58 = vmul.f32 %v7100_v50, %v6575_v9  ;;  %v1675_v9 = vmul.f32 %v7079_v41, %v6610_v36  ;;  %v1702_v4 = vmul.f32 %v7100_v50, %v6773_v44  ;;  %v1698_v12 = vmul.f32 %v7100_v50, %v6792_v13  ;;  %v8458_v5 = vld [vmem:[#allocation71_spill] sm:$0xff]  ;;  %v8461_v13 = vld [vmem:[#allocation76_spill] sm:$0xff] }
 0xa1d   :  { %v8460_v44 = vld [vmem:[#allocation75_spill] sm:$0xff] }
 0xa1e   :  { %v5083_v48 = vpack.i.bf16 %v1702_v4, %v1703_v17 }
 0xa1f   :  { %v1671_v26 = vpop.f32.mrf.mxu1 }
 0xa20   :  { %v7089_v10 = vadd.f32 %v5210_v22, %v1671_v26  ;;  %v1699_v22 = vmul.f32 %v7079_v41, %v6787_v63  ;;  %v1700_v26 = vmul.f32 %v7084_v7, %v8458_v5  ;;  %v8459_v63 = vld [vmem:[#allocation74_spill] sm:$0xff] }
 0xa22   :  { %v1689_v43 = vmul.f32 %v7089_v10, %v6515_v45  ;;  %v1685_v49 = vmul.f32 %v7089_v10, %v6526_v52  ;;  %v1681_v47 = vmul.f32 %v7089_v10, %v6558_v1  ;;  %v1682_v45 = vmul.f32 %v7100_v50, %v6594_v23 }
 0xa23   :  { %v1678_v52 = vmul.f32 %v7100_v50, %v6573_v8  ;;  %v1679_v1 = vmul.f32 %v7079_v41, %v6599_v25  ;;  %v1680_v23 = vmul.f32 %v7084_v7, %v6556_v0  ;;  %v1676_v8 = vmul.f32 %v7084_v7, %v6617_v40 }
 0xa24   :  { %1742 = vrot.lane.b32.xlu1 %v1684_v62, %s6002_s30  ;;  %1752 = vrot.lane.b32.xlu2 %v1689_v43, %s6002_s30  ;;  %v1677_v57 = vmul.f32 %v7089_v10, %v6605_v30  ;;  %v1674_v25 = vmul.f32 %v7100_v50, %v6621_v42  ;;  %v1705_v18 = vmul.f32 %v7089_v10, %v6767_v31 }
 0xa25   :  { %1744 = vrot.lane.b32.xlu0 %v1685_v49, %s6002_s30  ;;  %v1701_v31 = vmul.f32 %v7089_v10, %v6781_v53  ;;  %v5093_v29 = vpack.i.bf16 %v1698_v12, %v1699_v22  ;;  %v1695_v62 = vmul.f32 %v7079_v41, %v8459_v63  ;;  %v1693_v43 = vmul.f32 %v7089_v10, %v8460_v44  ;;  %v8462_v49 = vld [vmem:[#allocation77_spill] sm:$0xff] }
 0xa26   :  { %v5078_v61 = vpack.i.bf16 %v1704_v38, %v1705_v18  ;;  %v1694_v53 = vmul.f32 %v7100_v50, %v8461_v13  ;;  %v5402_v38 = vld [vmem:[#allocation12 + $0x18] sm:$0xff] }
 0xa27   :  { %v5088_v51 = vpack.i.bf16 %v1700_v26, %v1701_v31 }
 0xa2c   :  { %1736 = vrot.lane.b32.xlu1 %v1681_v47, %s6002_s30  ;;  %1746 = vrot.lane.b32.xlu2 %v1686_v58, %s6002_s30  ;;  %v1692_v47 = vmul.f32 %v7084_v7, %v8462_v49  ;;  %v5103_v58 = vpack.i.bf16 %v1694_v53, %v1695_v62 }
 0xa2d   :  { %1738 = vrot.lane.b32.xlu0 %v1682_v45, %s6002_s30  ;;  %v8463_v45 = vld [vmem:[#allocation73_spill] sm:$0xff] }
 0xa34   :  { %1730 = vrot.lane.b32.xlu1 %v1678_v52, %s6002_s30  ;;  %1740 = vrot.lane.b32.xlu2 %v1683_v3, %s6002_s30  ;;  %v1697_v52 = vmul.f32 %v7089_v10, %v8463_v45  ;;  %v5108_v3 = vpack.i.bf16 %v1692_v47, %v1693_v43 }
 0xa35   :  { %1732 = vrot.lane.b32.xlu0 %v1679_v1, %s6002_s30  ;;  %v8464_v1 = vld [vmem:[#allocation72_spill] sm:$0xff] }
 0xa3c   :  { %1724 = vrot.lane.b32.xlu1 %v1675_v9, %s6002_s30  ;;  %1734 = vrot.lane.b32.xlu2 %v1680_v23, %s6002_s30  ;;  %v1696_v9 = vmul.f32 %v7084_v7, %v8464_v1  ;;  %v4819_v1 = vld [vmem:[%s8454_s11 + $0x30] sm:$0xff] }
 0xa3d   :  { %1726 = vrot.lane.b32.xlu0 %v1676_v8, %s6002_s30  ;;  %v8465_v8 = vld [vmem:[#allocation79_spill] sm:$0xff] }
 0xa3e   :  { %v5098_v23 = vpack.i.bf16 %v1696_v9, %v1697_v52  ;;  %v4818_v9 = vld [vmem:[%s8454_s11 + $0x28] sm:$0xff] }
 0xa44   :  { %1728 = vrot.lane.b32.xlu2 %v1677_v57, %s6002_s30  ;;  %v1691_v57 = vmul.f32 %v7079_v41, %v8465_v8 }
 0xa4c   :  { %1722 = vrot.lane.b32.xlu2 %v1674_v25, %s6002_s30  ;;  %v8466_v25 = vld [vmem:[#allocation78_spill] sm:$0xff] }
 0xa7e   :  { %v1753_v0 = vpop.permute.xlu2 %1752 }
 0xa7f   :  { %4797 = vmatpush.xpose.msk.msrb.mxu2 %vm612_vm1, %v1753_v0  ;;  %v1690_v0 = vmul.f32 %v7100_v50, %v8466_v25 }
 0xa86   :  { %v1749_v40 = vpop.permute.xlu0 %1748  ;;  %v1747_v16 = vpop.permute.xlu2 %1746 }
 0xa8e   :  { %v1751_v36 = vpop.permute.xlu1 %1750  ;;  %v1741_v42 = vpop.permute.xlu2 %1740 }
 0xa8f   :  { %4798 = vmatpush.xpose.msk.msrb.mxu2 %vm612_vm1, %v1751_v36  ;;  %v5113_v36 = vpack.i.bf16 %v1690_v0, %v1691_v57 }
 0xa93   :  { %4799 = vmatpush.xpose.msk.msrb.mxu2 %vm612_vm1, %v1749_v40 }
 0xa96   :  { %v1743_v37 = vpop.permute.xlu1 %1742  ;;  %v1735_v11 = vpop.permute.xlu2 %1734 }
 0xa97   :  { %4800 = vmatpush.xpose.msk.msrb.mxu2 %vm612_vm1, %v1747_v16  ;;  %v1745_v30 = vpop.permute.xlu0 %1744 }
 0xa9b   :  { %4801 = vmatpush.xpose.msk.msrb.mxu2 %vm612_vm1, %v1745_v30 }
 0xa9e   :  { %v1737_v20 = vpop.permute.xlu1 %1736  ;;  %v1729_v6 = vpop.permute.xlu2 %1728 }
 0xa9f   :  { %4802 = vmatpush.xpose.msk.msrb.mxu2 %vm612_vm1, %v1743_v37  ;;  %v1739_v59 = vpop.permute.xlu0 %1738 }
 0xaa3   :  { %4803 = vmatpush.xpose.msk.msrb.mxu2 %vm612_vm1, %v1741_v42 }
 0xaa6   :  { %v1731_v60 = vpop.permute.xlu1 %1730  ;;  %v1723_v34 = vpop.permute.xlu2 %1722 }
 0xaa7   :  { %4804 = vmatpush.xpose.msk.msrb.mxu2 %vm612_vm1, %v1739_v59  ;;  %v1733_v32 = vpop.permute.xlu0 %1732  ;;  %v5399_v59 = vld [vmem:[#allocation12] sm:$0xff] }
 0xaab   :  { %4805 = vmatpush.xpose.msk.msrb.mxu2 %vm612_vm1, %v1737_v20 }
 0xaae   :  { %v1725_v27 = vpop.permute.xlu1 %1724 }
 0xaaf   :  { %4806 = vmatpush.xpose.msk.msrb.mxu2 %vm612_vm1, %v1735_v11  ;;  %v1727_v2 = vpop.permute.xlu0 %1726 }
 0xab3   :  { %4807 = vmatpush.xpose.msk.msrb.mxu2 %vm612_vm1, %v1733_v32 }
 0xab7   :  { %4808 = vmatpush.xpose.msk.msrb.mxu2 %vm612_vm1, %v1731_v60  ;;  %v5400_v60 = vld [vmem:[#allocation12 + $0x8] sm:$0xff] }
 0xabb   :  { %4809 = vmatpush.xpose.msk.msrb.mxu2 %vm612_vm1, %v1729_v6 }
 0xabf   :  { %4810 = vmatpush.xpose.msk.msrb.mxu2 %vm612_vm1, %v1727_v2 }
 0xac3   :  { %4811 = vmatpush.xpose.msk.msrb.mxu2 %vm612_vm1, %v1725_v27 }
 0xac7   :  { %4812 = vmatpush.xpose.msk.msrb.mxu2 %vm612_vm1, %v1723_v34 }
 0xaca   :  { %4813 = vmatmul.msk.f32.vlgmr.msrb.gmra.mxu2 %vm612_vm1, %v7100_v50 }
 0xad2   :  { %4814 = vmatmul.msk.f32.gmra.mxu2 %vm612_vm1, %v7079_v41 }
 0xada   :  { %4815 = vmatmul.msk.f32.gmra.mxu2 %vm612_vm1, %v7084_v7 }
 0xae2   :  { %4816 = vmatmul.msk.f32.gmra.mxu2 %vm612_vm1, %v7089_v10 }
 0xb4d   :  { %v1815_v14 = vpop.f32.mrf.mxu2 }
 0xb4e   :  { %v1827_v55 = vmul.f32 0.35355338, %v1815_v14 }
 0xb50   :  { %1831 = vmax.xlane.f32.xlu0 %v1827_v55 }
 0xb55   :  { %v1818_v15 = vpop.f32.mrf.mxu2 }
 0xb56   :  { %v1828_v46 = vmul.f32 0.35355338, %v1818_v15 }
 0xb58   :  { %1833 = vmax.xlane.f32.xlu1 %v1828_v46 }
 0xb5d   :  { %v1821_v39 = vpop.f32.mrf.mxu2 }
 0xb5e   :  { %v1829_v33 = vmul.f32 0.35355338, %v1821_v39 }
 0xb60   :  { %1835 = vmax.xlane.f32.xlu2 %v1829_v33 }
 0xb65   :  { %v1824_v54 = vpop.f32.mrf.mxu2 }
 0xb66   :  { %v1830_v21 = vmul.f32 0.35355338, %v1824_v54 }
 0xb68   :  { %1837 = vmax.xlane.f32.xlu0 %v1830_v21 }
 0xb71   :  { %5079 = vrot.lane.b32.xlu1 %v5078_v61, %s6003_s16 }
 0xb78   :  { %5084 = vrot.lane.b32.xlu2 %v5083_v48, %s6003_s16 }
 0xb79   :  { %5094 = vrot.lane.b32.xlu1 %v5093_v29, %s6003_s16 }
 0xb7c   :  { %5089 = vrot.lane.b32.xlu0 %v5088_v51, %s6003_s16 }
 0xb80   :  { %5104 = vrot.lane.b32.xlu2 %v5103_v58, %s6003_s16 }
 0xb81   :  { %5109 = vrot.lane.b32.xlu1 %v5108_v3, %s6003_s16  ;;  %v4820_v3 = vld [vmem:[%s8454_s11 + $0x38] sm:$0xff] }
 0xb82   :  { %2019 = vmatpush.msrb.mxu1 %v4820_v3 }
 0xb84   :  { %5099 = vrot.lane.b32.xlu0 %v5098_v23, %s6003_s16  ;;  %2020 = vmatpush.msrb.mxu1 %v4819_v1 }
 0xb86   :  { %2021 = vmatpush.msrb.mxu1 %v4818_v9 }
 0xb8c   :  { %5114 = vrot.lane.b32.xlu0 %v5113_v36, %s6003_s16 }
 0xbc3   :  { %v1832_v10 = vpop.xlane.xlu0 %1831 }
 0xbc4   :  { %v1839_v40 = vsub.f32 %v1827_v55, %v1832_v10  ;;  %v5401_v55 = vld [vmem:[#allocation12 + $0x10] sm:$0xff] }
 0xbc6   :  { %v1843_v16 = vmul.f32 1.442695, %v1839_v40 }
 0xbc8   :  { %5279 = vpow2.f32 %v1843_v16 }
 0xbcb   :  { %v1834_v30 = vpop.xlane.xlu1 %1833 }
 0xbcc   :  { %v1840_v7 = vsub.f32 %v1828_v46, %v1834_v30 }
 0xbce   :  { %v5280_v37 = vpop.eup %5279  ;;  %v1845_v42 = vmul.f32 1.442695, %v1840_v7 }
 0xbcf   :  { %v7199_v20 = vmul.f32 %v5399_v59, %v5280_v37 }
 0xbd0   :  { %5281 = vpow2.f32 %v1845_v42 }
 0xbd1   :  { %1871 = vmatmul.f32.vlgmr.msra.gmra.mxu3 %v7199_v20 }
 0xbd3   :  { %v1836_v41 = vpop.xlane.xlu2 %1835 }
 0xbd4   :  { %v1841_v11 = vsub.f32 %v1829_v33, %v1836_v41 }
 0xbd6   :  { %v5282_v50 = vpop.eup %5281  ;;  %v1847_v32 = vmul.f32 1.442695, %v1841_v11 }
 0xbd7   :  { %v7202_v6 = vmul.f32 %v5400_v60, %v5282_v50  ;;  %v5211_v60 = vld [vmem:[%s8455_s4 + $0x1] ss:$0 sm:$0xff] }
 0xbd8   :  { %5283 = vpow2.f32 %v1847_v32 }
 0xbd9   :  { %1874 = vmatmul.f32.gmra.mxu3 %v7202_v6 }
 0xbdb   :  { %v1838_v2 = vpop.xlane.xlu0 %1837  ;;  %v5085_v33 = vpop.permute.xlu2 %5084 }
 0xbdc   :  { %v1842_v27 = vsub.f32 %v1830_v21, %v1838_v2  ;;  %v5086_v17 = vunpack.i.l.bf16 %v5085_v33  ;;  %v5087_v21 = vunpack.i.h.bf16 %v5085_v33 }
 0xbde   :  { %v5284_v34 = vpop.eup %5283  ;;  %v1849_v14 = vmul.f32 1.442695, %v1842_v27 }
 0xbdf   :  { %v7205_v15 = vmul.f32 %v5401_v55, %v5284_v34 }
 0xbe0   :  { %5285 = vpow2.f32 %v1849_v14 }
 0xbe1   :  { %1877 = vmatmul.f32.gmra.mxu3 %v7205_v15 }
 0xbe3   :  { %v5080_v46 = vpop.permute.xlu1 %5079  ;;  %v5105_v51 = vpop.permute.xlu2 %5104 }
 0xbe4   :  { %v5081_v39 = vunpack.i.l.bf16 %v5080_v46  ;;  %v5082_v18 = vunpack.i.h.bf16 %v5080_v46  ;;  %v5106_v62 = vunpack.i.l.bf16 %v5105_v51  ;;  %v5107_v43 = vunpack.i.h.bf16 %v5105_v51 }
 0xbe6   :  { %v5286_v54 = vpop.eup %5285  ;;  %1956 = vmatpush.msrb.mxu0 %v5081_v39 }
 0xbe7   :  { %v7208_v61 = vmul.f32 %v5402_v38, %v5286_v54 }
 0xbe8   :  { %1957 = vmatpush.msrb.mxu0 %v5082_v18 }
 0xbe9   :  { %1880 = vmatmul.f32.gmra.mxu3 %v7208_v61 }
 0xbea   :  { %1958 = vmatpush.msrb.mxu0 %v5086_v17 }
 0xbeb   :  { %v5095_v12 = vpop.permute.xlu1 %5094 }
 0xbec   :  { %1959 = vmatpush.msrb.mxu0 %v5087_v21  ;;  %v5096_v31 = vunpack.i.l.bf16 %v5095_v12  ;;  %v5097_v29 = vunpack.i.h.bf16 %v5095_v12 }
 0xbee   :  { %v5090_v22 = vpop.permute.xlu0 %5089 }
 0xbef   :  { %v5091_v4 = vunpack.i.l.bf16 %v5090_v22  ;;  %v5092_v48 = vunpack.i.h.bf16 %v5090_v22 }
 0xbf1   :  { %1960 = vmatpush.msrb.mxu0 %v5091_v4 }
 0xbf3   :  { %1961 = vmatpush.msrb.mxu0 %v5092_v48  ;;  %v5110_v44 = vpop.permute.xlu1 %5109 }
 0xbf4   :  { %v5111_v13 = vunpack.i.l.bf16 %v5110_v44  ;;  %v5112_v49 = vunpack.i.h.bf16 %v5110_v44 }
 0xbf5   :  { %1962 = vmatpush.msrb.mxu0 %v5096_v31 }
 0xbf6   :  { %v5100_v5 = vpop.permute.xlu0 %5099 }
 0xbf7   :  { %v5101_v26 = vunpack.i.l.bf16 %v5100_v5  ;;  %1963 = vmatpush.msrb.mxu0 %v5097_v29  ;;  %v5102_v63 = vunpack.i.h.bf16 %v5100_v5 }
 0xbf9   :  { %1964 = vmatpush.msrb.mxu0 %v5101_v26 }
 0xbfb   :  { %1965 = vmatpush.msrb.mxu0 %v5102_v63 }
 0xbfd   :  { %1966 = vmatpush.msrb.mxu0 %v5106_v62 }
 0xbfe   :  { %v5115_v53 = vpop.permute.xlu0 %5114 }
 0xbff   :  { %1967 = vmatpush.msrb.mxu0 %v5107_v43  ;;  %v5116_v47 = vunpack.i.l.bf16 %v5115_v53  ;;  %v5117_v58 = vunpack.i.h.bf16 %v5115_v53 }
 0xc01   :  { %1968 = vmatpush.msrb.mxu0 %v5111_v13 }
 0xc03   :  { %1969 = vmatpush.msrb.mxu0 %v5112_v49 }
 0xc05   :  { %1970 = vmatpush.msrb.mxu0 %v5116_v47  ;;  %v4829_v47 = vld [vmem:[%s8456_s24 + $0x38] sm:$0xff] }
 0xc06   :  { %4945 = vmatpush.msrb.mxu3 %v4829_v47 }
 0xc07   :  { %1971 = vmatpush.msrb.mxu0 %v5117_v58  ;;  %v4828_v58 = vld [vmem:[%s8456_s24 + $0x30] sm:$0xff] }
 0xc08   :  { %4946 = vmatpush.msrb.mxu3 %v4828_v58 }
 0xc09   :  { %2180 = vmatpush.msra.mxu0 %v4829_v47 }
 0xc0b   :  { %2181 = vmatpush.msra.mxu0 %v4828_v58 }
 0xc54   :  { %v1872_v45 = vpop.f32.mrf.mxu3 }
 0xc55   :  { %v1873_v52 = vadd.f32 1e-20, %v1872_v45  ;;  %v4827_v45 = vld [vmem:[%s8456_s24 + $0x28] sm:$0xff] }
 0xc56   :  { %2182 = vmatpush.msra.mxu0 %v4827_v45  ;;  %4947 = vmatpush.msrb.mxu3 %v4827_v45 }
 0xc57   :  { %5287 = vrcp.f32 %v1873_v52  ;;  %v4826_v52 = vld [vmem:[%s8456_s24 + $0x20] sm:$0xff] }
 0xc58   :  { %2183 = vmatpush.msra.mxu0 %v4826_v52  ;;  %4948 = vmatpush.msrb.mxu3 %v4826_v52 }
 0xc5c   :  { %v1875_v23 = vpop.f32.mrf.mxu3 }
 0xc5d   :  { %v5288_v8 = vpop.eup %5287  ;;  %v1876_v57 = vadd.f32 1e-20, %v1875_v23 }
 0xc5e   :  { %v1888_v25 = vmul.f32 %v5288_v8, %v7199_v20  ;;  %v4817_v20 = vld [vmem:[%s8454_s11 + $0x20] sm:$0xff] }
 0xc5f   :  { %5289 = vrcp.f32 %v1876_v57  ;;  %2022 = vmatpush.msrb.mxu1 %v4817_v20  ;;  %v5212_v20 = vld [vmem:[#allocation6 + $0x1] ss:$0 sm:$0xff] }
 0xc60   :  { %1972 = vmatmul.f32.vlgmr.msrb.gmra.mxu0 %v1888_v25 }
 0xc64   :  { %v1878_v0 = vpop.f32.mrf.mxu3 }
 0xc65   :  { %v5290_v36 = vpop.eup %5289  ;;  %v1879_v10 = vadd.f32 1e-20, %v1878_v0 }
 0xc66   :  { %v1889_v40 = vmul.f32 %v5290_v36, %v7202_v6 }
 0xc67   :  { %5291 = vrcp.f32 %v1879_v10 }
 0xc68   :  { %1975 = vmatmul.f32.gmra.mxu0 %v1889_v40 }
 0xc6c   :  { %v1881_v16 = vpop.f32.mrf.mxu3 }
 0xc6d   :  { %v5292_v30 = vpop.eup %5291  ;;  %v1882_v7 = vadd.f32 1e-20, %v1881_v16 }
 0xc6e   :  { %v1890_v37 = vmul.f32 %v5292_v30, %v7205_v15 }
 0xc6f   :  { %5293 = vrcp.f32 %v1882_v7 }
 0xc70   :  { %1978 = vmatmul.f32.gmra.mxu0 %v1890_v37 }
 0xc75   :  { %v5294_v42 = vpop.eup %5293 }
 0xc76   :  { %v1891_v59 = vmul.f32 %v5294_v42, %v7208_v61 }
 0xc78   :  { %1981 = vmatmul.f32.gmra.mxu0 %v1891_v59 }
 0xcdd   :  { %v1973_v41 = vpop.f32.mrf.mxu0 }
 0xcde   :  { %4822 = vmatmul.msk.f32.vlgmr.msrb.gmra.mxu1 %vm612_vm1, %v1973_v41 }
 0xce5   :  { %v1976_v11 = vpop.f32.mrf.mxu0 }
 0xce6   :  { %4823 = vmatmul.msk.f32.gmra.mxu1 %vm612_vm1, %v1976_v11 }
 0xced   :  { %v1979_v50 = vpop.f32.mrf.mxu0 }
 0xcee   :  { %4824 = vmatmul.msk.f32.gmra.mxu1 %vm612_vm1, %v1979_v50 }
 0xcf5   :  { %v1982_v32 = vpop.f32.mrf.mxu0 }
 0xcf6   :  { %4825 = vmatmul.msk.f32.gmra.mxu1 %vm612_vm1, %v1982_v32  ;;  %v5213_v32 = vld [vmem:[#allocation7 + $0x1] ss:$0 sm:$0xff] }
 0xd5b   :  { %v2024_v6 = vpop.f32.mrf.mxu1 }
 0xd5c   :  { %v2025_v2 = vadd.f32 %v5211_v60, %v2024_v6 }
 0xd5e   :  { %v2036_v27 = vadd.f32 %v2025_v2, %v7058_v28 }
 0xd60   :  { %v2044_v34 = vsel %vm612_vm1, %v2036_v27, 0.0 }
 0xd61   :  { %2045 = vadd.xlane.f32.xlu2 %v2044_v34 }
 0xd63   :  { %v2027_v14 = vpop.f32.mrf.mxu1 }
 0xd64   :  { %v2028_v55 = vadd.f32 %v5211_v60, %v2027_v14 }
 0xd66   :  { %v2037_v15 = vadd.f32 %v2028_v55, %v7064_v56 }
 0xd68   :  { %v2047_v46 = vsel %vm612_vm1, %v2037_v15, 0.0 }
 0xd69   :  { %2048 = vadd.xlane.f32.xlu1 %v2047_v46 }
 0xd6b   :  { %v2030_v39 = vpop.f32.mrf.mxu1 }
 0xd6c   :  { %v2031_v33 = vadd.f32 %v5211_v60, %v2030_v39 }
 0xd6e   :  { %v2038_v54 = vadd.f32 %v2031_v33, %v7069_v24 }
 0xd70   :  { %v2050_v18 = vsel %vm612_vm1, %v2038_v54, 0.0 }
 0xd71   :  { %2051 = vadd.xlane.f32.xlu0 %v2050_v18 }
 0xd73   :  { %v2033_v38 = vpop.f32.mrf.mxu1 }
 0xd74   :  { %v2034_v61 = vadd.f32 %v5211_v60, %v2033_v38 }
 0xd76   :  { %v2039_v28 = vadd.f32 %v2034_v61, %v7074_v19 }
 0xd78   :  { %v2053_v17 = vsel %vm612_vm1, %v2039_v28, 0.0 }
 0xd79   :  { %2054 = vadd.xlane.f32.xlu2 %v2053_v17 }
 0xdd4   :  { %v2046_v21 = vpop.xlane.xlu2 %2045 }
 0xdd5   :  { %v2056_v56 = vmul.f32 %v2046_v21, %v6861_v35 }
 0xdd7   :  { %v2060_v22 = vsub.f32 %v2036_v27, %v2056_v56 }
 0xdd9   :  { %v2064_v4 = vmul.f32 %v2060_v22, %v2060_v22 }
 0xddb   :  { %v2068_v12 = vsel %vm612_vm1, %v2064_v4, 0.0 }
 0xddc   :  { %2069 = vadd.xlane.f32.xlu1 %v2068_v12  ;;  %v2049_v48 = vpop.xlane.xlu1 %2048 }
 0xddd   :  { %v2057_v24 = vmul.f32 %v2049_v48, %v6861_v35 }
 0xddf   :  { %v7235_v31 = vsub.f32 %v2037_v15, %v2057_v24 }
 0xde1   :  { %v2065_v19 = vmul.f32 %v7235_v31, %v7235_v31 }
 0xde3   :  { %v2071_v29 = vsel %vm612_vm1, %v2065_v19, 0.0 }
 0xde4   :  { %2072 = vadd.xlane.f32.xlu0 %v2071_v29  ;;  %v2052_v5 = vpop.xlane.xlu0 %2051 }
 0xde5   :  { %v2058_v26 = vmul.f32 %v2052_v5, %v6861_v35 }
 0xde7   :  { %v7241_v51 = vsub.f32 %v2038_v54, %v2058_v26 }
 0xde9   :  { %v2066_v63 = vmul.f32 %v7241_v51, %v7241_v51 }
 0xdeb   :  { %v2074_v62 = vsel %vm612_vm1, %v2066_v63, 0.0 }
 0xdec   :  { %2075 = vadd.xlane.f32.xlu2 %v2074_v62  ;;  %v2055_v44 = vpop.xlane.xlu2 %2054 }
 0xded   :  { %v2059_v43 = vmul.f32 %v2055_v44, %v6861_v35 }
 0xdef   :  { %v7247_v13 = vsub.f32 %v2039_v28, %v2059_v43 }
 0xdf1   :  { %v2067_v53 = vmul.f32 %v7247_v13, %v7247_v13 }
 0xdf3   :  { %v2077_v49 = vsel %vm612_vm1, %v2067_v53, 0.0 }
 0xdf4   :  { %2078 = vadd.xlane.f32.xlu1 %v2077_v49 }
 0xe4f   :  { %v2070_v3 = vpop.xlane.xlu1 %2069 }
 0xe50   :  { %v2080_v1 = vmul.f32 %v2070_v3, %v6861_v35 }
 0xe52   :  { %v2084_v9 = vadd.f32 1e-05, %v2080_v1 }
 0xe54   :  { %5295 = vrsqrt.f32 %v2084_v9  ;;  %vm2094_vm2 = vweird.f32 %v2084_v9 }
 0xe57   :  { %v2073_v23 = vpop.xlane.xlu0 %2072 }
 0xe58   :  { %v2081_v8 = vmul.f32 %v2073_v23, %v6861_v35 }
 0xe5a   :  { %v5296_v57 = vpop.eup %5295  ;;  %v2085_v25 = vadd.f32 1e-05, %v2081_v8 }
 0xe5b   :  { %v2089_v0 = vmul.f32 %v5296_v57, %v2084_v9  ;;  %vm2095_vm15 = vweird.f32 %v5296_v57 }
 0xe5c   :  { %5297 = vrsqrt.f32 %v2085_v25  ;;  %vm2096_vm3 = vmor %vm2094_vm2, %vm2095_vm15  ;;  %vm2104_vm5 = vweird.f32 %v2085_v25 }
 0xe5d   :  { %v2090_v36 = vmul.f32 %v5296_v57, %v2089_v0 }
 0xe5f   :  { %v2091_v10 = vmul.f32 0.5, %v2090_v36  ;;  %v2076_v40 = vpop.xlane.xlu2 %2075 }
 0xe60   :  { %v2082_v16 = vmul.f32 %v2076_v40, %v6861_v35 }
 0xe61   :  { %v2092_v30 = vsub.f32 1.5, %v2091_v10 }
 0xe62   :  { %v5298_v7 = vpop.eup %5297  ;;  %v2086_v37 = vadd.f32 1e-05, %v2082_v16 }
 0xe63   :  { %v2093_v42 = vmul.f32 %v5296_v57, %v2092_v30  ;;  %v2099_v59 = vmul.f32 %v5298_v7, %v2085_v25  ;;  %vm2105_vm4 = vweird.f32 %v5298_v7  ;;  %v4841_v30 = vld [vmem:[%s8457_s6 + $0x38] sm:$0xff] }
 0xe64   :  { %5299 = vrsqrt.f32 %v2086_v37  ;;  %vm2106_vm6 = vmor %vm2104_vm5, %vm2105_vm4  ;;  %vm2114_vm8 = vweird.f32 %v2086_v37  ;;  %2407 = vmatpush.msrb.mxu0 %v4841_v30 }
 0xe65   :  { %v2097_v41 = vsel %vm2096_vm3, %v5296_v57, %v2093_v42  ;;  %v2100_v11 = vmul.f32 %v5298_v7, %v2099_v59  ;;  %v4840_v59 = vld [vmem:[%s8457_s6 + $0x30] sm:$0xff] }
 0xe66   :  { %v2128_v50 = vmul.f32 %v2097_v41, %v2060_v22  ;;  %2408 = vmatpush.msrb.mxu0 %v4840_v59 }
 0xe67   :  { %v2101_v60 = vmul.f32 0.5, %v2100_v11  ;;  %v2079_v6 = vpop.xlane.xlu1 %2078 }
 0xe68   :  { %v2135_v2 = vmul.f32 %v5212_v20, %v2128_v50  ;;  %v2083_v27 = vmul.f32 %v2079_v6, %v6861_v35  ;;  %v4839_v6 = vld [vmem:[%s8457_s6 + $0x28] sm:$0xff] }
 0xe69   :  { %v2102_v34 = vsub.f32 1.5, %v2101_v60  ;;  %2409 = vmatpush.msrb.mxu0 %v4839_v6 }
 0xe6a   :  { %v5300_v14 = vpop.eup %5299  ;;  %v2087_v55 = vadd.f32 1e-05, %v2083_v27  ;;  %v7260_v15 = vadd.f32 %v5213_v32, %v2135_v2 }
 0xe6b   :  { %v2103_v46 = vmul.f32 %v5298_v7, %v2102_v34  ;;  %v2109_v39 = vmul.f32 %v5300_v14, %v2086_v37  ;;  %vm2115_vm7 = vweird.f32 %v5300_v14  ;;  %v4838_v34 = vld [vmem:[%s8457_s6 + $0x20] sm:$0xff] }
 0xe6c   :  { %5301 = vrsqrt.f32 %v2087_v55  ;;  %4830 = vmatmul.msk.f32.vlgmr.msra.gmra.mxu0 %vm612_vm1, %v7260_v15  ;;  %vm2116_vm9 = vmor %vm2114_vm8, %vm2115_vm7  ;;  %vm2124_vm11 = vweird.f32 %v2087_v55 }
 0xe6d   :  { %v2107_v33 = vsel %vm2106_vm6, %v5298_v7, %v2103_v46  ;;  %v2110_v54 = vmul.f32 %v5300_v14, %v2109_v39  ;;  %2410 = vmatpush.msrb.mxu0 %v4838_v34 }
 0xe6e   :  { %v2129_v18 = vmul.f32 %v2107_v33, %v7235_v31 }
 0xe6f   :  { %v2111_v38 = vmul.f32 0.5, %v2110_v54 }
 0xe70   :  { %v2136_v61 = vmul.f32 %v5212_v20, %v2129_v18 }
 0xe71   :  { %v2112_v28 = vsub.f32 1.5, %v2111_v38 }
 0xe72   :  { %v5302_v17 = vpop.eup %5301  ;;  %v7265_v21 = vadd.f32 %v5213_v32, %v2136_v61 }
 0xe73   :  { %v2113_v56 = vmul.f32 %v5300_v14, %v2112_v28  ;;  %v2119_v22 = vmul.f32 %v5302_v17, %v2087_v55  ;;  %vm2125_vm10 = vweird.f32 %v5302_v17 }
 0xe74   :  { %4831 = vmatmul.msk.f32.vlgmr.msrb.gmra.mxu3 %vm612_vm1, %v7265_v21  ;;  %vm2126_vm12 = vmor %vm2124_vm11, %vm2125_vm10 }
 0xe75   :  { %v2117_v4 = vsel %vm2116_vm9, %v5300_v14, %v2113_v56  ;;  %v2120_v12 = vmul.f32 %v5302_v17, %v2119_v22 }
 0xe76   :  { %v2130_v48 = vmul.f32 %v2117_v4, %v7241_v51  ;;  %v5214_v51 = vld [vmem:[#allocation2 + $0x1] ss:$0 sm:$0xff] }
 0xe77   :  { %v2121_v24 = vmul.f32 0.5, %v2120_v12 }
 0xe78   :  { %v2137_v31 = vmul.f32 %v5212_v20, %v2130_v48 }
 0xe79   :  { %v2122_v19 = vsub.f32 1.5, %v2121_v24 }
 0xe7a   :  { %v7270_v29 = vadd.f32 %v5213_v32, %v2137_v31 }
 0xe7b   :  { %v2123_v5 = vmul.f32 %v5302_v17, %v2122_v19 }
 0xe7c   :  { %4832 = vmatmul.msk.f32.gmra.mxu3 %vm612_vm1, %v7270_v29 }
 0xe7d   :  { %v2127_v26 = vsel %vm2126_vm12, %v5302_v17, %v2123_v5 }
 0xe7e   :  { %v2131_v63 = vmul.f32 %v2127_v26, %v7247_v13 }
 0xe80   :  { %v2138_v62 = vmul.f32 %v5212_v20, %v2131_v63 }
 0xe82   :  { %v7275_v44 = vadd.f32 %v5213_v32, %v2138_v62 }
 0xe84   :  { %4833 = vmatmul.msk.f32.gmra.mxu3 %vm612_vm1, %v7275_v44 }
 0xee9   :  { %v2185_v43 = vpop.f32.mrf.mxu0 }
 0xeea   :  { %v7279_v53 = vadd.f32 %v5214_v51, %v2185_v43 }
 0xeec   :  { %v7282_v49 = vmul.f32 0.70710677, %v7279_v53 }
 0xeee   :  { %v2205_v47 = vmul.f32 %v7282_v49, %v7282_v49 }
 0xef0   :  { %v2206_v58 = vmin.f32 %v2205_v47, 16.0 }
 0xef2   :  { %v2207_v45 = vmul.f32 2.1237322e-06, %v2206_v58  ;;  %v2218_v13 = vmul.f32 3.8918573e-05, %v2206_v58 }
 0xef4   :  { %v2208_v52 = vadd.f32 0.00028619796, %v2207_v45  ;;  %v2219_v3 = vadd.f32 0.001143296, %v2218_v13 }
 0xef6   :  { %v2209_v1 = vmul.f32 %v2208_v52, %v2206_v58  ;;  %v2220_v9 = vmul.f32 %v2219_v3, %v2206_v58 }
 0xef7   :  { %v2188_v23 = vpop.f32.mrf.mxu3 }
 0xef8   :  { %v2210_v8 = vadd.f32 0.0036580483, %v2209_v1  ;;  %v2221_v57 = vadd.f32 0.014752088, %v2220_v9  ;;  %v7286_v25 = vadd.f32 %v5214_v51, %v2188_v23 }
 0xefa   :  { %v2211_v0 = vmul.f32 %v2210_v8, %v2206_v58  ;;  %v2222_v36 = vmul.f32 %v2221_v57, %v2206_v58  ;;  %v7289_v10 = vmul.f32 0.70710677, %v7286_v25 }
 0xefc   :  { %v2223_v40 = vadd.f32 0.112945676, %v2222_v36  ;;  %v2245_v16 = vmul.f32 %v7289_v10, %v7289_v10  ;;  %v2212_v7 = vadd.f32 0.05243302, %v2211_v0 }
 0xefe   :  { %v2224_v37 = vmul.f32 %v2223_v40, %v2206_v58  ;;  %v7294_v42 = vmin.f32 %v2245_v16, 16.0  ;;  %v2213_v32 = vmul.f32 %v2212_v7, %v2206_v58 }
 0xeff   :  { %v2191_v20 = vpop.f32.mrf.mxu3 }
 0xf00   :  { %v2225_v41 = vadd.f32 0.4994258, %v2224_v37  ;;  %v2247_v11 = vmul.f32 2.1237322e-06, %v7294_v42  ;;  %v7298_v50 = vadd.f32 %v5214_v51, %v2191_v20  ;;  %v2258_v60 = vmul.f32 3.8918573e-05, %v7294_v42 }
 0xf01   :  { %v2214_v33 = vadd.f32 0.18741608, %v2213_v32 }
 0xf02   :  { %v2226_v2 = vmul.f32 %v2225_v41, %v2206_v58  ;;  %v2248_v27 = vadd.f32 0.00028619796, %v2247_v11  ;;  %v2259_v14 = vadd.f32 0.001143296, %v2258_v60  ;;  %v7304_v55 = vmul.f32 0.70710677, %v7298_v50 }
 0xf03   :  { %v2215_v22 = vmul.f32 %v2214_v33, %v2206_v58 }
 0xf04   :  { %v2227_v46 = vadd.f32 1.0, %v2226_v2  ;;  %v2249_v39 = vmul.f32 %v2248_v27, %v7294_v42  ;;  %v2260_v54 = vmul.f32 %v2259_v14, %v7294_v42  ;;  %v2285_v18 = vmul.f32 %v7304_v55, %v7304_v55 }
 0xf06   :  { %5303 = vrcp.f32 %v2227_v46  ;;  %v2250_v38 = vadd.f32 0.0036580483, %v2249_v39  ;;  %v2261_v61 = vadd.f32 0.014752088, %v2260_v54  ;;  %v7310_v28 = vmin.f32 %v2285_v18, 16.0 }
 0xf07   :  { %v2194_v17 = vpop.f32.mrf.mxu3  ;;  %v2237_v1 = vand.u32 2147483647, %v2227_v46  ;;  %v2239_v9 = vand.u32 2147483648, %v2227_v46  ;;  %vm2233_vm14 = vweird.f32 %v2227_v46 }
 0xf08   :  { %v7312_v56 = vadd.f32 %v5214_v51, %v2194_v17  ;;  %v2262_v4 = vmul.f32 %v2261_v61, %v7294_v42  ;;  %v2287_v12 = vmul.f32 2.1237322e-06, %v7310_v28  ;;  %v2251_v48 = vmul.f32 %v2250_v38, %v7294_v42 }
 0xf09   :  { %v2298_v24 = vmul.f32 3.8918573e-05, %v7310_v28  ;;  %v2216_v51 = vadd.f32 1.1283791, %v2215_v22  ;;  %v2240_v11 = vor.u32 1.1754944e-38, %v2239_v9  ;;  %vm2238_vm2 = vcmp.eq.f32.partialorder %v2237_v1, 8.507059e+37 }
 0xf0a   :  { %v7319_v31 = vmul.f32 0.70710677, %v7312_v56  ;;  %v2263_v19 = vadd.f32 0.112945676, %v2262_v4  ;;  %v2288_v5 = vadd.f32 0.00028619796, %v2287_v12 }
 0xf0b   :  { %v2299_v63 = vadd.f32 0.001143296, %v2298_v24  ;;  %v2252_v58 = vadd.f32 0.05243302, %v2251_v48  ;;  %v2217_v6 = vmul.f32 %v2216_v51, %v7282_v49  ;;  %v2197_v17 = vmul.f32 0.5, %v7279_v53 }
 0xf0c   :  { %v5304_v26 = vpop.eup %5303  ;;  %v2325_v62 = vmul.f32 %v7319_v31, %v7319_v31  ;;  %v2264_v47 = vmul.f32 %v2263_v19, %v7294_v42  ;;  %v2289_v45 = vmul.f32 %v2288_v5, %v7310_v28 }
 0xf0d   :  { %v2229_v43 = vmul.f32 %v5304_v26, %v2227_v46  ;;  %v2300_v13 = vmul.f32 %v2299_v63, %v7310_v28  ;;  %vm2234_vm13 = vweird.f32 %v5304_v26  ;;  %v2253_v30 = vmul.f32 %v2252_v58, %v7294_v42 }
 0xf0e   :  { %v7326_v52 = vmin.f32 %v2325_v62, 16.0  ;;  %v2265_v23 = vadd.f32 0.4994258, %v2264_v47  ;;  %v2290_v8 = vadd.f32 0.0036580483, %v2289_v45  ;;  %vm2235_vm15 = vmor %vm2233_vm14, %vm2234_vm13 }
 0xf0f   :  { %v2230_v3 = vsub.f32 1.0, %v2229_v43  ;;  %v2301_v57 = vadd.f32 0.014752088, %v2300_v13  ;;  %v2254_v34 = vadd.f32 0.18741608, %v2253_v30 }
 0xf10   :  { %v2327_v0 = vmul.f32 2.1237322e-06, %v7326_v52  ;;  %v2266_v40 = vmul.f32 %v2265_v23, %v7294_v42  ;;  %v2338_v16 = vmul.f32 3.8918573e-05, %v7326_v52  ;;  %v2291_v32 = vmul.f32 %v2290_v8, %v7310_v28 }
 0xf11   :  { %v2231_v36 = vmul.f32 %v5304_v26, %v2230_v3  ;;  %v2302_v7 = vmul.f32 %v2301_v57, %v7310_v28  ;;  %v2255_v49 = vmul.f32 %v2254_v34, %v7294_v42 }
 0xf12   :  { %v2267_v59 = vadd.f32 1.0, %v2266_v40  ;;  %v2328_v20 = vadd.f32 0.00028619796, %v2327_v0  ;;  %v2339_v41 = vadd.f32 0.001143296, %v2338_v16 }
 0xf13   :  { %v2232_v37 = vadd.f32 %v5304_v26, %v2231_v36  ;;  %v2303_v60 = vadd.f32 0.112945676, %v2302_v7  ;;  %v2292_v54 = vadd.f32 0.05243302, %v2291_v32  ;;  %v2256_v43 = vadd.f32 1.1283791, %v2255_v49 }
 0xf14   :  { %5305 = vrcp.f32 %v2267_v59  ;;  %v2329_v39 = vmul.f32 %v2328_v20, %v7326_v52  ;;  %v2340_v33 = vmul.f32 %v2339_v41, %v7326_v52  ;;  %v2279_v47 = vand.u32 2147483648, %v2267_v59 }
 0xf15   :  { %v2236_v2 = vsel %vm2235_vm15, %v5304_v26, %v2232_v37  ;;  %v2304_v46 = vmul.f32 %v2303_v60, %v7310_v28  ;;  %v2293_v26 = vmul.f32 %v2292_v54, %v7310_v28  ;;  %v2277_v58 = vand.u32 2147483647, %v2267_v59 }
 0xf16   :  { %v2241_v27 = vsel %vm2238_vm2, %v2240_v11, %v2236_v2  ;;  %v2341_v61 = vadd.f32 0.014752088, %v2340_v33  ;;  %v2330_v48 = vadd.f32 0.0036580483, %v2329_v39  ;;  %vm2273_vm4 = vweird.f32 %v2267_v59 }
 0xf17   :  { %v2242_v14 = vmul.f32 %v2241_v27, %v2217_v6  ;;  %v2305_v38 = vadd.f32 0.4994258, %v2304_v46  ;;  %v2294_v13 = vadd.f32 0.18741608, %v2293_v26  ;;  %v2280_v9 = vor.u32 1.1754944e-38, %v2279_v47 }
 0xf18   :  { %v2342_v24 = vmul.f32 %v2341_v61, %v7326_v52  ;;  %v2331_v53 = vmul.f32 %v2330_v48, %v7326_v52  ;;  %v2257_v8 = vmul.f32 %v2256_v43, %v7289_v10  ;;  %vm2278_vm6 = vcmp.eq.f32.partialorder %v2277_v58, 8.507059e+37 }
 0xf19   :  { %v4834_v18 = vclamps-f32 %v2242_v14, 1.0  ;;  %v2306_v12 = vmul.f32 %v2305_v38, %v7310_v28  ;;  %v2295_v16 = vmul.f32 %v2294_v13, %v7310_v28  ;;  %v2198_v11 = vmul.f32 0.5, %v7286_v25 }
 0xf1a   :  { %v5306_v22 = vpop.eup %5305  ;;  %v2343_v62 = vadd.f32 0.112945676, %v2342_v24  ;;  %v2332_v23 = vadd.f32 0.05243302, %v2331_v53  ;;  %v2199_v49 = vmul.f32 0.5, %v7298_v50 }
 0xf1b   :  { %v2365_v4 = vadd.f32 1.0, %v4834_v18  ;;  %v2269_v19 = vmul.f32 %v5306_v22, %v2267_v59  ;;  %v2307_v63 = vadd.f32 1.0, %v2306_v12  ;;  %vm2274_vm3 = vweird.f32 %v5306_v22  ;;  %v5215_v53 = vld [vmem:[#allocation4 + $0x1] ss:$0 sm:$0xff] }
 0xf1c   :  { %v2344_v45 = vmul.f32 %v2343_v62, %v7326_v52  ;;  %vm2275_vm5 = vmor %vm2273_vm4, %vm2274_vm3  ;;  %v2333_v37 = vmul.f32 %v2332_v23, %v7326_v52  ;;  %v2296_v32 = vadd.f32 1.1283791, %v2295_v16 }
 0xf1d   :  { %v2369_v5 = vmul.f32 %v2365_v4, %v2197_v17  ;;  %v2270_v51 = vsub.f32 1.0, %v2269_v19  ;;  %5307 = vrcp.f32 %v2307_v63  ;;  %v2319_v60 = vand.u32 2147483648, %v2307_v63 }
 0xf1e   :  { %v2345_v1 = vadd.f32 0.4994258, %v2344_v45  ;;  %v2317_v6 = vand.u32 2147483647, %v2307_v63  ;;  %v2334_v27 = vadd.f32 0.18741608, %v2333_v37  ;;  %vm2313_vm8 = vweird.f32 %v2307_v63 }
 0xf1f   :  { %4842 = vmatmul.msk.f32.vlgmr.msrb.gmra.mxu0 %vm612_vm1, %v2369_v5  ;;  %v2271_v42 = vmul.f32 %v5306_v22, %v2270_v51  ;;  %v2320_v14 = vor.u32 1.1754944e-38, %v2319_v60  ;;  %v2297_v46 = vmul.f32 %v2296_v32, %v7304_v55  ;;  %v2200_v51 = vmul.f32 0.5, %v7312_v56 }
 0xf20   :  { %v2346_v0 = vmul.f32 %v2345_v1, %v7326_v52  ;;  %vm2318_vm10 = vcmp.eq.f32.partialorder %v2317_v6, 8.507059e+37  ;;  %v2335_v54 = vmul.f32 %v2334_v27, %v7326_v52 }
 0xf21   :  { %v2272_v3 = vadd.f32 %v5306_v22, %v2271_v42 }
 0xf22   :  { %v2347_v20 = vadd.f32 1.0, %v2346_v0 }
 0xf23   :  { %v2276_v57 = vsel %vm2275_vm5, %v5306_v22, %v2272_v3  ;;  %v5308_v36 = vpop.eup %5307  ;;  %v2336_v22 = vadd.f32 1.1283791, %v2335_v54 }
 0xf24   :  { %v2281_v40 = vsel %vm2278_vm6, %v2280_v9, %v2276_v57  ;;  %v2309_v7 = vmul.f32 %v5308_v36, %v2307_v63  ;;  %5309 = vrcp.f32 %v2347_v20  ;;  %vm2314_vm7 = vweird.f32 %v5308_v36 }
 0xf25   :  { %v2282_v30 = vmul.f32 %v2281_v40, %v2257_v8  ;;  %vm2315_vm9 = vmor %vm2313_vm8, %vm2314_vm7  ;;  %v2359_v4 = vand.u32 2147483648, %v2347_v20  ;;  %v2357_v48 = vand.u32 2147483647, %v2347_v20  ;;  %vm2353_vm12 = vweird.f32 %v2347_v20 }
 0xf26   :  { %v2310_v59 = vsub.f32 1.0, %v2309_v7  ;;  %v2337_v26 = vmul.f32 %v2336_v22, %v7319_v31 }
 0xf27   :  { %v4835_v41 = vclamps-f32 %v2282_v30, 1.0  ;;  %v2360_v5 = vor.u32 1.1754944e-38, %v2359_v4  ;;  %vm2358_vm14 = vcmp.eq.f32.partialorder %v2357_v48, 8.507059e+37 }
 0xf28   :  { %v2311_v10 = vmul.f32 %v5308_v36, %v2310_v59 }
 0xf29   :  { %v2366_v2 = vadd.f32 1.0, %v4835_v41 }
 0xf2a   :  { %v2312_v34 = vadd.f32 %v5308_v36, %v2311_v10  ;;  %v5310_v25 = vpop.eup %5309 }
 0xf2b   :  { %v2370_v28 = vmul.f32 %v2366_v2, %v2198_v11  ;;  %v2349_v38 = vmul.f32 %v5310_v25, %v2347_v20  ;;  %vm2354_vm11 = vweird.f32 %v5310_v25 }
 0xf2c   :  { %v2316_v39 = vsel %vm2315_vm9, %v5308_v36, %v2312_v34  ;;  %vm2355_vm13 = vmor %vm2353_vm12, %vm2354_vm11 }
 0xf2d   :  { %4843 = vmatmul.msk.f32.gmra.mxu0 %vm612_vm1, %v2370_v28  ;;  %v2321_v33 = vsel %vm2318_vm10, %v2320_v14, %v2316_v39  ;;  %v2350_v61 = vsub.f32 1.0, %v2349_v38 }
 0xf2e   :  { %v2322_v18 = vmul.f32 %v2321_v33, %v2297_v46 }
 0xf2f   :  { %v2351_v12 = vmul.f32 %v5310_v25, %v2350_v61 }
 0xf30   :  { %v4836_v17 = vclamps-f32 %v2322_v18, 1.0 }
 0xf31   :  { %v2352_v24 = vadd.f32 %v5310_v25, %v2351_v12 }
 0xf32   :  { %v2367_v55 = vadd.f32 1.0, %v4836_v17 }
 0xf33   :  { %v2356_v52 = vsel %vm2355_vm13, %v5310_v25, %v2352_v24 }
 0xf34   :  { %v2371_v19 = vmul.f32 %v2367_v55, %v2199_v49  ;;  %v2361_v63 = vsel %vm2358_vm14, %v2360_v5, %v2356_v52  ;;  %v2536_v52 = vld [vmem:[%s8467_s5] sm:$0xff] }
 0xf35   :  { %v2362_v62 = vmul.f32 %v2361_v63, %v2337_v26 }
 0xf36   :  { %4844 = vmatmul.msk.f32.gmra.mxu0 %vm612_vm1, %v2371_v19 }
 0xf37   :  { %v4837_v50 = vclamps-f32 %v2362_v62, 1.0  ;;  %v6005_v62 = vmov 0  }
 0xf38   :  { %5118 = vset.pattern.permute.xlu1 %v6005_v62  ;;  %5119 = vset.pattern.permute.xlu0 %v6005_v62 }
 0xf39   :  { %v2368_v43 = vadd.f32 1.0, %v4837_v50 }
 0xf3b   :  { %v2372_v47 = vmul.f32 %v2368_v43, %v2200_v51 }
 0xf3e   :  { %4845 = vmatmul.msk.f32.gmra.mxu0 %vm612_vm1, %v2372_v47 }
 0xf9c   :  { %v2412_v42 = vpop.f32.mrf.mxu0 }
 0xf9d   :  { %v2413_v58 = vadd.f32 %v5215_v53, %v2412_v42 }
 0xf9f   :  { %v2424_v45 = vadd.f32 %v2413_v58, %v7260_v15 }
 0xfa1   :  { %v2432_v31 = vsel %vm612_vm1, %v2424_v45, 0.0 }
 0xfa2   :  { %2433 = vadd.xlane.f32.xlu2 %v2432_v31  ;;  %v5216_v31 = vld [vmem:[#allocation9 + $0x1] ss:$0 sm:$0xff] }
 0xfaa   :  { %v2415_v13 = vpop.f32.mrf.mxu0 }
 0xfab   :  { %v2416_v3 = vadd.f32 %v5215_v53, %v2415_v13 }
 0xfad   :  { %v2425_v1 = vadd.f32 %v2416_v3, %v7265_v21 }
 0xfaf   :  { %v2435_v9 = vsel %vm612_vm1, %v2425_v1, 0.0 }
 0xfb0   :  { %2436 = vadd.xlane.f32.xlu0 %v2435_v9  ;;  %v2537_v9 = vld [vmem:[%s8467_s5 + $0x8] sm:$0xff] }
 0xfb3   :  { %v2418_v56 = vpop.f32.mrf.mxu0 }
 0xfb4   :  { %v2419_v23 = vadd.f32 %v5215_v53, %v2418_v56 }
 0xfb6   :  { %v2426_v8 = vadd.f32 %v2419_v23, %v7270_v29  ;;  %v5217_v23 = vld [vmem:[#allocation10 + $0x1] ss:$0 sm:$0xff] }
 0xfb8   :  { %v2438_v57 = vsel %vm612_vm1, %v2426_v8, 0.0 }
 0xfb9   :  { %2439 = vadd.xlane.f32.xlu0 %v2438_v57 }
 0xfbb   :  { %v2421_v0 = vpop.f32.mrf.mxu0 }
 0xfbc   :  { %v2422_v36 = vadd.f32 %v5215_v53, %v2421_v0 }
 0xfbe   :  { %v2427_v15 = vadd.f32 %v2422_v36, %v7275_v44 }
 0xfc0   :  { %v2441_v40 = vsel %vm612_vm1, %v2427_v15, 0.0 }
 0xfc1   :  { %2442 = vadd.xlane.f32.xlu1 %v2441_v40 }
0x1015   :  { %v2434_v16 = vpop.xlane.xlu2 %2433 }
0x1016   :  { %v2444_v21 = vmul.f32 %v2434_v16, %v6861_v35 }
0x1018   :  { %v7368_v30 = vsub.f32 %v2424_v45, %v2444_v21  ;;  %v2613_v21 = vld [vmem:[#allocation15 + $0x8] sm:$0xff] }
0x1019   :  { %2644 = vmatpush.msra.mxu2 %v2613_v21 }
0x101a   :  { %v2452_v7 = vmul.f32 %v7368_v30, %v7368_v30 }
0x101c   :  { %v2456_v29 = vsel %vm612_vm1, %v2452_v7, 0.0 }
0x101d   :  { %2457 = vadd.xlane.f32.xlu1 %v2456_v29 }
0x1023   :  { %v2437_v37 = vpop.xlane.xlu0 %2436 }
0x1024   :  { %v2445_v20 = vmul.f32 %v2437_v37, %v6861_v35 }
0x1026   :  { %v2449_v59 = vsub.f32 %v2425_v1, %v2445_v20 }
0x1028   :  { %v2453_v41 = vmul.f32 %v2449_v59, %v2449_v59 }
0x102a   :  { %v2459_v44 = vsel %vm612_vm1, %v2453_v41, 0.0 }
0x102b   :  { %2460 = vadd.xlane.f32.xlu2 %v2459_v44  ;;  %v2535_v44 = vld [vmem:[#allocation13 + $0x8] sm:$0xff] }
0x102c   :  { %v2440_v11 = vpop.xlane.xlu0 %2439 }
0x102d   :  { %v2446_v32 = vmul.f32 %v2440_v11, %v6861_v35 }
0x102f   :  { %v7376_v60 = vsub.f32 %v2426_v8, %v2446_v32 }
0x1031   :  { %v2454_v10 = vmul.f32 %v7376_v60, %v7376_v60 }
0x1033   :  { %v2462_v6 = vsel %vm612_vm1, %v2454_v10, 0.0 }
0x1034   :  { %2463 = vadd.xlane.f32.xlu2 %v2462_v6  ;;  %v2443_v2 = vpop.xlane.xlu1 %2442 }
0x1035   :  { %v2447_v27 = vmul.f32 %v2443_v2, %v6861_v35 }
0x1036   :  { %2540 = vperm.xlu1 %5118, %v2536_v52   ;;  %v5219_v52 = vld [vmem:[%s8469_s18] ss:$0 sm:$0xff] }
0x1037   :  { %v7382_v34 = vsub.f32 %v2427_v15, %v2447_v27 }
0x1039   :  { %v2455_v28 = vmul.f32 %v7382_v34, %v7382_v34 }
0x103b   :  { %v2465_v14 = vsel %vm612_vm1, %v2455_v28, 0.0 }
0x103c   :  { %2466 = vadd.xlane.f32.xlu0 %v2465_v14  ;;  %v2612_v14 = vld [vmem:[#allocation15] sm:$0xff] }
0x103d   :  { %2645 = vmatpush.msra.mxu2 %v2612_v14 }
0x1050   :  { %2545 = vperm.xlu0 %5119, %v2537_v9   ;;  %v7470_v9 = vld [vmem:[%s8468_s19 + $0x40] sm:$0xff] }
0x1090   :  { %v2458_v46 = vpop.xlane.xlu1 %2457 }
0x1091   :  { %v2468_v39 = vmul.f32 %v2458_v46, %v6861_v35 }
0x1093   :  { %v2472_v25 = vadd.f32 1e-05, %v2468_v39 }
0x1095   :  { %5311 = vrsqrt.f32 %v2472_v25  ;;  %vm2482_vm2 = vweird.f32 %v2472_v25 }
0x109b   :  { %v5312_v33 = vpop.eup %5311 }
0x109c   :  { %v2477_v54 = vmul.f32 %v5312_v33, %v2472_v25  ;;  %vm2483_vm15 = vweird.f32 %v5312_v33 }
0x109d   :  { %vm2484_vm4 = vmor %vm2482_vm2, %vm2483_vm15 }
0x109e   :  { %v2461_v18 = vpop.xlane.xlu2 %2460  ;;  %v2478_v17 = vmul.f32 %v5312_v33, %v2477_v54 }
0x109f   :  { %v2469_v38 = vmul.f32 %v2461_v18, %v6861_v35 }
0x10a0   :  { %v2479_v49 = vmul.f32 0.5, %v2478_v17  ;;  %v7409_v17 = vld [vmem:[%s8468_s19 + $0x70] sm:$0xff] }
0x10a1   :  { %v2473_v61 = vadd.f32 1e-05, %v2469_v38  ;;  %2804 = vrot.lane.b32.xlu1 %v7409_v17, %s6001_s20 }
0x10a2   :  { %v2480_v48 = vsub.f32 1.5, %v2479_v49  ;;  %v2714_v49 = vld [vmem:[#allocation18 + $0x18] sm:$0xff] }
0x10a3   :  { %5313 = vrsqrt.f32 %v2473_v61  ;;  %vm2492_vm5 = vweird.f32 %v2473_v61  ;;  %2743 = vmatpush.msra.mxu3 %v2714_v49 }
0x10a4   :  { %v2481_v5 = vmul.f32 %v5312_v33, %v2480_v48  ;;  %v2711_v48 = vld [vmem:[#allocation18] sm:$0xff] }
0x10a6   :  { %v2485_v50 = vsel %vm2484_vm4, %v5312_v33, %v2481_v5  ;;  %v7429_v5 = vld [vmem:[%s8468_s19 + $0x78] sm:$0xff] }
0x10a7   :  { %v2464_v22 = vpop.xlane.xlu2 %2463  ;;  %v2516_v45 = vmul.f32 %v2485_v50, %v7368_v30  ;;  %v2534_v30 = vld [vmem:[#allocation13] sm:$0xff]  ;;  %2806 = vrot.lane.b32.xlu2 %v7429_v5, %s6001_s20  ;;  %v2667_v50 = vld [vmem:[%s8470_s15] sm:$0xff] }
0x10a8   :  { %v2470_v12 = vmul.f32 %v2464_v22, %v6861_v35  ;;  %v2713_v22 = vld [vmem:[#allocation18 + $0x10] sm:$0xff] }
0x10a9   :  { %v5314_v4 = vpop.eup %5313  ;;  %v2523_v57 = vmul.f32 %v5216_v31, %v2516_v45  ;;  %2744 = vmatpush.msra.mxu3 %v2713_v22  ;;  %v7455_v45 = vld [vmem:[%s8468_s19 + $0x38] sm:$0xff] }
0x10aa   :  { %v2487_v55 = vmul.f32 %v5314_v4, %v2473_v61  ;;  %v2474_v24 = vadd.f32 1e-05, %v2470_v12  ;;  %vm2493_vm3 = vweird.f32 %v5314_v4  ;;  %v7414_v12 = vld [vmem:[%s8468_s19 + $0x60] sm:$0xff] }
0x10ab   :  { %vm2494_vm6 = vmor %vm2492_vm5, %vm2493_vm3  ;;  %v2530_v15 = vadd.f32 %v5217_v23, %v2523_v57  ;;  %2800 = vrot.lane.b32.xlu1 %v7414_v12, %s6001_s20 }
0x10ac   :  { %v2488_v19 = vmul.f32 %v5314_v4, %v2487_v55  ;;  %5315 = vrsqrt.f32 %v2474_v24  ;;  %vm2502_vm8 = vweird.f32 %v2474_v24  ;;  %v7419_v55 = vld [vmem:[%s8468_s19 + $0x48] sm:$0xff] }
0x10ae   :  { %v2489_v26 = vmul.f32 0.5, %v2488_v19  ;;  %v5218_v19 = vld [vmem:[#allocation16] ss:$0 sm:$0xff] }
0x10af   :  { %v2467_v43 = vpop.xlane.xlu0 %2466 }
0x10b0   :  { %v2490_v63 = vsub.f32 1.5, %v2489_v26  ;;  %v2471_v53 = vmul.f32 %v2467_v43, %v6861_v35  ;;  %v7432_v26 = vld [vmem:[%s8468_s19 + $0x20] sm:$0xff]  ;;  %v7441_v43 = vld [vmem:[%s8468_s19 + $0x50] sm:$0xff] }
0x10b1   :  { %2796 = vrot.lane.b32.xlu0 %v7441_v43, %s6001_s20 }
0x10b2   :  { %v2491_v51 = vmul.f32 %v5314_v4, %v2490_v63  ;;  %v5316_v47 = vpop.eup %5315  ;;  %v2475_v3 = vadd.f32 1e-05, %v2471_v53 }
0x10b3   :  { %v2497_v58 = vmul.f32 %v5316_v47, %v2474_v24  ;;  %vm2503_vm7 = vweird.f32 %v5316_v47  ;;  %2794 = vrot.lane.b32.xlu1 %v7419_v55, %s6001_s20  ;;  %v7424_v24 = vld [vmem:[%s8468_s19 + $0x30] sm:$0xff] }
0x10b4   :  { %v2495_v42 = vsel %vm2494_vm6, %v5314_v4, %v2491_v51  ;;  %5317 = vrsqrt.f32 %v2475_v3  ;;  %vm2504_vm10 = vmor %vm2502_vm8, %vm2503_vm7  ;;  %vm2512_vm11 = vweird.f32 %v2475_v3  ;;  %v2712_v4 = vld [vmem:[#allocation18 + $0x8] sm:$0xff] }
0x10b5   :  { %v2517_v13 = vmul.f32 %v2495_v42, %v2449_v59  ;;  %v2498_v1 = vmul.f32 %v5316_v47, %v2497_v58  ;;  %2745 = vmatpush.msra.mxu3 %v2712_v4 }
0x10b7   :  { %v2524_v56 = vmul.f32 %v5216_v31, %v2517_v13  ;;  %v2499_v0 = vmul.f32 0.5, %v2498_v1  ;;  %2746 = vmatpush.msra.mxu3 %v2711_v48 }
0x10b9   :  { %v2531_v8 = vadd.f32 %v5217_v23, %v2524_v56  ;;  %v2500_v40 = vsub.f32 1.5, %v2499_v0  ;;  %2790 = vrot.lane.b32.xlu0 %v7455_v45, %s6001_s20 }
0x10ba   :  { %v5318_v36 = vpop.eup %5317 }
0x10bb   :  { %4846 = vmatpush.xpose.msk.msra.mxu1 %vm612_vm1, %v2531_v8  ;;  %v2507_v16 = vmul.f32 %v5318_v36, %v2475_v3  ;;  %v2501_v29 = vmul.f32 %v5316_v47, %v2500_v40  ;;  %vm2513_vm9 = vweird.f32 %v5318_v36  ;;  %2788 = vrot.lane.b32.xlu1 %v7424_v24, %s6001_s20  ;;  %v7459_v3 = vld [vmem:[%s8468_s19 + $0x58] sm:$0xff]  ;;  %v2669_v8 = vld [vmem:[%s8470_s15 + $0x10] sm:$0xff] }
0x10bc   :  { %vm2514_vm12 = vmor %vm2512_vm11, %vm2513_vm9 }
0x10bd   :  { %v2508_v7 = vmul.f32 %v5318_v36, %v2507_v16  ;;  %v2505_v59 = vsel %vm2504_vm10, %v5316_v47, %v2501_v29  ;;  %v7444_v47 = vld [vmem:[%s8468_s19 + $0x68] sm:$0xff]  ;;  %v2670_v16 = vld [vmem:[%s8470_s15 + $0x18] sm:$0xff] }
0x10be   :  { %v2518_v32 = vmul.f32 %v2505_v59, %v7376_v60  ;;  %v2541_v60 = vpop.permute.xlu1 %2540  ;;  %2802 = vrot.lane.b32.xlu2 %v7444_v47, %s6001_s20 }
0x10bf   :  { %4847 = vmatpush.xpose.msk.msra.mxu1 %vm612_vm1, %v2530_v15  ;;  %v2509_v37 = vmul.f32 0.5, %v2508_v7 }
0x10c0   :  { %v2525_v27 = vmul.f32 %v5216_v31, %v2518_v32 }
0x10c1   :  { %v2510_v20 = vsub.f32 1.5, %v2509_v37 }
0x10c2   :  { %4848 = vmatmul.msk.f32.vlgmr.msra.gmra.mxu1 %vm612_vm1, %v2534_v30  ;;  %v2532_v28 = vadd.f32 %v5217_v23, %v2525_v27  ;;  %v2546_v39 = vpop.permute.xlu0 %2545 }
0x10c3   :  { %v2511_v41 = vmul.f32 %v5318_v36, %v2510_v20  ;;  %2784 = vrot.lane.b32.xlu1 %v7432_v26, %s6001_s20  ;;  %v5220_v20 = vld [vmem:[#allocation19] ss:$0 sm:$0xff] }
0x10c5   :  { %v2515_v11 = vsel %vm2514_vm12, %v5318_v36, %v2511_v41  ;;  %v7480_v36 = vld [vmem:[%s8468_s19 + $0x28] sm:$0xff] }
0x10c6   :  { %v2519_v10 = vmul.f32 %v2515_v11, %v7382_v34  ;;  %2798 = vrot.lane.b32.xlu2 %v7459_v3, %s6001_s20 }
0x10c8   :  { %v2526_v6 = vmul.f32 %v5216_v31, %v2519_v10  ;;  %v2668_v31 = vld [vmem:[%s8470_s15 + $0x8] sm:$0xff] }
0x10c9   :  { %v7503_v10 = vld [vmem:[%s8468_s19 + $0x8] sm:$0xff] }
0x10ca   :  { %4849 = vmatmul.msk.f32.gmra.mxu1 %vm612_vm1, %v2535_v44  ;;  %v2533_v2 = vadd.f32 %v5217_v23, %v2526_v6 }
0x10cc   :  { %4850 = vmatpush.xpose.msk.msrb.mxu1 %vm612_vm1, %v2533_v2 }
0x10ce   :  { %2792 = vrot.lane.b32.xlu2 %v7470_v9, %s6001_s20 }
0x10d0   :  { %4851 = vmatpush.xpose.msk.msrb.mxu1 %vm612_vm1, %v2532_v28 }
0x10d3   :  { %4852 = vmatmul.msk.f32.vlgmr.msrb.gmra.mxu1 %vm612_vm1, %v2534_v30 }
0x10d6   :  { %2786 = vrot.lane.b32.xlu2 %v7480_v36, %s6001_s20 }
0x10db   :  { %4853 = vmatmul.msk.f32.gmra.mxu1 %vm612_vm1, %v2535_v44 }
0x1101   :  { %v7491_v37 = vpop.permute.xlu2 %2806 }
0x1113   :  { %v7489_v7 = vpop.permute.xlu1 %2804 }
0x1118   :  { %v7497_v11 = vpop.permute.xlu2 %2802 }
0x111d   :  { %v7495_v44 = vpop.permute.xlu1 %2800 }
0x1123   :  { %v7511_v28 = vpop.permute.xlu0 %2796 }
0x1125   :  { %v7505_v6 = vpop.permute.xlu1 %2794 }
0x113f   :  { %v2577_v46 = vpop.f32.mrf.mxu1 }
0x1140   :  { %v2578_v34 = vadd.f32 %v2577_v46, %v2541_v60 }
0x1142   :  { %4854 = vmatmul.msk.f32.vlgmr.msra.gmra.mxu2 %vm510_vm0, %v2578_v34 }
0x1147   :  { %v2580_v25 = vpop.f32.mrf.mxu1 }
0x1148   :  { %v2581_v33 = vadd.f32 %v2580_v25, %v2546_v39  ;;  %v7524_v25 = vld [vmem:[%s8468_s19 + $0x10] sm:$0xff] }
0x114a   :  { %4855 = vmatmul.msk.f32.gmra.mxu2 %vm510_vm0, %v2581_v33 }
0x1150   :  { %v2606_v54 = vpop.f32.mrf.mxu1 }
0x1151   :  { %v2607_v18 = vadd.f32 %v2606_v54, %v2541_v60  ;;  %v7528_v54 = vpop.permute.xlu0 %2790 }
0x1153   :  { %4856 = vmatmul.msk.f32.gmra.mxu2 %vm510_vm0, %v2607_v18 }
0x1158   :  { %v2609_v38 = vpop.f32.mrf.mxu1 }
0x1159   :  { %v2610_v61 = vadd.f32 %v2609_v38, %v2546_v39  ;;  %v7521_v39 = vpop.permute.xlu1 %2788  ;;  %v7536_v38 = vpop.permute.xlu2 %2798 }
0x115b   :  { %4857 = vmatmul.msk.f32.gmra.mxu2 %vm510_vm0, %v2610_v61  ;;  %v7539_v61 = vld [vmem:[%s8468_s19 + $0x18] sm:$0xff] }
0x1161   :  { %v7545_v4 = vpop.permute.xlu1 %2784 }
0x11c5   :  { %v2647_v63 = vpop.f32.mrf.mxu2 }
0x11c6   :  { %v2648_v62 = vadd.f32 %v5218_v19, %v2647_v63  ;;  %v7560_v63 = vld [vmem:[%s8468_s19] sm:$0xff] }
0x11c8   :  { %v2663_v51 = vadd.f32 %v5219_v52, %v2648_v62 }
0x11ca   :  { %v7448_v53 = vadd.f32 %v2667_v50, %v2663_v51  ;;  %v7567_v50 = vpop.permute.xlu2 %2792 }
0x11cc   :  { %4858 = vmatmul.msk.f32.vlgmr.msra.gmra.mxu3 %vm612_vm1, %v7448_v53 }
0x11cd   :  { %v2650_v42 = vpop.f32.mrf.mxu2 }
0x11ce   :  { %v2651_v58 = vadd.f32 %v5218_v19, %v2650_v42 }
0x11d0   :  { %v2664_v13 = vadd.f32 %v5219_v52, %v2651_v58 }
0x11d2   :  { %v7463_v1 = vadd.f32 %v2668_v31, %v2664_v13  ;;  %v7572_v42 = vpop.permute.xlu2 %2786 }
0x11d4   :  { %4859 = vmatmul.msk.f32.gmra.mxu3 %vm612_vm1, %v7463_v1 }
0x11d6   :  { %v2653_v56 = vpop.f32.mrf.mxu2 }
0x11d7   :  { %v2654_v23 = vadd.f32 %v5218_v19, %v2653_v56 }
0x11d9   :  { %v2665_v57 = vadd.f32 %v5219_v52, %v2654_v23 }
0x11db   :  { %v7475_v0 = vadd.f32 %v2669_v8, %v2665_v57 }
0x11dd   :  { %4860 = vmatmul.msk.f32.gmra.mxu3 %vm612_vm1, %v7475_v0 }
0x11de   :  { %v2656_v15 = vpop.f32.mrf.mxu2 }
0x11df   :  { %v2657_v40 = vadd.f32 %v5218_v19, %v2656_v15 }
0x11e1   :  { %v2666_v21 = vadd.f32 %v5219_v52, %v2657_v40 }
0x11e3   :  { %v7485_v30 = vadd.f32 %v2670_v16, %v2666_v21 }
0x11e5   :  { %4861 = vmatmul.msk.f32.gmra.mxu3 %vm612_vm1, %v7485_v30 }
0x124f   :  { %v2748_v29 = vpop.f32.mrf.mxu3 }
0x1250   :  { %v7541_v49 = vadd.f32 %v5220_v20, %v2748_v29 }
0x1252   :  { %v2828_v48 = vmul.f32 %v7545_v4, %v7541_v49  ;;  %v2836_v19 = vmul.f32 %v7495_v44, %v7541_v49  ;;  %v2832_v51 = vmul.f32 %v7567_v50, %v7541_v49 }
0x1257   :  { %v2751_v59 = vpop.f32.mrf.mxu3 }
0x1258   :  { %v7493_v41 = vadd.f32 %v5220_v20, %v2751_v59 }
0x125a   :  { %v2837_v32 = vmul.f32 %v7497_v11, %v7493_v41  ;;  %v2833_v52 = vmul.f32 %v7505_v6, %v7493_v41  ;;  %v2829_v58 = vmul.f32 %v7572_v42, %v7493_v41 }
0x125c   :  { %2946 = vrot.lane.b32.xlu1 %v2837_v32, %s6002_s30 }
0x1260   :  { %v2754_v2 = vpop.f32.mrf.mxu3 }
0x1261   :  { %v7507_v27 = vadd.f32 %v5220_v20, %v2754_v2 }
0x1263   :  { %v2838_v14 = vmul.f32 %v7489_v7, %v7507_v27  ;;  %v2834_v60 = vmul.f32 %v7511_v28, %v7507_v27  ;;  %v2830_v62 = vmul.f32 %v7521_v39, %v7507_v27 }
0x1264   :  { %2778 = vrot.lane.b32.xlu1 %v7503_v10, %s6001_s20 }
0x1265   :  { %2948 = vrot.lane.b32.xlu2 %v2838_v14, %s6002_s30 }
0x1268   :  { %v2757_v46 = vpop.f32.mrf.mxu3 }
0x1269   :  { %v7518_v34 = vadd.f32 %v5220_v20, %v2757_v46 }
0x126b   :  { %v2839_v33 = vmul.f32 %v7491_v37, %v7518_v34  ;;  %v2831_v18 = vmul.f32 %v7528_v54, %v7518_v34  ;;  %v2835_v22 = vmul.f32 %v7536_v38, %v7518_v34 }
0x126c   :  { %2940 = vrot.lane.b32.xlu1 %v2834_v60, %s6002_s30 }
0x126d   :  { %2780 = vrot.lane.b32.xlu2 %v7524_v25, %s6001_s20  ;;  %2950 = vrot.lane.b32.xlu0 %v2839_v33, %s6002_s30 }
0x1274   :  { %2934 = vrot.lane.b32.xlu1 %v2831_v18, %s6002_s30 }
0x1275   :  { %2782 = vrot.lane.b32.xlu0 %v7539_v61, %s6001_s20  ;;  %2942 = vrot.lane.b32.xlu2 %v2835_v22, %s6002_s30 }
0x127c   :  { %2928 = vrot.lane.b32.xlu1 %v2828_v48, %s6002_s30 }
0x127d   :  { %2944 = vrot.lane.b32.xlu0 %v2836_v19, %s6002_s30  ;;  %2938 = vrot.lane.b32.xlu2 %v2833_v52, %s6002_s30 }
0x1285   :  { %2776 = vrot.lane.b32.xlu0 %v7560_v63, %s6001_s20  ;;  %2932 = vrot.lane.b32.xlu2 %v2830_v62, %s6002_s30 }
0x128d   :  { %2936 = vrot.lane.b32.xlu0 %v2832_v51, %s6002_s30 }
0x1295   :  { %2930 = vrot.lane.b32.xlu0 %v2829_v58, %s6002_s30 }
0x12bf   :  { %v2949_v31 = vpop.permute.xlu2 %2948 }
0x12c7   :  { %v7577_v13 = vpop.permute.xlu2 %2780 }
0x12c8   :  { %v2826_v56 = vmul.f32 %v7577_v13, %v7507_v27 }
0x12ca   :  { %2924 = vrot.lane.b32.xlu0 %v2826_v56, %s6002_s30 }
0x12ce   :  { %v2947_v23 = vpop.permute.xlu1 %2946 }
0x12cf   :  { %v2943_v29 = vpop.permute.xlu2 %2942 }
0x12d6   :  { %v7582_v8 = vpop.permute.xlu1 %2778 }
0x12d7   :  { %v2825_v57 = vmul.f32 %v7582_v8, %v7493_v41  ;;  %v2939_v2 = vpop.permute.xlu2 %2938 }
0x12d9   :  { %2922 = vrot.lane.b32.xlu1 %v2825_v57, %s6002_s30 }
0x12de   :  { %v2941_v20 = vpop.permute.xlu1 %2940 }
0x12df   :  { %v2951_v15 = vpop.permute.xlu0 %2950  ;;  %v2933_v46 = vpop.permute.xlu2 %2932 }
0x12e0   :  { %4862 = vmatpush.xpose.msk.msra.mxu0 %vm612_vm1, %v2951_v15 }
0x12e4   :  { %4863 = vmatpush.xpose.msk.msra.mxu0 %vm612_vm1, %v2949_v31 }
0x12e6   :  { %v2935_v60 = vpop.permute.xlu1 %2934 }
0x12e7   :  { %v7589_v40 = vpop.permute.xlu0 %2782 }
0x12e8   :  { %v2827_v16 = vmul.f32 %v7589_v40, %v7518_v34  ;;  %4864 = vmatpush.xpose.msk.msra.mxu0 %vm612_vm1, %v2947_v23 }
0x12ea   :  { %2926 = vrot.lane.b32.xlu2 %v2827_v16, %s6002_s30 }
0x12ee   :  { %v2929_v18 = vpop.permute.xlu1 %2928 }
0x12ef   :  { %v2945_v21 = vpop.permute.xlu0 %2944 }
0x12f0   :  { %4865 = vmatpush.xpose.msk.msra.mxu0 %vm612_vm1, %v2945_v21 }
0x12f4   :  { %4866 = vmatpush.xpose.msk.msra.mxu0 %vm612_vm1, %v2943_v29 }
0x12f7   :  { %v7597_v59 = vpop.permute.xlu0 %2776 }
0x12f8   :  { %v2824_v32 = vmul.f32 %v7597_v59, %v7541_v49  ;;  %4867 = vmatpush.xpose.msk.msra.mxu0 %vm612_vm1, %v2941_v20 }
0x12fa   :  { %2920 = vrot.lane.b32.xlu2 %v2824_v32, %s6002_s30 }
0x12fc   :  { %4868 = vmatpush.xpose.msk.msra.mxu0 %vm612_vm1, %v2939_v2  ;;  %v2691_v2 = vld [vmem:[#allocation31] sm:$0xff] }
0x12ff   :  { %v2937_v14 = vpop.permute.xlu0 %2936 }
0x1300   :  { %4869 = vmatpush.xpose.msk.msra.mxu0 %vm612_vm1, %v2937_v14 }
0x1304   :  { %4870 = vmatpush.xpose.msk.msra.mxu0 %vm612_vm1, %v2935_v60 }
0x1307   :  { %v2931_v33 = vpop.permute.xlu0 %2930 }
0x1308   :  { %4871 = vmatpush.xpose.msk.msra.mxu0 %vm612_vm1, %v2933_v46 }
0x130c   :  { %4872 = vmatpush.xpose.msk.msra.mxu0 %vm612_vm1, %v2931_v33 }
0x1310   :  { %4873 = vmatpush.xpose.msk.msra.mxu0 %vm612_vm1, %v2929_v18 }
0x133c   :  { %v2925_v48 = vpop.permute.xlu0 %2924 }
0x1344   :  { %v2927_v22 = vpop.permute.xlu2 %2926 }
0x1345   :  { %4874 = vmatpush.xpose.msk.msra.mxu0 %vm612_vm1, %v2927_v22  ;;  %v2692_v22 = vld [vmem:[#allocation31 + $0x8] sm:$0xff] }
0x1349   :  { %4875 = vmatpush.xpose.msk.msra.mxu0 %vm612_vm1, %v2925_v48 }
0x134b   :  { %v2923_v19 = vpop.permute.xlu1 %2922 }
0x134d   :  { %4876 = vmatpush.xpose.msk.msra.mxu0 %vm612_vm1, %v2923_v19 }
0x1354   :  { %v2921_v52 = vpop.permute.xlu2 %2920 }
0x1355   :  { %4877 = vmatpush.xpose.msk.msra.mxu0 %vm612_vm1, %v2921_v52 }
0x1358   :  { %4878 = vmatmul.msk.f32.vlgmr.msra.gmra.mxu0 %vm612_vm1, %v7541_v49 }
0x1360   :  { %4879 = vmatmul.msk.f32.gmra.mxu0 %vm612_vm1, %v7493_v41 }
0x1368   :  { %4880 = vmatmul.msk.f32.gmra.mxu0 %vm612_vm1, %v7507_v27 }
0x1370   :  { %4881 = vmatmul.msk.f32.gmra.mxu0 %vm612_vm1, %v7518_v34 }
0x13d5   :  { %v3013_v62 = vpop.f32.mrf.mxu0 }
0x13d6   :  { %v3025_v51 = vmul.f32 0.35355338, %v3013_v62 }
0x13d8   :  { %3029 = vmax.xlane.f32.xlu0 %v3025_v51 }
0x13dd   :  { %v3016_v58 = vpop.f32.mrf.mxu0 }
0x13de   :  { %v7621_v31 = vmul.f32 0.35355338, %v3016_v58 }
0x13e0   :  { %3031 = vmax.xlane.f32.xlu1 %v7621_v31 }
0x13e5   :  { %v3019_v56 = vpop.f32.mrf.mxu0 }
0x13e6   :  { %v7624_v23 = vmul.f32 0.35355338, %v3019_v56 }
0x13e8   :  { %3033 = vmax.xlane.f32.xlu2 %v7624_v23 }
0x13ec   :  { %2870 = vrot.lane.b32.xlu0 %v7429_v5, %s6003_s16  ;;  %v7645_v5 = vld [vmem:[%s6214_s8 + $0x78] sm:$0xff] }
0x13ed   :  { %v3022_v57 = vpop.f32.mrf.mxu0  ;;  %3053 = vmatpush.msra.mxu1 %v7645_v5 }
0x13ee   :  { %v7629_v15 = vmul.f32 0.35355338, %v3022_v57 }
0x13f0   :  { %3035 = vmax.xlane.f32.xlu2 %v7629_v15 }
0x13f4   :  { %2864 = vrot.lane.b32.xlu0 %v7414_v12, %s6003_s16  ;;  %v7648_v12 = vld [vmem:[%s6214_s8 + $0x70] sm:$0xff] }
0x13f5   :  { %3054 = vmatpush.msra.mxu1 %v7648_v12 }
0x13f9   :  { %2868 = vrot.lane.b32.xlu1 %v7409_v17, %s6003_s16  ;;  %v7654_v17 = vld [vmem:[%s6214_s8 + $0x68] sm:$0xff] }
0x13fa   :  { %3055 = vmatpush.msra.mxu1 %v7654_v17 }
0x13fc   :  { %2860 = vrot.lane.b32.xlu0 %v7441_v43, %s6003_s16  ;;  %v7660_v43 = vld [vmem:[%s6214_s8 + $0x60] sm:$0xff] }
0x13fd   :  { %3056 = vmatpush.msra.mxu1 %v7660_v43 }
0x1401   :  { %2862 = vrot.lane.b32.xlu1 %v7459_v3, %s6003_s16  ;;  %v7682_v3 = vld [vmem:[%s6214_s8 + $0x40] sm:$0xff] }
0x1404   :  { %2854 = vrot.lane.b32.xlu0 %v7455_v45, %s6003_s16  ;;  %v7670_v45 = vld [vmem:[%s6214_s8 + $0x50] sm:$0xff] }
0x1408   :  { %2866 = vrot.lane.b32.xlu2 %v7444_v47, %s6003_s16  ;;  %v7664_v47 = vld [vmem:[%s6214_s8 + $0x58] sm:$0xff] }
0x1409   :  { %2856 = vrot.lane.b32.xlu1 %v7470_v9, %s6003_s16  ;;  %3057 = vmatpush.msra.mxu1 %v7664_v47  ;;  %v7699_v9 = vld [vmem:[%s6214_s8 + $0x30] sm:$0xff] }
0x140b   :  { %3058 = vmatpush.msra.mxu1 %v7670_v45 }
0x140c   :  { %2848 = vrot.lane.b32.xlu0 %v7432_v26, %s6003_s16  ;;  %v7676_v26 = vld [vmem:[%s6214_s8 + $0x48] sm:$0xff] }
0x140d   :  { %3059 = vmatpush.msra.mxu1 %v7676_v26 }
0x140f   :  { %3060 = vmatpush.msra.mxu1 %v7682_v3 }
0x1410   :  { %2858 = vrot.lane.b32.xlu2 %v7419_v55, %s6003_s16  ;;  %v7686_v55 = vld [vmem:[%s6214_s8 + $0x38] sm:$0xff] }
0x1411   :  { %2850 = vrot.lane.b32.xlu1 %v7480_v36, %s6003_s16  ;;  %3061 = vmatpush.msra.mxu1 %v7686_v55  ;;  %v7703_v36 = vld [vmem:[%s6214_s8 + $0x28] sm:$0xff] }
0x1413   :  { %3062 = vmatpush.msra.mxu1 %v7699_v9 }
0x1414   :  { %2842 = vrot.lane.b32.xlu0 %v7503_v10, %s6003_s16  ;;  %v7711_v10 = vld [vmem:[%s6214_s8 + $0x18] sm:$0xff] }
0x1415   :  { %3063 = vmatpush.msra.mxu1 %v7703_v36 }
0x1418   :  { %2852 = vrot.lane.b32.xlu2 %v7424_v24, %s6003_s16  ;;  %v7707_v24 = vld [vmem:[%s6214_s8 + $0x20] sm:$0xff] }
0x1419   :  { %2844 = vrot.lane.b32.xlu1 %v7524_v25, %s6003_s16  ;;  %3064 = vmatpush.msra.mxu1 %v7707_v24  ;;  %v7715_v25 = vld [vmem:[%s6214_s8 + $0x10] sm:$0xff] }
0x141b   :  { %3065 = vmatpush.msra.mxu1 %v7711_v10 }
0x141d   :  { %3066 = vmatpush.msra.mxu1 %v7715_v25 }
0x1420   :  { %2846 = vrot.lane.b32.xlu2 %v7539_v61, %s6003_s16  ;;  %v7719_v61 = vld [vmem:[%s6214_s8 + $0x8] sm:$0xff] }
0x1421   :  { %3067 = vmatpush.msra.mxu1 %v7719_v61 }
0x1428   :  { %2840 = vrot.lane.b32.xlu2 %v7560_v63, %s6003_s16  ;;  %v7723_v63 = vld [vmem:[%s6214_s8] sm:$0xff]  ;;  %s8482_s8 = sld [smem:[#allocation64_spill]] }
0x1429   :  { %3068 = vmatpush.msra.mxu1 %v7723_v63 }
0x144b   :  { %v3030_v16 = vpop.xlane.xlu0 %3029 }
0x144c   :  { %v3037_v21 = vsub.f32 %v3025_v51, %v3030_v16 }
0x144e   :  { %v3041_v29 = vmul.f32 1.442695, %v3037_v21 }
0x1450   :  { %5319 = vpow2.f32 %v3041_v29 }
0x1453   :  { %v3032_v20 = vpop.xlane.xlu1 %3031 }
0x1454   :  { %v3038_v32 = vsub.f32 %v7621_v31, %v3032_v20  ;;  %v2693_v31 = vld [vmem:[#allocation31 + $0x10] sm:$0xff] }
0x1456   :  { %v5320_v14 = vpop.eup %5319  ;;  %v3043_v60 = vmul.f32 1.442695, %v3038_v32 }
0x1457   :  { %v7727_v46 = vmul.f32 %v5320_v14, %v2691_v2  ;;  %v2694_v14 = vld [vmem:[#allocation31 + $0x18] sm:$0xff] }
0x1458   :  { %5321 = vpow2.f32 %v3043_v60 }
0x1459   :  { %3069 = vmatmul.f32.vlgmr.msra.gmra.mxu1 %v7727_v46 }
0x145b   :  { %v3034_v33 = vpop.xlane.xlu2 %3033 }
0x145c   :  { %v3039_v18 = vsub.f32 %v7624_v23, %v3034_v33 }
0x145e   :  { %v5322_v48 = vpop.eup %5321  ;;  %v3045_v19 = vmul.f32 1.442695, %v3039_v18  ;;  %v7731_v52 = vpop.permute.xlu0 %2870 }
0x145f   :  { %v7733_v62 = vmul.f32 %v5322_v48, %v2692_v22  ;;  %v2903_v20 = vmul.f32 %v7731_v52, %v7518_v34 }
0x1460   :  { %5323 = vpow2.f32 %v3045_v19 }
0x1461   :  { %3072 = vmatmul.f32.gmra.mxu1 %v7733_v62 }
0x1463   :  { %v3036_v51 = vpop.xlane.xlu2 %3035 }
0x1464   :  { %v3040_v58 = vsub.f32 %v7629_v15, %v3036_v51 }
0x1466   :  { %v5324_v56 = vpop.eup %5323  ;;  %v3047_v57 = vmul.f32 1.442695, %v3040_v58  ;;  %v7737_v16 = vpop.permute.xlu0 %2864 }
0x1467   :  { %v7739_v21 = vmul.f32 %v5324_v56, %v2693_v31  ;;  %v2900_v15 = vmul.f32 %v7737_v16, %v7541_v49 }
0x1468   :  { %5325 = vpow2.f32 %v3047_v57 }
0x1469   :  { %3075 = vmatmul.f32.gmra.mxu1 %v7739_v21 }
0x146b   :  { %v7742_v23 = vpop.permute.xlu1 %2868  ;;  %v7744_v29 = vpop.permute.xlu2 %2866 }
0x146c   :  { %v2902_v32 = vmul.f32 %v7742_v23, %v7507_v27  ;;  %v2901_v2 = vmul.f32 %v7744_v29, %v7493_v41 }
0x146e   :  { %v5326_v60 = vpop.eup %5325  ;;  %v5120_v33 = vpack.i.bf16 %v2902_v32, %v2903_v20  ;;  %v5125_v18 = vpack.i.bf16 %v2900_v15, %v2901_v2  ;;  %v7754_v22 = vpop.permute.xlu0 %2860 }
0x146f   :  { %8471 = vst [vmem:[#allocation71_spill] sm:$0xff] %v7754_v22  ;;  %v7756_v48 = vmul.f32 %v5326_v60, %v2694_v14  ;;  %v2898_v58 = vmul.f32 %v7754_v22, %v7507_v27 }
0x1470   :  { %5121 = vrot.lane.b32.xlu1 %v5120_v33, %s6003_s16  ;;  %5126 = vrot.lane.b32.xlu0 %v5125_v18, %s6003_s16 }
0x1471   :  { %3078 = vmatmul.f32.gmra.mxu1 %v7756_v48 }
0x1473   :  { %v7761_v19 = vpop.permute.xlu1 %2862  ;;  %v7763_v51 = vpop.permute.xlu2 %2858 }
0x1474   :  { %8472 = vst [vmem:[#allocation74_spill] sm:$0xff] %v7761_v19  ;;  %v2899_v31 = vmul.f32 %v7761_v19, %v7518_v34  ;;  %v2897_v32 = vmul.f32 %v7763_v51, %v7493_v41 }
0x1475   :  { %8473 = vst [vmem:[#allocation75_spill] sm:$0xff] %v7763_v51 }
0x1476   :  { %v5130_v56 = vpack.i.bf16 %v2898_v58, %v2899_v31  ;;  %v7769_v57 = vpop.permute.xlu0 %2854 }
0x1477   :  { %v2895_v2 = vmul.f32 %v7769_v57, %v7518_v34 }
0x1478   :  { %5131 = vrot.lane.b32.xlu2 %v5130_v56, %s6003_s16 }
0x147b   :  { %v7772_v20 = vpop.permute.xlu1 %2856  ;;  %v7774_v15 = vpop.permute.xlu2 %2852 }
0x147c   :  { %8474 = vst [vmem:[#allocation76_spill] sm:$0xff] %v7772_v20  ;;  %v2896_v14 = vmul.f32 %v7772_v20, %v7541_v49  ;;  %v2894_v60 = vmul.f32 %v7774_v15, %v7507_v27 }
0x147d   :  { %8475 = vst [vmem:[#allocation77_spill] sm:$0xff] %v7774_v15 }
0x147e   :  { %v5135_v33 = vpack.i.bf16 %v2896_v14, %v2897_v32  ;;  %v5140_v18 = vpack.i.bf16 %v2894_v60, %v2895_v2  ;;  %v7784_v58 = vpop.permute.xlu0 %2848 }
0x147f   :  { %8476 = vst [vmem:[#allocation73_spill] sm:$0xff] %v7784_v58  ;;  %v2892_v22 = vmul.f32 %v7784_v58, %v7541_v49 }
0x1480   :  { %5136 = vrot.lane.b32.xlu1 %v5135_v33, %s6003_s16  ;;  %5141 = vrot.lane.b32.xlu0 %v5140_v18, %s6003_s16 }
0x1483   :  { %v7788_v31 = vpop.permute.xlu1 %2850  ;;  %v7790_v56 = vpop.permute.xlu2 %2846 }
0x1484   :  { %8477 = vst [vmem:[#allocation72_spill] sm:$0xff] %v7788_v31  ;;  %v2893_v19 = vmul.f32 %v7788_v31, %v7493_v41  ;;  %v2891_v60 = vmul.f32 %v7790_v56, %v7518_v34 }
0x1485   :  { %8478 = vst [vmem:[#allocation79_spill] sm:$0xff] %v7790_v56 }
0x1486   :  { %v5145_v20 = vpack.i.bf16 %v2892_v22, %v2893_v19  ;;  %v7797_v32 = vpop.permute.xlu0 %2842 }
0x1487   :  { %8479 = vst [vmem:[#allocation78_spill] sm:$0xff] %v7797_v32  ;;  %v2889_v33 = vmul.f32 %v7797_v32, %v7493_v41 }
0x1488   :  { %5146 = vrot.lane.b32.xlu2 %v5145_v20, %s6003_s16 }
0x148b   :  { %v7799_v2 = vpop.permute.xlu1 %2844  ;;  %v7801_v14 = vpop.permute.xlu2 %2840 }
0x148c   :  { %8480 = vst [vmem:[#allocation80_spill] sm:$0xff] %v7799_v2  ;;  %v2890_v18 = vmul.f32 %v7799_v2, %v7507_v27  ;;  %v2888_v22 = vmul.f32 %v7801_v14, %v7541_v49 }
0x148d   :  { %8481 = vst [vmem:[#allocation81_spill] sm:$0xff] %v7801_v14  ;;  %v3185_v14 = vld [vmem:[#allocation21 + $0x10] sm:$0xff] }
0x148e   :  { %v5150_v19 = vpack.i.bf16 %v2890_v18, %v2891_v60  ;;  %v5155_v20 = vpack.i.bf16 %v2888_v22, %v2889_v33 }
0x1490   :  { %5151 = vrot.lane.b32.xlu1 %v5150_v19, %s6003_s16  ;;  %5156 = vrot.lane.b32.xlu0 %v5155_v20, %s6003_s16 }
0x14d2   :  { %v5132_v41 = vpop.permute.xlu2 %5131 }
0x14d3   :  { %v5133_v27 = vunpack.i.l.bf16 %v5132_v41  ;;  %v5134_v2 = vunpack.i.h.bf16 %v5132_v41 }
0x14d6   :  { %v3070_v33 = vpop.f32.mrf.mxu1 }
0x14e2   :  { %v5122_v58 = vpop.permute.xlu1 %5121  ;;  %v5127_v51 = vpop.permute.xlu0 %5126 }
0x14e3   :  { %v5123_v31 = vunpack.i.l.bf16 %v5122_v58  ;;  %v5124_v15 = vunpack.i.h.bf16 %v5122_v58  ;;  %v5128_v34 = vunpack.i.l.bf16 %v5127_v51  ;;  %v5129_v56 = vunpack.i.h.bf16 %v5127_v51  ;;  %v5147_v58 = vpop.permute.xlu2 %5146 }
0x14e4   :  { %v3071_v51 = vadd.f32 1e-20, %v3070_v33  ;;  %v5149_v20 = vunpack.i.h.bf16 %v5147_v58 }
0x14e5   :  { %3154 = vmatpush.msrb.mxu2 %v5123_v31 }
0x14e6   :  { %5327 = vrcp.f32 %v3071_v51 }
0x14e7   :  { %3155 = vmatpush.msrb.mxu2 %v5124_v15  ;;  %v5148_v15 = vunpack.i.l.bf16 %v5147_v58 }
0x14e9   :  { %3156 = vmatpush.msrb.mxu2 %v5128_v34 }
0x14eb   :  { %3157 = vmatpush.msrb.mxu2 %v5129_v56  ;;  %v3073_v56 = vpop.f32.mrf.mxu1 }
0x14ed   :  { %3158 = vmatpush.msrb.mxu2 %v5133_v27  ;;  %v3186_v27 = vld [vmem:[#allocation21 + $0x18] sm:$0xff] }
0x14ee   :  { %3215 = vmatpush.msrb.mxu3 %v3186_v27 }
0x14ef   :  { %3159 = vmatpush.msrb.mxu2 %v5134_v2 }
0x14f0   :  { %3216 = vmatpush.msrb.mxu3 %v3185_v14 }
0x14f2   :  { %v5137_v49 = vpop.permute.xlu1 %5136  ;;  %v5142_v18 = vpop.permute.xlu0 %5141 }
0x14f3   :  { %v5138_v60 = vunpack.i.l.bf16 %v5137_v49  ;;  %v5139_v22 = vunpack.i.h.bf16 %v5137_v49  ;;  %v5143_v19 = vunpack.i.l.bf16 %v5142_v18  ;;  %v5144_v31 = vunpack.i.h.bf16 %v5142_v18  ;;  %v5328_v18 = vpop.eup %5327  ;;  %v3076_v33 = vpop.f32.mrf.mxu1 }
0x14f4   :  { %v3074_v49 = vadd.f32 1e-20, %v3073_v56 }
0x14f5   :  { %3160 = vmatpush.msrb.mxu2 %v5138_v60 }
0x14f6   :  { %5329 = vrcp.f32 %v3074_v49 }
0x14f7   :  { %3161 = vmatpush.msrb.mxu2 %v5139_v22  ;;  %v3184_v22 = vld [vmem:[#allocation21 + $0x8] sm:$0xff] }
0x14f8   :  { %3217 = vmatpush.msrb.mxu3 %v3184_v22 }
0x14f9   :  { %3162 = vmatpush.msrb.mxu2 %v5143_v19 }
0x14fb   :  { %3163 = vmatpush.msrb.mxu2 %v5144_v31  ;;  %v3086_v31 = vmul.f32 %v5328_v18, %v7727_v46  ;;  %v3183_v46 = vld [vmem:[#allocation21] sm:$0xff] }
0x14fc   :  { %v5330_v51 = vpop.eup %5329  ;;  %3218 = vmatpush.msrb.mxu3 %v3183_v46 }
0x14fd   :  { %3164 = vmatpush.msrb.mxu2 %v5148_v15  ;;  %v3077_v15 = vadd.f32 1e-20, %v3076_v33  ;;  %v3087_v56 = vmul.f32 %v5330_v51, %v7733_v62 }
0x14ff   :  { %3165 = vmatpush.msrb.mxu2 %v5149_v20  ;;  %5331 = vrcp.f32 %v3077_v15  ;;  %v3079_v20 = vpop.f32.mrf.mxu1 }
0x1502   :  { %v5152_v2 = vpop.permute.xlu1 %5151  ;;  %v5157_v41 = vpop.permute.xlu0 %5156 }
0x1503   :  { %v5153_v34 = vunpack.i.l.bf16 %v5152_v2  ;;  %v5154_v60 = vunpack.i.h.bf16 %v5152_v2  ;;  %v5158_v19 = vunpack.i.l.bf16 %v5157_v41  ;;  %v5159_v58 = vunpack.i.h.bf16 %v5157_v41 }
0x1504   :  { %v3080_v2 = vadd.f32 1e-20, %v3079_v20 }
0x1505   :  { %3166 = vmatpush.msrb.mxu2 %v5153_v34  ;;  %v5332_v34 = vpop.eup %5331 }
0x1506   :  { %5333 = vrcp.f32 %v3080_v2  ;;  %v3088_v14 = vmul.f32 %v5332_v34, %v7739_v21  ;;  %v5221_v21 = vld [vmem:[%s8482_s8] ss:$0 sm:$0xff] }
0x1507   :  { %3167 = vmatpush.msrb.mxu2 %v5154_v60 }
0x1509   :  { %3168 = vmatpush.msrb.mxu2 %v5158_v19 }
0x150b   :  { %3169 = vmatpush.msrb.mxu2 %v5159_v58 }
0x150c   :  { %3170 = vmatmul.f32.vlgmr.msrb.gmra.mxu2 %v3086_v31  ;;  %v5334_v41 = vpop.eup %5333 }
0x150d   :  { %v3089_v27 = vmul.f32 %v5334_v41, %v7756_v48 }
0x1514   :  { %3173 = vmatmul.f32.gmra.mxu2 %v3087_v56 }
0x151c   :  { %3176 = vmatmul.f32.gmra.mxu2 %v3088_v14 }
0x1524   :  { %3179 = vmatmul.f32.gmra.mxu2 %v3089_v27 }
0x158f   :  { %v3171_v49 = vpop.f32.mrf.mxu2 }
0x1590   :  { %4882 = vmatmul.msk.f32.vlgmr.msrb.gmra.mxu3 %vm612_vm1, %v3171_v49 }
0x1597   :  { %v3174_v60 = vpop.f32.mrf.mxu2 }
0x1598   :  { %4883 = vmatmul.msk.f32.gmra.mxu3 %vm612_vm1, %v3174_v60 }
0x159f   :  { %v3177_v62 = vpop.f32.mrf.mxu2 }
0x15a0   :  { %4884 = vmatmul.msk.f32.gmra.mxu3 %vm612_vm1, %v3177_v62 }
0x15a7   :  { %v3180_v22 = vpop.f32.mrf.mxu2 }
0x15a8   :  { %4885 = vmatmul.msk.f32.gmra.mxu3 %vm612_vm1, %v3180_v22 }
0x1613   :  { %v3220_v18 = vpop.f32.mrf.mxu3 }
0x1614   :  { %v3221_v19 = vadd.f32 %v5221_v21, %v3220_v18 }
0x1616   :  { %v3232_v48 = vadd.f32 %v3221_v19, %v7448_v53 }
0x1618   :  { %v3238_v33 = vsel %vm612_vm1, %v3232_v48, 0.0 }
0x1619   :  { %3239 = vadd.xlane.f32.xlu2 %v3238_v33 }
0x161b   :  { %v3223_v58 = vpop.f32.mrf.mxu3 }
0x161c   :  { %v3224_v31 = vadd.f32 %v5221_v21, %v3223_v58 }
0x161e   :  { %v3233_v15 = vadd.f32 %v3224_v31, %v7463_v1 }
0x1620   :  { %v3241_v51 = vsel %vm612_vm1, %v3233_v15, 0.0 }
0x1621   :  { %3242 = vadd.xlane.f32.xlu1 %v3241_v51 }
0x1623   :  { %v3226_v20 = vpop.f32.mrf.mxu3 }
0x1624   :  { %v3227_v56 = vadd.f32 %v5221_v21, %v3226_v20 }
0x1626   :  { %v3234_v2 = vadd.f32 %v3227_v56, %v7475_v0 }
0x1628   :  { %v3244_v34 = vsel %vm612_vm1, %v3234_v2, 0.0 }
0x1629   :  { %3245 = vadd.xlane.f32.xlu0 %v3244_v34 }
0x162b   :  { %v3229_v14 = vpop.f32.mrf.mxu3 }
0x162c   :  { %v3230_v41 = vadd.f32 %v5221_v21, %v3229_v14  ;;  %v3343_v14 = vld [vmem:[#allocation22 + $0x18] sm:$0xff] }
0x162d   :  { %3372 = vmatpush.msrb.mxu1 %v3343_v14 }
0x162e   :  { %v3235_v53 = vadd.f32 %v3230_v41, %v7485_v30  ;;  %v3341_v41 = vld [vmem:[#allocation22 + $0x8] sm:$0xff] }
0x1630   :  { %v3247_v27 = vsel %vm612_vm1, %v3235_v53, 0.0 }
0x1631   :  { %3248 = vadd.xlane.f32.xlu2 %v3247_v27  ;;  %v3340_v27 = vld [vmem:[#allocation22] sm:$0xff] }
0x168c   :  { %v3240_v46 = vpop.xlane.xlu2 %3239 }
0x168d   :  { %v3250_v1 = vmul.f32 %v3240_v46, %v6861_v35 }
0x168f   :  { %v7831_v49 = vsub.f32 %v3232_v48, %v3250_v1 }
0x1691   :  { %v3258_v60 = vmul.f32 %v7831_v49, %v7831_v49 }
0x1693   :  { %v3262_v0 = vsel %vm612_vm1, %v3258_v60, 0.0 }
0x1694   :  { %3263 = vadd.xlane.f32.xlu1 %v3262_v0  ;;  %v3243_v62 = vpop.xlane.xlu1 %3242 }
0x1695   :  { %v3251_v22 = vmul.f32 %v3243_v62, %v6861_v35 }
0x1697   :  { %v7837_v21 = vsub.f32 %v3233_v15, %v3251_v22 }
0x1699   :  { %v3259_v30 = vmul.f32 %v7837_v21, %v7837_v21 }
0x169b   :  { %v3265_v18 = vsel %vm612_vm1, %v3259_v30, 0.0 }
0x169c   :  { %3266 = vadd.xlane.f32.xlu0 %v3265_v18  ;;  %v3246_v19 = vpop.xlane.xlu0 %3245 }
0x169d   :  { %v3252_v48 = vmul.f32 %v3246_v19, %v6861_v35  ;;  %v5222_v19 = vld [vmem:[%s8483_s12] ss:$0 sm:$0xff] }
0x169f   :  { %v7843_v33 = vsub.f32 %v3234_v2, %v3252_v48  ;;  %v3342_v2 = vld [vmem:[#allocation22 + $0x10] sm:$0xff] }
0x16a0   :  { %3373 = vmatpush.msrb.mxu1 %v3342_v2 }
0x16a1   :  { %v3260_v58 = vmul.f32 %v7843_v33, %v7843_v33 }
0x16a2   :  { %3374 = vmatpush.msrb.mxu1 %v3341_v41 }
0x16a3   :  { %v3268_v31 = vsel %vm612_vm1, %v3260_v58, 0.0 }
0x16a4   :  { %3269 = vadd.xlane.f32.xlu2 %v3268_v31  ;;  %v3249_v51 = vpop.xlane.xlu2 %3248  ;;  %3375 = vmatpush.msrb.mxu1 %v3340_v27 }
0x16a5   :  { %v3253_v15 = vmul.f32 %v3249_v51, %v6861_v35 }
0x16a6   :  { %3954 = vmatpush.msra.mxu1 %v7645_v5 }
0x16a7   :  { %v7849_v20 = vsub.f32 %v3235_v53, %v3253_v15 }
0x16a8   :  { %3955 = vmatpush.msra.mxu1 %v7648_v12 }
0x16a9   :  { %v3261_v56 = vmul.f32 %v7849_v20, %v7849_v20 }
0x16aa   :  { %3956 = vmatpush.msra.mxu1 %v7654_v17 }
0x16ab   :  { %v3271_v34 = vsel %vm612_vm1, %v3261_v56, 0.0 }
0x16ac   :  { %3272 = vadd.xlane.f32.xlu1 %v3271_v34  ;;  %3957 = vmatpush.msra.mxu1 %v7660_v43 }
0x16ae   :  { %3958 = vmatpush.msra.mxu1 %v7664_v47 }
0x16b0   :  { %3959 = vmatpush.msra.mxu1 %v7670_v45 }
0x16b2   :  { %3960 = vmatpush.msra.mxu1 %v7676_v26 }
0x16b4   :  { %3961 = vmatpush.msra.mxu1 %v7682_v3 }
0x16b6   :  { %3962 = vmatpush.msra.mxu1 %v7686_v55 }
0x16b8   :  { %3963 = vmatpush.msra.mxu1 %v7699_v9  ;;  %v5223_v9 = vld [vmem:[#allocation27] ss:$0 sm:$0xff] }
0x16ba   :  { %3964 = vmatpush.msra.mxu1 %v7703_v36 }
0x16bc   :  { %3965 = vmatpush.msra.mxu1 %v7707_v24 }
0x16be   :  { %3966 = vmatpush.msra.mxu1 %v7711_v10 }
0x16c0   :  { %3967 = vmatpush.msra.mxu1 %v7715_v25 }
0x16c2   :  { %3968 = vmatpush.msra.mxu1 %v7719_v61 }
0x16c4   :  { %3969 = vmatpush.msra.mxu1 %v7723_v63 }
0x1707   :  { %v3264_v46 = vpop.xlane.xlu1 %3263 }
0x1708   :  { %v3274_v53 = vmul.f32 %v3264_v46, %v6861_v35 }
0x170a   :  { %v3278_v1 = vadd.f32 1e-05, %v3274_v53 }
0x170c   :  { %5335 = vrsqrt.f32 %v3278_v1  ;;  %vm3288_vm14 = vweird.f32 %v3278_v1 }
0x170f   :  { %v3267_v60 = vpop.xlane.xlu0 %3266 }
0x1710   :  { %v3275_v0 = vmul.f32 %v3267_v60, %v6861_v35 }
0x1712   :  { %v5336_v5 = vpop.eup %5335  ;;  %v3279_v62 = vadd.f32 1e-05, %v3275_v0 }
0x1713   :  { %v3283_v12 = vmul.f32 %v5336_v5, %v3278_v1  ;;  %vm3289_vm13 = vweird.f32 %v5336_v5 }
0x1714   :  { %5337 = vrsqrt.f32 %v3279_v62  ;;  %vm3290_vm15 = vmor %vm3288_vm14, %vm3289_vm13  ;;  %vm3298_vm3 = vweird.f32 %v3279_v62 }
0x1715   :  { %v3284_v17 = vmul.f32 %v5336_v5, %v3283_v12 }
0x1717   :  { %v3285_v43 = vmul.f32 0.5, %v3284_v17  ;;  %v3270_v22 = vpop.xlane.xlu2 %3269 }
0x1718   :  { %v3276_v47 = vmul.f32 %v3270_v22, %v6861_v35 }
0x1719   :  { %v3286_v45 = vsub.f32 1.5, %v3285_v43 }
0x171a   :  { %v5338_v26 = vpop.eup %5337  ;;  %v3280_v30 = vadd.f32 1e-05, %v3276_v47 }
0x171b   :  { %v3287_v18 = vmul.f32 %v5336_v5, %v3286_v45  ;;  %v3293_v3 = vmul.f32 %v5338_v26, %v3279_v62  ;;  %vm3299_vm2 = vweird.f32 %v5338_v26 }
0x171c   :  { %5339 = vrsqrt.f32 %v3280_v30  ;;  %vm3300_vm4 = vmor %vm3298_vm3, %vm3299_vm2  ;;  %vm3308_vm6 = vweird.f32 %v3280_v30 }
0x171d   :  { %v3291_v55 = vsel %vm3290_vm15, %v5336_v5, %v3287_v18  ;;  %v3294_v48 = vmul.f32 %v5338_v26, %v3293_v3 }
0x171e   :  { %v3322_v58 = vmul.f32 %v3291_v55, %v7831_v49 }
0x171f   :  { %v3295_v31 = vmul.f32 0.5, %v3294_v48  ;;  %v3273_v51 = vpop.xlane.xlu1 %3272 }
0x1720   :  { %v3329_v36 = vmul.f32 %v5222_v19, %v3322_v58  ;;  %v3277_v15 = vmul.f32 %v3273_v51, %v6861_v35 }
0x1721   :  { %v3296_v56 = vsub.f32 1.5, %v3295_v31 }
0x1722   :  { %v5340_v24 = vpop.eup %5339  ;;  %v7875_v34 = vadd.f32 %v5223_v9, %v3329_v36  ;;  %v3281_v14 = vadd.f32 1e-05, %v3277_v15 }
0x1723   :  { %v3297_v2 = vmul.f32 %v5338_v26, %v3296_v56  ;;  %v3303_v10 = vmul.f32 %v5340_v24, %v3280_v30  ;;  %vm3309_vm5 = vweird.f32 %v5340_v24 }
0x1724   :  { %5341 = vrsqrt.f32 %v3281_v14  ;;  %4886 = vmatmul.msk.f32.vlgmr.msrb.gmra.mxu1 %vm612_vm1, %v7875_v34  ;;  %vm3310_vm7 = vmor %vm3308_vm6, %vm3309_vm5  ;;  %vm3318_vm9 = vweird.f32 %v3281_v14 }
0x1725   :  { %v3301_v25 = vsel %vm3300_vm4, %v5338_v26, %v3297_v2  ;;  %v3304_v49 = vmul.f32 %v5340_v24, %v3303_v10 }
0x1726   :  { %v3323_v41 = vmul.f32 %v3301_v25, %v7837_v21 }
0x1727   :  { %v3305_v27 = vmul.f32 0.5, %v3304_v49 }
0x1728   :  { %v3330_v61 = vmul.f32 %v5222_v19, %v3323_v41 }
0x1729   :  { %v3306_v46 = vsub.f32 1.5, %v3305_v27 }
0x172a   :  { %v5342_v53 = vpop.eup %5341  ;;  %v7881_v1 = vadd.f32 %v5223_v9, %v3330_v61 }
0x172b   :  { %v3307_v60 = vmul.f32 %v5340_v24, %v3306_v46  ;;  %v3313_v0 = vmul.f32 %v5342_v53, %v3281_v14  ;;  %vm3319_vm8 = vweird.f32 %v5342_v53 }
0x172c   :  { %4887 = vmatmul.msk.f32.gmra.mxu1 %vm612_vm1, %v7881_v1  ;;  %vm3320_vm10 = vmor %vm3318_vm9, %vm3319_vm8 }
0x172d   :  { %v3311_v63 = vsel %vm3310_vm7, %v5340_v24, %v3307_v60  ;;  %v3314_v5 = vmul.f32 %v5342_v53, %v3313_v0 }
0x172e   :  { %v3324_v62 = vmul.f32 %v3311_v63, %v7843_v33  ;;  %v5224_v33 = vld [vmem:[#allocation24] ss:$0 sm:$0xff] }
0x172f   :  { %v3315_v12 = vmul.f32 0.5, %v3314_v5 }
0x1730   :  { %v3331_v21 = vmul.f32 %v5222_v19, %v3324_v62 }
0x1731   :  { %v3316_v17 = vsub.f32 1.5, %v3315_v12  ;;  %v3568_v12 = vld [vmem:[#allocation25 + $0x18] sm:$0xff] }
0x1732   :  { %v7886_v43 = vadd.f32 %v5223_v9, %v3331_v21  ;;  %3597 = vmatpush.msra.mxu2 %v3568_v12 }
0x1733   :  { %v3317_v22 = vmul.f32 %v5342_v53, %v3316_v17 }
0x1734   :  { %4888 = vmatmul.msk.f32.gmra.mxu1 %vm612_vm1, %v7886_v43 }
0x1735   :  { %v3321_v47 = vsel %vm3320_vm10, %v5342_v53, %v3317_v22 }
0x1736   :  { %v3325_v45 = vmul.f32 %v3321_v47, %v7849_v20 }
0x1738   :  { %v3332_v26 = vmul.f32 %v5222_v19, %v3325_v45  ;;  %v3567_v45 = vld [vmem:[#allocation25 + $0x10] sm:$0xff] }
0x1739   :  { %3598 = vmatpush.msra.mxu2 %v3567_v45 }
0x173a   :  { %v7891_v30 = vadd.f32 %v5223_v9, %v3332_v26 }
0x173c   :  { %4889 = vmatmul.msk.f32.gmra.mxu1 %vm612_vm1, %v7891_v30 }
0x17a1   :  { %v3377_v18 = vpop.f32.mrf.mxu1 }
0x17a2   :  { %v7895_v3 = vadd.f32 %v5224_v33, %v3377_v18 }
0x17a4   :  { %v7898_v55 = vmul.f32 0.70710677, %v7895_v3 }
0x17a6   :  { %v3397_v48 = vmul.f32 %v7898_v55, %v7898_v55 }
0x17a8   :  { %v7902_v58 = vmin.f32 %v3397_v48, 16.0 }
0x17a9   :  { %v3380_v31 = vpop.f32.mrf.mxu1 }
0x17aa   :  { %v3399_v20 = vmul.f32 2.1237322e-06, %v7902_v58  ;;  %v3410_v19 = vmul.f32 3.8918573e-05, %v7902_v58  ;;  %v7906_v9 = vadd.f32 %v5224_v33, %v3380_v31 }
0x17ac   :  { %v3400_v51 = vadd.f32 0.00028619796, %v3399_v20  ;;  %v3411_v36 = vadd.f32 0.001143296, %v3410_v19  ;;  %v7909_v15 = vmul.f32 0.70710677, %v7906_v9 }
0x17ad   :  { %v3566_v19 = vld [vmem:[#allocation25 + $0x8] sm:$0xff] }
0x17ae   :  { %v3401_v56 = vmul.f32 %v3400_v51, %v7902_v58  ;;  %v3412_v24 = vmul.f32 %v3411_v36, %v7902_v58  ;;  %v3437_v14 = vmul.f32 %v7909_v15, %v7909_v15  ;;  %3599 = vmatpush.msra.mxu2 %v3566_v19 }
0x17b0   :  { %v3402_v2 = vadd.f32 0.0036580483, %v3401_v56  ;;  %v3413_v10 = vadd.f32 0.014752088, %v3412_v24  ;;  %v7915_v25 = vmin.f32 %v3437_v14, 16.0 }
0x17b1   :  { %v3383_v49 = vpop.f32.mrf.mxu1 }
0x17b2   :  { %v3414_v41 = vmul.f32 %v3413_v10, %v7902_v58  ;;  %v7918_v27 = vadd.f32 %v5224_v33, %v3383_v49  ;;  %v3403_v61 = vmul.f32 %v3402_v2, %v7902_v58  ;;  %v3439_v46 = vmul.f32 2.1237322e-06, %v7915_v25  ;;  %v3565_v2 = vld [vmem:[#allocation25] sm:$0xff] }
0x17b3   :  { %v3450_v53 = vmul.f32 3.8918573e-05, %v7915_v25  ;;  %3600 = vmatpush.msra.mxu2 %v3565_v2 }
0x17b4   :  { %v3415_v60 = vadd.f32 0.112945676, %v3414_v41  ;;  %v3440_v0 = vadd.f32 0.00028619796, %v3439_v46  ;;  %v7924_v5 = vmul.f32 0.70710677, %v7918_v27 }
0x17b5   :  { %v3451_v63 = vadd.f32 0.001143296, %v3450_v53  ;;  %v3404_v21 = vadd.f32 0.05243302, %v3403_v61 }
0x17b6   :  { %v3416_v62 = vmul.f32 %v3415_v60, %v7902_v58  ;;  %v3441_v17 = vmul.f32 %v3440_v0, %v7915_v25  ;;  %v3477_v47 = vmul.f32 %v7924_v5, %v7924_v5 }
0x17b7   :  { %v3452_v22 = vmul.f32 %v3451_v63, %v7915_v25  ;;  %v3405_v56 = vmul.f32 %v3404_v21, %v7902_v58 }
0x17b8   :  { %v3417_v26 = vadd.f32 0.4994258, %v3416_v62  ;;  %v3442_v18 = vadd.f32 0.0036580483, %v3441_v17  ;;  %v7931_v31 = vmin.f32 %v3477_v47, 16.0 }
0x17b9   :  { %v3453_v48 = vadd.f32 0.014752088, %v3452_v22  ;;  %v3386_v20 = vpop.f32.mrf.mxu1  ;;  %v3406_v53 = vadd.f32 0.18741608, %v3405_v56 }
0x17ba   :  { %v3418_v51 = vmul.f32 %v3417_v26, %v7902_v58  ;;  %v7934_v36 = vadd.f32 %v5224_v33, %v3386_v20  ;;  %v3479_v14 = vmul.f32 2.1237322e-06, %v7931_v31  ;;  %v3443_v49 = vmul.f32 %v3442_v18, %v7915_v25 }
0x17bb   :  { %v3454_v24 = vmul.f32 %v3453_v48, %v7915_v25  ;;  %v3490_v41 = vmul.f32 3.8918573e-05, %v7931_v31  ;;  %v3407_v47 = vmul.f32 %v3406_v53, %v7902_v58 }
0x17bc   :  { %v3419_v10 = vadd.f32 1.0, %v3418_v51  ;;  %v7942_v61 = vmul.f32 0.70710677, %v7934_v36  ;;  %v3480_v33 = vadd.f32 0.00028619796, %v3479_v14 }
0x17bd   :  { %v3455_v46 = vadd.f32 0.112945676, %v3454_v24  ;;  %v3444_v0 = vadd.f32 0.05243302, %v3443_v49  ;;  %v3491_v63 = vadd.f32 0.001143296, %v3490_v41 }
0x17be   :  { %5343 = vrcp.f32 %v3419_v10  ;;  %v3517_v62 = vmul.f32 %v7942_v61, %v7942_v61  ;;  %v3481_v21 = vmul.f32 %v3480_v33, %v7931_v31  ;;  %v3408_v41 = vadd.f32 1.1283791, %v3407_v47 }
0x17bf   :  { %v3456_v60 = vmul.f32 %v3455_v46, %v7915_v25  ;;  %v3492_v17 = vmul.f32 %v3491_v63, %v7931_v31  ;;  %v3445_v18 = vmul.f32 %v3444_v0, %v7915_v25  ;;  %v3429_v58 = vand.u32 2147483647, %v3419_v10 }
0x17c0   :  { %v7949_v22 = vmin.f32 %v3517_v62, 16.0  ;;  %v3482_v24 = vadd.f32 0.0036580483, %v3481_v21  ;;  %v3431_v33 = vand.u32 2147483648, %v3419_v10  ;;  %vm3425_vm12 = vweird.f32 %v3419_v10 }
0x17c1   :  { %v3457_v12 = vadd.f32 0.4994258, %v3456_v60  ;;  %v3493_v48 = vadd.f32 0.014752088, %v3492_v17  ;;  %v3446_v53 = vadd.f32 0.18741608, %v3445_v18  ;;  %v3409_v47 = vmul.f32 %v3408_v41, %v7898_v55 }
0x17c2   :  { %v3519_v20 = vmul.f32 2.1237322e-06, %v7949_v22  ;;  %v3530_v19 = vmul.f32 3.8918573e-05, %v7949_v22  ;;  %vm3430_vm14 = vcmp.eq.f32.partialorder %v3429_v58, 8.507059e+37 }
0x17c3   :  { %v3458_v45 = vmul.f32 %v3457_v12, %v7915_v25  ;;  %v3494_v14 = vmul.f32 %v3493_v48, %v7931_v31  ;;  %v3483_v12 = vmul.f32 %v3482_v24, %v7931_v31  ;;  %v3432_v48 = vor.u32 1.1754944e-38, %v3431_v33 }
0x17c4   :  { %v5344_v26 = vpop.eup %5343  ;;  %v3520_v2 = vadd.f32 0.00028619796, %v3519_v20  ;;  %v3531_v49 = vadd.f32 0.001143296, %v3530_v19  ;;  %v3447_v18 = vmul.f32 %v3446_v53, %v7915_v25 }
0x17c5   :  { %v3421_v51 = vmul.f32 %v5344_v26, %v3419_v10  ;;  %v3459_v56 = vadd.f32 1.0, %v3458_v45  ;;  %v3495_v60 = vadd.f32 0.112945676, %v3494_v14  ;;  %vm3426_vm11 = vweird.f32 %v5344_v26 }
0x17c6   :  { %v3521_v63 = vmul.f32 %v3520_v2, %v7949_v22  ;;  %v3532_v62 = vmul.f32 %v3531_v49, %v7949_v22  ;;  %vm3427_vm13 = vmor %vm3425_vm12, %vm3426_vm11 }
0x17c7   :  { %v3422_v46 = vsub.f32 1.0, %v3421_v51  ;;  %5345 = vrcp.f32 %v3459_v56  ;;  %v3496_v21 = vmul.f32 %v3495_v60, %v7931_v31  ;;  %v3471_v41 = vand.u32 2147483648, %v3459_v56 }
0x17c8   :  { %v3533_v45 = vadd.f32 0.014752088, %v3532_v62  ;;  %v3522_v14 = vadd.f32 0.0036580483, %v3521_v63  ;;  %v3448_v62 = vadd.f32 1.1283791, %v3447_v18  ;;  %vm3465_vm2 = vweird.f32 %v3459_v56 }
0x17c9   :  { %v3423_v0 = vmul.f32 %v5344_v26, %v3422_v46  ;;  %v3497_v20 = vadd.f32 0.4994258, %v3496_v21  ;;  %v3484_v46 = vadd.f32 0.05243302, %v3483_v12  ;;  %v3469_v53 = vand.u32 2147483647, %v3459_v56 }
0x17ca   :  { %v3534_v2 = vmul.f32 %v3533_v45, %v7949_v22  ;;  %v3523_v25 = vmul.f32 %v3522_v14, %v7949_v22  ;;  %v3389_v12 = vmul.f32 0.5, %v7895_v3  ;;  %v3472_v18 = vor.u32 1.1754944e-38, %v3471_v41 }
0x17cb   :  { %v3424_v17 = vadd.f32 %v5344_v26, %v3423_v0  ;;  %v3498_v10 = vmul.f32 %v3497_v20, %v7931_v31  ;;  %v3485_v63 = vmul.f32 %v3484_v46, %v7931_v31  ;;  %vm3470_vm4 = vcmp.eq.f32.partialorder %v3469_v53, 8.507059e+37 }
0x17cc   :  { %v3535_v0 = vadd.f32 0.112945676, %v3534_v2  ;;  %v3524_v20 = vadd.f32 0.05243302, %v3523_v25 }
0x17cd   :  { %v5346_v19 = vpop.eup %5345  ;;  %v3428_v51 = vsel %vm3427_vm13, %v5344_v26, %v3424_v17  ;;  %v3499_v32 = vadd.f32 1.0, %v3498_v10  ;;  %v3486_v14 = vadd.f32 0.18741608, %v3485_v63 }
0x17ce   :  { %v3433_v49 = vsel %vm3430_vm14, %v3432_v48, %v3428_v51  ;;  %v3461_v24 = vmul.f32 %v5346_v19, %v3459_v56  ;;  %v3536_v26 = vmul.f32 %v3535_v0, %v7949_v22  ;;  %vm3466_vm15 = vweird.f32 %v5346_v19 }
0x17cf   :  { %v3434_v60 = vmul.f32 %v3433_v49, %v3409_v47  ;;  %5347 = vrcp.f32 %v3499_v32  ;;  %v3449_v48 = vmul.f32 %v3448_v62, %v7909_v15  ;;  %vm3467_vm3 = vmor %vm3465_vm2, %vm3466_vm15  ;;  %v3525_v56 = vmul.f32 %v3524_v20, %v7949_v22 }
0x17d0   :  { %v3462_v55 = vsub.f32 1.0, %v3461_v24  ;;  %v3537_v45 = vadd.f32 0.4994258, %v3536_v26  ;;  %v3511_v62 = vand.u32 2147483648, %v3499_v32  ;;  %v3509_v26 = vand.u32 2147483647, %v3499_v32 }
0x17d1   :  { %v4890_v33 = vclamps-f32 %v3434_v60, 1.0  ;;  %v3487_v60 = vmul.f32 %v3486_v14, %v7931_v31  ;;  %vm3505_vm6 = vweird.f32 %v3499_v32 }
0x17d2   :  { %v3463_v58 = vmul.f32 %v5346_v19, %v3462_v55  ;;  %v3538_v2 = vmul.f32 %v3537_v45, %v7949_v22  ;;  %v3526_v55 = vadd.f32 0.18741608, %v3525_v56  ;;  %vm3510_vm8 = vcmp.eq.f32.partialorder %v3509_v26, 8.507059e+37 }
0x17d3   :  { %v3557_v21 = vadd.f32 1.0, %v4890_v33  ;;  %v3488_v33 = vadd.f32 1.1283791, %v3487_v60 }
0x17d4   :  { %v3464_v17 = vadd.f32 %v5346_v19, %v3463_v58  ;;  %v3539_v24 = vadd.f32 1.0, %v3538_v2  ;;  %v3527_v31 = vmul.f32 %v3526_v55, %v7949_v22  ;;  %v3391_v22 = vmul.f32 0.5, %v7918_v27  ;;  %v5225_v27 = vld [vmem:[%s8484_s0] ss:$0 sm:$0xff] }
0x17d5   :  { %v3561_v47 = vmul.f32 %v3557_v21, %v3389_v12  ;;  %v5348_v46 = vpop.eup %5347  ;;  %v3512_v12 = vor.u32 1.1754944e-38, %v3511_v62 }
0x17d6   :  { %v3468_v51 = vsel %vm3467_vm3, %v5346_v19, %v3464_v17  ;;  %v3501_v10 = vmul.f32 %v5348_v46, %v3499_v32  ;;  %5349 = vrcp.f32 %v3539_v24  ;;  %v3390_v19 = vmul.f32 0.5, %v7906_v9 }
0x17d7   :  { %v3473_v49 = vsel %vm3470_vm4, %v3472_v18, %v3468_v51  ;;  %4894 = vmatmul.msk.f32.vlgmr.msra.gmra.mxu2 %vm612_vm1, %v3561_v47  ;;  %vm3506_vm5 = vweird.f32 %v5348_v46  ;;  %v3489_v9 = vmul.f32 %v3488_v33, %v7924_v5  ;;  %v3551_v18 = vand.u32 2147483648, %v3539_v24 }
0x17d8   :  { %v3474_v3 = vmul.f32 %v3473_v49, %v3449_v48  ;;  %v3502_v0 = vsub.f32 1.0, %v3501_v10  ;;  %vm3507_vm7 = vmor %vm3505_vm6, %vm3506_vm5  ;;  %v3528_v20 = vadd.f32 1.1283791, %v3527_v31  ;;  %v3549_v14 = vand.u32 2147483647, %v3539_v24 }
0x17d9   :  { %vm3545_vm10 = vweird.f32 %v3539_v24  ;;  %v3552_v49 = vor.u32 1.1754944e-38, %v3551_v18 }
0x17da   :  { %v4891_v15 = vclamps-f32 %v3474_v3, 1.0  ;;  %v3503_v25 = vmul.f32 %v5348_v46, %v3502_v0  ;;  %v3529_v5 = vmul.f32 %v3528_v20, %v7942_v61  ;;  %vm3550_vm12 = vcmp.eq.f32.partialorder %v3549_v14, 8.507059e+37 }
0x17db   :  { %v3392_v0 = vmul.f32 0.5, %v7934_v36 }
0x17dc   :  { %v3558_v41 = vadd.f32 1.0, %v4891_v15  ;;  %v5350_v53 = vpop.eup %5349  ;;  %v3504_v63 = vadd.f32 %v5348_v46, %v3503_v25 }
0x17dd   :  { %v3541_v21 = vmul.f32 %v5350_v53, %v3539_v24  ;;  %vm3546_vm9 = vweird.f32 %v5350_v53 }
0x17de   :  { %v3562_v58 = vmul.f32 %v3558_v41, %v3390_v19  ;;  %v3508_v17 = vsel %vm3507_vm7, %v5348_v46, %v3504_v63  ;;  %vm3547_vm11 = vmor %vm3545_vm10, %vm3546_vm9 }
0x17df   :  { %v3513_v45 = vsel %vm3510_vm8, %v3512_v12, %v3508_v17  ;;  %v3542_v47 = vsub.f32 1.0, %v3541_v21 }
0x17e0   :  { %4895 = vmatmul.msk.f32.gmra.mxu2 %vm612_vm1, %v3562_v58  ;;  %v3514_v48 = vmul.f32 %v3513_v45, %v3489_v9 }
0x17e1   :  { %v3543_v51 = vmul.f32 %v5350_v53, %v3542_v47 }
0x17e2   :  { %v4892_v32 = vclamps-f32 %v3514_v48, 1.0 }
0x17e3   :  { %v3544_v2 = vadd.f32 %v5350_v53, %v3543_v51 }
0x17e4   :  { %v3559_v3 = vadd.f32 1.0, %v4892_v32 }
0x17e5   :  { %v3548_v46 = vsel %vm3547_vm11, %v5350_v53, %v3544_v2 }
0x17e6   :  { %v3553_v56 = vsel %vm3550_vm12, %v3552_v49, %v3548_v46  ;;  %v3563_v60 = vmul.f32 %v3559_v3, %v3391_v22 }
0x17e7   :  { %v3554_v10 = vmul.f32 %v3553_v56, %v3529_v5 }
0x17e8   :  { %4896 = vmatmul.msk.f32.gmra.mxu2 %vm612_vm1, %v3563_v60 }
0x17e9   :  { %v4893_v15 = vclamps-f32 %v3554_v10, 1.0  ;;  %v3726_v10 = vld [vmem:[#allocation18 + $0x38] sm:$0xff] }
0x17ea   :  { %3756 = vmatpush.msra.mxu3 %v3726_v10 }
0x17eb   :  { %v3560_v19 = vadd.f32 1.0, %v4893_v15  ;;  %v3725_v15 = vld [vmem:[#allocation18 + $0x30] sm:$0xff] }
0x17ec   :  { %3757 = vmatpush.msra.mxu3 %v3725_v15 }
0x17ed   :  { %v3564_v24 = vmul.f32 %v3560_v19, %v3392_v0  ;;  %v3724_v0 = vld [vmem:[#allocation18 + $0x28] sm:$0xff] }
0x17ee   :  { %3758 = vmatpush.msra.mxu3 %v3724_v0 }
0x17f0   :  { %4897 = vmatmul.msk.f32.gmra.mxu2 %vm612_vm1, %v3564_v24 }
0x185a   :  { %v3602_v62 = vpop.f32.mrf.mxu2 }
0x185b   :  { %v3603_v55 = vadd.f32 %v5225_v27, %v3602_v62 }
0x185d   :  { %v3614_v41 = vadd.f32 %v3603_v55, %v7875_v34 }
0x185f   :  { %v3620_v61 = vsel %vm612_vm1, %v3614_v41, 0.0 }
0x1860   :  { %3621 = vadd.xlane.f32.xlu0 %v3620_v61 }
0x1863   :  { %v3605_v33 = vpop.f32.mrf.mxu2 }
0x1864   :  { %v3606_v25 = vadd.f32 %v5225_v27, %v3605_v33 }
0x1866   :  { %v3615_v26 = vadd.f32 %v3606_v25, %v7881_v1 }
0x1868   :  { %v3623_v58 = vsel %vm612_vm1, %v3615_v26, 0.0 }
0x1869   :  { %3624 = vadd.xlane.f32.xlu2 %v3623_v58 }
0x186b   :  { %v3608_v36 = vpop.f32.mrf.mxu2 }
0x186c   :  { %v3609_v53 = vadd.f32 %v5225_v27, %v3608_v36 }
0x186e   :  { %v3616_v63 = vadd.f32 %v3609_v53, %v7886_v43 }
0x1870   :  { %v3626_v12 = vsel %vm612_vm1, %v3616_v63, 0.0 }
0x1871   :  { %3627 = vadd.xlane.f32.xlu1 %v3626_v12  ;;  %v5226_v12 = vld [vmem:[#allocation28] ss:$0 sm:$0xff] }
0x1873   :  { %v3611_v31 = vpop.f32.mrf.mxu2 }
0x1874   :  { %v3612_v21 = vadd.f32 %v5225_v27, %v3611_v31  ;;  %v3723_v27 = vld [vmem:[#allocation18 + $0x20] sm:$0xff] }
0x1875   :  { %3759 = vmatpush.msra.mxu3 %v3723_v27 }
0x1876   :  { %v3617_v34 = vadd.f32 %v3612_v21, %v7891_v30 }
0x1878   :  { %v3629_v9 = vsel %vm612_vm1, %v3617_v34, 0.0 }
0x1879   :  { %3630 = vadd.xlane.f32.xlu0 %v3629_v9 }
0x18d3   :  { %v3622_v17 = vpop.xlane.xlu0 %3621 }
0x18d4   :  { %v3632_v1 = vmul.f32 %v3622_v17, %v6861_v35 }
0x18d6   :  { %v3636_v45 = vsub.f32 %v3614_v41, %v3632_v1  ;;  %v5227_v1 = vld [vmem:[#allocation30] ss:$0 sm:$0xff] }
0x18d8   :  { %v3640_v47 = vmul.f32 %v3636_v45, %v3636_v45 }
0x18da   :  { %v3644_v48 = vsel %vm612_vm1, %v3640_v47, 0.0 }
0x18db   :  { %3645 = vadd.xlane.f32.xlu2 %v3644_v48 }
0x18dc   :  { %v3625_v18 = vpop.xlane.xlu2 %3624 }
0x18dd   :  { %v3633_v43 = vmul.f32 %v3625_v18, %v6861_v35 }
0x18df   :  { %v7995_v20 = vsub.f32 %v3615_v26, %v3633_v43 }
0x18e1   :  { %v3641_v51 = vmul.f32 %v7995_v20, %v7995_v20 }
0x18e3   :  { %v3647_v30 = vsel %vm612_vm1, %v3641_v51, 0.0 }
0x18e4   :  { %3648 = vadd.xlane.f32.xlu1 %v3647_v30  ;;  %v3628_v14 = vpop.xlane.xlu1 %3627 }
0x18e5   :  { %v3634_v32 = vmul.f32 %v3628_v14, %v6861_v35 }
0x18e7   :  { %v8001_v2 = vsub.f32 %v3616_v63, %v3634_v32 }
0x18e9   :  { %v3642_v22 = vmul.f32 %v8001_v2, %v8001_v2 }
0x18eb   :  { %v3650_v49 = vsel %vm612_vm1, %v3642_v22, 0.0 }
0x18ec   :  { %v3631_v3 = vpop.xlane.xlu0 %3630  ;;  %3651 = vadd.xlane.f32.xlu0 %v3650_v49 }
0x18ed   :  { %v3635_v5 = vmul.f32 %v3631_v3, %v6861_v35 }
0x18ef   :  { %v8007_v46 = vsub.f32 %v3617_v34, %v3635_v5 }
0x18f1   :  { %v3643_v56 = vmul.f32 %v8007_v46, %v8007_v46 }
0x18f3   :  { %v3653_v60 = vsel %vm612_vm1, %v3643_v56, 0.0 }
0x18f4   :  { %3654 = vadd.xlane.f32.xlu2 %v3653_v60 }
0x194e   :  { %v3646_v19 = vpop.xlane.xlu2 %3645 }
0x194f   :  { %v3656_v24 = vmul.f32 %v3646_v19, %v6861_v35 }
0x1951   :  { %v3660_v62 = vadd.f32 1e-05, %v3656_v24 }
0x1953   :  { %5351 = vrsqrt.f32 %v3660_v62  ;;  %vm3670_vm14 = vweird.f32 %v3660_v62 }
0x1957   :  { %v3649_v55 = vpop.xlane.xlu1 %3648 }
0x1958   :  { %v3657_v61 = vmul.f32 %v3649_v55, %v6861_v35 }
0x1959   :  { %v5352_v41 = vpop.eup %5351 }
0x195a   :  { %v3665_v33 = vmul.f32 %v5352_v41, %v3660_v62  ;;  %v3661_v25 = vadd.f32 1e-05, %v3657_v61  ;;  %vm3671_vm13 = vweird.f32 %v5352_v41 }
0x195b   :  { %vm3672_vm15 = vmor %vm3670_vm14, %vm3671_vm13 }
0x195c   :  { %v3666_v26 = vmul.f32 %v5352_v41, %v3665_v33  ;;  %5353 = vrsqrt.f32 %v3661_v25  ;;  %vm3680_vm3 = vweird.f32 %v3661_v25 }
0x195e   :  { %v3667_v58 = vmul.f32 0.5, %v3666_v26 }
0x195f   :  { %v3652_v31 = vpop.xlane.xlu0 %3651 }
0x1960   :  { %v3668_v36 = vsub.f32 1.5, %v3667_v58  ;;  %v3658_v9 = vmul.f32 %v3652_v31, %v6861_v35 }
0x1962   :  { %v3669_v53 = vmul.f32 %v5352_v41, %v3668_v36  ;;  %v5354_v63 = vpop.eup %5353  ;;  %v3662_v48 = vadd.f32 1e-05, %v3658_v9 }
0x1963   :  { %v3675_v34 = vmul.f32 %v5354_v63, %v3661_v25  ;;  %vm3681_vm2 = vweird.f32 %v5354_v63 }
0x1964   :  { %v3673_v21 = vsel %vm3672_vm15, %v5352_v41, %v3669_v53  ;;  %5355 = vrsqrt.f32 %v3662_v48  ;;  %vm3682_vm4 = vmor %vm3680_vm3, %vm3681_vm2  ;;  %vm3690_vm6 = vweird.f32 %v3662_v48 }
0x1965   :  { %v3704_v17 = vmul.f32 %v3673_v21, %v3636_v45  ;;  %v3676_v47 = vmul.f32 %v5354_v63, %v3675_v34  ;;  %v5228_v21 = vld [vmem:[#allocation19 + $0x1] ss:$0 sm:$0xff] }
0x1967   :  { %v3711_v18 = vmul.f32 %v5226_v12, %v3704_v17  ;;  %v3677_v43 = vmul.f32 0.5, %v3676_v47  ;;  %v3655_v14 = vpop.xlane.xlu2 %3654 }
0x1968   :  { %v3659_v22 = vmul.f32 %v3655_v14, %v6861_v35 }
0x1969   :  { %v8015_v51 = vadd.f32 %v5227_v1, %v3711_v18  ;;  %v3678_v30 = vsub.f32 1.5, %v3677_v43 }
0x196a   :  { %v5356_v45 = vpop.eup %5355  ;;  %v3663_v3 = vadd.f32 1e-05, %v3659_v22 }
0x196b   :  { %4898 = vmatmul.msk.f32.vlgmr.msra.gmra.mxu3 %vm612_vm1, %v8015_v51  ;;  %v3679_v32 = vmul.f32 %v5354_v63, %v3678_v30  ;;  %v3685_v56 = vmul.f32 %v5356_v45, %v3662_v48  ;;  %vm3691_vm5 = vweird.f32 %v5356_v45 }
0x196c   :  { %5357 = vrsqrt.f32 %v3663_v3  ;;  %vm3692_vm7 = vmor %vm3690_vm6, %vm3691_vm5  ;;  %vm3700_vm9 = vweird.f32 %v3663_v3 }
0x196d   :  { %v3683_v49 = vsel %vm3682_vm4, %v5354_v63, %v3679_v32  ;;  %v3686_v60 = vmul.f32 %v5356_v45, %v3685_v56 }
0x196e   :  { %v3705_v5 = vmul.f32 %v3683_v49, %v7995_v20 }
0x196f   :  { %v3687_v15 = vmul.f32 0.5, %v3686_v60 }
0x1970   :  { %v3712_v10 = vmul.f32 %v5226_v12, %v3705_v5 }
0x1971   :  { %v3688_v19 = vsub.f32 1.5, %v3687_v15 }
0x1972   :  { %v8021_v0 = vadd.f32 %v5227_v1, %v3712_v10  ;;  %v5358_v24 = vpop.eup %5357 }
0x1973   :  { %v3689_v27 = vmul.f32 %v5356_v45, %v3688_v19  ;;  %v3695_v62 = vmul.f32 %v5358_v24, %v3663_v3  ;;  %vm3701_vm8 = vweird.f32 %v5358_v24 }
0x1974   :  { %4899 = vmatmul.msk.f32.gmra.mxu3 %vm612_vm1, %v8021_v0  ;;  %vm3702_vm10 = vmor %vm3700_vm9, %vm3701_vm8 }
0x1975   :  { %v3693_v55 = vsel %vm3692_vm7, %v5356_v45, %v3689_v27  ;;  %v3696_v41 = vmul.f32 %v5358_v24, %v3695_v62 }
0x1976   :  { %v3706_v20 = vmul.f32 %v3693_v55, %v8001_v2 }
0x1977   :  { %v3697_v61 = vmul.f32 0.5, %v3696_v41 }
0x1978   :  { %v3713_v33 = vmul.f32 %v5226_v12, %v3706_v20 }
0x1979   :  { %v3698_v25 = vsub.f32 1.5, %v3697_v61 }
0x197a   :  { %v8026_v26 = vadd.f32 %v5227_v1, %v3713_v33 }
0x197b   :  { %v3699_v58 = vmul.f32 %v5358_v24, %v3698_v25 }
0x197c   :  { %4900 = vmatmul.msk.f32.gmra.mxu3 %vm612_vm1, %v8026_v26 }
0x197d   :  { %v3703_v36 = vsel %vm3702_vm10, %v5358_v24, %v3699_v58 }
0x197e   :  { %v3707_v53 = vmul.f32 %v3703_v36, %v8007_v46 }
0x1980   :  { %v3714_v63 = vmul.f32 %v5226_v12, %v3707_v53 }
0x1982   :  { %v8031_v31 = vadd.f32 %v5227_v1, %v3714_v63 }
0x1984   :  { %4901 = vmatmul.msk.f32.gmra.mxu3 %vm612_vm1, %v8031_v31 }
0x19ee   :  { %v3761_v2 = vpop.f32.mrf.mxu3 }
0x19ef   :  { %v8048_v1 = vadd.f32 %v5228_v21, %v3761_v2 }
0x19f1   :  { %v3801_v63 = vmul.f32 %v8048_v1, %v7737_v16  ;;  %v8488_v16 = vld [vmem:[#allocation78_spill] sm:$0xff] }
0x19f7   :  { %v3764_v34 = vpop.f32.mrf.mxu3 }
0x19f8   :  { %v8035_v9 = vadd.f32 %v5228_v21, %v3764_v34  ;;  %v8485_v34 = vld [vmem:[#allocation77_spill] sm:$0xff] }
0x19fa   :  { %v3786_v17 = vmul.f32 %v8035_v9, %v7497_v11  ;;  %v3785_v11 = vmul.f32 %v8048_v1, %v7495_v44  ;;  %v3777_v44 = vmul.f32 %v8048_v1, %v7545_v4  ;;  %v3802_v53 = vmul.f32 %v8035_v9, %v7744_v29  ;;  %v8487_v29 = vld [vmem:[#allocation76_spill] sm:$0xff] }
0x19fc   :  { %3847 = vrot.lane.b32.xlu2 %v3786_v17, %s6002_s30  ;;  %v5165_v2 = vpack.i.bf16 %v3801_v63, %v3802_v53  ;;  %v5406_v63 = vld [vmem:[#allocation31 + $0x18] sm:$0xff] }
0x19ff   :  { %v3767_v47 = vpop.f32.mrf.mxu3 }
0x1a00   :  { %v8040_v48 = vadd.f32 %v5228_v21, %v3767_v47 }
0x1a02   :  { %v3787_v46 = vmul.f32 %v8040_v48, %v7489_v7  ;;  %v3783_v12 = vmul.f32 %v8040_v48, %v7511_v28  ;;  %v3782_v28 = vmul.f32 %v8035_v9, %v7505_v6  ;;  %v3774_v6 = vmul.f32 %v8035_v9, %v7582_v8 }
0x1a03   :  { %v3803_v58 = vmul.f32 %v8040_v48, %v7742_v23  ;;  %v8486_v23 = vld [vmem:[#allocation75_spill] sm:$0xff] }
0x1a04   :  { %3849 = vrot.lane.b32.xlu0 %v3787_v46, %s6002_s30  ;;  %3841 = vrot.lane.b32.xlu2 %v3783_v12, %s6002_s30  ;;  %v3798_v47 = vmul.f32 %v8035_v9, %v8486_v23  ;;  %v3797_v46 = vmul.f32 %v8048_v1, %v8487_v29 }
0x1a06   :  { %v5175_v12 = vpack.i.bf16 %v3797_v46, %v3798_v47 }
0x1a07   :  { %v3770_v18 = vpop.f32.mrf.mxu3 }
0x1a08   :  { %v8050_v43 = vadd.f32 %v5228_v21, %v3770_v18  ;;  %v3790_v18 = vmul.f32 %v8035_v9, %v8488_v16 }
0x1a0a   :  { %v3788_v30 = vmul.f32 %v8050_v43, %v7491_v37  ;;  %v3780_v7 = vmul.f32 %v8050_v43, %v7528_v54  ;;  %v3784_v14 = vmul.f32 %v8050_v43, %v7536_v38  ;;  %v3779_v37 = vmul.f32 %v8040_v48, %v7521_v39 }
0x1a0b   :  { %v3781_v54 = vmul.f32 %v8048_v1, %v7567_v50  ;;  %v3778_v38 = vmul.f32 %v8035_v9, %v7572_v42  ;;  %v3776_v4 = vmul.f32 %v8050_v43, %v7589_v40  ;;  %v3775_v39 = vmul.f32 %v8040_v48, %v7577_v13 }
0x1a0c   :  { %3845 = vrot.lane.b32.xlu0 %v3785_v11, %s6002_s30  ;;  %3851 = vrot.lane.b32.xlu1 %v3788_v30, %s6002_s30  ;;  %v3773_v50 = vmul.f32 %v8048_v1, %v7597_v59  ;;  %v3804_v25 = vmul.f32 %v8050_v43, %v7731_v52  ;;  %v3796_v21 = vmul.f32 %v8050_v43, %v7769_v57  ;;  %v8489_v11 = vld [vmem:[#allocation74_spill] sm:$0xff]  ;;  %v8490_v30 = vld [vmem:[#allocation81_spill] sm:$0xff] }
0x1a0d   :  { %3835 = vrot.lane.b32.xlu2 %v3780_v7, %s6002_s30  ;;  %v3795_v52 = vmul.f32 %v8040_v48, %v8485_v34  ;;  %v3800_v57 = vmul.f32 %v8050_v43, %v8489_v11  ;;  %v3789_v7 = vmul.f32 %v8048_v1, %v8490_v30 }
0x1a0e   :  { %v5160_v36 = vpack.i.bf16 %v3803_v58, %v3804_v25  ;;  %v5405_v25 = vld [vmem:[#allocation31 + $0x10] sm:$0xff] }
0x1a0f   :  { %v5180_v17 = vpack.i.bf16 %v3795_v52, %v3796_v21 }
0x1a14   :  { %3839 = vrot.lane.b32.xlu0 %v3782_v28, %s6002_s30  ;;  %3843 = vrot.lane.b32.xlu1 %v3784_v14, %s6002_s30  ;;  %v8491_v28 = vld [vmem:[#allocation71_spill] sm:$0xff] }
0x1a15   :  { %3829 = vrot.lane.b32.xlu2 %v3777_v44, %s6002_s30  ;;  %v3799_v14 = vmul.f32 %v8040_v48, %v8491_v28  ;;  %v5195_v44 = vpack.i.bf16 %v3789_v7, %v3790_v18 }
0x1a1c   :  { %3833 = vrot.lane.b32.xlu0 %v3779_v37, %s6002_s30  ;;  %3837 = vrot.lane.b32.xlu1 %v3781_v54, %s6002_s30  ;;  %v8492_v37 = vld [vmem:[#allocation79_spill] sm:$0xff] }
0x1a1d   :  { %3823 = vrot.lane.b32.xlu2 %v3774_v6, %s6002_s30  ;;  %v3792_v54 = vmul.f32 %v8050_v43, %v8492_v37  ;;  %v5170_v6 = vpack.i.bf16 %v3799_v14, %v3800_v57 }
0x1a24   :  { %3831 = vrot.lane.b32.xlu1 %v3778_v38, %s6002_s30  ;;  %3827 = vrot.lane.b32.xlu0 %v3776_v4, %s6002_s30  ;;  %v8493_v38 = vld [vmem:[#allocation80_spill] sm:$0xff] }
0x1a25   :  { %v3791_v4 = vmul.f32 %v8040_v48, %v8493_v38  ;;  %v4087_v38 = vld [vmem:[#allocation21 + $0x30] sm:$0xff] }
0x1a2c   :  { %3825 = vrot.lane.b32.xlu1 %v3775_v39, %s6002_s30  ;;  %3821 = vrot.lane.b32.xlu0 %v3773_v50, %s6002_s30  ;;  %v5190_v39 = vpack.i.bf16 %v3791_v4, %v3792_v54  ;;  %v8494_v50 = vld [vmem:[#allocation72_spill] sm:$0xff]  ;;  %v4086_v4 = vld [vmem:[#allocation21 + $0x28] sm:$0xff] }
0x1a56   :  { %v3848_v40 = vpop.permute.xlu2 %3847 }
0x1a5e   :  { %v3842_v59 = vpop.permute.xlu2 %3841 }
0x1a67   :  { %v3836_v49 = vpop.permute.xlu2 %3835 }
0x1a6f   :  { %v3830_v56 = vpop.permute.xlu2 %3829 }
0x1a76   :  { %v3850_v42 = vpop.permute.xlu0 %3849 }
0x1a77   :  { %v3824_v15 = vpop.permute.xlu2 %3823 }
0x1a7e   :  { %v3852_v8 = vpop.permute.xlu1 %3851  ;;  %v3846_v32 = vpop.permute.xlu0 %3845 }
0x1a7f   :  { %4902 = vmatpush.xpose.msk.msrb.mxu0 %vm612_vm1, %v3852_v8  ;;  %v3794_v8 = vmul.f32 %v8035_v9, %v8494_v50 }
0x1a83   :  { %4903 = vmatpush.xpose.msk.msrb.mxu0 %vm612_vm1, %v3850_v42  ;;  %v8495_v42 = vld [vmem:[#allocation73_spill] sm:$0xff] }
0x1a86   :  { %v3844_v13 = vpop.permute.xlu1 %3843  ;;  %v3840_v22 = vpop.permute.xlu0 %3839 }
0x1a87   :  { %4904 = vmatpush.xpose.msk.msrb.mxu0 %vm612_vm1, %v3848_v40  ;;  %v3793_v40 = vmul.f32 %v8048_v1, %v8495_v42 }
0x1a8b   :  { %4905 = vmatpush.xpose.msk.msrb.mxu0 %vm612_vm1, %v3846_v32  ;;  %v5185_v32 = vpack.i.bf16 %v3793_v40, %v3794_v8 }
0x1a8e   :  { %v3838_v45 = vpop.permute.xlu1 %3837  ;;  %v3834_v3 = vpop.permute.xlu0 %3833 }
0x1a8f   :  { %4906 = vmatpush.xpose.msk.msrb.mxu0 %vm612_vm1, %v3844_v13 }
0x1a93   :  { %4907 = vmatpush.xpose.msk.msrb.mxu0 %vm612_vm1, %v3842_v59 }
0x1a96   :  { %v3832_v5 = vpop.permute.xlu1 %3831  ;;  %v3828_v60 = vpop.permute.xlu0 %3827 }
0x1a97   :  { %4908 = vmatpush.xpose.msk.msrb.mxu0 %vm612_vm1, %v3840_v22 }
0x1a9b   :  { %4909 = vmatpush.xpose.msk.msrb.mxu0 %vm612_vm1, %v3838_v45 }
0x1a9e   :  { %v3826_v10 = vpop.permute.xlu1 %3825  ;;  %v3822_v19 = vpop.permute.xlu0 %3821 }
0x1a9f   :  { %4910 = vmatpush.xpose.msk.msrb.mxu0 %vm612_vm1, %v3836_v49 }
0x1aa3   :  { %4911 = vmatpush.xpose.msk.msrb.mxu0 %vm612_vm1, %v3834_v3  ;;  %v5403_v3 = vld [vmem:[#allocation31] sm:$0xff] }
0x1aa7   :  { %4912 = vmatpush.xpose.msk.msrb.mxu0 %vm612_vm1, %v3832_v5 }
0x1aab   :  { %4913 = vmatpush.xpose.msk.msrb.mxu0 %vm612_vm1, %v3830_v56 }
0x1aaf   :  { %4914 = vmatpush.xpose.msk.msrb.mxu0 %vm612_vm1, %v3828_v60 }
0x1ab3   :  { %4915 = vmatpush.xpose.msk.msrb.mxu0 %vm612_vm1, %v3826_v10 }
0x1ab7   :  { %4916 = vmatpush.xpose.msk.msrb.mxu0 %vm612_vm1, %v3824_v15 }
0x1abb   :  { %4917 = vmatpush.xpose.msk.msrb.mxu0 %vm612_vm1, %v3822_v19 }
0x1abe   :  { %4918 = vmatmul.msk.f32.vlgmr.msrb.gmra.mxu0 %vm612_vm1, %v8048_v1 }
0x1ac6   :  { %4919 = vmatmul.msk.f32.gmra.mxu0 %vm612_vm1, %v8035_v9 }
0x1ace   :  { %4920 = vmatmul.msk.f32.gmra.mxu0 %vm612_vm1, %v8040_v48 }
0x1ad6   :  { %4921 = vmatmul.msk.f32.gmra.mxu0 %vm612_vm1, %v8050_v43 }
0x1b3b   :  { %v3914_v24 = vpop.f32.mrf.mxu0 }
0x1b3c   :  { %v3926_v27 = vmul.f32 0.35355338, %v3914_v24  ;;  %v5404_v24 = vld [vmem:[#allocation31 + $0x8] sm:$0xff] }
0x1b3e   :  { %3930 = vmax.xlane.f32.xlu1 %v3926_v27 }
0x1b43   :  { %v3917_v62 = vpop.f32.mrf.mxu0 }
0x1b44   :  { %v3927_v55 = vmul.f32 0.35355338, %v3917_v62 }
0x1b46   :  { %3932 = vmax.xlane.f32.xlu2 %v3927_v55 }
0x1b4b   :  { %v3920_v41 = vpop.f32.mrf.mxu0 }
0x1b4c   :  { %v3928_v20 = vmul.f32 0.35355338, %v3920_v41 }
0x1b4e   :  { %3934 = vmax.xlane.f32.xlu0 %v3928_v20 }
0x1b53   :  { %v3923_v61 = vpop.f32.mrf.mxu0 }
0x1b54   :  { %v8115_v33 = vmul.f32 0.35355338, %v3923_v61 }
0x1b56   :  { %3936 = vmax.xlane.f32.xlu1 %v8115_v33 }
0x1b5e   :  { %5161 = vrot.lane.b32.xlu2 %v5160_v36, %s6003_s16 }
0x1b62   :  { %5166 = vrot.lane.b32.xlu0 %v5165_v2, %s6003_s16 }
0x1b66   :  { %5181 = vrot.lane.b32.xlu2 %v5180_v17, %s6003_s16 }
0x1b6a   :  { %5176 = vrot.lane.b32.xlu0 %v5175_v12, %s6003_s16 }
0x1b6e   :  { %5196 = vrot.lane.b32.xlu2 %v5195_v44, %s6003_s16 }
0x1b6f   :  { %5171 = vrot.lane.b32.xlu1 %v5170_v6, %s6003_s16  ;;  %v4088_v6 = vld [vmem:[#allocation21 + $0x38] sm:$0xff] }
0x1b70   :  { %4118 = vmatpush.msrb.mxu3 %v4088_v6 }
0x1b72   :  { %5191 = vrot.lane.b32.xlu0 %v5190_v39, %s6003_s16  ;;  %4119 = vmatpush.msrb.mxu3 %v4087_v38 }
0x1b74   :  { %4120 = vmatpush.msrb.mxu3 %v4086_v4 }
0x1b77   :  { %5186 = vrot.lane.b32.xlu1 %v5185_v32, %s6003_s16 }
0x1bb1   :  { %v3931_v43 = vpop.xlane.xlu1 %3930 }
0x1bb2   :  { %v3938_v13 = vsub.f32 %v3926_v27, %v3931_v43 }
0x1bb4   :  { %v3942_v59 = vmul.f32 1.442695, %v3938_v13 }
0x1bb6   :  { %5359 = vpow2.f32 %v3942_v59 }
0x1bb9   :  { %v3933_v22 = vpop.xlane.xlu2 %3932 }
0x1bba   :  { %v3939_v48 = vsub.f32 %v3927_v55, %v3933_v22 }
0x1bbc   :  { %v5360_v45 = vpop.eup %5359  ;;  %v3944_v49 = vmul.f32 1.442695, %v3939_v48 }
0x1bbd   :  { %v8158_v5 = vmul.f32 %v5403_v3, %v5360_v45 }
0x1bbe   :  { %5361 = vpow2.f32 %v3944_v49 }
0x1bbf   :  { %3970 = vmatmul.f32.vlgmr.msra.gmra.mxu1 %v8158_v5 }
0x1bc1   :  { %v5162_v9 = vpop.permute.xlu2 %5161  ;;  %v3935_v56 = vpop.xlane.xlu0 %3934 }
0x1bc2   :  { %v5163_v1 = vunpack.i.l.bf16 %v5162_v9  ;;  %v3940_v60 = vsub.f32 %v3928_v20, %v3935_v56  ;;  %v5164_v15 = vunpack.i.h.bf16 %v5162_v9 }
0x1bc4   :  { %v5362_v10 = vpop.eup %5361  ;;  %v3946_v19 = vmul.f32 1.442695, %v3940_v60  ;;  %4055 = vmatpush.msra.mxu0 %v5163_v1  ;;  %4949 = vmatpush.msrb.mxu2 %v5163_v1 }
0x1bc5   :  { %v8161_v27 = vmul.f32 %v5404_v24, %v5362_v10  ;;  %v5229_v10 = vld [vmem:[%s8482_s8 + $0x1] ss:$0 sm:$0xff] }
0x1bc6   :  { %5363 = vpow2.f32 %v3946_v19  ;;  %4056 = vmatpush.msra.mxu0 %v5164_v15  ;;  %4950 = vmatpush.msrb.mxu2 %v5164_v15 }
0x1bc7   :  { %3973 = vmatmul.f32.gmra.mxu1 %v8161_v27 }
0x1bc9   :  { %v3937_v62 = vpop.xlane.xlu1 %3936  ;;  %v5182_v47 = vpop.permute.xlu2 %5181 }
0x1bca   :  { %v3941_v55 = vsub.f32 %v8115_v33, %v3937_v62  ;;  %v5183_v46 = vunpack.i.l.bf16 %v5182_v47  ;;  %v5184_v16 = vunpack.i.h.bf16 %v5182_v47 }
0x1bcc   :  { %v5364_v41 = vpop.eup %5363  ;;  %v3948_v61 = vmul.f32 1.442695, %v3941_v55 }
0x1bcd   :  { %v8165_v20 = vmul.f32 %v5405_v25, %v5364_v41 }
0x1bce   :  { %5365 = vpow2.f32 %v3948_v61 }
0x1bcf   :  { %3976 = vmatmul.f32.gmra.mxu1 %v8165_v20 }
0x1bd1   :  { %v5197_v7 = vpop.permute.xlu2 %5196 }
0x1bd2   :  { %v5198_v14 = vunpack.i.l.bf16 %v5197_v7  ;;  %v5199_v44 = vunpack.i.h.bf16 %v5197_v7 }
0x1bd4   :  { %v5366_v58 = vpop.eup %5365  ;;  %v5167_v36 = vpop.permute.xlu0 %5166 }
0x1bd5   :  { %v5168_v53 = vunpack.i.l.bf16 %v5167_v36  ;;  %v8168_v2 = vmul.f32 %v5406_v63, %v5366_v58  ;;  %v5169_v21 = vunpack.i.h.bf16 %v5167_v36 }
0x1bd7   :  { %3979 = vmatmul.f32.gmra.mxu1 %v8168_v2  ;;  %4057 = vmatpush.msra.mxu0 %v5168_v53 }
0x1bd8   :  { %4951 = vmatpush.msrb.mxu2 %v5168_v53 }
0x1bd9   :  { %4058 = vmatpush.msra.mxu0 %v5169_v21 }
0x1bda   :  { %4952 = vmatpush.msrb.mxu2 %v5169_v21 }
0x1bdc   :  { %v5177_v52 = vpop.permute.xlu0 %5176 }
0x1bdd   :  { %v5178_v23 = vunpack.i.l.bf16 %v5177_v52  ;;  %v5179_v29 = vunpack.i.h.bf16 %v5177_v52 }
0x1be1   :  { %v5172_v33 = vpop.permute.xlu1 %5171 }
0x1be2   :  { %v5173_v34 = vunpack.i.l.bf16 %v5172_v33  ;;  %v5174_v17 = vunpack.i.h.bf16 %v5172_v33 }
0x1be4   :  { %4059 = vmatpush.msra.mxu0 %v5173_v34  ;;  %4953 = vmatpush.msrb.mxu2 %v5173_v34  ;;  %v5192_v11 = vpop.permute.xlu0 %5191 }
0x1be5   :  { %v5193_v30 = vunpack.i.l.bf16 %v5192_v11  ;;  %v5194_v28 = vunpack.i.h.bf16 %v5192_v11 }
0x1be6   :  { %4060 = vmatpush.msra.mxu0 %v5174_v17  ;;  %4954 = vmatpush.msrb.mxu2 %v5174_v17 }
0x1be8   :  { %4061 = vmatpush.msra.mxu0 %v5178_v23  ;;  %4955 = vmatpush.msrb.mxu2 %v5178_v23 }
0x1be9   :  { %v5187_v12 = vpop.permute.xlu1 %5186 }
0x1bea   :  { %4062 = vmatpush.msra.mxu0 %v5179_v29  ;;  %4956 = vmatpush.msrb.mxu2 %v5179_v29  ;;  %v5188_v18 = vunpack.i.l.bf16 %v5187_v12  ;;  %v5189_v57 = vunpack.i.h.bf16 %v5187_v12 }
0x1bec   :  { %4063 = vmatpush.msra.mxu0 %v5183_v46  ;;  %4957 = vmatpush.msrb.mxu2 %v5183_v46 }
0x1bee   :  { %4064 = vmatpush.msra.mxu0 %v5184_v16  ;;  %4958 = vmatpush.msrb.mxu2 %v5184_v16 }
0x1bf0   :  { %4065 = vmatpush.msra.mxu0 %v5188_v18  ;;  %4959 = vmatpush.msrb.mxu2 %v5188_v18 }
0x1bf2   :  { %4066 = vmatpush.msra.mxu0 %v5189_v57  ;;  %4960 = vmatpush.msrb.mxu2 %v5189_v57 }
0x1bf4   :  { %4067 = vmatpush.msra.mxu0 %v5193_v30  ;;  %4961 = vmatpush.msrb.mxu2 %v5193_v30 }
0x1bf6   :  { %4068 = vmatpush.msra.mxu0 %v5194_v28  ;;  %4962 = vmatpush.msrb.mxu2 %v5194_v28 }
0x1bf8   :  { %4069 = vmatpush.msra.mxu0 %v5198_v14  ;;  %4963 = vmatpush.msrb.mxu2 %v5198_v14  ;;  %v4249_v14 = vld [vmem:[#allocation22 + $0x38] sm:$0xff] }
0x1bf9   :  { %4279 = vmatpush.msrb.mxu1 %v4249_v14 }
0x1bfa   :  { %4070 = vmatpush.msra.mxu0 %v5199_v44  ;;  %4964 = vmatpush.msrb.mxu2 %v5199_v44  ;;  %v4248_v44 = vld [vmem:[#allocation22 + $0x30] sm:$0xff] }
0x1bfb   :  { %4280 = vmatpush.msrb.mxu1 %v4248_v44 }
0x1c3c   :  { %v3971_v37 = vpop.f32.mrf.mxu1 }
0x1c3d   :  { %v3972_v54 = vadd.f32 1e-20, %v3971_v37  ;;  %v4247_v37 = vld [vmem:[#allocation22 + $0x28] sm:$0xff] }
0x1c3e   :  { %4281 = vmatpush.msrb.mxu1 %v4247_v37 }
0x1c3f   :  { %5367 = vrcp.f32 %v3972_v54  ;;  %v4246_v54 = vld [vmem:[#allocation22 + $0x20] sm:$0xff] }
0x1c40   :  { %4282 = vmatpush.msrb.mxu1 %v4246_v54 }
0x1c44   :  { %v3974_v39 = vpop.f32.mrf.mxu1 }
0x1c45   :  { %v5368_v50 = vpop.eup %5367  ;;  %v3975_v8 = vadd.f32 1e-20, %v3974_v39 }
0x1c46   :  { %v3987_v42 = vmul.f32 %v5368_v50, %v8158_v5  ;;  %v4085_v5 = vld [vmem:[#allocation21 + $0x20] sm:$0xff] }
0x1c47   :  { %5369 = vrcp.f32 %v3975_v8  ;;  %4121 = vmatpush.msrb.mxu3 %v4085_v5 }
0x1c48   :  { %4071 = vmatmul.f32.vlgmr.msra.gmra.mxu0 %v3987_v42 }
0x1c4c   :  { %v3977_v40 = vpop.f32.mrf.mxu1 }
0x1c4d   :  { %v5370_v32 = vpop.eup %5369  ;;  %v3978_v43 = vadd.f32 1e-20, %v3977_v40 }
0x1c4e   :  { %v3988_v13 = vmul.f32 %v5370_v32, %v8161_v27 }
0x1c4f   :  { %5371 = vrcp.f32 %v3978_v43 }
0x1c50   :  { %4074 = vmatmul.f32.vlgmr.msrb.gmra.mxu2 %v3988_v13 }
0x1c54   :  { %v3980_v59 = vpop.f32.mrf.mxu1 }
0x1c55   :  { %v5372_v22 = vpop.eup %5371  ;;  %v3981_v48 = vadd.f32 1e-20, %v3980_v59 }
0x1c56   :  { %v3989_v45 = vmul.f32 %v5372_v22, %v8165_v20  ;;  %v5230_v22 = vld [vmem:[%s8483_s12 + $0x1] ss:$0 sm:$0xff] }
0x1c57   :  { %5373 = vrcp.f32 %v3981_v48 }
0x1c58   :  { %4077 = vmatmul.f32.gmra.mxu2 %v3989_v45 }
0x1c5d   :  { %v5374_v49 = vpop.eup %5373 }
0x1c5e   :  { %v3990_v3 = vmul.f32 %v5374_v49, %v8168_v2  ;;  %v5231_v49 = vld [vmem:[#allocation27 + $0x1] ss:$0 sm:$0xff] }
0x1c60   :  { %4080 = vmatmul.f32.gmra.mxu2 %v3990_v3 }
0x1cc5   :  { %v4072_v9 = vpop.f32.mrf.mxu0 }
0x1cc6   :  { %4923 = vmatmul.msk.f32.vlgmr.msrb.gmra.mxu3 %vm612_vm1, %v4072_v9 }
0x1cd3   :  { %v4075_v56 = vpop.f32.mrf.mxu2 }
0x1cd4   :  { %4924 = vmatmul.msk.f32.gmra.mxu3 %vm612_vm1, %v4075_v56 }
0x1cdb   :  { %v4078_v1 = vpop.f32.mrf.mxu2 }
0x1cdc   :  { %4925 = vmatmul.msk.f32.gmra.mxu3 %vm612_vm1, %v4078_v1 }
0x1ce3   :  { %v4081_v60 = vpop.f32.mrf.mxu2 }
0x1ce4   :  { %4926 = vmatmul.msk.f32.gmra.mxu3 %vm612_vm1, %v4081_v60 }
0x1d49   :  { %v4123_v15 = vpop.f32.mrf.mxu3 }
0x1d4a   :  { %v4124_v19 = vadd.f32 %v5229_v10, %v4123_v15 }
0x1d4c   :  { %v4135_v24 = vadd.f32 %v4124_v19, %v8015_v51 }
0x1d4e   :  { %v4143_v27 = vsel %vm612_vm1, %v4135_v24, 0.0 }
0x1d4f   :  { %4144 = vadd.xlane.f32.xlu1 %v4143_v27 }
0x1d57   :  { %v4126_v62 = vpop.f32.mrf.mxu3 }
0x1d58   :  { %v4127_v55 = vadd.f32 %v5229_v10, %v4126_v62 }
0x1d5a   :  { %v4136_v41 = vadd.f32 %v4127_v55, %v8021_v0 }
0x1d5c   :  { %v4146_v61 = vsel %vm612_vm1, %v4136_v41, 0.0 }
0x1d5d   :  { %4147 = vadd.xlane.f32.xlu0 %v4146_v61 }
0x1d5f   :  { %v4129_v25 = vpop.f32.mrf.mxu3 }
0x1d60   :  { %v4130_v20 = vadd.f32 %v5229_v10, %v4129_v25 }
0x1d62   :  { %v4137_v58 = vadd.f32 %v4130_v20, %v8026_v26 }
0x1d64   :  { %v4149_v36 = vsel %vm612_vm1, %v4137_v58, 0.0 }
0x1d65   :  { %4150 = vadd.xlane.f32.xlu2 %v4149_v36 }
0x1d67   :  { %v4132_v53 = vpop.f32.mrf.mxu3 }
0x1d68   :  { %v4133_v63 = vadd.f32 %v5229_v10, %v4132_v53 }
0x1d6a   :  { %v4138_v51 = vadd.f32 %v4133_v63, %v8031_v31 }
0x1d6c   :  { %v4152_v2 = vsel %vm612_vm1, %v4138_v51, 0.0 }
0x1d6d   :  { %4153 = vadd.xlane.f32.xlu1 %v4152_v2 }
0x1dc2   :  { %v4145_v21 = vpop.xlane.xlu1 %4144 }
0x1dc3   :  { %v4155_v0 = vmul.f32 %v4145_v21, %v6861_v35 }
0x1dc5   :  { %v4159_v33 = vsub.f32 %v4135_v24, %v4155_v0 }
0x1dc7   :  { %v4163_v34 = vmul.f32 %v4159_v33, %v4159_v33 }
0x1dc9   :  { %v4167_v52 = vsel %vm612_vm1, %v4163_v34, 0.0 }
0x1dca   :  { %4168 = vadd.xlane.f32.xlu0 %v4167_v52 }
0x1dd0   :  { %v4148_v17 = vpop.xlane.xlu0 %4147 }
0x1dd1   :  { %v4156_v26 = vmul.f32 %v4148_v17, %v6861_v35 }
0x1dd3   :  { %v8191_v23 = vsub.f32 %v4136_v41, %v4156_v26 }
0x1dd5   :  { %v4164_v47 = vmul.f32 %v8191_v23, %v8191_v23 }
0x1dd7   :  { %v4170_v31 = vsel %vm612_vm1, %v4164_v47, 0.0 }
0x1dd8   :  { %v4151_v29 = vpop.xlane.xlu2 %4150  ;;  %4171 = vadd.xlane.f32.xlu2 %v4170_v31 }
0x1dd9   :  { %v4157_v46 = vmul.f32 %v4151_v29, %v6861_v35 }
0x1ddb   :  { %v8197_v12 = vsub.f32 %v4137_v58, %v4157_v46 }
0x1ddd   :  { %v4165_v16 = vmul.f32 %v8197_v12, %v8197_v12 }
0x1ddf   :  { %v4173_v18 = vsel %vm612_vm1, %v4165_v16, 0.0 }
0x1de0   :  { %4174 = vadd.xlane.f32.xlu1 %v4173_v18  ;;  %v4154_v11 = vpop.xlane.xlu1 %4153 }
0x1de1   :  { %v4158_v57 = vmul.f32 %v4154_v11, %v6861_v35 }
0x1de3   :  { %v8203_v30 = vsub.f32 %v4138_v51, %v4158_v57 }
0x1de5   :  { %v4166_v7 = vmul.f32 %v8203_v30, %v8203_v30 }
0x1de7   :  { %v4176_v28 = vsel %vm612_vm1, %v4166_v7, 0.0 }
0x1de8   :  { %4177 = vadd.xlane.f32.xlu0 %v4176_v28 }
0x1e3d   :  { %v4169_v6 = vpop.xlane.xlu0 %4168 }
0x1e3e   :  { %v4179_v38 = vmul.f32 %v4169_v6, %v6861_v35 }
0x1e40   :  { %v4183_v4 = vadd.f32 1e-05, %v4179_v38 }
0x1e42   :  { %5375 = vrsqrt.f32 %v4183_v4  ;;  %vm4193_vm12 = vweird.f32 %v4183_v4 }
0x1e48   :  { %v5376_v39 = vpop.eup %5375 }
0x1e49   :  { %v4188_v50 = vmul.f32 %v5376_v39, %v4183_v4  ;;  %vm4194_vm11 = vweird.f32 %v5376_v39 }
0x1e4a   :  { %vm4195_vm13 = vmor %vm4193_vm12, %vm4194_vm11 }
0x1e4b   :  { %v4189_v8 = vmul.f32 %v5376_v39, %v4188_v50  ;;  %v4172_v42 = vpop.xlane.xlu2 %4171 }
0x1e4c   :  { %v4180_v40 = vmul.f32 %v4172_v42, %v6861_v35 }
0x1e4d   :  { %v4190_v32 = vmul.f32 0.5, %v4189_v8 }
0x1e4e   :  { %v4184_v43 = vadd.f32 1e-05, %v4180_v40 }
0x1e4f   :  { %v4191_v13 = vsub.f32 1.5, %v4190_v32 }
0x1e50   :  { %5377 = vrsqrt.f32 %v4184_v43  ;;  %vm4203_vm15 = vweird.f32 %v4184_v43 }
0x1e51   :  { %v4192_v59 = vmul.f32 %v5376_v39, %v4191_v13 }
0x1e53   :  { %v4196_v48 = vsel %vm4195_vm13, %v5376_v39, %v4192_v59  ;;  %v4175_v45 = vpop.xlane.xlu1 %4174 }
0x1e54   :  { %v4227_v3 = vmul.f32 %v4196_v48, %v4159_v33  ;;  %v4181_v5 = vmul.f32 %v4175_v45, %v6861_v35 }
0x1e56   :  { %v5378_v9 = vpop.eup %5377  ;;  %v4234_v56 = vmul.f32 %v5230_v22, %v4227_v3  ;;  %v4185_v1 = vadd.f32 1e-05, %v4181_v5  ;;  %v4475_v3 = vld [vmem:[#allocation25 + $0x30] sm:$0xff] }
0x1e57   :  { %v4198_v60 = vmul.f32 %v5378_v9, %v4184_v43  ;;  %vm4204_vm14 = vweird.f32 %v5378_v9 }
0x1e58   :  { %v8212_v10 = vadd.f32 %v5231_v49, %v4234_v56  ;;  %5379 = vrsqrt.f32 %v4185_v1  ;;  %vm4205_vm2 = vmor %vm4203_vm15, %vm4204_vm14  ;;  %vm4213_vm4 = vweird.f32 %v4185_v1 }
0x1e59   :  { %v4199_v15 = vmul.f32 %v5378_v9, %v4198_v60 }
0x1e5a   :  { %4928 = vmatmul.msk.f32.vlgmr.msrb.gmra.mxu1 %vm612_vm1, %v8212_v10 }
0x1e5b   :  { %v4200_v19 = vmul.f32 0.5, %v4199_v15  ;;  %v4178_v24 = vpop.xlane.xlu0 %4177 }
0x1e5c   :  { %v4182_v27 = vmul.f32 %v4178_v24, %v6861_v35 }
0x1e5d   :  { %v4201_v62 = vsub.f32 1.5, %v4200_v19  ;;  %v4474_v19 = vld [vmem:[#allocation25 + $0x28] sm:$0xff] }
0x1e5e   :  { %v5380_v55 = vpop.eup %5379  ;;  %v4186_v41 = vadd.f32 1e-05, %v4182_v27 }
0x1e5f   :  { %v4202_v61 = vmul.f32 %v5378_v9, %v4201_v62  ;;  %v4208_v25 = vmul.f32 %v5380_v55, %v4185_v1  ;;  %vm4214_vm3 = vweird.f32 %v5380_v55  ;;  %v4473_v62 = vld [vmem:[#allocation25 + $0x20] sm:$0xff] }
0x1e60   :  { %5381 = vrsqrt.f32 %v4186_v41  ;;  %vm4215_vm5 = vmor %vm4213_vm4, %vm4214_vm3  ;;  %vm4223_vm7 = vweird.f32 %v4186_v41 }
0x1e61   :  { %v4206_v20 = vsel %vm4205_vm2, %v5378_v9, %v4202_v61  ;;  %v4209_v58 = vmul.f32 %v5380_v55, %v4208_v25 }
0x1e62   :  { %v4228_v36 = vmul.f32 %v4206_v20, %v8191_v23 }
0x1e63   :  { %v4210_v53 = vmul.f32 0.5, %v4209_v58 }
0x1e64   :  { %v4235_v63 = vmul.f32 %v5230_v22, %v4228_v36 }
0x1e65   :  { %v4211_v51 = vsub.f32 1.5, %v4210_v53 }
0x1e66   :  { %v5382_v2 = vpop.eup %5381  ;;  %v8218_v21 = vadd.f32 %v5231_v49, %v4235_v63 }
0x1e67   :  { %v4212_v0 = vmul.f32 %v5380_v55, %v4211_v51  ;;  %v4218_v33 = vmul.f32 %v5382_v2, %v4186_v41  ;;  %vm4224_vm6 = vweird.f32 %v5382_v2 }
0x1e68   :  { %4929 = vmatmul.msk.f32.gmra.mxu1 %vm612_vm1, %v8218_v21  ;;  %vm4225_vm8 = vmor %vm4223_vm7, %vm4224_vm6 }
0x1e69   :  { %v4216_v34 = vsel %vm4215_vm5, %v5380_v55, %v4212_v0  ;;  %v4219_v52 = vmul.f32 %v5382_v2, %v4218_v33 }
0x1e6a   :  { %v4229_v17 = vmul.f32 %v4216_v34, %v8197_v12  ;;  %v5232_v12 = vld [vmem:[#allocation24 + $0x1] ss:$0 sm:$0xff] }
0x1e6b   :  { %v4220_v26 = vmul.f32 0.5, %v4219_v52 }
0x1e6c   :  { %v4236_v23 = vmul.f32 %v5230_v22, %v4229_v17 }
0x1e6d   :  { %v4221_v47 = vsub.f32 1.5, %v4220_v26 }
0x1e6e   :  { %v8223_v31 = vadd.f32 %v5231_v49, %v4236_v23 }
0x1e6f   :  { %v4222_v29 = vmul.f32 %v5382_v2, %v4221_v47 }
0x1e70   :  { %4930 = vmatmul.msk.f32.gmra.mxu1 %vm612_vm1, %v8223_v31 }
0x1e71   :  { %v4226_v46 = vsel %vm4225_vm8, %v5382_v2, %v4222_v29 }
0x1e72   :  { %v4230_v16 = vmul.f32 %v4226_v46, %v8203_v30 }
0x1e74   :  { %v4237_v18 = vmul.f32 %v5230_v22, %v4230_v16  ;;  %v4476_v22 = vld [vmem:[#allocation25 + $0x38] sm:$0xff] }
0x1e75   :  { %4506 = vmatpush.msra.mxu2 %v4476_v22 }
0x1e76   :  { %v8228_v11 = vadd.f32 %v5231_v49, %v4237_v18 }
0x1e77   :  { %4507 = vmatpush.msra.mxu2 %v4475_v3 }
0x1e78   :  { %4931 = vmatmul.msk.f32.gmra.mxu1 %vm612_vm1, %v8228_v11 }
0x1e79   :  { %4508 = vmatpush.msra.mxu2 %v4474_v19 }
0x1e7b   :  { %4509 = vmatpush.msra.mxu2 %v4473_v62 }
0x1ed7   :  { %v4284_v57 = vpop.f32.mrf.mxu1 }
0x1ed8   :  { %v8232_v7 = vadd.f32 %v5232_v12, %v4284_v57 }
0x1eda   :  { %v8235_v28 = vmul.f32 0.70710677, %v8232_v7 }
0x1edc   :  { %v4304_v14 = vmul.f32 %v8235_v28, %v8235_v28 }
0x1ede   :  { %v4305_v44 = vmin.f32 %v4304_v14, 16.0 }
0x1ee0   :  { %v4306_v37 = vmul.f32 2.1237322e-06, %v4305_v44  ;;  %v4317_v54 = vmul.f32 3.8918573e-05, %v4305_v44 }
0x1ee2   :  { %v4307_v30 = vadd.f32 0.00028619796, %v4306_v37  ;;  %v4318_v6 = vadd.f32 0.001143296, %v4317_v54 }
0x1ee4   :  { %v4308_v38 = vmul.f32 %v4307_v30, %v4305_v44  ;;  %v4319_v4 = vmul.f32 %v4318_v6, %v4305_v44 }
0x1ee5   :  { %v4287_v39 = vpop.f32.mrf.mxu1 }
0x1ee6   :  { %v4309_v50 = vadd.f32 0.0036580483, %v4308_v38  ;;  %v4320_v8 = vadd.f32 0.014752088, %v4319_v4  ;;  %v8239_v42 = vadd.f32 %v5232_v12, %v4287_v39 }
0x1ee8   :  { %v4310_v40 = vmul.f32 %v4309_v50, %v4305_v44  ;;  %v4321_v32 = vmul.f32 %v4320_v8, %v4305_v44  ;;  %v8242_v43 = vmul.f32 0.70710677, %v8239_v42 }
0x1eea   :  { %v4322_v13 = vadd.f32 0.112945676, %v4321_v32  ;;  %v4344_v59 = vmul.f32 %v8242_v43, %v8242_v43  ;;  %v4311_v48 = vadd.f32 0.05243302, %v4310_v40 }
0x1eec   :  { %v4323_v45 = vmul.f32 %v4322_v13, %v4305_v44  ;;  %v8246_v49 = vmin.f32 %v4344_v59, 16.0  ;;  %v4312_v60 = vmul.f32 %v4311_v48, %v4305_v44 }
0x1eed   :  { %v4290_v5 = vpop.f32.mrf.mxu1 }
0x1eee   :  { %v4324_v9 = vadd.f32 0.4994258, %v4323_v45  ;;  %v4346_v56 = vmul.f32 2.1237322e-06, %v8246_v49  ;;  %v8249_v1 = vadd.f32 %v5232_v12, %v4290_v5  ;;  %v4357_v15 = vmul.f32 3.8918573e-05, %v8246_v49 }
0x1eef   :  { %v4313_v20 = vadd.f32 0.18741608, %v4312_v60 }
0x1ef0   :  { %v4325_v24 = vmul.f32 %v4324_v9, %v4305_v44  ;;  %v4347_v27 = vadd.f32 0.00028619796, %v4346_v56  ;;  %v4358_v55 = vadd.f32 0.001143296, %v4357_v15  ;;  %v8253_v41 = vmul.f32 0.70710677, %v8249_v1 }
0x1ef1   :  { %v4314_v33 = vmul.f32 %v4313_v20, %v4305_v44 }
0x1ef2   :  { %v4326_v61 = vadd.f32 1.0, %v4325_v24  ;;  %v4348_v25 = vmul.f32 %v4347_v27, %v8246_v49  ;;  %v4359_v58 = vmul.f32 %v4358_v55, %v8246_v49  ;;  %v4384_v36 = vmul.f32 %v8253_v41, %v8253_v41 }
0x1ef4   :  { %5383 = vrcp.f32 %v4326_v61  ;;  %v4349_v53 = vadd.f32 0.0036580483, %v4348_v25  ;;  %v4360_v63 = vadd.f32 0.014752088, %v4359_v58  ;;  %v8259_v51 = vmin.f32 %v4384_v36, 16.0 }
0x1ef5   :  { %v4293_v2 = vpop.f32.mrf.mxu1  ;;  %v4336_v38 = vand.u32 2147483647, %v4326_v61  ;;  %v4338_v4 = vand.u32 2147483648, %v4326_v61  ;;  %vm4332_vm10 = vweird.f32 %v4326_v61 }
0x1ef6   :  { %v8261_v0 = vadd.f32 %v5232_v12, %v4293_v2  ;;  %v4361_v34 = vmul.f32 %v4360_v63, %v8246_v49  ;;  %v4386_v52 = vmul.f32 2.1237322e-06, %v8259_v51  ;;  %v4350_v17 = vmul.f32 %v4349_v53, %v8246_v49 }
0x1ef7   :  { %v4397_v26 = vmul.f32 3.8918573e-05, %v8259_v51  ;;  %v4315_v12 = vadd.f32 1.1283791, %v4314_v33  ;;  %v4339_v56 = vor.u32 1.1754944e-38, %v4338_v4  ;;  %vm4337_vm12 = vcmp.eq.f32.partialorder %v4336_v38, 8.507059e+37 }
0x1ef8   :  { %v8268_v23 = vmul.f32 0.70710677, %v8261_v0  ;;  %v4362_v47 = vadd.f32 0.112945676, %v4361_v34  ;;  %v4387_v29 = vadd.f32 0.00028619796, %v4386_v52 }
0x1ef9   :  { %v4398_v16 = vadd.f32 0.001143296, %v4397_v26  ;;  %v4351_v44 = vadd.f32 0.05243302, %v4350_v17  ;;  %v4316_v19 = vmul.f32 %v4315_v12, %v8235_v28  ;;  %v4296_v2 = vmul.f32 0.5, %v8232_v7 }
0x1efa   :  { %v5384_v46 = vpop.eup %5383  ;;  %v4424_v18 = vmul.f32 %v8268_v23, %v8268_v23  ;;  %v4363_v14 = vmul.f32 %v4362_v47, %v8246_v49  ;;  %v4388_v37 = vmul.f32 %v4387_v29, %v8259_v51 }
0x1efb   :  { %v4328_v57 = vmul.f32 %v5384_v46, %v4326_v61  ;;  %v4399_v54 = vmul.f32 %v4398_v16, %v8259_v51  ;;  %vm4333_vm9 = vweird.f32 %v5384_v46  ;;  %v4352_v22 = vmul.f32 %v4351_v44, %v8246_v49 }
0x1efc   :  { %v8275_v30 = vmin.f32 %v4424_v18, 16.0  ;;  %v4364_v39 = vadd.f32 0.4994258, %v4363_v14  ;;  %v4389_v50 = vadd.f32 0.0036580483, %v4388_v37  ;;  %vm4334_vm11 = vmor %vm4332_vm10, %vm4333_vm9 }
0x1efd   :  { %v4329_v6 = vsub.f32 1.0, %v4328_v57  ;;  %v4400_v8 = vadd.f32 0.014752088, %v4399_v54  ;;  %v4353_v62 = vadd.f32 0.18741608, %v4352_v22 }
0x1efe   :  { %v4426_v40 = vmul.f32 2.1237322e-06, %v8275_v30  ;;  %v4365_v13 = vmul.f32 %v4364_v39, %v8246_v49  ;;  %v4437_v59 = vmul.f32 3.8918573e-05, %v8275_v30  ;;  %v4390_v60 = vmul.f32 %v4389_v50, %v8259_v51 }
0x1eff   :  { %v4330_v32 = vmul.f32 %v5384_v46, %v4329_v6  ;;  %v4401_v48 = vmul.f32 %v4400_v8, %v8259_v51  ;;  %v4354_v28 = vmul.f32 %v4353_v62, %v8246_v49 }
0x1f00   :  { %v4366_v3 = vadd.f32 1.0, %v4365_v13  ;;  %v4427_v5 = vadd.f32 0.00028619796, %v4426_v40  ;;  %v4438_v9 = vadd.f32 0.001143296, %v4437_v59 }
0x1f01   :  { %v4331_v45 = vadd.f32 %v5384_v46, %v4330_v32  ;;  %v4402_v15 = vadd.f32 0.112945676, %v4401_v48  ;;  %v4391_v58 = vadd.f32 0.05243302, %v4390_v60  ;;  %v4355_v57 = vadd.f32 1.1283791, %v4354_v28 }
0x1f02   :  { %5385 = vrcp.f32 %v4366_v3  ;;  %v4428_v25 = vmul.f32 %v4427_v5, %v8275_v30  ;;  %v4439_v20 = vmul.f32 %v4438_v9, %v8275_v30  ;;  %v4378_v14 = vand.u32 2147483648, %v4366_v3 }
0x1f03   :  { %v4335_v24 = vsel %vm4334_vm11, %v5384_v46, %v4331_v45  ;;  %v4403_v61 = vmul.f32 %v4402_v15, %v8259_v51  ;;  %v4392_v46 = vmul.f32 %v4391_v58, %v8259_v51  ;;  %v4376_v44 = vand.u32 2147483647, %v4366_v3 }
0x1f04   :  { %v4340_v27 = vsel %vm4337_vm12, %v4339_v56, %v4335_v24  ;;  %v4440_v63 = vadd.f32 0.014752088, %v4439_v20  ;;  %v4429_v17 = vadd.f32 0.0036580483, %v4428_v25  ;;  %vm4372_vm14 = vweird.f32 %v4366_v3 }
0x1f05   :  { %v4341_v55 = vmul.f32 %v4340_v27, %v4316_v19  ;;  %v4404_v53 = vadd.f32 0.4994258, %v4403_v61  ;;  %v4393_v54 = vadd.f32 0.18741608, %v4392_v46  ;;  %v4379_v4 = vor.u32 1.1754944e-38, %v4378_v14 }
0x1f06   :  { %v4441_v26 = vmul.f32 %v4440_v63, %v8275_v30  ;;  %v4430_v7 = vmul.f32 %v4429_v17, %v8275_v30  ;;  %v4356_v50 = vmul.f32 %v4355_v57, %v8242_v43  ;;  %vm4377_vm2 = vcmp.eq.f32.partialorder %v4376_v44, 8.507059e+37 }
0x1f07   :  { %v4932_v36 = vclamps-f32 %v4341_v55, 1.0  ;;  %v4405_v52 = vmul.f32 %v4404_v53, %v8259_v51  ;;  %v4394_v59 = vmul.f32 %v4393_v54, %v8259_v51  ;;  %v4297_v56 = vmul.f32 0.5, %v8239_v42 }
0x1f08   :  { %v5386_v33 = vpop.eup %5385  ;;  %v4442_v18 = vadd.f32 0.112945676, %v4441_v26  ;;  %v4431_v39 = vadd.f32 0.05243302, %v4430_v7  ;;  %v4298_v28 = vmul.f32 0.5, %v8249_v1 }
0x1f09   :  { %v4464_v34 = vadd.f32 1.0, %v4932_v36  ;;  %v4368_v47 = vmul.f32 %v5386_v33, %v4366_v3  ;;  %v4406_v16 = vadd.f32 1.0, %v4405_v52  ;;  %vm4373_vm13 = vweird.f32 %v5386_v33  ;;  %v5233_v7 = vld [vmem:[%s8484_s0 + $0x1] ss:$0 sm:$0xff] }
0x1f0a   :  { %v4443_v37 = vmul.f32 %v4442_v18, %v8275_v30  ;;  %vm4374_vm15 = vmor %vm4372_vm14, %vm4373_vm13  ;;  %v4432_v45 = vmul.f32 %v4431_v39, %v8275_v30  ;;  %v4395_v60 = vadd.f32 1.1283791, %v4394_v59 }
0x1f0b   :  { %v4468_v29 = vmul.f32 %v4464_v34, %v4296_v2  ;;  %v4369_v12 = vsub.f32 1.0, %v4368_v47  ;;  %5387 = vrcp.f32 %v4406_v16  ;;  %v4418_v15 = vand.u32 2147483648, %v4406_v16 }
0x1f0c   :  { %v4444_v38 = vadd.f32 0.4994258, %v4443_v37  ;;  %v4416_v24 = vand.u32 2147483647, %v4406_v16  ;;  %v4433_v27 = vadd.f32 0.18741608, %v4432_v45  ;;  %vm4412_vm4 = vweird.f32 %v4406_v16 }
0x1f0d   :  { %4937 = vmatmul.msk.f32.vlgmr.msra.gmra.mxu2 %vm612_vm1, %v4468_v29  ;;  %v4370_v49 = vmul.f32 %v5386_v33, %v4369_v12  ;;  %v4419_v51 = vor.u32 1.1754944e-38, %v4418_v15  ;;  %v4396_v61 = vmul.f32 %v4395_v60, %v8253_v41  ;;  %v4299_v12 = vmul.f32 0.5, %v8261_v0 }
0x1f0e   :  { %v4445_v40 = vmul.f32 %v4444_v38, %v8275_v30  ;;  %vm4417_vm6 = vcmp.eq.f32.partialorder %v4416_v24, 8.507059e+37  ;;  %v4434_v58 = vmul.f32 %v4433_v27, %v8275_v30 }
0x1f0f   :  { %v4371_v6 = vadd.f32 %v5386_v33, %v4370_v49 }
0x1f10   :  { %v4446_v5 = vadd.f32 1.0, %v4445_v40 }
0x1f11   :  { %v4375_v8 = vsel %vm4374_vm15, %v5386_v33, %v4371_v6  ;;  %v5388_v32 = vpop.eup %5387  ;;  %v4435_v33 = vadd.f32 1.1283791, %v4434_v58  ;;  %v4633_v58 = vld [vmem:[%s6219_s25] sm:$0xff] }
0x1f12   :  { %v4380_v13 = vsel %vm4377_vm2, %v4379_v4, %v4375_v8  ;;  %v4408_v48 = vmul.f32 %v5388_v32, %v4406_v16  ;;  %5389 = vrcp.f32 %v4446_v5  ;;  %vm4413_vm3 = vweird.f32 %v5388_v32 }
0x1f13   :  { %v4381_v22 = vmul.f32 %v4380_v13, %v4356_v50  ;;  %vm4414_vm5 = vmor %vm4412_vm4, %vm4413_vm3  ;;  %v4458_v34 = vand.u32 2147483648, %v4446_v5  ;;  %v4456_v41 = vand.u32 2147483647, %v4446_v5  ;;  %vm4452_vm8 = vweird.f32 %v4446_v5 }
0x1f14   :  { %v4409_v9 = vsub.f32 1.0, %v4408_v48  ;;  %v4436_v30 = vmul.f32 %v4435_v33, %v8268_v23 }
0x1f15   :  { %v4933_v3 = vclamps-f32 %v4381_v22, 1.0  ;;  %v4459_v29 = vor.u32 1.1754944e-38, %v4458_v34  ;;  %vm4457_vm10 = vcmp.eq.f32.partialorder %v4456_v41, 8.507059e+37 }
0x1f16   :  { %v4410_v19 = vmul.f32 %v5388_v32, %v4409_v9 }
0x1f17   :  { %v4465_v43 = vadd.f32 1.0, %v4933_v3 }
0x1f18   :  { %v4411_v55 = vadd.f32 %v5388_v32, %v4410_v19  ;;  %v5390_v42 = vpop.eup %5389 }
0x1f19   :  { %v4469_v62 = vmul.f32 %v4465_v43, %v4297_v56  ;;  %v4448_v53 = vmul.f32 %v5390_v42, %v4446_v5  ;;  %vm4453_vm7 = vweird.f32 %v5390_v42 }
0x1f1a   :  { %v4415_v25 = vsel %vm4414_vm5, %v5388_v32, %v4411_v55  ;;  %vm4454_vm9 = vmor %vm4452_vm8, %vm4453_vm7 }
0x1f1b   :  { %4938 = vmatmul.msk.f32.gmra.mxu2 %vm612_vm1, %v4469_v62  ;;  %v4420_v20 = vsel %vm4417_vm6, %v4419_v51, %v4415_v25  ;;  %v4449_v2 = vsub.f32 1.0, %v4448_v53  ;;  %v4635_v25 = vld [vmem:[%s6219_s25 + $0x10] sm:$0xff] }
0x1f1c   :  { %v4421_v36 = vmul.f32 %v4420_v20, %v4396_v61  ;;  %v4636_v61 = vld [vmem:[%s6219_s25 + $0x18] sm:$0xff] }
0x1f1d   :  { %v4450_v17 = vmul.f32 %v5390_v42, %v4449_v2  ;;  %4665 = vmatpush.msra.mxu3 %v4636_v61 }
0x1f1e   :  { %v4934_v63 = vclamps-f32 %v4421_v36, 1.0 }
0x1f1f   :  { %v4451_v47 = vadd.f32 %v5390_v42, %v4450_v17  ;;  %4666 = vmatpush.msra.mxu3 %v4635_v25 }
0x1f20   :  { %v4466_v52 = vadd.f32 1.0, %v4934_v63 }
0x1f21   :  { %v4455_v46 = vsel %vm4454_vm9, %v5390_v42, %v4451_v47  ;;  %v4634_v42 = vld [vmem:[%s6219_s25 + $0x8] sm:$0xff]  ;;  %v5234_v47 = vld [vmem:[#allocation28 + $0x1] ss:$0 sm:$0xff] }
0x1f22   :  { %v4470_v26 = vmul.f32 %v4466_v52, %v4298_v28  ;;  %v4460_v16 = vsel %vm4457_vm10, %v4459_v29, %v4455_v46  ;;  %4667 = vmatpush.msra.mxu3 %v4634_v42 }
0x1f23   :  { %v4461_v1 = vmul.f32 %v4460_v16, %v4436_v30  ;;  %v5235_v30 = vld [vmem:[#allocation30 + $0x1] ss:$0 sm:$0xff] }
0x1f24   :  { %4939 = vmatmul.msk.f32.gmra.mxu2 %vm612_vm1, %v4470_v26  ;;  %4668 = vmatpush.msra.mxu3 %v4633_v58 }
0x1f25   :  { %v4935_v18 = vclamps-f32 %v4461_v1, 1.0 }
0x1f27   :  { %v4467_v57 = vadd.f32 1.0, %v4935_v18 }
0x1f29   :  { %v4471_v14 = vmul.f32 %v4467_v57, %v4299_v12 }
0x1f2c   :  { %4940 = vmatmul.msk.f32.gmra.mxu2 %vm612_vm1, %v4471_v14 }
0x1f90   :  { %v4511_v49 = vpop.f32.mrf.mxu2 }
0x1f91   :  { %v4512_v44 = vadd.f32 %v5233_v7, %v4511_v49 }
0x1f93   :  { %v4523_v37 = vadd.f32 %v4512_v44, %v8212_v10 }
0x1f95   :  { %v4531_v23 = vsel %vm612_vm1, %v4523_v37, 0.0 }
0x1f96   :  { %4532 = vadd.xlane.f32.xlu2 %v4531_v23 }
0x1f9e   :  { %v4514_v54 = vpop.f32.mrf.mxu2 }
0x1f9f   :  { %v4515_v6 = vadd.f32 %v5233_v7, %v4514_v54 }
0x1fa1   :  { %v4524_v38 = vadd.f32 %v4515_v6, %v8218_v21 }
0x1fa3   :  { %v4534_v4 = vsel %vm612_vm1, %v4524_v38, 0.0 }
0x1fa4   :  { %4535 = vadd.xlane.f32.xlu1 %v4534_v4 }
0x1fa7   :  { %v4517_v0 = vpop.f32.mrf.mxu2 }
0x1fa8   :  { %v4518_v39 = vadd.f32 %v5233_v7, %v4517_v0 }
0x1faa   :  { %v4525_v50 = vadd.f32 %v4518_v39, %v8223_v31 }
0x1fac   :  { %v4537_v8 = vsel %vm612_vm1, %v4525_v50, 0.0 }
0x1fad   :  { %4538 = vadd.xlane.f32.xlu0 %v4537_v8 }
0x1faf   :  { %v4520_v40 = vpop.f32.mrf.mxu2 }
0x1fb0   :  { %v4521_v32 = vadd.f32 %v5233_v7, %v4520_v40 }
0x1fb2   :  { %v4526_v10 = vadd.f32 %v4521_v32, %v8228_v11 }
0x1fb4   :  { %v4540_v13 = vsel %vm612_vm1, %v4526_v10, 0.0 }
0x1fb5   :  { %4541 = vadd.xlane.f32.xlu2 %v4540_v13 }
0x2009   :  { %v4533_v59 = vpop.xlane.xlu2 %4532 }
0x200a   :  { %v4543_v21 = vmul.f32 %v4533_v59, %v6861_v35 }
0x200c   :  { %v4547_v22 = vsub.f32 %v4523_v37, %v4543_v21 }
0x200e   :  { %v4551_v48 = vmul.f32 %v4547_v22, %v4547_v22 }
0x2010   :  { %v4555_v45 = vsel %vm612_vm1, %v4551_v48, 0.0 }
0x2011   :  { %4556 = vadd.xlane.f32.xlu1 %v4555_v45 }
0x2017   :  { %v4536_v5 = vpop.xlane.xlu1 %4535 }
0x2018   :  { %v4544_v31 = vmul.f32 %v4536_v5, %v6861_v35 }
0x201a   :  { %v8320_v3 = vsub.f32 %v4524_v38, %v4544_v31 }
0x201c   :  { %v4552_v11 = vmul.f32 %v8320_v3, %v8320_v3 }
0x201e   :  { %v4558_v9 = vsel %vm612_vm1, %v4552_v11, 0.0 }
0x201f   :  { %4559 = vadd.xlane.f32.xlu0 %v4558_v9 }
0x2020   :  { %v4539_v56 = vpop.xlane.xlu0 %4538 }
0x2021   :  { %v4545_v60 = vmul.f32 %v4539_v56, %v6861_v35 }
0x2023   :  { %v8326_v15 = vsub.f32 %v4525_v50, %v4545_v60 }
0x2025   :  { %v4553_v43 = vmul.f32 %v8326_v15, %v8326_v15 }
0x2027   :  { %v4561_v19 = vsel %vm612_vm1, %v4553_v43, 0.0 }
0x2028   :  { %4562 = vadd.xlane.f32.xlu2 %v4561_v19  ;;  %v4542_v24 = vpop.xlane.xlu2 %4541  ;;  %v5236_v19 = vld [vmem:[#allocation33] ss:$0 sm:$0xff] }
0x2029   :  { %v4546_v27 = vmul.f32 %v4542_v24, %v6861_v35 }
0x202b   :  { %v8332_v62 = vsub.f32 %v4526_v10, %v4546_v27 }
0x202d   :  { %v4554_v55 = vmul.f32 %v8332_v62, %v8332_v62 }
0x202f   :  { %v4564_v51 = vsel %vm612_vm1, %v4554_v55, 0.0 }
0x2030   :  { %4565 = vadd.xlane.f32.xlu1 %v4564_v51 }
0x2084   :  { %v4557_v20 = vpop.xlane.xlu1 %4556 }
0x2085   :  { %v4567_v36 = vmul.f32 %v4557_v20, %v6861_v35 }
0x2087   :  { %v4571_v53 = vadd.f32 1e-05, %v4567_v36 }
0x2089   :  { %5391 = vrsqrt.f32 %v4571_v53  ;;  %vm4581_vm12 = vweird.f32 %v4571_v53 }
0x208f   :  { %v5392_v63 = vpop.eup %5391 }
0x2090   :  { %v4576_v2 = vmul.f32 %v5392_v63, %v4571_v53  ;;  %vm4582_vm11 = vweird.f32 %v5392_v63 }
0x2091   :  { %vm4583_vm13 = vmor %vm4581_vm12, %vm4582_vm11 }
0x2092   :  { %v4577_v28 = vmul.f32 %v5392_v63, %v4576_v2  ;;  %v4560_v33 = vpop.xlane.xlu0 %4559 }
0x2093   :  { %v4568_v52 = vmul.f32 %v4560_v33, %v6861_v35 }
0x2094   :  { %v4578_v34 = vmul.f32 0.5, %v4577_v28 }
0x2095   :  { %v4572_v41 = vadd.f32 1e-05, %v4568_v52 }
0x2096   :  { %v4579_v17 = vsub.f32 1.5, %v4578_v34 }
0x2097   :  { %5393 = vrsqrt.f32 %v4572_v41  ;;  %vm4591_vm15 = vweird.f32 %v4572_v41 }
0x2098   :  { %v4580_v26 = vmul.f32 %v5392_v63, %v4579_v17 }
0x209a   :  { %v4584_v29 = vsel %vm4583_vm13, %v5392_v63, %v4580_v26 }
0x209b   :  { %v4615_v46 = vmul.f32 %v4584_v29, %v4547_v22  ;;  %v4563_v1 = vpop.xlane.xlu2 %4562 }
0x209c   :  { %v4569_v12 = vmul.f32 %v4563_v1, %v6861_v35 }
0x209d   :  { %v4622_v16 = vmul.f32 %v5234_v47, %v4615_v46  ;;  %v5394_v18 = vpop.eup %5393 }
0x209e   :  { %v4586_v14 = vmul.f32 %v5394_v18, %v4572_v41  ;;  %v4573_v7 = vadd.f32 1e-05, %v4569_v12  ;;  %vm4592_vm14 = vweird.f32 %v5394_v18 }
0x209f   :  { %v4629_v57 = vadd.f32 %v5235_v30, %v4622_v16  ;;  %vm4593_vm2 = vmor %vm4591_vm15, %vm4592_vm14 }
0x20a0   :  { %v4587_v49 = vmul.f32 %v5394_v18, %v4586_v14  ;;  %5395 = vrsqrt.f32 %v4573_v7  ;;  %vm4601_vm4 = vweird.f32 %v4573_v7 }
0x20a1   :  { %4941 = vmatmul.msk.f32.vlgmr.msra.gmra.mxu3 %vm612_vm1, %v4629_v57 }
0x20a2   :  { %v4588_v44 = vmul.f32 0.5, %v4587_v49 }
0x20a3   :  { %v4566_v54 = vpop.xlane.xlu1 %4565 }
0x20a4   :  { %v4589_v37 = vsub.f32 1.5, %v4588_v44  ;;  %v4570_v38 = vmul.f32 %v4566_v54, %v6861_v35 }
0x20a6   :  { %v4590_v23 = vmul.f32 %v5394_v18, %v4589_v37  ;;  %v5396_v6 = vpop.eup %5395  ;;  %v4574_v50 = vadd.f32 1e-05, %v4570_v38 }
0x20a7   :  { %v4596_v0 = vmul.f32 %v5396_v6, %v4573_v7  ;;  %vm4602_vm3 = vweird.f32 %v5396_v6 }
0x20a8   :  { %v4594_v4 = vsel %vm4593_vm2, %v5394_v18, %v4590_v23  ;;  %5397 = vrsqrt.f32 %v4574_v50  ;;  %vm4603_vm5 = vmor %vm4601_vm4, %vm4602_vm3  ;;  %vm4611_vm7 = vweird.f32 %v4574_v50 }
0x20a9   :  { %v4616_v39 = vmul.f32 %v4594_v4, %v8320_v3  ;;  %v4597_v8 = vmul.f32 %v5396_v6, %v4596_v0 }
0x20ab   :  { %v4623_v40 = vmul.f32 %v5234_v47, %v4616_v39  ;;  %v4598_v32 = vmul.f32 0.5, %v4597_v8 }
0x20ad   :  { %v4630_v10 = vadd.f32 %v5235_v30, %v4623_v40  ;;  %v4599_v13 = vsub.f32 1.5, %v4598_v32 }
0x20ae   :  { %v5398_v21 = vpop.eup %5397 }
0x20af   :  { %4942 = vmatmul.msk.f32.gmra.mxu3 %vm612_vm1, %v4630_v10  ;;  %v4600_v59 = vmul.f32 %v5396_v6, %v4599_v13  ;;  %v4606_v35 = vmul.f32 %v5398_v21, %v4574_v50  ;;  %vm4612_vm6 = vweird.f32 %v5398_v21 }
0x20b0   :  { %vm4613_vm8 = vmor %vm4611_vm7, %vm4612_vm6 }
0x20b1   :  { %v4604_v22 = vsel %vm4603_vm5, %v5396_v6, %v4600_v59  ;;  %v4607_v45 = vmul.f32 %v5398_v21, %v4606_v35 }
0x20b2   :  { %v4617_v48 = vmul.f32 %v4604_v22, %v8326_v15 }
0x20b3   :  { %v4608_v31 = vmul.f32 0.5, %v4607_v45 }
0x20b4   :  { %v4624_v5 = vmul.f32 %v5234_v47, %v4617_v48 }
0x20b5   :  { %v4609_v11 = vsub.f32 1.5, %v4608_v31 }
0x20b6   :  { %v4631_v3 = vadd.f32 %v5235_v30, %v4624_v5 }
0x20b7   :  { %v4610_v9 = vmul.f32 %v5398_v21, %v4609_v11 }
0x20b8   :  { %4943 = vmatmul.msk.f32.gmra.mxu3 %vm612_vm1, %v4631_v3 }
0x20b9   :  { %v4614_v56 = vsel %vm4613_vm8, %v5398_v21, %v4610_v9 }
0x20ba   :  { %v4618_v60 = vmul.f32 %v4614_v56, %v8332_v62 }
0x20bc   :  { %v4625_v43 = vmul.f32 %v5234_v47, %v4618_v60 }
0x20be   :  { %v4632_v15 = vadd.f32 %v5235_v30, %v4625_v43 }
0x20c0   :  { %4944 = vmatmul.msk.f32.gmra.mxu3 %vm612_vm1, %v4632_v15 }
0x2124   :  { %v4670_v24 = vpop.f32.mrf.mxu3 }
0x2125   :  { %v4671_v27 = vadd.f32 %v5236_v19, %v4670_v24 }
0x2127   :  { %4682 = vst.msk [vmem:[%s6229_s3] sm:$0xff] %vm510_vm0, %v4671_v27 }
0x2132   :  { %v4673_v55 = vpop.f32.mrf.mxu3 }
0x2133   :  { %v4674_v51 = vadd.f32 %v5236_v19, %v4673_v55 }
0x2135   :  { %4683 = vst.msk [vmem:[%s6229_s3 + $0x8] sm:$0xff] %vm510_vm0, %v4674_v51 }
0x213b   :  { %v4676_v61 = vpop.f32.mrf.mxu3 }
0x213c   :  { %v4677_v25 = vadd.f32 %v5236_v19, %v4676_v61 }
0x213e   :  { %4684 = vst.msk [vmem:[%s6229_s3 + $0x10] sm:$0xff] %vm510_vm0, %v4677_v25 }
0x2143   :  { %v4679_v42 = vpop.f32.mrf.mxu3 }
0x2144   :  { %v4680_v62 = vadd.f32 %v5236_v19, %v4679_v42 }
0x2146   :  { %4685 = vst.msk [vmem:[%s6229_s3 + $0x18] sm:$0xff] %vm510_vm0, %v4680_v62 }
0x2147   :  { %4690 = vsyncpa [#allocation3], 1 }
0x2148   :  { %4691 = vsyncpa [#allocation5], 1 }
0x2149   :  { %4692 = vsyncpa [#allocation8], 1 }
0x214a   :  { %4693 = vsyncpa [#allocation11], 1 }
0x214b   :  { %4694 = vsyncpa [#allocation14], 1 }
0x214c   :  { %4695 = vsyncpa [#allocation17], 1 }
0x214d   :  { %4696 = vsyncpa [#allocation20], 1 }
0x214e   :  { %4697 = vsyncpa [#allocation23], 1 }
0x214f   :  { %4698 = vsyncpa [#allocation26], 1 }
0x2150   :  { %4699 = vsyncpa [#allocation29], 1 }
0x2151   :  { %4700 = vsyncpa [#allocation32], 1 }

</bundles_post_ra>
